<compile_context>
chip_gen: v7x
topology: tpu7x:2x2x1
jax: 0.10.0
libtpu: 0.0.40
codegen_flags: <defaults>
</compile_context>

<pallas_src>
import jax
import jax.numpy as jnp
from jax.experimental import pallas as pl
from jax.experimental.pallas import tpu as pltpu


# ----------------------------- Pallas kernels ------------------------------ #

def conv_bn_relu_pool_kernel(p_ref, w_ref, scale_ref, shift_ref, o_ref):
    """Fused 3x3 conv (stride=1, pad=1) + BN(inference) + ReLU + 2x2 maxpool.

    p_ref:     (4, tm, Kp) bf16  4 pool phases of im2col patches (taps in K)
    w_ref:     (Kp, Cout)  bf16  conv weights, tap-major rows (zero-padded)
    scale_ref: (1, Cout)   f32   folded BN scale
    shift_ref: (1, Cout)   f32   folded BN shift (includes conv bias)
    o_ref:     (tm, Cout)  bf16  pooled output rows
    """
    tm = o_ref.shape[0]
    kp = p_ref.shape[2]
    # Merge phases into M (layout-preserving: tm % 8 == 0) -> one MXU dot.
    p = p_ref[...].reshape(4 * tm, kp)
    z = jnp.dot(p, w_ref[...], preferred_element_type=jnp.float32)
    y = jnp.maximum(z * scale_ref[...] + shift_ref[...], 0.0)     # BN + ReLU
    # 2x2 max-pool == elementwise max over the 4 phase slabs.
    o_ref[...] = jnp.maximum(
        jnp.maximum(y[0 * tm:1 * tm], y[1 * tm:2 * tm]),
        jnp.maximum(y[2 * tm:3 * tm], y[3 * tm:4 * tm])).astype(o_ref.dtype)


def mlp_kernel(x_ref, w1_ref, b1_ref, w2_ref, o_ref, acc_ref):
    """Half of Linear(8192,512)+ReLU+Linear(512,E), K-tiled; j picks the half.

    x_ref:  (B, tk)  bf16    w1_ref: (tk, Hs) bf16    b1_ref: (1, Hs) f32
    w2_ref: (Hs, E)  bf16    o_ref:  (B, E)   f32     acc_ref:(B, Hs) f32
    """
    k = pl.program_id(1)

    @pl.when(k == 0)
    def _():
        acc_ref[...] = jnp.zeros_like(acc_ref)

    acc_ref[...] += jnp.dot(x_ref[...], w1_ref[...],
                            preferred_element_type=jnp.float32)

    @pl.when(k == pl.num_programs(1) - 1)
    def _():
        h = jnp.maximum(acc_ref[...] + b1_ref[...], 0.0)
        # TODO(synk): Dropout(p=0.3) is train-time only; inference = identity.
        out = jnp.dot(h, w2_ref[...].astype(jnp.float32),
                      preferred_element_type=jnp.float32)
        o_ref[...] = out.astype(o_ref.dtype)


# ------------------------------ wrappers ----------------------------------- #

def _pick_tile(m):
    for t in (512, 256, 128, 64, 32, 16, 8):
        if m % t == 0:
            return t
    return m


def conv_block(x_nhwc, wk, scale, shift):
    """x_nhwc: (B,H,W,Cin) -> (B,H//2,W//2,Cout) bf16; wk: (Kp, Cout) bf16."""
    B, H, W, Cin = x_nhwc.shape
    Kp, Cout = wk.shape
    K = 9 * Cin
    assert Kp >= K and Kp % 128 == 0 and H % 2 == 0 and W % 2 == 0
    Ho, Wo = H // 2, W // 2
    M = B * Ho * Wo

    # Phased im2col built with strided slices only (no big transpose):
    # slab[pa*2+pb], row (b,i,j), cols tap-major = x_pad[b, 2i+pa+dy, 2j+pb+dx, :]
    xp = jnp.pad(x_nhwc.astype(jnp.bfloat16), ((0, 0), (1, 1), (1, 1), (0, 0)))
    slabs = []
    for pa in range(2):
        for pb in range(2):
            taps = [xp[:, pa + dy: pa + dy + 2 * Ho - 1: 2,
                       pb + dx: pb + dx + 2 * Wo - 1: 2, :]
                    for dy in range(3) for dx in range(3)]
            if Kp > K:   # zero-pad K to a lane-dense multiple of 128 (layer 1)
                taps.append(jnp.zeros((B, Ho, Wo, Kp - K), jnp.bfloat16))
            slabs.append(jnp.concatenate(taps, axis=-1).reshape(M, Kp))
    pat = jnp.stack(slabs, axis=0)                       # (4, M, Kp) bf16

    tm = _pick_tile(M)
    out = pl.pallas_call(
        conv_bn_relu_pool_kernel,
        out_shape=jax.ShapeDtypeStruct((M, Cout), jnp.bfloat16),
        grid=(M // tm,),
        in_specs=[
            pl.BlockSpec((4, tm, Kp), lambda i: (0, i, 0)),
            pl.BlockSpec((Kp, Cout), lambda i: (0, 0)),     # invariant
            pl.BlockSpec((1, Cout), lambda i: (0, 0)),      # invariant
            pl.BlockSpec((1, Cout), lambda i: (0, 0)),      # invariant
        ],
        out_specs=pl.BlockSpec((tm, Cout), lambda i: (i, 0)),
        compiler_params=pltpu.CompilerParams(
            dimension_semantics=("parallel",)),
    )(pat, wk, scale, shift)
    return out.reshape(B, Ho, Wo, Cout)


def classifier(x_flat, w1, b1, w2, b2, tk=4096, n_split=2):
    """fc1(8192,512)+ReLU+fc2(512,E); fc1 columns split across n_split blocks."""
    B, K1 = x_flat.shape
    H1 = w1.shape[1]
    E = w2.shape[1]
    assert K1 % tk == 0 and H1 % n_split == 0
    Hs = H1 // n_split
    flops = 2 * B * K1 * H1 + 2 * B * H1 * E
    nbytes = (int(w1.size) * w1.dtype.itemsize + int(w2.size) * w2.dtype.itemsize
              + int(x_flat.size) * x_flat.dtype.itemsize + B * E * 4)

    partial = pl.pallas_call(
        mlp_kernel,
        out_shape=jax.ShapeDtypeStruct((n_split, B, E), jnp.float32),
        grid=(n_split, K1 // tk),
        in_specs=[
            pl.BlockSpec((B, tk), lambda j, k: (0, k)),
            pl.BlockSpec((tk, Hs), lambda j, k: (k, j)),
            pl.BlockSpec((1, Hs), lambda j, k: (0, j)),
            pl.BlockSpec((Hs, E), lambda j, k: (j, 0)),
        ],
        out_specs=pl.BlockSpec((None, B, E), lambda j, k: (j, 0, 0)),
        scratch_shapes=[pltpu.VMEM((B, Hs), jnp.float32)],
        compiler_params=pltpu.CompilerParams(
            dimension_semantics=("parallel", "arbitrary")),
        cost_estimate=pl.CostEstimate(flops=flops, transcendentals=0,
                                      bytes_accessed=nbytes),
    )(x_flat, w1, b1, w2)
    return jnp.sum(partial, axis=0) + b2     # fc2 bias added once, outside


def custom_cnn_forward(x_nchw, pp):
    x = jnp.transpose(x_nchw, (0, 2, 3, 1))                      # NCHW -> NHWC
    x = conv_block(x, pp["w1k"], pp["scale1"], pp["shift1"])     # (B,16,16,128)
    x = conv_block(x, pp["w2k"], pp["scale2"], pp["shift2"])     # (B, 8, 8,128)
    B = x.shape[0]
    x = x.reshape(B, -1)              # (H,W,C)-order flatten, bf16
    assert x.shape[1] == pp["fc1_w"].shape[0]
    return classifier(x, pp["fc1_w"], pp["fc1_b"], pp["fc2_w"], pp["fc2_b"])


# --------------------------- parameter handling ----------------------------- #

def init_params(key, input_channels=3, embedding_dim=256):
    """Raw (PyTorch-equivalent) parameters: conv weights HWIO, fc weights (in,out)."""
    ks = jax.random.split(key, 16)
    f32 = jnp.float32
    return {
        "w1": 0.1 * jax.random.normal(ks[0], (3, 3, input_channels, 64), f32),
        "cb1": 0.05 * jax.random.normal(ks[1], (64,), f32),
        "g1": 1.0 + 0.1 * jax.random.normal(ks[2], (64,), f32),
        "be1": 0.05 * jax.random.normal(ks[3], (64,), f32),
        "m1": 0.05 * jax.random.normal(ks[4], (64,), f32),
        "v1": 0.5 + jax.random.uniform(ks[5], (64,), f32),
        "w2": 0.05 * jax.random.normal(ks[6], (3, 3, 64, 128), f32),
        "cb2": 0.05 * jax.random.normal(ks[7], (128,), f32),
        "g2": 1.0 + 0.1 * jax.random.normal(ks[8], (128,), f32),
        "be2": 0.05 * jax.random.normal(ks[9], (128,), f32),
        "m2": 0.05 * jax.random.normal(ks[10], (128,), f32),
        "v2": 0.5 + jax.random.uniform(ks[11], (128,), f32),
        "fc1_w": 0.01 * jax.random.normal(ks[12], (8192, 512), f32),
        "fc1_b": 0.01 * jax.random.normal(ks[13], (512,), f32),
        "fc2_w": 0.02 * jax.random.normal(ks[14], (512, embedding_dim), f32),
        "fc2_b": 0.01 * jax.random.normal(ks[15], (embedding_dim,), f32),
    }


def prepare_params(p, height=32, width=32, eps=1e-5):
    """One-time prep (outside jit): fold BN, pad channels/K, permute fc1, bf16."""
    assert height % 4 == 0 and width % 4 == 0

    def fold_bn(gamma, beta, mean, var, conv_b):
        scale = gamma / jnp.sqrt(var + eps)
        shift = beta + scale * (conv_b - mean)
        return scale.astype(jnp.float32), shift.astype(jnp.float32)

    # layer 1: fold BN, pad Cout 64->128 (lane-dense), pad K 27->128 (dense MXU feed)
    s1, t1 = fold_bn(p["g1"], p["be1"], p["m1"], p["v1"], p["cb1"])
    cin1, c1 = p["w1"].shape[2], p["w1"].shape[3]
    c1p = 128
    w1 = jnp.pad(p["w1"], ((0, 0), (0, 0), (0, 0), (0, c1p - c1)))
    s1 = jnp.pad(s1, (0, c1p - c1))   # padded channels: scale=shift=0 -> ReLU(0)=0
    t1 = jnp.pad(t1, (0, c1p - c1))
    w1k = w1.reshape(9 * cin1, c1p)
    kp1 = ((9 * cin1 + 127) // 128) * 128
    w1k = jnp.pad(w1k, ((0, kp1 - 9 * cin1), (0, 0))).astype(jnp.bfloat16)

    # layer 2: fold BN, pad Cin 64->128 to match padded layer-1 output channels
    s2, t2 = fold_bn(p["g2"], p["be2"], p["m2"], p["v2"], p["cb2"])
    c2 = p["w2"].shape[3]
    w2 = jnp.pad(p["w2"], ((0, 0), (0, 0), (0, c1p - p["w2"].shape[2]), (0, 0)))
    w2k = w2.reshape(9 * c1p, c2).astype(jnp.bfloat16)

    # classifier: permute fc1 rows from (C,H,W) flatten to (H,W,C) flatten; bf16
    ho, wo = height // 4, width // 4
    assert p["fc1_w"].shape[0] == c2 * ho * wo == 8192
    fc1 = p["fc1_w"].reshape(c2, ho, wo, -1)
    fc1 = jnp.transpose(fc1, (1, 2, 0, 3)).reshape(c2 * ho * wo, -1)

    return {
        "w1k": w1k, "scale1": s1.reshape(1, c1p), "shift1": t1.reshape(1, c1p),
        "w2k": w2k,
        "scale2": s2.reshape(1, c2).astype(jnp.float32),
        "shift2": t2.reshape(1, c2).astype(jnp.float32),
        "fc1_w": fc1.astype(jnp.bfloat16),
        "fc1_b": p["fc1_b"].reshape(1, -1).astype(jnp.float32),
        "fc2_w": p["fc2_w"].astype(jnp.bfloat16),
        "fc2_b": p["fc2_b"].reshape(1, -1).astype(jnp.float32),
    }


# ----------------------------- pure-JAX reference --------------------------- #

def reference_forward(x_nchw, p, eps=1e-5):
    hp = jax.lax.Precision.HIGHEST

    def block(x, w, b, g, be, m, v):
        y = jax.lax.conv_general_dilated(
            x, w, window_strides=(1, 1), padding=((1, 1), (1, 1)),
            dimension_numbers=("NHWC", "HWIO", "NHWC"), precision=hp)
        y = y + b
        y = g * (y - m) / jnp.sqrt(v + eps) + be
        y = jnp.maximum(y, 0.0)
        return jax.lax.reduce_window(y, -jnp.inf, jax.lax.max,
                                     (1, 2, 2, 1), (1, 2, 2, 1), "VALID")

    x = jnp.transpose(x_nchw, (0, 2, 3, 1))
    x = block(x, p["w1"], p["cb1"], p["g1"], p["be1"], p["m1"], p["v1"])
    x = block(x, p["w2"], p["cb2"], p["g2"], p["be2"], p["m2"], p["v2"])
    x = jnp.transpose(x, (0, 3, 1, 2)).reshape(x.shape[0], -1)  # PyTorch CHW flatten
    h = jnp.maximum(jnp.dot(x, p["fc1_w"], precision=hp) + p["fc1_b"], 0.0)
    return jnp.dot(h, p["fc2_w"], precision=hp) + p["fc2_b"]


# ---------------------------------- main ------------------------------------ #

if __name__ == "__main__":
    raw_params = init_params(jax.random.PRNGKey(0))
    prepared = prepare_params(raw_params)        # one-time prep, outside jit
    # Linear(8192, 512) with 128 channels after two 2x pools => 32x32 input.
    x = jax.random.normal(jax.random.PRNGKey(0), (2, 3, 32, 32), jnp.float32)

    fwd = jax.jit(custom_cnn_forward)
    out = fwd(x, prepared)
    jax.block_until_ready(out)

    assert out.shape == (2, 256), out.shape
    assert out.dtype == jnp.float32

    ref = reference_forward(x, raw_params)
    # 2e-2 tolerance accounts for bf16 weights/activations (f32 accumulation).
    assert jnp.allclose(out, ref, atol=2e-2, rtol=2e-2), \
        float(jnp.max(jnp.abs(out - ref)))

    print("KERNEL_OK")
</pallas_src>

<mosaic_0001>
module attributes {stable_mosaic.version = 11 : i64} {
  func.func @conv_bn_relu_pool_kernel(%arg0: i32, %arg1: memref<4x512x128xbf16, #tpu.memory_space<vmem>>, %arg2: memref<128x128xbf16, #tpu.memory_space<vmem>>, %arg3: memref<1x128xf32, #tpu.memory_space<vmem>>, %arg4: memref<1x128xf32, #tpu.memory_space<vmem>>, %arg5: memref<512x128xbf16, #tpu.memory_space<vmem>>) attributes {dimension_semantics = [#tpu.dimension_semantics<parallel>], iteration_bounds = array<i64: 1>, scalar_prefetch = 0 : i64, scratch_operands = 0 : i64, tpu.core_type = #tpu.core_type<tc>, window_params = [{transform_indices = @transform_0, window_bounds = array<i64: 4, 512, 128>}, {pipeline_mode = #tpu.pipeline_mode<synchronous>, transform_indices = @transform_1, window_bounds = array<i64: 128, 128>}, {pipeline_mode = #tpu.pipeline_mode<synchronous>, transform_indices = @transform_2, window_bounds = array<i64: 1, 128>}, {pipeline_mode = #tpu.pipeline_mode<synchronous>, transform_indices = @transform_3, window_bounds = array<i64: 1, 128>}, {transform_indices = @transform_4, window_bounds = array<i64: 512, 128>}]} {
    %c0 = arith.constant 0 : index
    %c0_0 = arith.constant 0 : index
    %c0_1 = arith.constant 0 : index
    %0 = vector.load %arg1[%c0, %c0_0, %c0_1] : memref<4x512x128xbf16, #tpu.memory_space<vmem>>, vector<4x512x128xbf16>
    %1 = vector.shape_cast %0 : vector<4x512x128xbf16> to vector<2048x128xbf16>
    %c0_2 = arith.constant 0 : index
    %c0_3 = arith.constant 0 : index
    %2 = vector.load %arg2[%c0_2, %c0_3] : memref<128x128xbf16, #tpu.memory_space<vmem>>, vector<128x128xbf16>
    %cst = arith.constant dense<0.000000e+00> : vector<2048x128xf32>
    %3 = tpu.matmul %1, %2, %cst {dimension_numbers = #tpu.dot_dimension_numbers<[1], [0], [0], [1], [0, 0, 1, 1], [], []>} : vector<2048x128xbf16>, vector<128x128xbf16>, vector<2048x128xf32> -> vector<2048x128xf32>
    %c0_4 = arith.constant 0 : index
    %c0_5 = arith.constant 0 : index
    %4 = vector.load %arg3[%c0_4, %c0_5] : memref<1x128xf32, #tpu.memory_space<vmem>>, vector<1x128xf32>
    %5 = vector.broadcast %4 : vector<1x128xf32> to vector<2048x128xf32>
    %6 = arith.mulf %3, %5 : vector<2048x128xf32>
    %c0_6 = arith.constant 0 : index
    %c0_7 = arith.constant 0 : index
    %7 = vector.load %arg4[%c0_6, %c0_7] : memref<1x128xf32, #tpu.memory_space<vmem>>, vector<1x128xf32>
    %8 = vector.broadcast %7 : vector<1x128xf32> to vector<2048x128xf32>
    %9 = arith.addf %6, %8 : vector<2048x128xf32>
    %cst_8 = arith.constant 0.000000e+00 : f32
    %10 = vector.broadcast %cst_8 : f32 to vector<2048x128xf32>
    %11 = arith.maximumf %9, %10 : vector<2048x128xf32>
    %12 = vector.extract_strided_slice %11 {offsets = [0, 0], sizes = [512, 128], strides = [1, 1]} : vector<2048x128xf32> to vector<512x128xf32>
    %13 = vector.extract_strided_slice %11 {offsets = [512, 0], sizes = [512, 128], strides = [1, 1]} : vector<2048x128xf32> to vector<512x128xf32>
    %14 = arith.maximumf %12, %13 : vector<512x128xf32>
    %15 = vector.extract_strided_slice %11 {offsets = [1024, 0], sizes = [512, 128], strides = [1, 1]} : vector<2048x128xf32> to vector<512x128xf32>
    %16 = vector.extract_strided_slice %11 {offsets = [1536, 0], sizes = [512, 128], strides = [1, 1]} : vector<2048x128xf32> to vector<512x128xf32>
    %17 = arith.maximumf %15, %16 : vector<512x128xf32>
    %18 = arith.maximumf %14, %17 : vector<512x128xf32>
    %19 = arith.truncf %18 : vector<512x128xf32> to vector<512x128xbf16>
    %c0_9 = arith.constant 0 : index
    %c0_10 = arith.constant 0 : index
    %20 = vector.load %arg5[%c0_9, %c0_10] : memref<512x128xbf16, #tpu.memory_space<vmem>>, vector<512x128xbf16>
    tpu.vector_store %arg5[%c0_9, %c0_10], %19 {strides = array<i32>} : memref<512x128xbf16, #tpu.memory_space<vmem>>, vector<512x128xbf16>,
    return
  }
  func.func @transform_0(%arg0: i32) -> (i32, i32, i32) {
    %c0_i32 = arith.constant 0 : i32
    %c0_i32_0 = arith.constant 0 : i32
    %c0_i32_1 = arith.constant 0 : i32
    return %c0_i32, %arg0, %c0_i32_0 : i32, i32, i32
  }
  func.func @transform_1(%arg0: i32) -> (i32, i32) {
    %c0_i32 = arith.constant 0 : i32
    %c0_i32_0 = arith.constant 0 : i32
    %c0_i32_1 = arith.constant 0 : i32
    return %c0_i32, %c0_i32_0 : i32, i32
  }
  func.func @transform_2(%arg0: i32) -> (i32, i32) {
    %c0_i32 = arith.constant 0 : i32
    %c0_i32_0 = arith.constant 0 : i32
    %c0_i32_1 = arith.constant 0 : i32
    return %c0_i32, %c0_i32_0 : i32, i32
  }
  func.func @transform_3(%arg0: i32) -> (i32, i32) {
    %c0_i32 = arith.constant 0 : i32
    %c0_i32_0 = arith.constant 0 : i32
    %c0_i32_1 = arith.constant 0 : i32
    return %c0_i32, %c0_i32_0 : i32, i32
  }
  func.func @transform_4(%arg0: i32) -> (i32, i32) {
    %c0_i32 = arith.constant 0 : i32
    %c0_i32_0 = arith.constant 0 : i32
    return %arg0, %c0_i32 : i32, i32
  }
}

module attributes {stable_mosaic.version = 11 : i64} {
  func.func @mlp_kernel(%arg0: i32, %arg1: i32, %arg2: memref<2x4096xbf16, #tpu.memory_space<vmem>>, %arg3: memref<4096x256xbf16, #tpu.memory_space<vmem>>, %arg4: memref<1x256xf32, #tpu.memory_space<vmem>>, %arg5: memref<256x256xbf16, #tpu.memory_space<vmem>>, %arg6: memref<1x2x256xf32, #tpu.memory_space<vmem>>, %arg7: memref<2x256xf32, #tpu.memory_space<vmem>>) attributes {dimension_semantics = [#tpu.dimension_semantics<parallel>, #tpu.dimension_semantics<arbitrary>], iteration_bounds = array<i64: 2, 2>, scalar_prefetch = 0 : i64, scratch_operands = 1 : i64, tpu.core_type = #tpu.core_type<tc>, window_params = [{transform_indices = @transform_0, window_bounds = array<i64: 2, 4096>}, {transform_indices = @transform_1, window_bounds = array<i64: 4096, 256>}, {transform_indices = @transform_2, window_bounds = array<i64: 1, 256>}, {transform_indices = @transform_3, window_bounds = array<i64: 256, 256>}, {transform_indices = @transform_4, window_bounds = array<i64: 1, 2, 256>}]} {
    %c0_i32 = arith.constant 0 : i32
    %0 = arith.cmpi eq, %arg1, %c0_i32 : i32
    %1 = arith.extui %0 : i1 to i32
    %c0_i32_0 = arith.constant 0 : i32
    %2 = arith.cmpi ne, %1, %c0_i32_0 : i32
    scf.if %2 {
      %cst_9 = arith.constant 0.000000e+00 : f32
      %12 = vector.broadcast %cst_9 : f32 to vector<2x256xf32>
      %c0_10 = arith.constant 0 : index
      %c0_11 = arith.constant 0 : index
      %13 = vector.load %arg7[%c0_10, %c0_11] : memref<2x256xf32, #tpu.memory_space<vmem>>, vector<2x256xf32>
      tpu.vector_store %arg7[%c0_10, %c0_11], %12 {strides = array<i32>} : memref<2x256xf32, #tpu.memory_space<vmem>>, vector<2x256xf32>,
    } else {
    }
    %c0 = arith.constant 0 : index
    %c0_1 = arith.constant 0 : index
    %3 = vector.load %arg7[%c0, %c0_1] : memref<2x256xf32, #tpu.memory_space<vmem>>, vector<2x256xf32>
    %c0_2 = arith.constant 0 : index
    %c0_3 = arith.constant 0 : index
    %4 = vector.load %arg2[%c0_2, %c0_3] : memref<2x4096xbf16, #tpu.memory_space<vmem>>, vector<2x4096xbf16>
    %c0_4 = arith.constant 0 : index
    %c0_5 = arith.constant 0 : index
    %5 = vector.load %arg3[%c0_4, %c0_5] : memref<4096x256xbf16, #tpu.memory_space<vmem>>, vector<4096x256xbf16>
    %cst = arith.constant dense<0.000000e+00> : vector<2x256xf32>
    %6 = tpu.matmul %4, %5, %cst {dimension_numbers = #tpu.dot_dimension_numbers<[1], [0], [0], [1], [0, 0, 1, 1], [], []>} : vector<2x4096xbf16>, vector<4096x256xbf16>, vector<2x256xf32> -> vector<2x256xf32>
    %7 = arith.addf %3, %6 : vector<2x256xf32>
    %c0_6 = arith.constant 0 : index
    %c0_7 = arith.constant 0 : index
    %8 = vector.load %arg7[%c0_6, %c0_7] : memref<2x256xf32, #tpu.memory_space<vmem>>, vector<2x256xf32>
    tpu.vector_store %arg7[%c0_6, %c0_7], %7 {strides = array<i32>} : memref<2x256xf32, #tpu.memory_space<vmem>>, vector<2x256xf32>,
    %c1_i32 = arith.constant 1 : i32
    %9 = arith.cmpi eq, %arg1, %c1_i32 : i32
    %10 = arith.extui %9 : i1 to i32
    %c0_i32_8 = arith.constant 0 : i32
    %11 = arith.cmpi ne, %10, %c0_i32_8 : i32
    scf.if %11 {
      %c0_9 = arith.constant 0 : index
      %c0_10 = arith.constant 0 : index
      %12 = vector.load %arg7[%c0_9, %c0_10] : memref<2x256xf32, #tpu.memory_space<vmem>>, vector<2x256xf32>
      %c0_11 = arith.constant 0 : index
      %c0_12 = arith.constant 0 : index
      %13 = vector.load %arg4[%c0_11, %c0_12] : memref<1x256xf32, #tpu.memory_space<vmem>>, vector<1x256xf32>
      %14 = vector.broadcast %13 : vector<1x256xf32> to vector<2x256xf32>
      %15 = arith.addf %12, %14 : vector<2x256xf32>
      %cst_13 = arith.constant 0.000000e+00 : f32
      %16 = vector.broadcast %cst_13 : f32 to vector<2x256xf32>
      %17 = arith.maximumf %15, %16 : vector<2x256xf32>
      %c0_14 = arith.constant 0 : index
      %c0_15 = arith.constant 0 : index
      %18 = vector.load %arg5[%c0_14, %c0_15] : memref<256x256xbf16, #tpu.memory_space<vmem>>, vector<256x256xbf16>
      %19 = arith.extf %18 : vector<256x256xbf16> to vector<256x256xf32>
      %cst_16 = arith.constant dense<0.000000e+00> : vector<2x256xf32>
      %20 = tpu.matmul %17, %19, %cst_16 {dimension_numbers = #tpu.dot_dimension_numbers<[1], [0], [0], [1], [0, 0, 1, 1], [], []>} : vector<2x256xf32>, vector<256x256xf32>, vector<2x256xf32> -> vector<2x256xf32>
      %c0_17 = arith.constant 0 : index
      %c0_18 = arith.constant 0 : index
      %c0_19 = arith.constant 0 : index
      %21 = vector.load %arg6[%c0_17, %c0_18, %c0_19] : memref<1x2x256xf32, #tpu.memory_space<vmem>>, vector<1x2x256xf32>
      %22 = vector.shape_cast %21 : vector<1x2x256xf32> to vector<2x256xf32>
      %23 = vector.shape_cast %20 : vector<2x256xf32> to vector<1x2x256xf32>
      tpu.vector_store %arg6[%c0_17, %c0_18, %c0_19], %23 {strides = array<i32>} : memref<1x2x256xf32, #tpu.memory_space<vmem>>, vector<1x2x256xf32>,
    } else {
    }
    return
  }
  func.func @transform_0(%arg0: i32, %arg1: i32) -> (i32, i32) {
    %c0_i32 = arith.constant 0 : i32
    %c0_i32_0 = arith.constant 0 : i32
    return %c0_i32, %arg1 : i32, i32
  }
  func.func @transform_1(%arg0: i32, %arg1: i32) -> (i32, i32) {
    %c0_i32 = arith.constant 0 : i32
    return %arg1, %arg0 : i32, i32
  }
  func.func @transform_2(%arg0: i32, %arg1: i32) -> (i32, i32) {
    %c0_i32 = arith.constant 0 : i32
    %c0_i32_0 = arith.constant 0 : i32
    return %c0_i32, %arg0 : i32, i32
  }
  func.func @transform_3(%arg0: i32, %arg1: i32) -> (i32, i32) {
    %c0_i32 = arith.constant 0 : i32
    %c0_i32_0 = arith.constant 0 : i32
    return %arg0, %c0_i32 : i32, i32
  }
  func.func @transform_4(%arg0: i32, %arg1: i32) -> (i32, i32, i32) {
    %c0_i32 = arith.constant 0 : i32
    %c0_i32_0 = arith.constant 0 : i32
    %c0_i32_1 = arith.constant 0 : i32
    return %arg0, %c0_i32, %c0_i32_0 : i32, i32, i32
  }
}

module attributes {stable_mosaic.version = 11 : i64} {
  func.func @conv_bn_relu_pool_kernel(%arg0: i32, %arg1: memref<4x128x1152xbf16, #tpu.memory_space<vmem>>, %arg2: memref<1152x128xbf16, #tpu.memory_space<vmem>>, %arg3: memref<1x128xf32, #tpu.memory_space<vmem>>, %arg4: memref<1x128xf32, #tpu.memory_space<vmem>>, %arg5: memref<128x128xbf16, #tpu.memory_space<vmem>>) attributes {dimension_semantics = [#tpu.dimension_semantics<parallel>], iteration_bounds = array<i64: 1>, scalar_prefetch = 0 : i64, scratch_operands = 0 : i64, tpu.core_type = #tpu.core_type<tc>, window_params = [{transform_indices = @transform_0, window_bounds = array<i64: 4, 128, 1152>}, {pipeline_mode = #tpu.pipeline_mode<synchronous>, transform_indices = @transform_1, window_bounds = array<i64: 1152, 128>}, {pipeline_mode = #tpu.pipeline_mode<synchronous>, transform_indices = @transform_2, window_bounds = array<i64: 1, 128>}, {pipeline_mode = #tpu.pipeline_mode<synchronous>, transform_indices = @transform_3, window_bounds = array<i64: 1, 128>}, {transform_indices = @transform_4, window_bounds = array<i64: 128, 128>}]} {
    %c0 = arith.constant 0 : index
    %c0_0 = arith.constant 0 : index
    %c0_1 = arith.constant 0 : index
    %0 = vector.load %arg1[%c0, %c0_0, %c0_1] : memref<4x128x1152xbf16, #tpu.memory_space<vmem>>, vector<4x128x1152xbf16>
    %1 = vector.shape_cast %0 : vector<4x128x1152xbf16> to vector<512x1152xbf16>
    %c0_2 = arith.constant 0 : index
    %c0_3 = arith.constant 0 : index
    %2 = vector.load %arg2[%c0_2, %c0_3] : memref<1152x128xbf16, #tpu.memory_space<vmem>>, vector<1152x128xbf16>
    %cst = arith.constant dense<0.000000e+00> : vector<512x128xf32>
    %3 = tpu.matmul %1, %2, %cst {dimension_numbers = #tpu.dot_dimension_numbers<[1], [0], [0], [1], [0, 0, 1, 1], [], []>} : vector<512x1152xbf16>, vector<1152x128xbf16>, vector<512x128xf32> -> vector<512x128xf32>
    %c0_4 = arith.constant 0 : index
    %c0_5 = arith.constant 0 : index
    %4 = vector.load %arg3[%c0_4, %c0_5] : memref<1x128xf32, #tpu.memory_space<vmem>>, vector<1x128xf32>
    %5 = vector.broadcast %4 : vector<1x128xf32> to vector<512x128xf32>
    %6 = arith.mulf %3, %5 : vector<512x128xf32>
    %c0_6 = arith.constant 0 : index
    %c0_7 = arith.constant 0 : index
    %7 = vector.load %arg4[%c0_6, %c0_7] : memref<1x128xf32, #tpu.memory_space<vmem>>, vector<1x128xf32>
    %8 = vector.broadcast %7 : vector<1x128xf32> to vector<512x128xf32>
    %9 = arith.addf %6, %8 : vector<512x128xf32>
    %cst_8 = arith.constant 0.000000e+00 : f32
    %10 = vector.broadcast %cst_8 : f32 to vector<512x128xf32>
    %11 = arith.maximumf %9, %10 : vector<512x128xf32>
    %12 = vector.extract_strided_slice %11 {offsets = [0, 0], sizes = [128, 128], strides = [1, 1]} : vector<512x128xf32> to vector<128x128xf32>
    %13 = vector.extract_strided_slice %11 {offsets = [128, 0], sizes = [128, 128], strides = [1, 1]} : vector<512x128xf32> to vector<128x128xf32>
    %14 = arith.maximumf %12, %13 : vector<128x128xf32>
    %15 = vector.extract_strided_slice %11 {offsets = [256, 0], sizes = [128, 128], strides = [1, 1]} : vector<512x128xf32> to vector<128x128xf32>
    %16 = vector.extract_strided_slice %11 {offsets = [384, 0], sizes = [128, 128], strides = [1, 1]} : vector<512x128xf32> to vector<128x128xf32>
    %17 = arith.maximumf %15, %16 : vector<128x128xf32>
    %18 = arith.maximumf %14, %17 : vector<128x128xf32>
    %19 = arith.truncf %18 : vector<128x128xf32> to vector<128x128xbf16>
    %c0_9 = arith.constant 0 : index
    %c0_10 = arith.constant 0 : index
    %20 = vector.load %arg5[%c0_9, %c0_10] : memref<128x128xbf16, #tpu.memory_space<vmem>>, vector<128x128xbf16>
    tpu.vector_store %arg5[%c0_9, %c0_10], %19 {strides = array<i32>} : memref<128x128xbf16, #tpu.memory_space<vmem>>, vector<128x128xbf16>,
    return
  }
  func.func @transform_0(%arg0: i32) -> (i32, i32, i32) {
    %c0_i32 = arith.constant 0 : i32
    %c0_i32_0 = arith.constant 0 : i32
    %c0_i32_1 = arith.constant 0 : i32
    return %c0_i32, %arg0, %c0_i32_0 : i32, i32, i32
  }
  func.func @transform_1(%arg0: i32) -> (i32, i32) {
    %c0_i32 = arith.constant 0 : i32
    %c0_i32_0 = arith.constant 0 : i32
    %c0_i32_1 = arith.constant 0 : i32
    return %c0_i32, %c0_i32_0 : i32, i32
  }
  func.func @transform_2(%arg0: i32) -> (i32, i32) {
    %c0_i32 = arith.constant 0 : i32
    %c0_i32_0 = arith.constant 0 : i32
    %c0_i32_1 = arith.constant 0 : i32
    return %c0_i32, %c0_i32_0 : i32, i32
  }
  func.func @transform_3(%arg0: i32) -> (i32, i32) {
    %c0_i32 = arith.constant 0 : i32
    %c0_i32_0 = arith.constant 0 : i32
    %c0_i32_1 = arith.constant 0 : i32
    return %c0_i32, %c0_i32_0 : i32, i32
  }
  func.func @transform_4(%arg0: i32) -> (i32, i32) {
    %c0_i32 = arith.constant 0 : i32
    %c0_i32_0 = arith.constant 0 : i32
    return %arg0, %c0_i32 : i32, i32
  }
}

</mosaic_0001>

<bundles_post_ra>
// kernel: custom_cnn_forward.3
= control target key start
LH: loop header
LB: loop body
LE: loop exit
PB: predicated region body
PF: predicated region fallthrough
CT: control target
= control target key end

     0   :  { %s6622_s1 = inlined_call_operand.vmem [shape: bf16[128,128], index: 1, kind: input, shape index: {}]   ;;  %s6623_s0 = inlined_call_operand.vmem [shape: bf16[4,512,128], index: 0, kind: input, shape index: {}]   ;;  %s6624_s2 = inlined_call_operand.vmem [shape: f32[1,128], index: 2, kind: input, shape index: {}]   ;;  %s6625_s3 = inlined_call_operand.vmem [shape: f32[1,128], index: 3, kind: input, shape index: {}]   ;;  %s6626_s4 = inlined_call_operand.vmem [shape: bf16[512,128], index: 4, kind: output, shape index: {}]  }
   0x1   :  { %v4342_v0 = vld [vmem:[%s6622_s1] sm:$0xff]   ;;  %v4343_v1 = vld [vmem:[%s6622_s1 + $0x8] sm:$0xff]   ;;  %v4344_v2 = vld [vmem:[%s6622_s1 + $0x10] sm:$0xff]  }
   0x2   :  { %4054 = vmatprep.subr.bf16.mxu0 %v4342_v0  ;;  %4326 = vmatprep.subr.bf16.mxu1 %v4342_v0  ;;  %v4345_v3 = vld [vmem:[%s6622_s1 + $0x18] sm:$0xff]   ;;  %v4350_v4 = vld [vmem:[%s6623_s0] sm:$0xff]   ;;  %v4347_v7 = vld [vmem:[%s6622_s1 + $0x28] sm:$0xff]  }
   0x3   :  { %4055 = vmatpush3.bf16.msra.mxu0 %v4342_v0  ;;  %4334 = vmatpush3.bf16.msra.mxu1 %v4342_v0  ;;  %v4351_v5 = vld [vmem:[%s6623_s0 + $0x200] sm:$0xff]   ;;  %v4348_v8 = vld [vmem:[%s6622_s1 + $0x30] sm:$0xff]   ;;  %v4349_v9 = vld [vmem:[%s6622_s1 + $0x38] sm:$0xff]  }
   0x4   :  { %4056 = vmatprep.subr.bf16.mxu0 %v4343_v1  ;;  %4327 = vmatprep.subr.bf16.mxu1 %v4343_v1  ;;  %v4346_v6 = vld [vmem:[%s6622_s1 + $0x20] sm:$0xff]   ;;  %v4352_v10 = vld [vmem:[%s6623_s0 + $0x8] sm:$0xff]   ;;  %v4354_v12 = vld [vmem:[%s6623_s0 + $0x10] sm:$0xff]  }
   0x5   :  { %4070 = vmatprep.mubr.bf16.mxu0 %v4350_v4  ;;  %4198 = vmatprep.mubr.bf16.mxu1 %v4351_v5  ;;  %v4353_v11 = vld [vmem:[%s6623_s0 + $0x208] sm:$0xff]   ;;  %v4355_v13 = vld [vmem:[%s6623_s0 + $0x210] sm:$0xff]   ;;  %v4356_v14 = vld [vmem:[%s6623_s0 + $0x18] sm:$0xff]  }
   0x6   :  { %v4357_v15 = vld [vmem:[%s6623_s0 + $0x218] sm:$0xff]   ;;  %v4358_v16 = vld [vmem:[%s6623_s0 + $0x20] sm:$0xff]   ;;  %v4360_v18 = vld [vmem:[%s6623_s0 + $0x28] sm:$0xff]  }
   0x7   :  { %4057 = vmatpush3.bf16.msra.mxu0 %v4343_v1  ;;  %4335 = vmatpush3.bf16.msra.mxu1 %v4343_v1  ;;  %v4359_v17 = vld [vmem:[%s6623_s0 + $0x220] sm:$0xff]   ;;  %v4361_v19 = vld [vmem:[%s6623_s0 + $0x228] sm:$0xff]   ;;  %v4362_v20 = vld [vmem:[%s6623_s0 + $0x30] sm:$0xff]  }
   0x8   :  { %4058 = vmatprep.subr.bf16.mxu0 %v4344_v2  ;;  %4328 = vmatprep.subr.bf16.mxu1 %v4344_v2  ;;  %v4363_v21 = vld [vmem:[%s6623_s0 + $0x230] sm:$0xff]   ;;  %v4364_v22 = vld [vmem:[%s6623_s0 + $0x38] sm:$0xff]   ;;  %v4366_v24 = vld [vmem:[%s6623_s0 + $0x40] sm:$0xff]  }
   0x9   :  { %v4365_v23 = vld [vmem:[%s6623_s0 + $0x238] sm:$0xff]   ;;  %v4367_v25 = vld [vmem:[%s6623_s0 + $0x240] sm:$0xff]   ;;  %v4368_v26 = vld [vmem:[%s6623_s0 + $0x48] sm:$0xff]  }
   0xa   :  { %v4369_v27 = vld [vmem:[%s6623_s0 + $0x248] sm:$0xff]   ;;  %v4370_v28 = vld [vmem:[%s6623_s0 + $0x50] sm:$0xff]   ;;  %v4372_v30 = vld [vmem:[%s6623_s0 + $0x58] sm:$0xff]  }
   0xb   :  { %4059 = vmatpush3.bf16.msra.mxu0 %v4344_v2  ;;  %4336 = vmatpush3.bf16.msra.mxu1 %v4344_v2  ;;  %v4371_v29 = vld [vmem:[%s6623_s0 + $0x250] sm:$0xff]   ;;  %v4373_v31 = vld [vmem:[%s6623_s0 + $0x258] sm:$0xff]   ;;  %v4374_v32 = vld [vmem:[%s6623_s0 + $0x60] sm:$0xff]  }
   0xc   :  { %4060 = vmatprep.subr.bf16.mxu0 %v4345_v3  ;;  %4329 = vmatprep.subr.bf16.mxu1 %v4345_v3  ;;  %v4375_v33 = vld [vmem:[%s6623_s0 + $0x260] sm:$0xff]   ;;  %v4376_v34 = vld [vmem:[%s6623_s0 + $0x68] sm:$0xff]   ;;  %v4378_v36 = vld [vmem:[%s6623_s0 + $0x70] sm:$0xff]  }
   0xd   :  { %v4377_v35 = vld [vmem:[%s6623_s0 + $0x268] sm:$0xff]   ;;  %v4379_v37 = vld [vmem:[%s6623_s0 + $0x270] sm:$0xff]   ;;  %v4380_v38 = vld [vmem:[%s6623_s0 + $0x78] sm:$0xff]  }
   0xe   :  { %v4381_v39 = vld [vmem:[%s6623_s0 + $0x278] sm:$0xff]   ;;  %v4382_v40 = vld [vmem:[%s6623_s0 + $0x80] sm:$0xff]   ;;  %v4384_v42 = vld [vmem:[%s6623_s0 + $0x88] sm:$0xff]  }
   0xf   :  { %4061 = vmatpush3.bf16.msra.mxu0 %v4345_v3  ;;  %4337 = vmatpush3.bf16.msra.mxu1 %v4345_v3  ;;  %v4383_v41 = vld [vmem:[%s6623_s0 + $0x280] sm:$0xff]   ;;  %v4385_v43 = vld [vmem:[%s6623_s0 + $0x288] sm:$0xff]   ;;  %v4386_v44 = vld [vmem:[%s6623_s0 + $0x90] sm:$0xff]  }
  0x10   :  { %4062 = vmatprep.subr.bf16.mxu0 %v4346_v6  ;;  %4330 = vmatprep.subr.bf16.mxu1 %v4346_v6  ;;  %v4387_v45 = vld [vmem:[%s6623_s0 + $0x290] sm:$0xff]   ;;  %v4388_v46 = vld [vmem:[%s6623_s0 + $0x98] sm:$0xff]   ;;  %v4390_v48 = vld [vmem:[%s6623_s0 + $0xa0] sm:$0xff]  }
  0x11   :  { %v4389_v47 = vld [vmem:[%s6623_s0 + $0x298] sm:$0xff]   ;;  %v4391_v49 = vld [vmem:[%s6623_s0 + $0x2a0] sm:$0xff]   ;;  %v4392_v50 = vld [vmem:[%s6623_s0 + $0xa8] sm:$0xff]  }
  0x12   :  { %v4393_v51 = vld [vmem:[%s6623_s0 + $0x2a8] sm:$0xff]   ;;  %v4394_v52 = vld [vmem:[%s6623_s0 + $0xb0] sm:$0xff]   ;;  %v4396_v54 = vld [vmem:[%s6623_s0 + $0xb8] sm:$0xff]  }
  0x13   :  { %4063 = vmatpush3.bf16.msra.mxu0 %v4346_v6  ;;  %4338 = vmatpush3.bf16.msra.mxu1 %v4346_v6  ;;  %v4395_v53 = vld [vmem:[%s6623_s0 + $0x2b0] sm:$0xff]   ;;  %v4397_v55 = vld [vmem:[%s6623_s0 + $0x2b8] sm:$0xff]   ;;  %v4398_v56 = vld [vmem:[%s6623_s0 + $0xc0] sm:$0xff]  }
  0x14   :  { %4064 = vmatprep.subr.bf16.mxu0 %v4347_v7  ;;  %4331 = vmatprep.subr.bf16.mxu1 %v4347_v7  ;;  %v4399_v57 = vld [vmem:[%s6623_s0 + $0x2c0] sm:$0xff]   ;;  %v4400_v58 = vld [vmem:[%s6623_s0 + $0xc8] sm:$0xff]   ;;  %v4402_v60 = vld [vmem:[%s6623_s0 + $0xd0] sm:$0xff]  }
  0x15   :  { %v4401_v59 = vld [vmem:[%s6623_s0 + $0x2c8] sm:$0xff]   ;;  %v4403_v61 = vld [vmem:[%s6623_s0 + $0x2d0] sm:$0xff]   ;;  %v4404_v62 = vld [vmem:[%s6623_s0 + $0xd8] sm:$0xff]  }
  0x16   :  { %v4405_v63 = vld [vmem:[%s6623_s0 + $0x2d8] sm:$0xff]   ;;  %v4406_v0 = vld [vmem:[%s6623_s0 + $0xe0] sm:$0xff]   ;;  %v4408_v2 = vld [vmem:[%s6623_s0 + $0xe8] sm:$0xff]  }
  0x17   :  { %4065 = vmatpush3.bf16.msra.mxu0 %v4347_v7  ;;  %4339 = vmatpush3.bf16.msra.mxu1 %v4347_v7  ;;  %v4407_v1 = vld [vmem:[%s6623_s0 + $0x2e0] sm:$0xff]   ;;  %v4409_v3 = vld [vmem:[%s6623_s0 + $0x2e8] sm:$0xff]   ;;  %v4410_v4 = vld [vmem:[%s6623_s0 + $0xf0] sm:$0xff]  }
  0x18   :  { %4066 = vmatprep.subr.bf16.mxu0 %v4348_v8  ;;  %4332 = vmatprep.subr.bf16.mxu1 %v4348_v8  ;;  %v4411_v5 = vld [vmem:[%s6623_s0 + $0x2f0] sm:$0xff]   ;;  %v4412_v6 = vld [vmem:[%s6623_s0 + $0xf8] sm:$0xff]  }
  0x19   :  { %v4413_v7 = vld [vmem:[%s6623_s0 + $0x2f8] sm:$0xff]  }
  0x1b   :  { %4067 = vmatpush3.bf16.msra.mxu0 %v4348_v8  ;;  %4340 = vmatpush3.bf16.msra.mxu1 %v4348_v8  ;;  %v4414_v8 = vld [vmem:[%s6623_s0 + $0x100] sm:$0xff]  }
  0x1c   :  { %4068 = vmatprep.subr.bf16.mxu0 %v4349_v9  ;;  %4333 = vmatprep.subr.bf16.mxu1 %v4349_v9 }
  0x1f   :  { %4069 = vmatpush3.bf16.msra.mxu0 %v4349_v9  ;;  %4341 = vmatpush3.bf16.msra.mxu1 %v4349_v9  ;;  %v4415_v9 = vld [vmem:[%s6623_s0 + $0x300] sm:$0xff]  }
  0x22   :  { %4071 = vmatmul.mubr.bf16.vlgmr.msra.gmra.mrb[0].mxu0 %v4352_v10  ;;  %4199 = vmatmul.mubr.bf16.vlgmr.msra.gmra.mrb[0].mxu1 %v4353_v11  ;;  %v4416_v10 = vld [vmem:[%s6623_s0 + $0x108] sm:$0xff]  }
  0x23   :  { %4074 = vmatprep.mubr.bf16.mxu0 %v4354_v12  ;;  %4202 = vmatprep.mubr.bf16.mxu1 %v4355_v13  ;;  %v4417_v11 = vld [vmem:[%s6623_s0 + $0x308] sm:$0xff]   ;;  %v4418_v12 = vld [vmem:[%s6623_s0 + $0x110] sm:$0xff]  }
  0x24   :  { %v4419_v13 = vld [vmem:[%s6623_s0 + $0x310] sm:$0xff]  }
  0x2a   :  { %4075 = vmatmul.mubr.bf16.gmra.mrb[4].mxu0 %v4356_v14  ;;  %4203 = vmatmul.mubr.bf16.gmra.mrb[4].mxu1 %v4357_v15  ;;  %v4420_v14 = vld [vmem:[%s6623_s0 + $0x118] sm:$0xff]  }
  0x2b   :  { %4078 = vmatprep.mubr.bf16.mxu0 %v4358_v16  ;;  %4206 = vmatprep.mubr.bf16.mxu1 %v4359_v17  ;;  %v4421_v15 = vld [vmem:[%s6623_s0 + $0x318] sm:$0xff]   ;;  %v4422_v16 = vld [vmem:[%s6623_s0 + $0x120] sm:$0xff]  }
  0x2c   :  { %v4423_v17 = vld [vmem:[%s6623_s0 + $0x320] sm:$0xff]  }
  0x32   :  { %4079 = vmatmul.mubr.bf16.gmra.mrb[8].mxu0 %v4360_v18  ;;  %4207 = vmatmul.mubr.bf16.gmra.mrb[8].mxu1 %v4361_v19  ;;  %v4424_v18 = vld [vmem:[%s6623_s0 + $0x128] sm:$0xff]  }
  0x33   :  { %4082 = vmatprep.mubr.bf16.mxu0 %v4362_v20  ;;  %4210 = vmatprep.mubr.bf16.mxu1 %v4363_v21  ;;  %v4425_v19 = vld [vmem:[%s6623_s0 + $0x328] sm:$0xff]   ;;  %v4426_v20 = vld [vmem:[%s6623_s0 + $0x130] sm:$0xff]  }
  0x34   :  { %v4427_v21 = vld [vmem:[%s6623_s0 + $0x330] sm:$0xff]  }
  0x3a   :  { %4083 = vmatmul.mubr.bf16.gmra.mrb[12].mxu0 %v4364_v22  ;;  %4211 = vmatmul.mubr.bf16.gmra.mrb[12].mxu1 %v4365_v23  ;;  %v4428_v22 = vld [vmem:[%s6623_s0 + $0x138] sm:$0xff]  }
  0x3b   :  { %4086 = vmatprep.mubr.bf16.mxu0 %v4366_v24  ;;  %4214 = vmatprep.mubr.bf16.mxu1 %v4367_v25  ;;  %v4429_v23 = vld [vmem:[%s6623_s0 + $0x338] sm:$0xff]   ;;  %v4430_v24 = vld [vmem:[%s6623_s0 + $0x140] sm:$0xff]  }
  0x3c   :  { %v4431_v25 = vld [vmem:[%s6623_s0 + $0x340] sm:$0xff]  }
  0x42   :  { %4087 = vmatmul.mubr.bf16.gmra.mrb[16].mxu0 %v4368_v26  ;;  %4215 = vmatmul.mubr.bf16.gmra.mrb[16].mxu1 %v4369_v27  ;;  %v4432_v26 = vld [vmem:[%s6623_s0 + $0x148] sm:$0xff]  }
  0x43   :  { %4090 = vmatprep.mubr.bf16.mxu0 %v4370_v28  ;;  %4218 = vmatprep.mubr.bf16.mxu1 %v4371_v29  ;;  %v4433_v27 = vld [vmem:[%s6623_s0 + $0x348] sm:$0xff]   ;;  %v4434_v28 = vld [vmem:[%s6623_s0 + $0x150] sm:$0xff]  }
  0x44   :  { %v4435_v29 = vld [vmem:[%s6623_s0 + $0x350] sm:$0xff]  }
  0x4a   :  { %4091 = vmatmul.mubr.bf16.gmra.mrb[20].mxu0 %v4372_v30  ;;  %4219 = vmatmul.mubr.bf16.gmra.mrb[20].mxu1 %v4373_v31  ;;  %v4436_v30 = vld [vmem:[%s6623_s0 + $0x158] sm:$0xff]  }
  0x4b   :  { %4094 = vmatprep.mubr.bf16.mxu0 %v4374_v32  ;;  %4222 = vmatprep.mubr.bf16.mxu1 %v4375_v33  ;;  %v4437_v31 = vld [vmem:[%s6623_s0 + $0x358] sm:$0xff]   ;;  %v4438_v32 = vld [vmem:[%s6623_s0 + $0x160] sm:$0xff]  }
  0x4c   :  { %v4439_v33 = vld [vmem:[%s6623_s0 + $0x360] sm:$0xff]  }
  0x52   :  { %4095 = vmatmul.mubr.bf16.gmra.mrb[24].mxu0 %v4376_v34  ;;  %4223 = vmatmul.mubr.bf16.gmra.mrb[24].mxu1 %v4377_v35  ;;  %v4440_v34 = vld [vmem:[%s6623_s0 + $0x168] sm:$0xff]  }
  0x53   :  { %4098 = vmatprep.mubr.bf16.mxu0 %v4378_v36  ;;  %4226 = vmatprep.mubr.bf16.mxu1 %v4379_v37  ;;  %v4441_v35 = vld [vmem:[%s6623_s0 + $0x368] sm:$0xff]   ;;  %v4442_v36 = vld [vmem:[%s6623_s0 + $0x170] sm:$0xff]  }
  0x54   :  { %v4443_v37 = vld [vmem:[%s6623_s0 + $0x370] sm:$0xff]  }
  0x5a   :  { %4099 = vmatmul.mubr.bf16.gmra.mrb[28].mxu0 %v4380_v38  ;;  %4227 = vmatmul.mubr.bf16.gmra.mrb[28].mxu1 %v4381_v39  ;;  %v4444_v38 = vld [vmem:[%s6623_s0 + $0x178] sm:$0xff]  }
  0x5b   :  { %4102 = vmatprep.mubr.bf16.mxu0 %v4382_v40  ;;  %4230 = vmatprep.mubr.bf16.mxu1 %v4383_v41  ;;  %v4445_v39 = vld [vmem:[%s6623_s0 + $0x378] sm:$0xff]   ;;  %v4446_v40 = vld [vmem:[%s6623_s0 + $0x180] sm:$0xff]  }
  0x5c   :  { %v4447_v41 = vld [vmem:[%s6623_s0 + $0x380] sm:$0xff]  }
  0x62   :  { %4103 = vmatmul.mubr.bf16.gmra.mrb[32].mxu0 %v4384_v42  ;;  %4231 = vmatmul.mubr.bf16.gmra.mrb[32].mxu1 %v4385_v43  ;;  %v4448_v42 = vld [vmem:[%s6623_s0 + $0x188] sm:$0xff]  }
  0x63   :  { %4106 = vmatprep.mubr.bf16.mxu0 %v4386_v44  ;;  %4234 = vmatprep.mubr.bf16.mxu1 %v4387_v45  ;;  %v4449_v43 = vld [vmem:[%s6623_s0 + $0x388] sm:$0xff]   ;;  %v4450_v44 = vld [vmem:[%s6623_s0 + $0x190] sm:$0xff]  }
  0x64   :  { %v4451_v45 = vld [vmem:[%s6623_s0 + $0x390] sm:$0xff]  }
  0x6a   :  { %4107 = vmatmul.mubr.bf16.gmra.mrb[36].mxu0 %v4388_v46  ;;  %4235 = vmatmul.mubr.bf16.gmra.mrb[36].mxu1 %v4389_v47  ;;  %v4452_v46 = vld [vmem:[%s6623_s0 + $0x198] sm:$0xff]  }
  0x6b   :  { %4110 = vmatprep.mubr.bf16.mxu0 %v4390_v48  ;;  %4238 = vmatprep.mubr.bf16.mxu1 %v4391_v49  ;;  %v4453_v47 = vld [vmem:[%s6623_s0 + $0x398] sm:$0xff]   ;;  %v4454_v48 = vld [vmem:[%s6623_s0 + $0x1a0] sm:$0xff]  }
  0x6c   :  { %v4455_v49 = vld [vmem:[%s6623_s0 + $0x3a0] sm:$0xff]  }
  0x72   :  { %4111 = vmatmul.mubr.bf16.gmra.mrb[40].mxu0 %v4392_v50  ;;  %4239 = vmatmul.mubr.bf16.gmra.mrb[40].mxu1 %v4393_v51  ;;  %v4456_v50 = vld [vmem:[%s6623_s0 + $0x1a8] sm:$0xff]  }
  0x73   :  { %4114 = vmatprep.mubr.bf16.mxu0 %v4394_v52  ;;  %4242 = vmatprep.mubr.bf16.mxu1 %v4395_v53  ;;  %v4457_v51 = vld [vmem:[%s6623_s0 + $0x3a8] sm:$0xff]   ;;  %v4458_v52 = vld [vmem:[%s6623_s0 + $0x1b0] sm:$0xff]  }
  0x74   :  { %v4459_v53 = vld [vmem:[%s6623_s0 + $0x3b0] sm:$0xff]  }
  0x7a   :  { %4115 = vmatmul.mubr.bf16.gmra.mrb[44].mxu0 %v4396_v54  ;;  %4243 = vmatmul.mubr.bf16.gmra.mrb[44].mxu1 %v4397_v55 }
  0x7b   :  { %4118 = vmatprep.mubr.bf16.mxu0 %v4398_v56  ;;  %4246 = vmatprep.mubr.bf16.mxu1 %v4399_v57 }
  0x82   :  { %4119 = vmatmul.mubr.bf16.gmra.mrb[48].mxu0 %v4400_v58  ;;  %4247 = vmatmul.mubr.bf16.gmra.mrb[48].mxu1 %v4401_v59  ;;  %v4460_v58 = vld [vmem:[%s6623_s0 + $0x1b8] sm:$0xff]  }
  0x83   :  { %4122 = vmatprep.mubr.bf16.mxu0 %v4402_v60  ;;  %4250 = vmatprep.mubr.bf16.mxu1 %v4403_v61  ;;  %v4461_v59 = vld [vmem:[%s6623_s0 + $0x3b8] sm:$0xff]  }
  0x8a   :  { %4123 = vmatmul.mubr.bf16.gmra.mrb[52].mxu0 %v4404_v62  ;;  %4251 = vmatmul.mubr.bf16.gmra.mrb[52].mxu1 %v4405_v63  ;;  %v4462_v62 = vld [vmem:[%s6623_s0 + $0x1c0] sm:$0xff]  }
  0x8b   :  { %4126 = vmatprep.mubr.bf16.mxu0 %v4406_v0  ;;  %4254 = vmatprep.mubr.bf16.mxu1 %v4407_v1  ;;  %v4463_v63 = vld [vmem:[%s6623_s0 + $0x3c0] sm:$0xff]  }
  0x92   :  { %4127 = vmatmul.mubr.bf16.gmra.mrb[56].mxu0 %v4408_v2  ;;  %4255 = vmatmul.mubr.bf16.gmra.mrb[56].mxu1 %v4409_v3 }
  0x93   :  { %4130 = vmatprep.mubr.bf16.mxu0 %v4410_v4  ;;  %4258 = vmatprep.mubr.bf16.mxu1 %v4411_v5 }
  0x9a   :  { %4131 = vmatmul.mubr.bf16.gmra.mrb[60].mxu0 %v4412_v6  ;;  %4259 = vmatmul.mubr.bf16.gmra.mrb[60].mxu1 %v4413_v7  ;;  %v4464_v6 = vld [vmem:[%s6623_s0 + $0x1c8] sm:$0xff]  }
  0x9b   :  { %4134 = vmatprep.mubr.bf16.mxu0 %v4414_v8  ;;  %4262 = vmatprep.mubr.bf16.mxu1 %v4415_v9  ;;  %v4465_v7 = vld [vmem:[%s6623_s0 + $0x3c8] sm:$0xff]  }
  0xa2   :  { %4135 = vmatmul.mubr.bf16.gmra.mrb[64].mxu0 %v4416_v10  ;;  %4263 = vmatmul.mubr.bf16.gmra.mrb[64].mxu1 %v4417_v11  ;;  %v4466_v10 = vld [vmem:[%s6623_s0 + $0x1d0] sm:$0xff]  }
  0xa3   :  { %4138 = vmatprep.mubr.bf16.mxu0 %v4418_v12  ;;  %4266 = vmatprep.mubr.bf16.mxu1 %v4419_v13  ;;  %v4467_v11 = vld [vmem:[%s6623_s0 + $0x3d0] sm:$0xff]  }
  0xaa   :  { %4139 = vmatmul.mubr.bf16.gmra.mrb[68].mxu0 %v4420_v14  ;;  %4267 = vmatmul.mubr.bf16.gmra.mrb[68].mxu1 %v4421_v15 }
  0xab   :  { %4142 = vmatprep.mubr.bf16.mxu0 %v4422_v16  ;;  %4270 = vmatprep.mubr.bf16.mxu1 %v4423_v17 }
  0xb2   :  { %4143 = vmatmul.mubr.bf16.gmra.mrb[72].mxu0 %v4424_v18  ;;  %4271 = vmatmul.mubr.bf16.gmra.mrb[72].mxu1 %v4425_v19  ;;  %v4468_v18 = vld [vmem:[%s6623_s0 + $0x1d8] sm:$0xff]  }
  0xb3   :  { %4146 = vmatprep.mubr.bf16.mxu0 %v4426_v20  ;;  %4274 = vmatprep.mubr.bf16.mxu1 %v4427_v21  ;;  %v4469_v19 = vld [vmem:[%s6623_s0 + $0x3d8] sm:$0xff]  }
  0xba   :  { %4147 = vmatmul.mubr.bf16.gmra.mrb[76].mxu0 %v4428_v22  ;;  %4275 = vmatmul.mubr.bf16.gmra.mrb[76].mxu1 %v4429_v23  ;;  %v4470_v22 = vld [vmem:[%s6623_s0 + $0x1e0] sm:$0xff]  }
  0xbb   :  { %4150 = vmatprep.mubr.bf16.mxu0 %v4430_v24  ;;  %4278 = vmatprep.mubr.bf16.mxu1 %v4431_v25  ;;  %v4471_v23 = vld [vmem:[%s6623_s0 + $0x3e0] sm:$0xff]  }
  0xc2   :  { %4151 = vmatmul.mubr.bf16.gmra.mrb[80].mxu0 %v4432_v26  ;;  %4279 = vmatmul.mubr.bf16.gmra.mrb[80].mxu1 %v4433_v27 }
  0xc3   :  { %4154 = vmatprep.mubr.bf16.mxu0 %v4434_v28  ;;  %4282 = vmatprep.mubr.bf16.mxu1 %v4435_v29 }
  0xca   :  { %4155 = vmatmul.mubr.bf16.gmra.mrb[84].mxu0 %v4436_v30  ;;  %4283 = vmatmul.mubr.bf16.gmra.mrb[84].mxu1 %v4437_v31  ;;  %v4472_v30 = vld [vmem:[%s6623_s0 + $0x1e8] sm:$0xff]  }
  0xcb   :  { %4158 = vmatprep.mubr.bf16.mxu0 %v4438_v32  ;;  %4286 = vmatprep.mubr.bf16.mxu1 %v4439_v33  ;;  %v4473_v31 = vld [vmem:[%s6623_s0 + $0x3e8] sm:$0xff]  }
  0xd2   :  { %4159 = vmatmul.mubr.bf16.gmra.mrb[88].mxu0 %v4440_v34  ;;  %4287 = vmatmul.mubr.bf16.gmra.mrb[88].mxu1 %v4441_v35  ;;  %v4474_v34 = vld [vmem:[%s6623_s0 + $0x1f0] sm:$0xff]  }
  0xd3   :  { %4162 = vmatprep.mubr.bf16.mxu0 %v4442_v36  ;;  %4290 = vmatprep.mubr.bf16.mxu1 %v4443_v37  ;;  %v4475_v35 = vld [vmem:[%s6623_s0 + $0x3f0] sm:$0xff]  }
  0xda   :  { %4163 = vmatmul.mubr.bf16.gmra.mrb[92].mxu0 %v4444_v38  ;;  %4291 = vmatmul.mubr.bf16.gmra.mrb[92].mxu1 %v4445_v39  ;;  %v4976_v38 = vld [vmem:[%s6624_s2] ss:$0 sm:$0xff] }
  0xdb   :  { %4166 = vmatprep.mubr.bf16.mxu0 %v4446_v40  ;;  %4294 = vmatprep.mubr.bf16.mxu1 %v4447_v41 }
  0xe2   :  { %4167 = vmatmul.mubr.bf16.gmra.mrb[96].mxu0 %v4448_v42  ;;  %4295 = vmatmul.mubr.bf16.gmra.mrb[96].mxu1 %v4449_v43  ;;  %v4989_v43 = vld [vmem:[%s6625_s3] ss:$0 sm:$0xff] }
  0xe3   :  { %4170 = vmatprep.mubr.bf16.mxu0 %v4450_v44  ;;  %4298 = vmatprep.mubr.bf16.mxu1 %v4451_v45 }
  0xea   :  { %4171 = vmatmul.mubr.bf16.gmra.mrb[100].mxu0 %v4452_v46  ;;  %4299 = vmatmul.mubr.bf16.gmra.mrb[100].mxu1 %v4453_v47  ;;  %v4476_v47 = vld [vmem:[%s6623_s0 + $0x1f8] sm:$0xff]  }
  0xeb   :  { %4174 = vmatprep.mubr.bf16.mxu0 %v4454_v48  ;;  %4302 = vmatprep.mubr.bf16.mxu1 %v4455_v49  ;;  %v4477_v48 = vld [vmem:[%s6623_s0 + $0x3f8] sm:$0xff]  }
  0xf2   :  { %4175 = vmatmul.mubr.bf16.gmra.mrb[104].mxu0 %v4456_v50  ;;  %4303 = vmatmul.mubr.bf16.gmra.mrb[104].mxu1 %v4457_v51 }
  0xf3   :  { %4178 = vmatprep.mubr.bf16.mxu0 %v4458_v52  ;;  %4306 = vmatprep.mubr.bf16.mxu1 %v4459_v53 }
  0xf5   :  { %v4861_v54 = vpop.f32.mrb[0].mxu0  ;;  %v4863_v55 = vpop.f32.mrb[0].mxu1 }
  0xf6   :  { %v4865_v56 = vpop.f32.mrb[1].mxu0  ;;  %v4867_v57 = vpop.f32.mrb[1].mxu1  ;;  %v2172_v39 = vmul.f32 %v4861_v54, %v4976_v38  ;;  %v2300_v40 = vmul.f32 %v4863_v55, %v4976_v38 }
  0xf7   :  { %v4875_v60 = vpop.f32.mrb[2].mxu0  ;;  %v4877_v61 = vpop.f32.mrb[2].mxu1  ;;  %v2170_v44 = vmul.f32 %v4976_v38, %v4865_v56  ;;  %v2298_v49 = vmul.f32 %v4976_v38, %v4867_v57 }
  0xf8   :  { %v4885_v0 = vpop.f32.mrb[3].mxu0  ;;  %v4887_v1 = vpop.f32.mrb[3].mxu1  ;;  %v2173_v50 = vmul.f32 %v4875_v60, %v4976_v38  ;;  %v2301_v53 = vmul.f32 %v4877_v61, %v4976_v38  ;;  %v5022_v57 = vadd.f32 %v4989_v43, %v2172_v39 }
  0xf9   :  { %v2171_v54 = vmul.f32 %v4976_v38, %v4885_v0  ;;  %v2299_v55 = vmul.f32 %v4976_v38, %v4887_v1  ;;  %v5028_v60 = vadd.f32 %v4989_v43, %v2170_v44 }
  0xfa   :  { %4179 = vmatmul.mubr.bf16.gmra.mrb[108].mxu0 %v4460_v58  ;;  %4307 = vmatmul.mubr.bf16.gmra.mrb[108].mxu1 %v4461_v59  ;;  %v5025_v59 = vadd.f32 %v4989_v43, %v2300_v40  ;;  %v5038_v0 = vadd.f32 %v4989_v43, %v2173_v50 }
  0xfb   :  { %4182 = vmatprep.mubr.bf16.mxu0 %v4462_v62  ;;  %4310 = vmatprep.mubr.bf16.mxu1 %v4463_v63  ;;  %v5035_v63 = vadd.f32 %v4989_v43, %v2298_v49 }
  0xfd   :  { %v4889_v2 = vpop.f32.mrb[4].mxu0  ;;  %v4891_v3 = vpop.f32.mrb[4].mxu1 }
  0xfe   :  { %v4893_v4 = vpop.f32.mrb[5].mxu0  ;;  %v4895_v5 = vpop.f32.mrb[5].mxu1  ;;  %v2176_v61 = vmul.f32 %v4889_v2, %v4976_v38  ;;  %v2304_v62 = vmul.f32 %v4891_v3, %v4976_v38  ;;  %v5048_v2 = vadd.f32 %v4989_v43, %v2171_v54  ;;  %v5051_v3 = vadd.f32 %v4989_v43, %v2299_v55 }
  0xff   :  { %v4903_v8 = vpop.f32.mrb[6].mxu0  ;;  %v4905_v9 = vpop.f32.mrb[6].mxu1  ;;  %v2174_v1 = vmul.f32 %v4976_v38, %v4893_v4 }
 0x100   :  { %v4913_v12 = vpop.f32.mrb[7].mxu0  ;;  %v4915_v13 = vpop.f32.mrb[7].mxu1  ;;  %v2305_v4 = vmul.f32 %v4905_v9, %v4976_v38 }
 0x101   :  { %v2303_v50 = vmul.f32 %v4976_v38, %v4915_v13 }
 0x102   :  { %4183 = vmatmul.mubr.bf16.gmra.mrb[112].mxu0 %v4464_v6  ;;  %4311 = vmatmul.mubr.bf16.gmra.mrb[112].mxu1 %v4465_v7  ;;  %v2302_v6 = vmul.f32 %v4976_v38, %v4895_v5  ;;  %v5045_v7 = vadd.f32 %v4989_v43, %v2301_v53  ;;  %v2175_v5 = vmul.f32 %v4976_v38, %v4913_v12 }
 0x103   :  { %4186 = vmatprep.mubr.bf16.mxu0 %v4466_v10  ;;  %4314 = vmatprep.mubr.bf16.mxu1 %v4467_v11  ;;  %v2177_v11 = vmul.f32 %v4903_v8, %v4976_v38 }
 0x104   :  { %v5082_v39 = vadd.f32 %v4989_v43, %v2302_v6  ;;  %v5121_v6 = vadd.f32 %v4989_v43, %v2303_v50 }
 0x105   :  { %v4917_v14 = vpop.f32.mrb[8].mxu0  ;;  %v4919_v15 = vpop.f32.mrb[8].mxu1  ;;  %v5098_v55 = vadd.f32 %v4989_v43, %v2177_v11 }
 0x106   :  { %v4921_v16 = vpop.f32.mrb[9].mxu0  ;;  %v4923_v17 = vpop.f32.mrb[9].mxu1  ;;  %v2308_v49 = vmul.f32 %v4919_v15, %v4976_v38  ;;  %6714 = vst [vmem:[#allocation3_spill] sm:$0xff] %v5121_v6 }
 0x107   :  { %v4931_v20 = vpop.f32.mrb[10].mxu0  ;;  %v4933_v21 = vpop.f32.mrb[10].mxu1  ;;  %v2178_v11 = vmul.f32 %v4976_v38, %v4921_v16 }
 0x108   :  { %v4941_v24 = vpop.f32.mrb[11].mxu0  ;;  %v4943_v25 = vpop.f32.mrb[11].mxu1  ;;  %v2309_v13 = vmul.f32 %v4933_v21, %v4976_v38  ;;  %v5140_v21 = vadd.f32 %v4989_v43, %v2308_v49 }
 0x109   :  { %v2179_v15 = vmul.f32 %v4976_v38, %v4941_v24  ;;  %v2307_v16 = vmul.f32 %v4976_v38, %v4943_v25  ;;  %v5143_v24 = vadd.f32 %v4989_v43, %v2178_v11 }
 0x10a   :  { %4187 = vmatmul.mubr.bf16.gmra.mrb[116].mxu0 %v4468_v18  ;;  %4315 = vmatmul.mubr.bf16.gmra.mrb[116].mxu1 %v4469_v19 }
 0x10b   :  { %4190 = vmatprep.mubr.bf16.mxu0 %v4470_v22  ;;  %4318 = vmatprep.mubr.bf16.mxu1 %v4471_v23  ;;  %v5169_v23 = vadd.f32 %v4989_v43, %v2309_v13 }
 0x10d   :  { %v4945_v26 = vpop.f32.mrb[12].mxu0  ;;  %v4947_v27 = vpop.f32.mrb[12].mxu1  ;;  %6716 = vst [vmem:[#allocation5_spill] sm:$0xff] %v5169_v23 }
 0x10e   :  { %v4949_v28 = vpop.f32.mrb[13].mxu0  ;;  %v4951_v29 = vpop.f32.mrb[13].mxu1  ;;  %v2184_v25 = vmul.f32 %v4945_v26, %v4976_v38 }
 0x10f   :  { %v4959_v32 = vpop.f32.mrb[14].mxu0  ;;  %v4961_v33 = vpop.f32.mrb[14].mxu1  ;;  %v2182_v49 = vmul.f32 %v4976_v38, %v4949_v28  ;;  %v2310_v11 = vmul.f32 %v4976_v38, %v4951_v29 }
 0x110   :  { %v4969_v36 = vpop.f32.mrb[15].mxu0  ;;  %v4971_v37 = vpop.f32.mrb[15].mxu1  ;;  %v2185_v10 = vmul.f32 %v4959_v32, %v4976_v38  ;;  %v5191_v6 = vadd.f32 %v4989_v43, %v2184_v25 }
 0x111   :  { %v2183_v13 = vmul.f32 %v4976_v38, %v4969_v36 }
 0x112   :  { %4191 = vmatmul.mubr.bf16.gmra.mrb[120].mxu0 %v4472_v30  ;;  %4319 = vmatmul.mubr.bf16.gmra.mrb[120].mxu1 %v4473_v31  ;;  %v5067_v30 = vadd.f32 %v4989_v43, %v2176_v61  ;;  %v5070_v31 = vadd.f32 %v4989_v43, %v2304_v62  ;;  %v5101_v61 = vadd.f32 %v4989_v43, %v2305_v4 }
 0x113   :  { %4194 = vmatprep.mubr.bf16.mxu0 %v4474_v34  ;;  %4322 = vmatprep.mubr.bf16.mxu1 %v4475_v35  ;;  %v5079_v35 = vadd.f32 %v4989_v43, %v2174_v1  ;;  %v5104_v62 = vadd.f32 %v4989_v43, %v2175_v5  ;;  %v2180_v1 = vmul.f32 %v4917_v14, %v4976_v38 }
 0x114   :  { %v2306_v5 = vmul.f32 %v4976_v38, %v4923_v17  ;;  %v2181_v14 = vmul.f32 %v4931_v20, %v4976_v38  ;;  %6719 = vst [vmem:[#allocation8_spill] sm:$0xff] %v5191_v6 }
 0x115   :  { %v4982_v41 = vpop.f32.mrb[16].mxu0  ;;  %v4984_v42 = vpop.f32.mrb[16].mxu1  ;;  %6713 = vst [vmem:[#allocation2_spill] sm:$0xff] %v5104_v62  ;;  %v5133_v20 = vadd.f32 %v4989_v43, %v2180_v1 }
 0x116   :  { %v4993_v45 = vpop.f32.mrb[17].mxu0  ;;  %v4995_v46 = vpop.f32.mrb[17].mxu1  ;;  %v5154_v4 = vadd.f32 %v4989_v43, %v2306_v5  ;;  %v5157_v34 = vadd.f32 %v4989_v43, %v2181_v14  ;;  %v5172_v5 = vadd.f32 %v4989_v43, %v2179_v15  ;;  %v5175_v14 = vadd.f32 %v4989_v43, %v2307_v16 }
 0x117   :  { %v5007_v51 = vpop.f32.mrb[18].mxu0  ;;  %v5009_v52 = vpop.f32.mrb[18].mxu1  ;;  %6715 = vst [vmem:[#allocation4_spill] sm:$0xff] %v5133_v20  ;;  %v5199_v20 = vadd.f32 %v4989_v43, %v2182_v49  ;;  %v5210_v15 = vadd.f32 %v4989_v43, %v2185_v10  ;;  %v5216_v49 = vadd.f32 %v4989_v43, %v2183_v13  ;;  %v2316_v10 = vmul.f32 %v4984_v42, %v4976_v38 }
 0x118   :  { %v5017_v56 = vpop.f32.mrb[19].mxu0  ;;  %v5019_v58 = vpop.f32.mrb[19].mxu1  ;;  %6717 = vst [vmem:[#allocation6_spill] sm:$0xff] %v5172_v5  ;;  %6718 = vst [vmem:[#allocation7_spill] sm:$0xff] %v5175_v14  ;;  %v2314_v5 = vmul.f32 %v4976_v38, %v4995_v46 }
 0x119   :  { %6721 = vst [vmem:[#allocation10_spill] sm:$0xff] %v5199_v20  ;;  %6723 = vst [vmem:[#allocation12_spill] sm:$0xff] %v5216_v49  ;;  %v2315_v14 = vmul.f32 %v4976_v38, %v5019_v58 }
 0x11a   :  { %4195 = vmatmul.mubr.bf16.gmra.mrb[124].mxu0 %v4476_v47  ;;  %4323 = vmatmul.mubr.bf16.gmra.mrb[124].mxu1 %v4477_v48  ;;  %v2312_v48 = vmul.f32 %v4947_v27, %v4976_v38  ;;  %v2313_v27 = vmul.f32 %v4961_v33, %v4976_v38  ;;  %v5202_v33 = vadd.f32 %v4989_v43, %v2310_v11 }
 0x11b   :  { %v2188_v11 = vmul.f32 %v4982_v41, %v4976_v38  ;;  %v2187_v41 = vmul.f32 %v4976_v38, %v5017_v56 }
 0x11c   :  { %v5194_v62 = vadd.f32 %v4989_v43, %v2312_v48  ;;  %6722 = vst [vmem:[#allocation11_spill] sm:$0xff] %v5202_v33  ;;  %v2311_v48 = vmul.f32 %v4976_v38, %v4971_v37  ;;  %v5213_v32 = vadd.f32 %v4989_v43, %v2313_v27  ;;  %v2186_v27 = vmul.f32 %v4976_v38, %v4993_v45 }
 0x11d   :  { %v5060_v18 = vpop.f32.mrb[20].mxu0  ;;  %v5062_v19 = vpop.f32.mrb[20].mxu1  ;;  %v2189_v37 = vmul.f32 %v5007_v51, %v4976_v38  ;;  %v5261_v6 = vadd.f32 %v4989_v43, %v2188_v11  ;;  %v5274_v51 = vadd.f32 %v4989_v43, %v2314_v5 }
 0x11e   :  { %v5072_v8 = vpop.f32.mrb[21].mxu0  ;;  %v5074_v9 = vpop.f32.mrb[21].mxu1  ;;  %6720 = vst [vmem:[#allocation9_spill] sm:$0xff] %v5194_v62  ;;  %v5245_v45 = vadd.f32 %v4989_v43, %v2311_v48  ;;  %v2317_v62 = vmul.f32 %v5009_v52, %v4976_v38  ;;  %v5264_v52 = vadd.f32 %v4989_v43, %v2316_v10  ;;  %v5267_v56 = vadd.f32 %v4989_v43, %v2186_v27 }
 0x11f   :  { %v5084_v40 = vpop.f32.mrb[22].mxu0  ;;  %v5086_v44 = vpop.f32.mrb[22].mxu1  ;;  %6725 = vst [vmem:[#allocation14_spill] sm:$0xff] %v5261_v6  ;;  %v2192_v58 = vmul.f32 %v5060_v18, %v4976_v38  ;;  %v2320_v23 = vmul.f32 %v5062_v19, %v4976_v38  ;;  %6728 = vst [vmem:[#allocation17_spill] sm:$0xff] %v5274_v51  ;;  %v5277_v48 = vadd.f32 %v4989_v43, %v2189_v37 }
 0x120   :  { %v5093_v53 = vpop.f32.mrb[23].mxu0  ;;  %v5095_v54 = vpop.f32.mrb[23].mxu1  ;;  %6724 = vst [vmem:[#allocation13_spill] sm:$0xff] %v5245_v45  ;;  %6726 = vst [vmem:[#allocation15_spill] sm:$0xff] %v5264_v52  ;;  %v2190_v11 = vmul.f32 %v4976_v38, %v5072_v8  ;;  %v2318_v10 = vmul.f32 %v4976_v38, %v5074_v9  ;;  %v5285_v20 = vadd.f32 %v4989_v43, %v2317_v62 }
 0x121   :  { %6727 = vst [vmem:[#allocation16_spill] sm:$0xff] %v5267_v56  ;;  %6729 = vst [vmem:[#allocation18_spill] sm:$0xff] %v5277_v48  ;;  %v5288_v18 = vadd.f32 %v4989_v43, %v2187_v41  ;;  %v5291_v19 = vadd.f32 %v4989_v43, %v2315_v14  ;;  %v2193_v37 = vmul.f32 %v5084_v40, %v4976_v38 }
 0x122   :  { %v2321_v8 = vmul.f32 %v5086_v44, %v4976_v38  ;;  %v2191_v9 = vmul.f32 %v4976_v38, %v5093_v53  ;;  %v5307_v45 = vadd.f32 %v4989_v43, %v2192_v58  ;;  %v5310_v5 = vadd.f32 %v4989_v43, %v2320_v23 }
 0x123   :  { %6730 = vst [vmem:[#allocation19_spill] sm:$0xff] %v5291_v19  ;;  %v5319_v49 = vadd.f32 %v4989_v43, %v2190_v11  ;;  %v5322_v41 = vadd.f32 %v4989_v43, %v2318_v10  ;;  %v2319_v53 = vmul.f32 %v4976_v38, %v5095_v54  ;;  %v5338_v10 = vadd.f32 %v4989_v43, %v2193_v37 }
 0x124   :  { %6731 = vst [vmem:[#allocation20_spill] sm:$0xff] %v5307_v45  ;;  %6732 = vst [vmem:[#allocation21_spill] sm:$0xff] %v5310_v5  ;;  %v5341_v48 = vadd.f32 %v4989_v43, %v2321_v8  ;;  %v5344_v51 = vadd.f32 %v4989_v43, %v2191_v9 }
 0x125   :  { %v5135_v50 = vpop.f32.mrb[24].mxu0  ;;  %v5137_v47 = vpop.f32.mrb[24].mxu1  ;;  %6733 = vst [vmem:[#allocation22_spill] sm:$0xff] %v5319_v49  ;;  %6734 = vst [vmem:[#allocation23_spill] sm:$0xff] %v5322_v41  ;;  %v5361_v52 = vadd.f32 %v4989_v43, %v2319_v53 }
 0x126   :  { %v5149_v17 = vpop.f32.mrb[25].mxu0  ;;  %v5151_v1 = vpop.f32.mrb[25].mxu1  ;;  %6735 = vst [vmem:[#allocation24_spill] sm:$0xff] %v5338_v10  ;;  %6736 = vst [vmem:[#allocation25_spill] sm:$0xff] %v5341_v48  ;;  %v2196_v56 = vmul.f32 %v5135_v50, %v4976_v38  ;;  %v2324_v23 = vmul.f32 %v5137_v47, %v4976_v38 }
 0x127   :  { %v5163_v26 = vpop.f32.mrb[26].mxu0  ;;  %v5165_v12 = vpop.f32.mrb[26].mxu1  ;;  %6737 = vst [vmem:[#allocation26_spill] sm:$0xff] %v5344_v51  ;;  %v2194_v37 = vmul.f32 %v4976_v38, %v5149_v17  ;;  %v2322_v9 = vmul.f32 %v4976_v38, %v5151_v1  ;;  %6738 = vst [vmem:[#allocation27_spill] sm:$0xff] %v5361_v52 }
 0x128   :  { %v5177_v22 = vpop.f32.mrb[27].mxu0  ;;  %v5179_v28 = vpop.f32.mrb[27].mxu1  ;;  %v2197_v50 = vmul.f32 %v5163_v26, %v4976_v38  ;;  %v2325_v54 = vmul.f32 %v5165_v12, %v4976_v38  ;;  %v5373_v26 = vadd.f32 %v4989_v43, %v2196_v56  ;;  %v5380_v12 = vadd.f32 %v4989_v43, %v2324_v23 }
 0x129   :  { %v2195_v47 = vmul.f32 %v4976_v38, %v5177_v22  ;;  %v2323_v17 = vmul.f32 %v4976_v38, %v5179_v28  ;;  %v5383_v22 = vadd.f32 %v4989_v43, %v2194_v37  ;;  %v5394_v8 = vadd.f32 %v4989_v43, %v2322_v9 }
 0x12a   :  { %6739 = vst [vmem:[#allocation28_spill] sm:$0xff] %v5373_v26  ;;  %v5397_v51 = vadd.f32 %v4989_v43, %v2197_v50  ;;  %v5409_v10 = vadd.f32 %v4989_v43, %v2325_v54 }
 0x12b   :  { %v5412_v9 = vadd.f32 %v4989_v43, %v2195_v47  ;;  %v5415_v50 = vadd.f32 %v4989_v43, %v2323_v17 }
 0x12c   :  { %6740 = vst [vmem:[#allocation29_spill] sm:$0xff] %v5409_v10 }
 0x12d   :  { %v5220_v36 = vpop.f32.mrb[28].mxu0  ;;  %v5222_v16 = vpop.f32.mrb[28].mxu1  ;;  %6741 = vst [vmem:[#allocation30_spill] sm:$0xff] %v5412_v9  ;;  %6742 = vst [vmem:[#allocation31_spill] sm:$0xff] %v5415_v50 }
 0x12e   :  { %v5230_v29 = vpop.f32.mrb[29].mxu0  ;;  %v5232_v13 = vpop.f32.mrb[29].mxu1  ;;  %v2200_v28 = vmul.f32 %v5220_v36, %v4976_v38  ;;  %v2328_v19 = vmul.f32 %v5222_v16, %v4976_v38 }
 0x12f   :  { %v5240_v25 = vpop.f32.mrb[30].mxu0  ;;  %v5242_v42 = vpop.f32.mrb[30].mxu1  ;;  %v2198_v23 = vmul.f32 %v4976_v38, %v5230_v29  ;;  %v2326_v37 = vmul.f32 %v4976_v38, %v5232_v13 }
 0x130   :  { %v5253_v46 = vpop.f32.mrb[31].mxu0  ;;  %v5255_v33 = vpop.f32.mrb[31].mxu1  ;;  %v2201_v5 = vmul.f32 %v5240_v25, %v4976_v38  ;;  %v2329_v16 = vmul.f32 %v5242_v42, %v4976_v38  ;;  %v5429_v17 = vadd.f32 %v4989_v43, %v2200_v28  ;;  %v5432_v45 = vadd.f32 %v4989_v43, %v2328_v19 }
 0x131   :  { %v2199_v54 = vmul.f32 %v4976_v38, %v5253_v46  ;;  %v5437_v26 = vadd.f32 %v4989_v43, %v2198_v23  ;;  %v5440_v42 = vadd.f32 %v4989_v43, %v2326_v37  ;;  %v2327_v19 = vmul.f32 %v4976_v38, %v5255_v33 }
 0x132   :  { %6743 = vst [vmem:[#allocation32_spill] sm:$0xff] %v5429_v17  ;;  %6744 = vst [vmem:[#allocation33_spill] sm:$0xff] %v5432_v45  ;;  %v5448_v47 = vadd.f32 %v4989_v43, %v2201_v5  ;;  %v5451_v25 = vadd.f32 %v4989_v43, %v2329_v16 }
 0x133   :  { %6745 = vst [vmem:[#allocation34_spill] sm:$0xff] %v5437_v26  ;;  %6746 = vst [vmem:[#allocation35_spill] sm:$0xff] %v5440_v42  ;;  %v5454_v23 = vadd.f32 %v4989_v43, %v2199_v54 }
 0x134   :  { %6747 = vst [vmem:[#allocation36_spill] sm:$0xff] %v5451_v25 }
 0x135   :  { %v5300_v27 = vpop.f32.mrb[32].mxu0  ;;  %v5302_v62 = vpop.f32.mrb[32].mxu1  ;;  %6748 = vst [vmem:[#allocation37_spill] sm:$0xff] %v5454_v23 }
 0x136   :  { %v5312_v40 = vpop.f32.mrb[33].mxu0  ;;  %v5314_v44 = vpop.f32.mrb[33].mxu1  ;;  %v2204_v37 = vmul.f32 %v5300_v27, %v4976_v38  ;;  %v2332_v5 = vmul.f32 %v5302_v62, %v4976_v38  ;;  %v5477_v62 = vadd.f32 %v4989_v43, %v2327_v19 }
 0x137   :  { %v5324_v14 = vpop.f32.mrb[34].mxu0  ;;  %v5326_v58 = vpop.f32.mrb[34].mxu1  ;;  %v2202_v16 = vmul.f32 %v4976_v38, %v5312_v40  ;;  %v2330_v9 = vmul.f32 %v4976_v38, %v5314_v44 }
 0x138   :  { %v5333_v6 = vpop.f32.mrb[35].mxu0  ;;  %v5335_v11 = vpop.f32.mrb[35].mxu1  ;;  %v2205_v28 = vmul.f32 %v5324_v14, %v4976_v38  ;;  %6749 = vst [vmem:[#allocation38_spill] sm:$0xff] %v5477_v62  ;;  %v2333_v40 = vmul.f32 %v5326_v58, %v4976_v38  ;;  %v5489_v19 = vadd.f32 %v4989_v43, %v2204_v37  ;;  %v5492_v10 = vadd.f32 %v4989_v43, %v2332_v5 }
 0x139   :  { %v2203_v17 = vmul.f32 %v4976_v38, %v5333_v6  ;;  %v2331_v27 = vmul.f32 %v4976_v38, %v5335_v11  ;;  %v5495_v58 = vadd.f32 %v4989_v43, %v2202_v16  ;;  %v5502_v44 = vadd.f32 %v4989_v43, %v2330_v9 }
 0x13a   :  { %6750 = vst [vmem:[#allocation39_spill] sm:$0xff] %v5489_v19  ;;  %6751 = vst [vmem:[#allocation40_spill] sm:$0xff] %v5492_v10  ;;  %v5505_v26 = vadd.f32 %v4989_v43, %v2205_v28  ;;  %v5513_v14 = vadd.f32 %v4989_v43, %v2333_v40 }
 0x13b   :  { %6752 = vst [vmem:[#allocation41_spill] sm:$0xff] %v5495_v58  ;;  %6753 = vst [vmem:[#allocation42_spill] sm:$0xff] %v5502_v44 }
 0x13d   :  { %v5375_v53 = vpop.f32.mrb[36].mxu0  ;;  %v5377_v41 = vpop.f32.mrb[36].mxu1 }
 0x13e   :  { %v5389_v1 = vpop.f32.mrb[37].mxu0  ;;  %v5391_v56 = vpop.f32.mrb[37].mxu1  ;;  %v2208_v6 = vmul.f32 %v5375_v53, %v4976_v38  ;;  %v2336_v11 = vmul.f32 %v5377_v41, %v4976_v38  ;;  %v5516_v53 = vadd.f32 %v4989_v43, %v2203_v17  ;;  %v5519_v41 = vadd.f32 %v4989_v43, %v2331_v27 }
 0x13f   :  { %v5403_v36 = vpop.f32.mrb[38].mxu0  ;;  %v5405_v48 = vpop.f32.mrb[38].mxu1  ;;  %v2206_v37 = vmul.f32 %v4976_v38, %v5389_v1  ;;  %v2334_v5 = vmul.f32 %v4976_v38, %v5391_v56 }
 0x140   :  { %v1287_v49 = vpop.f32.mrb[39].mxu0  ;;  %v5417_v29 = vpop.f32.mrb[39].mxu1  ;;  %6754 = vst [vmem:[#allocation43_spill] sm:$0xff] %v5516_v53  ;;  %6755 = vst [vmem:[#allocation44_spill] sm:$0xff] %v5519_v41  ;;  %v2209_v28 = vmul.f32 %v5403_v36, %v4976_v38  ;;  %v2337_v1 = vmul.f32 %v5405_v48, %v4976_v38  ;;  %v5530_v23 = vadd.f32 %v4989_v43, %v2208_v6 }
 0x141   :  { %v2207_v56 = vmul.f32 %v4976_v38, %v1287_v49  ;;  %v5533_v27 = vadd.f32 %v4989_v43, %v2336_v11  ;;  %v5538_v49 = vadd.f32 %v4989_v43, %v2206_v37  ;;  %v5541_v25 = vadd.f32 %v4989_v43, %v2334_v5 }
 0x142   :  { %6756 = vst [vmem:[#allocation45_spill] sm:$0xff] %v5530_v23  ;;  %v2335_v10 = vmul.f32 %v4976_v38, %v5417_v29  ;;  %v5549_v48 = vadd.f32 %v4989_v43, %v2209_v28  ;;  %v5552_v37 = vadd.f32 %v4989_v43, %v2337_v1 }
 0x143   :  { %6757 = vst [vmem:[#allocation46_spill] sm:$0xff] %v5533_v27  ;;  %6758 = vst [vmem:[#allocation47_spill] sm:$0xff] %v5538_v49  ;;  %v5555_v5 = vadd.f32 %v4989_v43, %v2207_v56 }
 0x144   :  { %6759 = vst [vmem:[#allocation48_spill] sm:$0xff] %v5541_v25  ;;  %6760 = vst [vmem:[#allocation49_spill] sm:$0xff] %v5549_v48 }
 0x145   :  { %v5458_v46 = vpop.f32.mrb[40].mxu0  ;;  %v5460_v52 = vpop.f32.mrb[40].mxu1  ;;  %6761 = vst [vmem:[#allocation50_spill] sm:$0xff] %v5552_v37  ;;  %6762 = vst [vmem:[#allocation51_spill] sm:$0xff] %v5555_v5 }
 0x146   :  { %v1300_v13 = vpop.f32.mrb[41].mxu0  ;;  %v5468_v54 = vpop.f32.mrb[41].mxu1  ;;  %v2212_v6 = vmul.f32 %v5458_v46, %v4976_v38  ;;  %v2340_v29 = vmul.f32 %v5460_v52, %v4976_v38  ;;  %v5570_v46 = vadd.f32 %v4989_v43, %v2335_v10 }
 0x147   :  { %v4113_v33 = vpop.f32.mrb[42].mxu0  ;;  %v4241_v45 = vpop.f32.mrb[42].mxu1  ;;  %v2210_v41 = vmul.f32 %v4976_v38, %v1300_v13  ;;  %v2338_v56 = vmul.f32 %v4976_v38, %v5468_v54 }
 0x148   :  { %v1303_v50 = vpop.f32.mrb[43].mxu0  ;;  %v1815_v42 = vpop.f32.mrb[43].mxu1  ;;  %v2213_v53 = vmul.f32 %v4113_v33, %v4976_v38  ;;  %6763 = vst [vmem:[#allocation52_spill] sm:$0xff] %v5570_v46  ;;  %v2341_v58 = vmul.f32 %v4241_v45, %v4976_v38  ;;  %v5579_v25 = vadd.f32 %v4989_v43, %v2212_v6  ;;  %v5582_v10 = vadd.f32 %v4989_v43, %v2340_v29 }
 0x149   :  { %v2211_v11 = vmul.f32 %v4976_v38, %v1303_v50  ;;  %v2339_v52 = vmul.f32 %v4976_v38, %v1815_v42  ;;  %v5585_v45 = vadd.f32 %v4989_v43, %v2210_v41  ;;  %v5590_v28 = vadd.f32 %v4989_v43, %v2338_v56 }
 0x14a   :  { %v5593_v6 = vadd.f32 %v4989_v43, %v2213_v53 }
 0x14b   :  { %6764 = vst [vmem:[#allocation53_spill] sm:$0xff] %v5590_v28  ;;  %v5605_v56 = vadd.f32 %v4989_v43, %v2339_v52 }
 0x14c   :  { %6765 = vst [vmem:[#allocation54_spill] sm:$0xff] %v5593_v6 }
 0x14d   :  { %v4116_v16 = vpop.f32.mrb[44].mxu0  ;;  %v4244_v62 = vpop.f32.mrb[44].mxu1  ;;  %6768 = vst [vmem:[#allocation57_spill] sm:$0xff] %v5605_v56 }
 0x14e   :  { %v1316_v9 = vpop.f32.mrb[45].mxu0  ;;  %v1828_v19 = vpop.f32.mrb[45].mxu1  ;;  %v2216_v50 = vmul.f32 %v4116_v16, %v4976_v38  ;;  %v2344_v42 = vmul.f32 %v4244_v62, %v4976_v38  ;;  %v5599_v16 = vadd.f32 %v4989_v43, %v2341_v58  ;;  %v5602_v62 = vadd.f32 %v4989_v43, %v2211_v11 }
 0x14f   :  { %v4117_v40 = vpop.f32.mrb[46].mxu0  ;;  %v4245_v17 = vpop.f32.mrb[46].mxu1  ;;  %v2214_v1 = vmul.f32 %v4976_v38, %v1316_v9  ;;  %v2342_v29 = vmul.f32 %v4976_v38, %v1828_v19 }
 0x150   :  { %v1319_v36 = vpop.f32.mrb[47].mxu0  ;;  %v1831_v44 = vpop.f32.mrb[47].mxu1  ;;  %6766 = vst [vmem:[#allocation55_spill] sm:$0xff] %v5599_v16  ;;  %6767 = vst [vmem:[#allocation56_spill] sm:$0xff] %v5602_v62  ;;  %v2217_v9 = vmul.f32 %v4117_v40, %v4976_v38  ;;  %v2345_v19 = vmul.f32 %v4245_v17, %v4976_v38  ;;  %v5614_v11 = vadd.f32 %v4989_v43, %v2216_v50 }
 0x151   :  { %v2215_v23 = vmul.f32 %v4976_v38, %v1319_v36  ;;  %v5617_v52 = vadd.f32 %v4989_v43, %v2344_v42  ;;  %v5622_v40 = vadd.f32 %v4989_v43, %v2214_v1  ;;  %v5625_v17 = vadd.f32 %v4989_v43, %v2342_v29 }
 0x152   :  { %6769 = vst [vmem:[#allocation58_spill] sm:$0xff] %v5614_v11  ;;  %v2343_v41 = vmul.f32 %v4976_v38, %v1831_v44  ;;  %v5632_v42 = vadd.f32 %v4989_v43, %v2217_v9  ;;  %v5635_v46 = vadd.f32 %v4989_v43, %v2345_v19 }
 0x153   :  { %6770 = vst [vmem:[#allocation59_spill] sm:$0xff] %v5617_v52  ;;  %6771 = vst [vmem:[#allocation60_spill] sm:$0xff] %v5625_v17  ;;  %v5638_v1 = vadd.f32 %v4989_v43, %v2215_v23 }
 0x154   :  { %6772 = vst [vmem:[#allocation61_spill] sm:$0xff] %v5635_v46  ;;  %v5650_v36 = vadd.f32 %v4989_v43, %v2343_v41 }
 0x155   :  { %v4120_v54 = vpop.f32.mrb[48].mxu0  ;;  %v4248_v33 = vpop.f32.mrb[48].mxu1  ;;  %6773 = vst [vmem:[#allocation62_spill] sm:$0xff] %v5638_v1 }
 0x156   :  { %v1332_v13 = vpop.f32.mrb[49].mxu0  ;;  %v1844_v48 = vpop.f32.mrb[49].mxu1  ;;  %v2220_v29 = vmul.f32 %v4120_v54, %v4976_v38  ;;  %v2348_v50 = vmul.f32 %v4248_v33, %v4976_v38  ;;  %6774 = vst [vmem:[#allocation63_spill] sm:$0xff] %v5650_v36 }
 0x157   :  { %v4121_v5 = vpop.f32.mrb[50].mxu0  ;;  %v4249_v37 = vpop.f32.mrb[50].mxu1  ;;  %v2218_v44 = vmul.f32 %v4976_v38, %v1332_v13  ;;  %v2346_v23 = vmul.f32 %v4976_v38, %v1844_v48 }
 0x158   :  { %v1335_v49 = vpop.f32.mrb[51].mxu0  ;;  %v1847_v53 = vpop.f32.mrb[51].mxu1  ;;  %v2221_v54 = vmul.f32 %v4121_v5, %v4976_v38  ;;  %v2349_v58 = vmul.f32 %v4249_v37, %v4976_v38  ;;  %v5659_v5 = vadd.f32 %v4989_v43, %v2220_v29  ;;  %v5662_v41 = vadd.f32 %v4989_v43, %v2348_v50 }
 0x159   :  { %v2219_v33 = vmul.f32 %v4976_v38, %v1335_v49  ;;  %v2347_v13 = vmul.f32 %v4976_v38, %v1847_v53  ;;  %v5665_v37 = vadd.f32 %v4989_v43, %v2218_v44  ;;  %v5670_v17 = vadd.f32 %v4989_v43, %v2346_v23 }
 0x15a   :  { %6775 = vst [vmem:[#allocation64_spill] sm:$0xff] %v5659_v5  ;;  %6776 = vst [vmem:[#allocation65_spill] sm:$0xff] %v5662_v41  ;;  %v5673_v62 = vadd.f32 %v4989_v43, %v2221_v54  ;;  %v5679_v19 = vadd.f32 %v4989_v43, %v2349_v58 }
 0x15b   :  { %6777 = vst [vmem:[#allocation66_spill] sm:$0xff] %v5665_v37  ;;  %v5682_v44 = vadd.f32 %v4989_v43, %v2219_v33 }
 0x15c   :  { %6778 = vst [vmem:[#allocation67_spill] sm:$0xff] %v5673_v62 }
 0x15d   :  { %v4124_v27 = vpop.f32.mrb[52].mxu0  ;;  %v4252_v6 = vpop.f32.mrb[52].mxu1  ;;  %6779 = vst [vmem:[#allocation68_spill] sm:$0xff] %v5682_v44 }
 0x15e   :  { %v1348_v9 = vpop.f32.mrb[53].mxu0  ;;  %v1860_v56 = vpop.f32.mrb[53].mxu1  ;;  %v2224_v49 = vmul.f32 %v4124_v27, %v4976_v38  ;;  %v2352_v53 = vmul.f32 %v4252_v6, %v4976_v38  ;;  %v5685_v27 = vadd.f32 %v4989_v43, %v2347_v13 }
 0x15f   :  { %v4125_v16 = vpop.f32.mrb[54].mxu0  ;;  %v4253_v28 = vpop.f32.mrb[54].mxu1  ;;  %v2222_v48 = vmul.f32 %v4976_v38, %v1348_v9  ;;  %v2350_v29 = vmul.f32 %v4976_v38, %v1860_v56 }
 0x160   :  { %v1351_v52 = vpop.f32.mrb[55].mxu0  ;;  %v1863_v11 = vpop.f32.mrb[55].mxu1  ;;  %6780 = vst [vmem:[#allocation69_spill] sm:$0xff] %v5685_v27  ;;  %v2225_v23 = vmul.f32 %v4125_v16, %v4976_v38  ;;  %v2353_v54 = vmul.f32 %v4253_v28, %v4976_v38  ;;  %v5694_v33 = vadd.f32 %v4989_v43, %v2224_v49  ;;  %v5697_v13 = vadd.f32 %v4989_v43, %v2352_v53 }
 0x161   :  { %v2223_v9 = vmul.f32 %v4976_v38, %v1351_v52  ;;  %v5702_v52 = vadd.f32 %v4989_v43, %v2222_v48  ;;  %v5705_v5 = vadd.f32 %v4989_v43, %v2350_v29  ;;  %v2351_v41 = vmul.f32 %v4976_v38, %v1863_v11 }
 0x162   :  { %6781 = vst [vmem:[#allocation70_spill] sm:$0xff] %v5697_v13  ;;  %v5712_v28 = vadd.f32 %v4989_v43, %v2225_v23  ;;  %v5715_v48 = vadd.f32 %v4989_v43, %v2353_v54 }
 0x163   :  { %6782 = vst [vmem:[#allocation71_spill] sm:$0xff] %v5702_v52  ;;  %6783 = vst [vmem:[#allocation72_spill] sm:$0xff] %v5705_v5  ;;  %v5718_v29 = vadd.f32 %v4989_v43, %v2223_v9  ;;  %v5730_v9 = vadd.f32 %v4989_v43, %v2351_v41 }
 0x164   :  { %6784 = vst [vmem:[#allocation73_spill] sm:$0xff] %v5712_v28  ;;  %6785 = vst [vmem:[#allocation74_spill] sm:$0xff] %v5715_v48 }
 0x165   :  { %v4128_v56 = vpop.f32.mrb[56].mxu0  ;;  %v4256_v1 = vpop.f32.mrb[56].mxu1  ;;  %6786 = vst [vmem:[#allocation75_spill] sm:$0xff] %v5718_v29  ;;  %6787 = vst [vmem:[#allocation76_spill] sm:$0xff] %v5730_v9 }
 0x166   :  { %v1364_v36 = vpop.f32.mrb[57].mxu0  ;;  %v1876_v6 = vpop.f32.mrb[57].mxu1  ;;  %v2228_v62 = vmul.f32 %v4128_v56, %v4976_v38  ;;  %v2356_v53 = vmul.f32 %v4256_v1, %v4976_v38 }
 0x167   :  { %v4129_v50 = vpop.f32.mrb[58].mxu0  ;;  %v4257_v58 = vpop.f32.mrb[58].mxu1  ;;  %v2226_v11 = vmul.f32 %v4976_v38, %v1364_v36  ;;  %v2354_v54 = vmul.f32 %v4976_v38, %v1876_v6 }
 0x168   :  { %v1367_v46 = vpop.f32.mrb[59].mxu0  ;;  %v1879_v16 = vpop.f32.mrb[59].mxu1  ;;  %v2229_v44 = vmul.f32 %v4129_v50, %v4976_v38  ;;  %v2357_v56 = vmul.f32 %v4257_v58, %v4976_v38  ;;  %v5739_v23 = vadd.f32 %v4989_v43, %v2228_v62  ;;  %v5742_v41 = vadd.f32 %v4989_v43, %v2356_v53 }
 0x169   :  { %v2227_v49 = vmul.f32 %v4976_v38, %v1367_v46  ;;  %v2355_v37 = vmul.f32 %v4976_v38, %v1879_v16  ;;  %v5745_v58 = vadd.f32 %v4989_v43, %v2226_v11  ;;  %v5750_v36 = vadd.f32 %v4989_v43, %v2354_v54 }
 0x16a   :  { %6788 = vst [vmem:[#allocation77_spill] sm:$0xff] %v5742_v41  ;;  %v5753_v62 = vadd.f32 %v4989_v43, %v2229_v44  ;;  %v5758_v11 = vadd.f32 %v4989_v43, %v2357_v56 }
 0x16b   :  { %6789 = vst [vmem:[#allocation78_spill] sm:$0xff] %v5750_v36 }
 0x16c   :  { %6790 = vst [vmem:[#allocation79_spill] sm:$0xff] %v5753_v62  ;;  %6791 = vst [vmem:[#allocation80_spill] sm:$0xff] %v5758_v11 }
 0x16d   :  { %v4132_v6 = vpop.f32.mrb[60].mxu0  ;;  %v4260_v50 = vpop.f32.mrb[60].mxu1 }
 0x16e   :  { %v2232_v46 = vmul.f32 %v4132_v6, %v4976_v38  ;;  %v2360_v16 = vmul.f32 %v4260_v50, %v4976_v38  ;;  %v1380_v1 = vpop.f32.mrb[61].mxu0  ;;  %v1892_v28 = vpop.f32.mrb[61].mxu1  ;;  %v5761_v6 = vadd.f32 %v4989_v43, %v2227_v49  ;;  %v5764_v50 = vadd.f32 %v4989_v43, %v2355_v37 }
 0x16f   :  { %v2230_v27 = vmul.f32 %v4976_v38, %v1380_v1  ;;  %v2358_v53 = vmul.f32 %v4976_v38, %v1892_v28  ;;  %v4133_v29 = vpop.f32.mrb[62].mxu0  ;;  %v4261_v48 = vpop.f32.mrb[62].mxu1 }
 0x170   :  { %6792 = vst [vmem:[#allocation81_spill] sm:$0xff] %v5761_v6  ;;  %6793 = vst [vmem:[#allocation82_spill] sm:$0xff] %v5764_v50  ;;  %v2233_v54 = vmul.f32 %v4133_v29, %v4976_v38  ;;  %v1383_v5 = vpop.f32.mrb[63].mxu0  ;;  %v1895_v44 = vpop.f32.mrb[63].mxu1  ;;  %v5769_v1 = vadd.f32 %v4989_v43, %v2232_v46  ;;  %v5772_v28 = vadd.f32 %v4989_v43, %v2360_v16 }
 0x171   :  { %v2361_v56 = vmul.f32 %v4261_v48, %v4976_v38  ;;  %v5778_v37 = vadd.f32 %v4989_v43, %v2230_v27  ;;  %v5781_v29 = vadd.f32 %v4989_v43, %v2358_v53  ;;  %v2231_v16 = vmul.f32 %v4976_v38, %v1383_v5 }
 0x172   :  { %6794 = vst [vmem:[#allocation83_spill] sm:$0xff] %v5769_v1  ;;  %6795 = vst [vmem:[#allocation84_spill] sm:$0xff] %v5772_v28  ;;  %v5786_v9 = vadd.f32 %v4989_v43, %v2233_v54  ;;  %v5799_v54 = vmul.f32 %v4976_v38, %v1895_v44 }
 0x173   :  { %6796 = vst [vmem:[#allocation85_spill] sm:$0xff] %v5778_v37  ;;  %6797 = vst [vmem:[#allocation86_spill] sm:$0xff] %v5781_v29  ;;  %v5796_v52 = vadd.f32 %v4989_v43, %v2361_v56  ;;  %v5807_v56 = vadd.f32 %v4989_v43, %v2231_v16 }
 0x174   :  { %6798 = vst [vmem:[#allocation87_spill] sm:$0xff] %v5786_v9  ;;  %6800 = vst [vmem:[#allocation89_spill] sm:$0xff] %v5799_v54 }
 0x175   :  { %6799 = vst [vmem:[#allocation88_spill] sm:$0xff] %v5796_v52  ;;  %v4136_v46 = vpop.f32.mrb[64].mxu0  ;;  %v4264_v5 = vpop.f32.mrb[64].mxu1  ;;  %6801 = vst [vmem:[#allocation90_spill] sm:$0xff] %v5807_v56 }
 0x176   :  { %v2236_v13 = vmul.f32 %v4136_v46, %v4976_v38  ;;  %v2364_v27 = vmul.f32 %v4264_v5, %v4976_v38  ;;  %v1396_v50 = vpop.f32.mrb[65].mxu0  ;;  %v1908_v53 = vpop.f32.mrb[65].mxu1 }
 0x177   :  { %v2234_v44 = vmul.f32 %v4976_v38, %v1396_v50  ;;  %v2362_v52 = vmul.f32 %v4976_v38, %v1908_v53  ;;  %v4137_v54 = vpop.f32.mrb[66].mxu0  ;;  %v4265_v28 = vpop.f32.mrb[66].mxu1 }
 0x178   :  { %v2499_v48 = vadd.f32 %v4989_v43, %v2236_v13  ;;  %v2627_v49 = vadd.f32 %v4989_v43, %v2364_v27  ;;  %v2237_v46 = vmul.f32 %v4137_v54, %v4976_v38  ;;  %v2365_v5 = vmul.f32 %v4265_v28, %v4976_v38  ;;  %v1399_v29 = vpop.f32.mrb[67].mxu0  ;;  %v1911_v37 = vpop.f32.mrb[67].mxu1 }
 0x179   :  { %v2497_v41 = vadd.f32 %v4989_v43, %v2234_v44  ;;  %v2625_v16 = vadd.f32 %v4989_v43, %v2362_v52  ;;  %v2235_v50 = vmul.f32 %v4976_v38, %v1399_v29  ;;  %v2363_v53 = vmul.f32 %v4976_v38, %v1911_v37 }
 0x17a   :  { %v2755_v56 = vmax.f32 %v2499_v48, 0.0  ;;  %v2883_v9 = vmax.f32 %v2627_v49, 0.0  ;;  %v2500_v13 = vadd.f32 %v4989_v43, %v2237_v46  ;;  %v2628_v27 = vadd.f32 %v4989_v43, %v2365_v5 }
 0x17b   :  { %v2753_v1 = vmax.f32 %v2497_v41, 0.0  ;;  %v2881_v54 = vmax.f32 %v2625_v16, 0.0  ;;  %v2498_v28 = vadd.f32 %v4989_v43, %v2235_v50  ;;  %v2626_v6 = vadd.f32 %v4989_v43, %v2363_v53 }
 0x17c   :  { %v6802_v44 = vmax.f32 %v5022_v57, 0.0  ;;  %v6803_v52 = vmax.f32 %v5025_v59, 0.0  ;;  %v2756_v62 = vmax.f32 %v2500_v13, 0.0  ;;  %v2884_v38 = vmax.f32 %v2628_v27, 0.0 }
 0x17d   :  { %v6804_v49 = vmax.f32 %v5028_v60, 0.0  ;;  %v6805_v48 = vmax.f32 %v5035_v63, 0.0  ;;  %v2754_v41 = vmax.f32 %v2498_v28, 0.0  ;;  %v2882_v5 = vmax.f32 %v2626_v6, 0.0  ;;  %v4140_v16 = vpop.f32.mrb[68].mxu0  ;;  %v4268_v50 = vpop.f32.mrb[68].mxu1 }
 0x17e   :  { %v2947_v11 = vmax.f32 %v6802_v44, %v2755_v56  ;;  %v3011_v29 = vmax.f32 %v6803_v52, %v2883_v9  ;;  %v6806_v43 = vmax.f32 %v5038_v0, 0.0  ;;  %v6807_v56 = vmax.f32 %v5045_v7, 0.0  ;;  %v5838_v9 = vld [vmem:[%s6624_s2] ss:$0 sm:$0xff]  ;;  %v1412_v63 = vpop.f32.mrb[69].mxu0 }
 0x17f   :  { %v2945_v37 = vmax.f32 %v6804_v49, %v2753_v1  ;;  %v3009_v46 = vmax.f32 %v6805_v48, %v2881_v54  ;;  %v2240_v60 = vmul.f32 %v5838_v9, %v4140_v16  ;;  %v1924_v1 = vpop.f32.mrb[69].mxu1  ;;  %v6808_v6 = vmax.f32 %v5048_v2, 0.0  ;;  %v4141_v7 = vpop.f32.mrb[70].mxu0  ;;  %v5849_v28 = vld [vmem:[%s6625_s3] ss:$0 sm:$0xff] }
 0x180   :  { %v3075_v36 = vmax.f32 %v2947_v11, %v3011_v29  ;;  %v2948_v57 = vmax.f32 %v6806_v43, %v2756_v62  ;;  %v3012_v59 = vmax.f32 %v6807_v56, %v2884_v38  ;;  %v6809_v11 = vmax.f32 %v5051_v3, 0.0  ;;  %v4269_v27 = vpop.f32.mrb[70].mxu1  ;;  %v1415_v29 = vpop.f32.mrb[71].mxu0 }
 0x181   :  { %v3073_v53 = vmax.f32 %v2945_v37, %v3009_v46  ;;  %v2946_v13 = vmax.f32 %v6808_v6, %v2754_v41  ;;  %v2368_v62 = vmul.f32 %v5838_v9, %v4268_v50  ;;  %v2503_v44 = vadd.f32 %v5849_v28, %v2240_v60  ;;  %v1927_v38 = vpop.f32.mrb[71].mxu1 }
 0x182   :  { %v3010_v0 = vmax.f32 %v6809_v11, %v2882_v5  ;;  %v3076_v54 = vmax.f32 %v2948_v57, %v3012_v59  ;;  %v2238_v52 = vmul.f32 %v5838_v9, %v1412_v63  ;;  %v2366_v2 = vmul.f32 %v5838_v9, %v1924_v1 }
 0x183   :  { %v2631_v49 = vadd.f32 %v5849_v28, %v2368_v62  ;;  %v2241_v37 = vmul.f32 %v5838_v9, %v4141_v7  ;;  %v2369_v48 = vmul.f32 %v5838_v9, %v4269_v27  ;;  %v2759_v41 = vmax.f32 %v2503_v44, 0.0 }
 0x184   :  { %v3074_v3 = vmax.f32 %v2946_v13, %v3010_v0  ;;  %v3735_v46 = vpack.c.bf16 %v3076_v54, %v3075_v36  ;;  %v2501_v5 = vadd.f32 %v5849_v28, %v2238_v52  ;;  %v2629_v16 = vadd.f32 %v5849_v28, %v2366_v2 }
 0x185   :  { %v2887_v43 = vmax.f32 %v2631_v49, 0.0  ;;  %v2504_v57 = vadd.f32 %v5849_v28, %v2241_v37  ;;  %v2632_v56 = vadd.f32 %v5849_v28, %v2369_v48  ;;  %v6810_v59 = vmax.f32 %v5067_v30, 0.0  ;;  %v4144_v62 = vpop.f32.mrb[72].mxu0  ;;  %v4272_v7 = vpop.f32.mrb[72].mxu1 }
 0x186   :  { %v3730_v50 = vpack.c.bf16 %v3074_v3, %v3073_v53  ;;  %3887 = vst [vmem:[%s6626_s4 + $0x8] sm:$0xff] %v3735_v46   ;;  %v2757_v63 = vmax.f32 %v2501_v5, 0.0  ;;  %v2885_v36 = vmax.f32 %v2629_v16, 0.0  ;;  %v2239_v1 = vmul.f32 %v5838_v9, %v1415_v29  ;;  %v1428_v29 = vpop.f32.mrb[73].mxu0  ;;  %v1940_v3 = vpop.f32.mrb[73].mxu1 }
 0x187   :  { %v2951_v60 = vmax.f32 %v6810_v59, %v2759_v41  ;;  %v6811_v53 = vmax.f32 %v5070_v31, 0.0  ;;  %v2760_v13 = vmax.f32 %v2504_v57, 0.0  ;;  %v2888_v11 = vmax.f32 %v2632_v56, 0.0  ;;  %v4273_v41 = vpop.f32.mrb[74].mxu1 }
 0x188   :  { %3731 = vst [vmem:[%s6626_s4] sm:$0xff] %v3730_v50   ;;  %v2367_v0 = vmul.f32 %v5838_v9, %v1927_v38  ;;  %v6812_v30 = vmax.f32 %v5079_v35, 0.0  ;;  %v6813_v54 = vmax.f32 %v5082_v39, 0.0  ;;  %v2502_v52 = vadd.f32 %v5849_v28, %v2239_v1  ;;  %v4145_v35 = vpop.f32.mrb[74].mxu0  ;;  %v1943_v57 = vpop.f32.mrb[75].mxu1 }
 0x189   :  { %v3015_v6 = vmax.f32 %v6811_v53, %v2887_v43  ;;  %v2244_v2 = vmul.f32 %v5838_v9, %v4144_v62  ;;  %v6814_v49 = vmax.f32 %v5098_v55, 0.0  ;;  %v6815_v38 = vmax.f32 %v5101_v61, 0.0  ;;  %v1431_v43 = vpop.f32.mrb[75].mxu0  ;;  %v6816_v61 = vld [vmem:[#allocation2_spill] sm:$0xff] }
 0x18a   :  { %v2949_v27 = vmax.f32 %v6812_v30, %v2757_v63  ;;  %v3013_v44 = vmax.f32 %v6813_v54, %v2885_v36  ;;  %v2630_v46 = vadd.f32 %v5849_v28, %v2367_v0  ;;  %v2758_v39 = vmax.f32 %v2502_v52, 0.0 }
 0x18b   :  { %v3079_v31 = vmax.f32 %v2951_v60, %v3015_v6  ;;  %v2952_v37 = vmax.f32 %v6814_v49, %v2760_v13  ;;  %v3016_v48 = vmax.f32 %v6815_v38, %v2888_v11  ;;  %v2507_v16 = vadd.f32 %v5849_v28, %v2244_v2  ;;  %v6818_v11 = vld [vmem:[#allocation3_spill] sm:$0xff] }
 0x18c   :  { %v3077_v5 = vmax.f32 %v2949_v27, %v3013_v44  ;;  %v2372_v50 = vmul.f32 %v5838_v9, %v4272_v7  ;;  %v2886_v59 = vmax.f32 %v2630_v46, 0.0  ;;  %v2242_v55 = vmul.f32 %v5838_v9, %v1428_v29  ;;  %v6820_v27 = vld [vmem:[#allocation4_spill] sm:$0xff] }
 0x18d   :  { %v3080_v56 = vmax.f32 %v2952_v37, %v3016_v48  ;;  %v2370_v60 = vmul.f32 %v5838_v9, %v1940_v3  ;;  %v6817_v63 = vmax.f32 %v6816_v61, 0.0  ;;  %v2763_v1 = vmax.f32 %v2507_v16, 0.0  ;;  %v4148_v38 = vpop.f32.mrb[76].mxu0  ;;  %v4276_v48 = vpop.f32.mrb[76].mxu1 }
 0x18e   :  { %v2635_v53 = vadd.f32 %v5849_v28, %v2372_v50  ;;  %v2245_v6 = vmul.f32 %v5838_v9, %v4145_v35  ;;  %v6819_v0 = vmax.f32 %v6818_v11, 0.0  ;;  %v2505_v7 = vadd.f32 %v5849_v28, %v2242_v55 }
 0x18f   :  { %v2950_v36 = vmax.f32 %v6817_v63, %v2758_v39  ;;  %v3745_v13 = vpack.c.bf16 %v3080_v56, %v3079_v31  ;;  %v2633_v30 = vadd.f32 %v5849_v28, %v2370_v60  ;;  %v6821_v54 = vmax.f32 %v6820_v27, 0.0  ;;  %v1956_v56 = vpop.f32.mrb[77].mxu1 }
 0x190   :  { %v3014_v62 = vmax.f32 %v6819_v0, %v2886_v59  ;;  %v2891_v52 = vmax.f32 %v2635_v53, 0.0  ;;  %v2508_v2 = vadd.f32 %v5849_v28, %v2245_v6  ;;  %v2373_v29 = vmul.f32 %v5838_v9, %v4273_v41  ;;  %v1444_v41 = vpop.f32.mrb[77].mxu0 }
 0x191   :  { %v2955_v44 = vmax.f32 %v6821_v54, %v2763_v1  ;;  %3889 = vst [vmem:[%s6626_s4 + $0x18] sm:$0xff] %v3745_v13   ;;  %v2761_v31 = vmax.f32 %v2505_v7, 0.0  ;;  %v2889_v49 = vmax.f32 %v2633_v30, 0.0  ;;  %v2243_v37 = vmul.f32 %v5838_v9, %v1431_v43  ;;  %v4277_v1 = vpop.f32.mrb[78].mxu1  ;;  %v6826_v7 = vld [vmem:[#allocation5_spill] sm:$0xff] }
 0x192   :  { %v3078_v3 = vmax.f32 %v2950_v36, %v3014_v62  ;;  %v6822_v46 = vmax.f32 %v5140_v21, 0.0  ;;  %v2764_v39 = vmax.f32 %v2508_v2, 0.0  ;;  %v2636_v16 = vadd.f32 %v5849_v28, %v2373_v29  ;;  %v4149_v36 = vpop.f32.mrb[78].mxu0  ;;  %v1959_v0 = vpop.f32.mrb[79].mxu1 }
 0x193   :  { %v2371_v50 = vmul.f32 %v5838_v9, %v1943_v57  ;;  %v6823_v55 = vmax.f32 %v5143_v24, 0.0  ;;  %v6824_v61 = vmax.f32 %v5154_v4, 0.0  ;;  %v2506_v43 = vadd.f32 %v5849_v28, %v2243_v37  ;;  %v1447_v11 = vpop.f32.mrb[79].mxu0 }
 0x194   :  { %v3019_v35 = vmax.f32 %v6822_v46, %v2891_v52  ;;  %v3740_v59 = vpack.c.bf16 %v3078_v3, %v3077_v5  ;;  %v6825_v53 = vmax.f32 %v5157_v34, 0.0  ;;  %v2892_v13 = vmax.f32 %v2636_v16, 0.0  ;;  %v6828_v52 = vld [vmem:[#allocation6_spill] sm:$0xff] }
 0x195   :  { %v2953_v60 = vmax.f32 %v6823_v55, %v2761_v31  ;;  %v3017_v63 = vmax.f32 %v6824_v61, %v2889_v49  ;;  %v2634_v57 = vadd.f32 %v5849_v28, %v2371_v50  ;;  %v2762_v4 = vmax.f32 %v2506_v43, 0.0  ;;  %v4280_v55 = vpop.f32.mrb[80].mxu1 }
 0x196   :  { %v3083_v21 = vmax.f32 %v2955_v44, %v3019_v35  ;;  %v2956_v6 = vmax.f32 %v6825_v53, %v2764_v39  ;;  %3888 = vst [vmem:[%s6626_s4 + $0x10] sm:$0xff] %v3740_v59   ;;  %v2248_v5 = vmul.f32 %v5838_v9, %v4148_v38  ;;  %v2376_v62 = vmul.f32 %v5838_v9, %v4276_v48  ;;  %v6830_v38 = vld [vmem:[#allocation7_spill] sm:$0xff]  ;;  %v4152_v59 = vpop.f32.mrb[80].mxu0  ;;  %v1972_v53 = vpop.f32.mrb[81].mxu1 }
 0x197   :  { %v3081_v24 = vmax.f32 %v2953_v60, %v3017_v63  ;;  %v6827_v30 = vmax.f32 %v6826_v7, 0.0  ;;  %v2890_v34 = vmax.f32 %v2634_v57, 0.0  ;;  %v2246_v54 = vmul.f32 %v5838_v9, %v1444_v41 }
 0x198   :  { %v2374_v44 = vmul.f32 %v5838_v9, %v1956_v56  ;;  %v6829_v2 = vmax.f32 %v6828_v52, 0.0  ;;  %v2511_v3 = vadd.f32 %v5849_v28, %v2248_v5  ;;  %v2639_v31 = vadd.f32 %v5849_v28, %v2376_v62  ;;  %v6838_v52 = vld [vmem:[#allocation11_spill] sm:$0xff] }
 0x199   :  { %v3020_v27 = vmax.f32 %v6827_v30, %v2892_v13  ;;  %v2249_v49 = vmul.f32 %v5838_v9, %v4149_v36  ;;  %v6831_v48 = vmax.f32 %v6830_v38, 0.0  ;;  %v2509_v35 = vadd.f32 %v5849_v28, %v2246_v54  ;;  %v1460_v36 = vpop.f32.mrb[81].mxu0 }
 0x19a   :  { %v2954_v29 = vmax.f32 %v6829_v2, %v2762_v4  ;;  %v2637_v39 = vadd.f32 %v5849_v28, %v2374_v44  ;;  %v2767_v16 = vmax.f32 %v2511_v3, 0.0  ;;  %v2895_v50 = vmax.f32 %v2639_v31, 0.0  ;;  %v6834_v4 = vld [vmem:[#allocation9_spill] sm:$0xff] }
 0x19b   :  { %v3084_v37 = vmax.f32 %v2956_v6, %v3020_v27  ;;  %v3018_v46 = vmax.f32 %v6831_v48, %v2890_v34  ;;  %v2512_v41 = vadd.f32 %v5849_v28, %v2249_v49  ;;  %v2377_v56 = vmul.f32 %v5838_v9, %v4277_v1  ;;  %v6832_v6 = vld [vmem:[#allocation8_spill] sm:$0xff]  ;;  %v4153_v27 = vpop.f32.mrb[82].mxu0  ;;  %v4281_v34 = vpop.f32.mrb[82].mxu1 }
 0x19c   :  { %v2765_v63 = vmax.f32 %v2509_v35, 0.0  ;;  %v2893_v43 = vmax.f32 %v2637_v39, 0.0  ;;  %v6833_v13 = vmax.f32 %v6832_v6, 0.0  ;;  %v6835_v5 = vmax.f32 %v6834_v4, 0.0  ;;  %v1463_v31 = vpop.f32.mrb[83].mxu0  ;;  %v1975_v49 = vpop.f32.mrb[83].mxu1 }
 0x19d   :  { %v3755_v60 = vpack.c.bf16 %v3084_v37, %v3083_v21  ;;  %v3082_v61 = vmax.f32 %v2954_v29, %v3018_v46  ;;  %v2768_v7 = vmax.f32 %v2512_v41, 0.0  ;;  %v2640_v30 = vadd.f32 %v5849_v28, %v2377_v56  ;;  %v6836_v21 = vld [vmem:[#allocation10_spill] sm:$0xff]  ;;  %v6842_v4 = vld [vmem:[#allocation12_spill] sm:$0xff] }
 0x19e   :  { %v2959_v57 = vmax.f32 %v6833_v13, %v2767_v16  ;;  %v3023_v62 = vmax.f32 %v6835_v5, %v2895_v50  ;;  %v6837_v54 = vmax.f32 %v6836_v21, 0.0  ;;  %v6839_v2 = vmax.f32 %v6838_v52, 0.0  ;;  %v4156_v13 = vpop.f32.mrb[84].mxu0 }
 0x19f   :  { %3891 = vst [vmem:[%s6626_s4 + $0x28] sm:$0xff] %v3755_v60   ;;  %v3750_v1 = vpack.c.bf16 %v3082_v61, %v3081_v24  ;;  %v2247_v3 = vmul.f32 %v5838_v9, %v1447_v11  ;;  %v6840_v38 = vmax.f32 %v5210_v15, 0.0  ;;  %v2896_v46 = vmax.f32 %v2640_v30, 0.0  ;;  %v1476_v30 = vpop.f32.mrb[85].mxu0 }
 0x1a0   :  { %v2957_v44 = vmax.f32 %v6837_v54, %v2765_v63  ;;  %v3021_v29 = vmax.f32 %v6839_v2, %v2893_v43  ;;  %v3087_v37 = vmax.f32 %v2959_v57, %v3023_v62  ;;  %v2375_v35 = vmul.f32 %v5838_v9, %v1959_v0  ;;  %v4284_v57 = vpop.f32.mrb[84].mxu1  ;;  %v6844_v54 = vld [vmem:[#allocation13_spill] sm:$0xff] }
 0x1a1   :  { %v2960_v48 = vmax.f32 %v6840_v38, %v2768_v7  ;;  %3890 = vst [vmem:[%s6626_s4 + $0x20] sm:$0xff] %v3750_v1   ;;  %v2510_v39 = vadd.f32 %v5849_v28, %v2247_v3  ;;  %v2252_v16 = vmul.f32 %v5838_v9, %v4152_v59  ;;  %v2380_v11 = vmul.f32 %v5838_v9, %v4280_v55  ;;  %v1988_v1 = vpop.f32.mrb[85].mxu1  ;;  %v6846_v38 = vld [vmem:[#allocation14_spill] sm:$0xff] }
 0x1a2   :  { %v3085_v24 = vmax.f32 %v2957_v44, %v3021_v29  ;;  %v6841_v50 = vmax.f32 %v5213_v32, 0.0  ;;  %v2638_v15 = vadd.f32 %v5849_v28, %v2375_v35  ;;  %v2250_v56 = vmul.f32 %v5838_v9, %v1460_v36  ;;  %v4157_v29 = vpop.f32.mrb[86].mxu0  ;;  %v4285_v3 = vpop.f32.mrb[86].mxu1  ;;  %v6848_v35 = vld [vmem:[#allocation15_spill] sm:$0xff] }
 0x1a3   :  { %v2378_v0 = vmul.f32 %v5838_v9, %v1972_v53  ;;  %v2766_v60 = vmax.f32 %v2510_v39, 0.0  ;;  %v2515_v61 = vadd.f32 %v5849_v28, %v2252_v16  ;;  %v2643_v63 = vadd.f32 %v5849_v28, %v2380_v11 }
 0x1a4   :  { %v3024_v41 = vmax.f32 %v6841_v50, %v2896_v46  ;;  %v2253_v43 = vmul.f32 %v5838_v9, %v4153_v27  ;;  %v2894_v59 = vmax.f32 %v2638_v15, 0.0  ;;  %v2513_v55 = vadd.f32 %v5849_v28, %v2250_v56  ;;  %v1991_v15 = vpop.f32.mrb[87].mxu1  ;;  %v6850_v56 = vld [vmem:[#allocation16_spill] sm:$0xff] }
 0x1a5   :  { %v2641_v32 = vadd.f32 %v5849_v28, %v2378_v0  ;;  %v6843_v5 = vmax.f32 %v6842_v4, 0.0  ;;  %v2771_v62 = vmax.f32 %v2515_v61, 0.0  ;;  %v2899_v53 = vmax.f32 %v2643_v63, 0.0  ;;  %v6852_v61 = vld [vmem:[#allocation17_spill] sm:$0xff] }
 0x1a6   :  { %v3088_v6 = vmax.f32 %v2960_v48, %v3024_v41  ;;  %v2516_v7 = vadd.f32 %v5849_v28, %v2253_v43  ;;  %v6845_v27 = vmax.f32 %v6844_v54, 0.0  ;;  %v2769_v52 = vmax.f32 %v2513_v55, 0.0  ;;  %v1479_v41 = vpop.f32.mrb[87].mxu0  ;;  %v6854_v55 = vld [vmem:[#allocation18_spill] sm:$0xff] }
 0x1a7   :  { %v2958_v36 = vmax.f32 %v6843_v5, %v2766_v60  ;;  %v2897_v2 = vmax.f32 %v2641_v32, 0.0  ;;  %v6847_v48 = vmax.f32 %v6846_v38, 0.0  ;;  %v6849_v39 = vmax.f32 %v6848_v35, 0.0 }
 0x1a8   :  { %v3765_v21 = vpack.c.bf16 %v3088_v6, %v3087_v37  ;;  %v3022_v44 = vmax.f32 %v6845_v27, %v2894_v59  ;;  %v2772_v11 = vmax.f32 %v2516_v7, 0.0  ;;  %v2381_v50 = vmul.f32 %v5838_v9, %v4281_v34 }
 0x1a9   :  { %v2963_v46 = vmax.f32 %v6847_v48, %v2771_v62  ;;  %v3027_v16 = vmax.f32 %v6849_v39, %v2899_v53  ;;  %v6851_v0 = vmax.f32 %v6850_v56, 0.0  ;;  %v6853_v63 = vmax.f32 %v6852_v61, 0.0 }
 0x1aa   :  { %3893 = vst [vmem:[%s6626_s4 + $0x38] sm:$0xff] %v3765_v21   ;;  %v3086_v37 = vmax.f32 %v2958_v36, %v3022_v44  ;;  %v2251_v6 = vmul.f32 %v5838_v9, %v1463_v31  ;;  %v6855_v32 = vmax.f32 %v6854_v55, 0.0  ;;  %v2644_v34 = vadd.f32 %v5849_v28, %v2381_v50 }
 0x1ab   :  { %v2961_v60 = vmax.f32 %v6851_v0, %v2769_v52  ;;  %v3025_v43 = vmax.f32 %v6853_v63, %v2897_v2  ;;  %v3091_v59 = vmax.f32 %v2963_v46, %v3027_v16  ;;  %v2379_v5 = vmul.f32 %v5838_v9, %v1975_v49  ;;  %v4160_v2 = vpop.f32.mrb[88].mxu0 }
 0x1ac   :  { %v2964_v4 = vmax.f32 %v6855_v32, %v2772_v11  ;;  %v3760_v62 = vpack.c.bf16 %v3086_v37, %v3085_v24  ;;  %v2514_v36 = vadd.f32 %v5849_v28, %v2251_v6  ;;  %v2256_v7 = vmul.f32 %v5838_v9, %v4156_v13  ;;  %v4288_v13 = vpop.f32.mrb[88].mxu1  ;;  %v1492_v35 = vpop.f32.mrb[89].mxu0  ;;  %v6860_v32 = vld [vmem:[#allocation20_spill] sm:$0xff] }
 0x1ad   :  { %v3089_v53 = vmax.f32 %v2961_v60, %v3025_v43  ;;  %v2900_v21 = vmax.f32 %v2644_v34, 0.0  ;;  %v2642_v54 = vadd.f32 %v5849_v28, %v2379_v5  ;;  %v2384_v27 = vmul.f32 %v5838_v9, %v4284_v57  ;;  %v2004_v39 = vpop.f32.mrb[89].mxu1  ;;  %v4161_v37 = vpop.f32.mrb[90].mxu0 }
 0x1ae   :  { %v2254_v31 = vmul.f32 %v5838_v9, %v1476_v30  ;;  %3892 = vst [vmem:[%s6626_s4 + $0x30] sm:$0xff] %v3760_v62   ;;  %v2770_v44 = vmax.f32 %v2514_v36, 0.0  ;;  %v2519_v49 = vadd.f32 %v5849_v28, %v2256_v7  ;;  %v2382_v24 = vmul.f32 %v5838_v9, %v1988_v1  ;;  %v4289_v56 = vpop.f32.mrb[90].mxu1  ;;  %v1495_v6 = vpop.f32.mrb[91].mxu0 }
 0x1af   :  { %v2257_v52 = vmul.f32 %v5838_v9, %v4157_v29  ;;  %v6856_v38 = vmax.f32 %v5285_v20, 0.0  ;;  %v2898_v46 = vmax.f32 %v2642_v54, 0.0  ;;  %v2647_v57 = vadd.f32 %v5849_v28, %v2384_v27  ;;  %v6858_v20 = vld [vmem:[#allocation19_spill] sm:$0xff]  ;;  %v6011_v55 = vpop.f32.mrb[91].mxu1  ;;  %v6862_v54 = vld [vmem:[#allocation21_spill] sm:$0xff] }
 0x1b0   :  { %v2517_v30 = vadd.f32 %v5849_v28, %v2254_v31  ;;  %v6857_v16 = vmax.f32 %v5288_v18, 0.0  ;;  %v2775_v50 = vmax.f32 %v2519_v49, 0.0  ;;  %v2645_v1 = vadd.f32 %v5849_v28, %v2382_v24  ;;  %v6864_v31 = vld [vmem:[#allocation22_spill] sm:$0xff]  ;;  %v6866_v24 = vld [vmem:[#allocation23_spill] sm:$0xff] }
 0x1b1   :  { %v3028_v48 = vmax.f32 %v6856_v38, %v2900_v21  ;;  %v2520_v29 = vadd.f32 %v5849_v28, %v2257_v52  ;;  %v6859_v60 = vmax.f32 %v6858_v20, 0.0  ;;  %v2903_v63 = vmax.f32 %v2647_v57, 0.0 }
 0x1b2   :  { %v2962_v11 = vmax.f32 %v6857_v16, %v2770_v44  ;;  %v2773_v43 = vmax.f32 %v2517_v30, 0.0  ;;  %v6861_v34 = vmax.f32 %v6860_v32, 0.0  ;;  %v2901_v5 = vmax.f32 %v2645_v1, 0.0  ;;  %v6870_v32 = vld [vmem:[#allocation25_spill] sm:$0xff] }
 0x1b3   :  { %v3092_v0 = vmax.f32 %v2964_v4, %v3028_v48  ;;  %v3026_v61 = vmax.f32 %v6859_v60, %v2898_v46  ;;  %v2776_v62 = vmax.f32 %v2520_v29, 0.0  ;;  %v2385_v36 = vmul.f32 %v5838_v9, %v4285_v3  ;;  %v6868_v48 = vld [vmem:[#allocation24_spill] sm:$0xff]  ;;  %v4164_v60 = vpop.f32.mrb[92].mxu0 }
 0x1b4   :  { %v2967_v18 = vmax.f32 %v6861_v34, %v2775_v50  ;;  %v6863_v27 = vmax.f32 %v6862_v54, 0.0  ;;  %v6865_v44 = vmax.f32 %v6864_v31, 0.0  ;;  %v6867_v52 = vmax.f32 %v6866_v24, 0.0 }
 0x1b5   :  { %v3775_v7 = vpack.c.bf16 %v3092_v0, %v3091_v59  ;;  %v3090_v21 = vmax.f32 %v2962_v11, %v3026_v61  ;;  %v6869_v46 = vmax.f32 %v6868_v48, 0.0  ;;  %v2648_v30 = vadd.f32 %v5849_v28, %v2385_v36  ;;  %v4292_v61 = vpop.f32.mrb[92].mxu1 }
 0x1b6   :  { %v3031_v4 = vmax.f32 %v6863_v27, %v2903_v63  ;;  %v2965_v49 = vmax.f32 %v6865_v44, %v2773_v43  ;;  %v3029_v38 = vmax.f32 %v6867_v52, %v2901_v5  ;;  %v2255_v16 = vmul.f32 %v5838_v9, %v1479_v41  ;;  %v1508_v63 = vpop.f32.mrb[93].mxu0  ;;  %v2020_v43 = vpop.f32.mrb[93].mxu1  ;;  %v6872_v44 = vld [vmem:[#allocation26_spill] sm:$0xff] }
 0x1b7   :  { %v2968_v57 = vmax.f32 %v6869_v46, %v2776_v62  ;;  %3895 = vst [vmem:[%s6626_s4 + $0x48] sm:$0xff] %v3775_v7   ;;  %v3770_v3 = vpack.c.bf16 %v3090_v21, %v3089_v53  ;;  %v2383_v11 = vmul.f32 %v5838_v9, %v1991_v15  ;;  %v2260_v50 = vmul.f32 %v5838_v9, %v4160_v2  ;;  %v4165_v36 = vpop.f32.mrb[94].mxu0  ;;  %v6044_v7 = vpop.f32.mrb[94].mxu1 }
 0x1b8   :  { %v3095_v59 = vmax.f32 %v2967_v18, %v3031_v4  ;;  %v3093_v1 = vmax.f32 %v2965_v49, %v3029_v38  ;;  %v2904_v29 = vmax.f32 %v2648_v30, 0.0  ;;  %v2518_v0 = vadd.f32 %v5849_v28, %v2255_v16  ;;  %v6050_v4 = vpop.f32.mrb[95].mxu1  ;;  %v6874_v38 = vld [vmem:[#allocation27_spill] sm:$0xff]  ;;  %v6876_v30 = vld [vmem:[#allocation28_spill] sm:$0xff] }
 0x1b9   :  { %v2388_v20 = vmul.f32 %v5838_v9, %v4288_v13  ;;  %3894 = vst [vmem:[%s6626_s4 + $0x40] sm:$0xff] %v3770_v3   ;;  %v2646_v41 = vadd.f32 %v5849_v28, %v2383_v11  ;;  %v2523_v53 = vadd.f32 %v5849_v28, %v2260_v50  ;;  %v2258_v15 = vmul.f32 %v5838_v9, %v1492_v35 }
 0x1ba   :  { %v2386_v2 = vmul.f32 %v5838_v9, %v2004_v39  ;;  %v6871_v34 = vmax.f32 %v6870_v32, 0.0  ;;  %v2774_v13 = vmax.f32 %v2518_v0, 0.0  ;;  %v2261_v62 = vmul.f32 %v5838_v9, %v4161_v37  ;;  %v6048_v39 = vpop.f32.mrb[95].mxu0 }
 0x1bb   :  { %v2651_v5 = vadd.f32 %v5849_v28, %v2388_v20  ;;  %v2902_v21 = vmax.f32 %v2646_v41, 0.0  ;;  %v2779_v54 = vmax.f32 %v2523_v53, 0.0  ;;  %v2521_v27 = vadd.f32 %v5849_v28, %v2258_v15 }
 0x1bc   :  { %v3032_v18 = vmax.f32 %v6871_v34, %v2904_v29  ;;  %v2649_v35 = vadd.f32 %v5849_v28, %v2386_v2  ;;  %v6873_v49 = vmax.f32 %v6872_v44, 0.0  ;;  %v2524_v37 = vadd.f32 %v5849_v28, %v2261_v62  ;;  %v4296_v62 = vpop.f32.mrb[96].mxu1 }
 0x1bd   :  { %v2907_v52 = vmax.f32 %v2651_v5, 0.0  ;;  %v6875_v48 = vmax.f32 %v6874_v38, 0.0  ;;  %v6877_v16 = vmax.f32 %v6876_v30, 0.0  ;;  %v2777_v11 = vmax.f32 %v2521_v27, 0.0 }
 0x1be   :  { %v3096_v31 = vmax.f32 %v2968_v57, %v3032_v18  ;;  %v2966_v24 = vmax.f32 %v6873_v49, %v2774_v13  ;;  %v2905_v50 = vmax.f32 %v2649_v35, 0.0  ;;  %v6878_v0 = vmax.f32 %v5380_v12, 0.0  ;;  %v2036_v35 = vpop.f32.mrb[97].mxu1 }
 0x1bf   :  { %v3030_v46 = vmax.f32 %v6875_v48, %v2902_v21  ;;  %v2971_v3 = vmax.f32 %v6877_v16, %v2779_v54  ;;  %v2780_v41 = vmax.f32 %v2524_v37, 0.0  ;;  %v2389_v57 = vmul.f32 %v5838_v9, %v4289_v56 }
 0x1c0   :  { %v3785_v29 = vpack.c.bf16 %v3096_v31, %v3095_v59  ;;  %v3035_v20 = vmax.f32 %v6878_v0, %v2907_v52  ;;  %v6879_v15 = vmax.f32 %v5383_v22, 0.0  ;;  %v6880_v32 = vmax.f32 %v5394_v8, 0.0  ;;  %v4168_v22 = vpop.f32.mrb[96].mxu0  ;;  %v6080_v52 = vpop.f32.mrb[98].mxu1 }
 0x1c1   :  { %v3094_v53 = vmax.f32 %v2966_v24, %v3030_v46  ;;  %v2259_v18 = vmul.f32 %v5838_v9, %v1495_v6  ;;  %v6881_v12 = vmax.f32 %v5397_v51, 0.0  ;;  %v2652_v5 = vadd.f32 %v5849_v28, %v2389_v57  ;;  %v1524_v27 = vpop.f32.mrb[97].mxu0  ;;  %v6090_v48 = vpop.f32.mrb[99].mxu1 }
 0x1c2   :  { %v2969_v2 = vmax.f32 %v6879_v15, %v2777_v11  ;;  %v3033_v34 = vmax.f32 %v6880_v32, %v2905_v50  ;;  %3897 = vst [vmem:[%s6626_s4 + $0x58] sm:$0xff] %v3785_v29   ;;  %v3099_v59 = vmax.f32 %v2971_v3, %v3035_v20  ;;  %v2387_v56 = vmul.f32 %v5838_v9, %v6011_v55  ;;  %v4169_v24 = vpop.f32.mrb[98].mxu0  ;;  %v6884_v11 = vld [vmem:[#allocation30_spill] sm:$0xff]  ;;  %v6888_v32 = vld [vmem:[#allocation32_spill] sm:$0xff] }
 0x1c3   :  { %v2972_v13 = vmax.f32 %v6881_v12, %v2780_v41  ;;  %v3780_v21 = vpack.c.bf16 %v3094_v53, %v3093_v1  ;;  %v2522_v54 = vadd.f32 %v5849_v28, %v2259_v18  ;;  %v2264_v6 = vmul.f32 %v5838_v9, %v4164_v60  ;;  %v6088_v38 = vpop.f32.mrb[99].mxu0  ;;  %v6886_v41 = vld [vmem:[#allocation31_spill] sm:$0xff] }
 0x1c4   :  { %v3097_v8 = vmax.f32 %v2969_v2, %v3033_v34  ;;  %v2908_v31 = vmax.f32 %v2652_v5, 0.0  ;;  %v2650_v44 = vadd.f32 %v5849_v28, %v2387_v56  ;;  %v2392_v51 = vmul.f32 %v5838_v9, %v4292_v61  ;;  %v6882_v61 = vld [vmem:[#allocation29_spill] sm:$0xff] }
 0x1c5   :  { %v2262_v49 = vmul.f32 %v5838_v9, %v1508_v63  ;;  %3896 = vst [vmem:[%s6626_s4 + $0x50] sm:$0xff] %v3780_v21   ;;  %v2778_v55 = vmax.f32 %v2522_v54, 0.0  ;;  %v2527_v1 = vadd.f32 %v5849_v28, %v2264_v6  ;;  %v2390_v60 = vmul.f32 %v5838_v9, %v2020_v43  ;;  %v6890_v6 = vld [vmem:[#allocation33_spill] sm:$0xff] }
 0x1c6   :  { %v2265_v37 = vmul.f32 %v5838_v9, %v4165_v36  ;;  %v6883_v63 = vmax.f32 %v6882_v61, 0.0  ;;  %v2906_v30 = vmax.f32 %v2650_v44, 0.0  ;;  %v2655_v16 = vadd.f32 %v5849_v28, %v2392_v51  ;;  %v6892_v51 = vld [vmem:[#allocation34_spill] sm:$0xff] }
 0x1c7   :  { %v2525_v3 = vadd.f32 %v5849_v28, %v2262_v49  ;;  %v6885_v50 = vmax.f32 %v6884_v11, 0.0  ;;  %v2783_v0 = vmax.f32 %v2527_v1, 0.0  ;;  %v2653_v43 = vadd.f32 %v5849_v28, %v2390_v60  ;;  %v6114_v1 = vpop.f32.mrb[100].mxu1  ;;  %v6894_v60 = vld [vmem:[#allocation35_spill] sm:$0xff] }
 0x1c8   :  { %v3036_v46 = vmax.f32 %v6883_v63, %v2908_v31  ;;  %v2528_v36 = vadd.f32 %v5849_v28, %v2265_v37  ;;  %v6887_v57 = vmax.f32 %v6886_v41, 0.0  ;;  %v2911_v15 = vmax.f32 %v2655_v16, 0.0  ;;  %v6125_v16 = vpop.f32.mrb[101].mxu1 }
 0x1c9   :  { %v2970_v29 = vmax.f32 %v6885_v50, %v2778_v55  ;;  %v2781_v2 = vmax.f32 %v2525_v3, 0.0  ;;  %v6889_v34 = vmax.f32 %v6888_v32, 0.0  ;;  %v2909_v12 = vmax.f32 %v2653_v43, 0.0  ;;  %v6112_v55 = vpop.f32.mrb[100].mxu0 }
 0x1ca   :  { %v3100_v20 = vmax.f32 %v2972_v13, %v3036_v46  ;;  %v3034_v53 = vmax.f32 %v6887_v57, %v2906_v30  ;;  %v2784_v5 = vmax.f32 %v2528_v36, 0.0  ;;  %v2393_v56 = vmul.f32 %v5838_v9, %v6044_v7  ;;  %v6123_v30 = vpop.f32.mrb[101].mxu0 }
 0x1cb   :  { %v2975_v18 = vmax.f32 %v6889_v34, %v2783_v0  ;;  %v6891_v31 = vmax.f32 %v6890_v6, 0.0  ;;  %v6893_v13 = vmax.f32 %v6892_v51, 0.0  ;;  %v6895_v37 = vmax.f32 %v6894_v60, 0.0  ;;  %v6133_v0 = vpop.f32.mrb[102].mxu1  ;;  %v6899_v6 = vld [vmem:[#allocation37_spill] sm:$0xff]  ;;  %v6901_v51 = vld [vmem:[#allocation38_spill] sm:$0xff] }
 0x1cc   :  { %v3795_v21 = vpack.c.bf16 %v3100_v20, %v3099_v59  ;;  %v3098_v54 = vmax.f32 %v2970_v29, %v3034_v53  ;;  %v6896_v63 = vmax.f32 %v5448_v47, 0.0  ;;  %v2656_v7 = vadd.f32 %v5849_v28, %v2393_v56  ;;  %v4173_v29 = vpop.f32.mrb[102].mxu0  ;;  %v6140_v57 = vpop.f32.mrb[103].mxu1  ;;  %v6903_v60 = vld [vmem:[#allocation39_spill] sm:$0xff] }
 0x1cd   :  { %v3039_v44 = vmax.f32 %v6891_v31, %v2911_v15  ;;  %v6110_v49 = vmax.f32 %v6893_v13, %v2781_v2  ;;  %v3037_v61 = vmax.f32 %v6895_v37, %v2909_v12  ;;  %v2263_v59 = vmul.f32 %v5838_v9, %v6048_v39  ;;  %v6138_v41 = vpop.f32.mrb[103].mxu0  ;;  %v6897_v15 = vld [vmem:[#allocation36_spill] sm:$0xff] }
 0x1ce   :  { %v2976_v46 = vmax.f32 %v6896_v63, %v2784_v5  ;;  %3899 = vst [vmem:[%s6626_s4 + $0x68] sm:$0xff] %v3795_v21   ;;  %v3790_v3 = vpack.c.bf16 %v3098_v54, %v3097_v8  ;;  %v2391_v50 = vmul.f32 %v5838_v9, %v6050_v4  ;;  %v2268_v47 = vmul.f32 %v5838_v9, %v4168_v22 }
 0x1cf   :  { %v3103_v11 = vmax.f32 %v2975_v18, %v3039_v44  ;;  %v3101_v39 = vmax.f32 %v6110_v49, %v3037_v61  ;;  %v2912_v43 = vmax.f32 %v2656_v7, 0.0  ;;  %v2526_v36 = vadd.f32 %v5849_v28, %v2263_v59  ;;  %v6162_v7 = vpop.f32.mrb[104].mxu0  ;;  %v6164_v59 = vpop.f32.mrb[104].mxu1 }
 0x1d0   :  { %v2396_v20 = vmul.f32 %v5838_v9, %v4296_v62  ;;  %3898 = vst [vmem:[%s6626_s4 + $0x60] sm:$0xff] %v3790_v3   ;;  %v2654_v4 = vadd.f32 %v5849_v28, %v2391_v50  ;;  %v2531_v22 = vadd.f32 %v5849_v28, %v2268_v47  ;;  %v2266_v8 = vmul.f32 %v5838_v9, %v1524_v27 }
 0x1d1   :  { %v2394_v53 = vmul.f32 %v5838_v9, %v2036_v35  ;;  %v6898_v2 = vmax.f32 %v6897_v15, 0.0  ;;  %v2782_v62 = vmax.f32 %v2526_v36, 0.0  ;;  %v2269_v18 = vmul.f32 %v5838_v9, %v4169_v24 }
 0x1d2   :  { %v2659_v34 = vadd.f32 %v5849_v28, %v2396_v20  ;;  %v2910_v12 = vmax.f32 %v2654_v4, 0.0  ;;  %v2787_v5 = vmax.f32 %v2531_v22, 0.0  ;;  %v2529_v56 = vadd.f32 %v5849_v28, %v2266_v8  ;;  %v6170_v20 = vpop.f32.mrb[105].mxu0  ;;  %v6172_v4 = vpop.f32.mrb[105].mxu1  ;;  %v6907_v8 = vld [vmem:[#allocation41_spill] sm:$0xff] }
 0x1d3   :  { %v3040_v32 = vmax.f32 %v6898_v2, %v2912_v43  ;;  %v2657_v21 = vadd.f32 %v5849_v28, %v2394_v53  ;;  %v6900_v31 = vmax.f32 %v6899_v6, 0.0  ;;  %v2532_v35 = vadd.f32 %v5849_v28, %v2269_v18  ;;  %v6909_v2 = vld [vmem:[#allocation42_spill] sm:$0xff]  ;;  %v6182_v18 = vpop.f32.mrb[106].mxu1 }
 0x1d4   :  { %v2915_v44 = vmax.f32 %v2659_v34, 0.0  ;;  %v6902_v13 = vmax.f32 %v6901_v51, 0.0  ;;  %v6904_v37 = vmax.f32 %v6903_v60, 0.0  ;;  %v2785_v24 = vmax.f32 %v2529_v56, 0.0  ;;  %v6180_v34 = vpop.f32.mrb[106].mxu0 }
 0x1d5   :  { %v3104_v54 = vmax.f32 %v2976_v46, %v3040_v32  ;;  %v2974_v27 = vmax.f32 %v6900_v31, %v2782_v62  ;;  %v2913_v63 = vmax.f32 %v2657_v21, 0.0  ;;  %v6905_v46 = vld [vmem:[#allocation40_spill] sm:$0xff]  ;;  %v2788_v43 = vmax.f32 %v2532_v35, 0.0 }
 0x1d6   :  { %v3038_v49 = vmax.f32 %v6902_v13, %v2910_v12  ;;  %v2979_v61 = vmax.f32 %v6904_v37, %v2787_v5  ;;  %v6906_v50 = vmax.f32 %v6905_v46, 0.0  ;;  %v2397_v36 = vmul.f32 %v5838_v9, %v6080_v52 }
 0x1d7   :  { %v3805_v3 = vpack.c.bf16 %v3104_v54, %v3103_v11  ;;  %v6908_v53 = vmax.f32 %v6907_v8, 0.0  ;;  %v6910_v32 = vmax.f32 %v6909_v2, 0.0  ;;  %v2267_v11 = vmul.f32 %v5838_v9, %v6088_v38  ;;  %v6192_v54 = vpop.f32.mrb[107].mxu0  ;;  %v6194_v38 = vpop.f32.mrb[107].mxu1 }
 0x1d8   :  { %v3043_v47 = vmax.f32 %v6906_v50, %v2915_v44  ;;  %v3102_v22 = vmax.f32 %v2974_v27, %v3038_v49  ;;  %v6911_v12 = vmax.f32 %v5505_v26, 0.0  ;;  %v2660_v56 = vadd.f32 %v5849_v28, %v2397_v36 }
 0x1d9   :  { %v2977_v15 = vmax.f32 %v6908_v53, %v2785_v24  ;;  %v3041_v62 = vmax.f32 %v6910_v32, %v2913_v63  ;;  %3901 = vst [vmem:[%s6626_s4 + $0x78] sm:$0xff] %v3805_v3   ;;  %v2395_v21 = vmul.f32 %v5838_v9, %v6090_v48  ;;  %v2530_v27 = vadd.f32 %v5849_v28, %v2267_v11  ;;  %v6913_v24 = vld [vmem:[#allocation43_spill] sm:$0xff]  ;;  %v6917_v32 = vld [vmem:[#allocation45_spill] sm:$0xff] }
 0x1da   :  { %v3107_v52 = vmax.f32 %v2979_v61, %v3043_v47  ;;  %v2980_v5 = vmax.f32 %v6911_v12, %v2788_v43  ;;  %v3800_v6 = vpack.c.bf16 %v3102_v22, %v3101_v39  ;;  %v2272_v44 = vmul.f32 %v5838_v9, %v6112_v55  ;;  %v6219_v43 = vpop.f32.mrb[108].mxu0 }
 0x1db   :  { %v3105_v31 = vmax.f32 %v2977_v15, %v3041_v62  ;;  %v2916_v35 = vmax.f32 %v2660_v56, 0.0  ;;  %v2658_v26 = vadd.f32 %v5849_v28, %v2395_v21  ;;  %v2400_v51 = vmul.f32 %v5838_v9, %v6114_v1  ;;  %v6225_v15 = vpop.f32.mrb[109].mxu0 }
 0x1dc   :  { %v2270_v48 = vmul.f32 %v5838_v9, %v6123_v30  ;;  %3900 = vst [vmem:[%s6626_s4 + $0x70] sm:$0xff] %v3800_v6   ;;  %v2786_v39 = vmax.f32 %v2530_v27, 0.0  ;;  %v2535_v13 = vadd.f32 %v5849_v28, %v2272_v44  ;;  %v2398_v49 = vmul.f32 %v5838_v9, %v6125_v16  ;;  %v6221_v16 = vpop.f32.mrb[108].mxu1  ;;  %v6233_v6 = vpop.f32.mrb[110].mxu0 }
 0x1dd   :  { %v2273_v55 = vmul.f32 %v5838_v9, %v4173_v29  ;;  %v6912_v60 = vmax.f32 %v5513_v14, 0.0  ;;  %v2914_v61 = vmax.f32 %v2658_v26, 0.0  ;;  %v2663_v1 = vadd.f32 %v5849_v28, %v2400_v51  ;;  %v6915_v14 = vld [vmem:[#allocation44_spill] sm:$0xff]  ;;  %v6227_v2 = vpop.f32.mrb[109].mxu1 }
 0x1de   :  { %v2533_v30 = vadd.f32 %v5849_v28, %v2270_v48  ;;  %v6914_v63 = vmax.f32 %v6913_v24, 0.0  ;;  %v2791_v46 = vmax.f32 %v2535_v13, 0.0  ;;  %v2661_v50 = vadd.f32 %v5849_v28, %v2398_v49  ;;  %v6921_v48 = vld [vmem:[#allocation47_spill] sm:$0xff]  ;;  %v6241_v49 = vpop.f32.mrb[111].mxu0 }
 0x1df   :  { %v3044_v37 = vmax.f32 %v6912_v60, %v2916_v35  ;;  %v2536_v47 = vadd.f32 %v5849_v28, %v2273_v55  ;;  %v6916_v36 = vmax.f32 %v6915_v14, 0.0  ;;  %v2919_v8 = vmax.f32 %v2663_v1, 0.0  ;;  %v6919_v35 = vld [vmem:[#allocation46_spill] sm:$0xff]  ;;  %v6923_v60 = vld [vmem:[#allocation48_spill] sm:$0xff] }
 0x1e0   :  { %v2978_v3 = vmax.f32 %v6914_v63, %v2786_v39  ;;  %v2789_v53 = vmax.f32 %v2533_v30, 0.0  ;;  %v6918_v62 = vmax.f32 %v6917_v32, 0.0  ;;  %v2917_v12 = vmax.f32 %v2661_v50, 0.0 }
 0x1e1   :  { %v3108_v29 = vmax.f32 %v2980_v5, %v3044_v37  ;;  %v3042_v22 = vmax.f32 %v6916_v36, %v2914_v61  ;;  %v2792_v56 = vmax.f32 %v2536_v47, 0.0  ;;  %v2401_v21 = vmul.f32 %v5838_v9, %v6133_v0  ;;  %v6235_v5 = vpop.f32.mrb[110].mxu1  ;;  %v6925_v0 = vld [vmem:[#allocation49_spill] sm:$0xff] }
 0x1e2   :  { %v2983_v11 = vmax.f32 %v6918_v62, %v2791_v46  ;;  %v6920_v26 = vmax.f32 %v6919_v35, 0.0  ;;  %v6922_v39 = vmax.f32 %v6921_v48, 0.0  ;;  %v6243_v55 = vpop.f32.mrb[111].mxu1  ;;  %v6924_v37 = vmax.f32 %v6923_v60, 0.0 }
 0x1e3   :  { %v3815_v27 = vpack.c.bf16 %v3108_v29, %v3107_v52  ;;  %v3106_v44 = vmax.f32 %v2978_v3, %v3042_v22  ;;  %v6926_v1 = vmax.f32 %v6925_v0, 0.0  ;;  %v2664_v24 = vadd.f32 %v5849_v28, %v2401_v21  ;;  %v6927_v22 = vld [vmem:[#allocation50_spill] sm:$0xff] }
 0x1e4   :  { %v3047_v51 = vmax.f32 %v6920_v26, %v2919_v8  ;;  %v2981_v13 = vmax.f32 %v6922_v39, %v2789_v53  ;;  %v3045_v61 = vmax.f32 %v6924_v37, %v2917_v12  ;;  %v2271_v52 = vmul.f32 %v5838_v9, %v6138_v41  ;;  %v6278_v12 = vpop.f32.mrb[112].mxu1  ;;  %v6929_v26 = vld [vmem:[#allocation51_spill] sm:$0xff]  ;;  %v6931_v37 = vld [vmem:[#allocation52_spill] sm:$0xff] }
 0x1e5   :  { %v2984_v30 = vmax.f32 %v6926_v1, %v2792_v56  ;;  %3903 = vst [vmem:[%s6626_s4 + $0x88] sm:$0xff] %v3815_v27   ;;  %v3810_v63 = vpack.c.bf16 %v3106_v44, %v3105_v31  ;;  %v2399_v46 = vmul.f32 %v5838_v9, %v6140_v57  ;;  %v2276_v50 = vmul.f32 %v5838_v9, %v6162_v7  ;;  %v6284_v44 = vpop.f32.mrb[113].mxu1 }
 0x1e6   :  { %v3111_v3 = vmax.f32 %v2983_v11, %v3047_v51  ;;  %v3109_v47 = vmax.f32 %v2981_v13, %v3045_v61  ;;  %v2920_v29 = vmax.f32 %v2664_v24, 0.0  ;;  %v2534_v14 = vadd.f32 %v5849_v28, %v2271_v52  ;;  %v6276_v11 = vpop.f32.mrb[112].mxu0  ;;  %v6291_v60 = vpop.f32.mrb[114].mxu1 }
 0x1e7   :  { %v2404_v36 = vmul.f32 %v5838_v9, %v6164_v59  ;;  %3902 = vst [vmem:[%s6626_s4 + $0x80] sm:$0xff] %v3810_v63   ;;  %v2662_v41 = vadd.f32 %v5849_v28, %v2399_v46  ;;  %v2539_v31 = vadd.f32 %v5849_v28, %v2276_v50  ;;  %v2274_v57 = vmul.f32 %v5838_v9, %v6170_v20 }
 0x1e8   :  { %v2402_v7 = vmul.f32 %v5838_v9, %v6172_v4  ;;  %v6928_v8 = vmax.f32 %v6927_v22, 0.0  ;;  %v2790_v32 = vmax.f32 %v2534_v14, 0.0  ;;  %v2277_v62 = vmul.f32 %v5838_v9, %v6180_v34  ;;  %v6282_v4 = vpop.f32.mrb[113].mxu0 }
 0x1e9   :  { %v2667_v59 = vadd.f32 %v5849_v28, %v2404_v36  ;;  %v2918_v56 = vmax.f32 %v2662_v41, 0.0  ;;  %v2795_v21 = vmax.f32 %v2539_v31, 0.0  ;;  %v2537_v20 = vadd.f32 %v5849_v28, %v2274_v57  ;;  %v6289_v13 = vpop.f32.mrb[114].mxu0 }
 0x1ea   :  { %v3048_v53 = vmax.f32 %v6928_v8, %v2920_v29  ;;  %v2665_v27 = vadd.f32 %v5849_v28, %v2402_v7  ;;  %v6930_v51 = vmax.f32 %v6929_v26, 0.0  ;;  %v2540_v34 = vadd.f32 %v5849_v28, %v2277_v62  ;;  %v6297_v46 = vpop.f32.mrb[115].mxu0 }
 0x1eb   :  { %v2923_v39 = vmax.f32 %v2667_v59, 0.0  ;;  %v6932_v61 = vmax.f32 %v6931_v37, 0.0  ;;  %v6933_v1 = vmax.f32 %v5579_v25, 0.0  ;;  %v2793_v52 = vmax.f32 %v2537_v20, 0.0  ;;  %v6936_v25 = vld [vmem:[#allocation53_spill] sm:$0xff] }
 0x1ec   :  { %v3112_v35 = vmax.f32 %v2984_v30, %v3048_v53  ;;  %v2982_v48 = vmax.f32 %v6930_v51, %v2790_v32  ;;  %v2921_v63 = vmax.f32 %v2665_v27, 0.0  ;;  %v6299_v30 = vpop.f32.mrb[115].mxu1  ;;  %v6934_v29 = vmax.f32 %v5582_v10, 0.0  ;;  %v6327_v51 = vpop.f32.mrb[116].mxu0 }
 0x1ed   :  { %v3046_v0 = vmax.f32 %v6932_v61, %v2918_v56  ;;  %v2987_v24 = vmax.f32 %v6933_v1, %v2795_v21  ;;  %v2796_v36 = vmax.f32 %v2540_v34, 0.0  ;;  %v2405_v41 = vmul.f32 %v5838_v9, %v6182_v18  ;;  %v6940_v34 = vld [vmem:[#allocation55_spill] sm:$0xff] }
 0x1ee   :  { %v3825_v50 = vpack.c.bf16 %v3112_v35, %v3111_v3  ;;  %v3051_v14 = vmax.f32 %v6934_v29, %v2923_v39  ;;  %v6935_v57 = vmax.f32 %v5585_v45, 0.0  ;;  %v6937_v22 = vmax.f32 %v6936_v25, 0.0  ;;  %v6938_v3 = vld [vmem:[#allocation54_spill] sm:$0xff]  ;;  %v6339_v39 = vpop.f32.mrb[117].mxu0 }
 0x1ef   :  { %v3110_v31 = vmax.f32 %v2982_v48, %v3046_v0  ;;  %v2275_v53 = vmul.f32 %v5838_v9, %v6192_v54  ;;  %v6939_v32 = vmax.f32 %v6938_v3, 0.0  ;;  %v2668_v18 = vadd.f32 %v5849_v28, %v2405_v41  ;;  %v6329_v48 = vpop.f32.mrb[116].mxu1 }
 0x1f0   :  { %v2985_v7 = vmax.f32 %v6935_v57, %v2793_v52  ;;  %v3049_v8 = vmax.f32 %v6937_v22, %v2921_v63  ;;  %3905 = vst [vmem:[%s6626_s4 + $0x98] sm:$0xff] %v3825_v50   ;;  %v3115_v10 = vmax.f32 %v2987_v24, %v3051_v14  ;;  %v2403_v45 = vmul.f32 %v5838_v9, %v6194_v38  ;;  %v6347_v52 = vpop.f32.mrb[118].mxu0  ;;  %v6944_v57 = vld [vmem:[#allocation57_spill] sm:$0xff] }
 0x1f1   :  { %v2988_v59 = vmax.f32 %v6939_v32, %v2796_v36  ;;  %v3820_v62 = vpack.c.bf16 %v3110_v31, %v3109_v47  ;;  %v2538_v21 = vadd.f32 %v5849_v28, %v2275_v53  ;;  %v2280_v54 = vmul.f32 %v5838_v9, %v6219_v43  ;;  %v6355_v36 = vpop.f32.mrb[119].mxu0  ;;  %v6946_v53 = vld [vmem:[#allocation58_spill] sm:$0xff] }
 0x1f2   :  { %v3113_v56 = vmax.f32 %v2985_v7, %v3049_v8  ;;  %v2924_v20 = vmax.f32 %v2668_v18, 0.0  ;;  %v2666_v27 = vadd.f32 %v5849_v28, %v2403_v45  ;;  %v2408_v35 = vmul.f32 %v5838_v9, %v6221_v16 }
 0x1f3   :  { %v2278_v26 = vmul.f32 %v5838_v9, %v6225_v15  ;;  %3904 = vst [vmem:[%s6626_s4 + $0x90] sm:$0xff] %v3820_v62   ;;  %v2794_v38 = vmax.f32 %v2538_v21, 0.0  ;;  %v2543_v43 = vadd.f32 %v5849_v28, %v2280_v54  ;;  %v2406_v47 = vmul.f32 %v5838_v9, %v6227_v2  ;;  %v6341_v15 = vpop.f32.mrb[117].mxu1  ;;  %v6942_v2 = vld [vmem:[#allocation56_spill] sm:$0xff]  ;;  %v6366_v62 = vld [vmem:[%s6624_s2] ss:$0 sm:$0xff] }
 0x1f4   :  { %v2281_v16 = vmul.f32 %v5838_v9, %v6233_v6  ;;  %v6941_v37 = vmax.f32 %v6940_v34, 0.0  ;;  %v2922_v0 = vmax.f32 %v2666_v27, 0.0  ;;  %v2671_v1 = vadd.f32 %v5849_v28, %v2408_v35  ;;  %v6349_v63 = vpop.f32.mrb[118].mxu1  ;;  %v6948_v54 = vld [vmem:[#allocation59_spill] sm:$0xff] }
 0x1f5   :  { %v2541_v24 = vadd.f32 %v5849_v28, %v2278_v26  ;;  %v6943_v50 = vmax.f32 %v6942_v2, 0.0  ;;  %v2799_v9 = vmax.f32 %v2543_v43, 0.0  ;;  %v2669_v6 = vadd.f32 %v5849_v28, %v2406_v47  ;;  %v6357_v41 = vpop.f32.mrb[119].mxu1 }
 0x1f6   :  { %v3052_v61 = vmax.f32 %v6941_v37, %v2924_v20  ;;  %v2544_v14 = vadd.f32 %v5849_v28, %v2281_v16  ;;  %v6945_v7 = vmax.f32 %v6944_v57, 0.0  ;;  %v2927_v22 = vmax.f32 %v2671_v1, 0.0  ;;  %v6381_v37 = vld [vmem:[%s6625_s3] ss:$0 sm:$0xff]  ;;  %v6393_v1 = vpop.f32.mrb[120].mxu0  ;;  %v6954_v57 = vld [vmem:[#allocation61_spill] sm:$0xff] }
 0x1f7   :  { %v2986_v29 = vmax.f32 %v6943_v50, %v2794_v38  ;;  %v2797_v8 = vmax.f32 %v2541_v24, 0.0  ;;  %v6947_v3 = vmax.f32 %v6946_v53, 0.0  ;;  %v2925_v18 = vmax.f32 %v2669_v6, 0.0  ;;  %v6951_v38 = vld [vmem:[#allocation60_spill] sm:$0xff]  ;;  %v6395_v24 = vpop.f32.mrb[120].mxu1 }
 0x1f8   :  { %v3116_v31 = vmax.f32 %v2988_v59, %v3052_v61  ;;  %v3050_v25 = vmax.f32 %v6945_v7, %v2922_v0  ;;  %v2800_v45 = vmax.f32 %v2544_v14, 0.0  ;;  %v2409_v28 = vmul.f32 %v6366_v62, %v6235_v5 }
 0x1f9   :  { %v2991_v32 = vmax.f32 %v6947_v3, %v2799_v9  ;;  %v6949_v20 = vmax.f32 %v6948_v54, 0.0  ;;  %v6950_v35 = vmax.f32 %v5622_v40, 0.0  ;;  %v6952_v43 = vmax.f32 %v6951_v38, 0.0  ;;  %v6400_v9 = vpop.f32.mrb[121].mxu0  ;;  %v6960_v38 = vld [vmem:[#allocation64_spill] sm:$0xff] }
 0x1fa   :  { %v3835_v21 = vpack.c.bf16 %v3116_v31, %v3115_v10  ;;  %v3114_v59 = vmax.f32 %v2986_v29, %v3050_v25  ;;  %v6953_v16 = vmax.f32 %v5632_v42, 0.0  ;;  %v2672_v5 = vadd.f32 %v6381_v37, %v2409_v28  ;;  %v6413_v31 = vpop.f32.mrb[122].mxu0 }
 0x1fb   :  { %v3055_v27 = vmax.f32 %v6949_v20, %v2927_v22  ;;  %v2989_v26 = vmax.f32 %v6950_v35, %v2797_v8  ;;  %v3053_v47 = vmax.f32 %v6952_v43, %v2925_v18  ;;  %v2279_v10 = vmul.f32 %v6366_v62, %v6241_v49  ;;  %v6422_v3 = vpop.f32.mrb[123].mxu0  ;;  %v6958_v35 = vld [vmem:[#allocation63_spill] sm:$0xff] }
 0x1fc   :  { %v2992_v34 = vmax.f32 %v6953_v16, %v2800_v45  ;;  %3907 = vst [vmem:[%s6626_s4 + $0xa8] sm:$0xff] %v3835_v21   ;;  %v3830_v40 = vpack.c.bf16 %v3114_v59, %v3113_v56  ;;  %v2407_v42 = vmul.f32 %v6366_v62, %v6243_v55  ;;  %v2284_v0 = vmul.f32 %v6366_v62, %v6276_v11  ;;  %v6402_v56 = vpop.f32.mrb[121].mxu1  ;;  %v6956_v21 = vld [vmem:[#allocation62_spill] sm:$0xff] }
 0x1fd   :  { %v3119_v61 = vmax.f32 %v2991_v32, %v3055_v27  ;;  %v3117_v2 = vmax.f32 %v2989_v26, %v3053_v47  ;;  %v2928_v50 = vmax.f32 %v2672_v5, 0.0  ;;  %v2542_v49 = vadd.f32 %v6381_v37, %v2279_v10 }
 0x1fe   :  { %v2412_v29 = vmul.f32 %v6366_v62, %v6278_v12  ;;  %3906 = vst [vmem:[%s6626_s4 + $0xa0] sm:$0xff] %v3830_v40   ;;  %v2670_v55 = vadd.f32 %v6381_v37, %v2407_v42  ;;  %v2547_v11 = vadd.f32 %v6381_v37, %v2284_v0  ;;  %v2282_v6 = vmul.f32 %v6366_v62, %v6282_v4  ;;  %v6415_v12 = vpop.f32.mrb[122].mxu1  ;;  %v6962_v40 = vld [vmem:[#allocation65_spill] sm:$0xff] }
 0x1ff   :  { %v2410_v14 = vmul.f32 %v6366_v62, %v6284_v44  ;;  %v6955_v7 = vmax.f32 %v6954_v57, 0.0  ;;  %v2798_v22 = vmax.f32 %v2542_v49, 0.0  ;;  %v2285_v53 = vmul.f32 %v6366_v62, %v6289_v13  ;;  %v6424_v32 = vpop.f32.mrb[123].mxu1 }
 0x200   :  { %v2675_v8 = vadd.f32 %v6381_v37, %v2412_v29  ;;  %v2926_v4 = vmax.f32 %v2670_v55, 0.0  ;;  %v2803_v18 = vmax.f32 %v2547_v11, 0.0  ;;  %v2545_v44 = vadd.f32 %v6381_v37, %v2282_v6  ;;  %v6964_v29 = vld [vmem:[#allocation66_spill] sm:$0xff] }
 0x201   :  { %v3056_v25 = vmax.f32 %v6955_v7, %v2928_v50  ;;  %v2673_v45 = vadd.f32 %v6381_v37, %v2410_v14  ;;  %v6957_v59 = vmax.f32 %v6956_v21, 0.0  ;;  %v2548_v27 = vadd.f32 %v6381_v37, %v2285_v53  ;;  %v6445_v7 = vpop.f32.mrb[124].mxu0 }
 0x202   :  { %v2931_v20 = vmax.f32 %v2675_v8, 0.0  ;;  %v6959_v26 = vmax.f32 %v6958_v35, 0.0  ;;  %v6961_v43 = vmax.f32 %v6960_v38, 0.0  ;;  %v2801_v16 = vmax.f32 %v2545_v44, 0.0 }
 0x203   :  { %v3120_v28 = vmax.f32 %v2992_v34, %v3056_v25  ;;  %v2990_v54 = vmax.f32 %v6957_v59, %v2798_v22  ;;  %v2929_v5 = vmax.f32 %v2673_v45, 0.0  ;;  %v6963_v42 = vmax.f32 %v6962_v40, 0.0 }
 0x204   :  { %v3054_v13 = vmax.f32 %v6959_v26, %v2926_v4  ;;  %v2995_v47 = vmax.f32 %v6961_v43, %v2803_v18  ;;  %v2804_v50 = vmax.f32 %v2548_v27, 0.0  ;;  %v2413_v34 = vmul.f32 %v6366_v62, %v6291_v60  ;;  %v6967_v60 = vld [vmem:[#allocation67_spill] sm:$0xff]  ;;  %v6457_v4 = vpop.f32.mrb[125].mxu0 }
 0x205   :  { %v3845_v10 = vpack.c.bf16 %v3120_v28, %v3119_v61  ;;  %v3059_v0 = vmax.f32 %v6963_v42, %v2931_v20  ;;  %v6965_v55 = vmax.f32 %v6964_v29, 0.0  ;;  %v6966_v6 = vmax.f32 %v5670_v17, 0.0  ;;  %v6447_v61 = vpop.f32.mrb[124].mxu1  ;;  %v6464_v21 = vpop.f32.mrb[126].mxu0 }
 0x206   :  { %v3118_v49 = vmax.f32 %v2990_v54, %v3054_v13  ;;  %v2283_v57 = vmul.f32 %v6366_v62, %v6297_v46  ;;  %v6968_v22 = vmax.f32 %v6967_v60, 0.0  ;;  %v2676_v53 = vadd.f32 %v6381_v37, %v2413_v34  ;;  %v6459_v46 = vpop.f32.mrb[125].mxu1  ;;  %v6972_v34 = vld [vmem:[#allocation69_spill] sm:$0xff] }
 0x207   :  { %v2993_v11 = vmax.f32 %v6965_v55, %v2801_v16  ;;  %v3057_v14 = vmax.f32 %v6966_v6, %v2929_v5  ;;  %3909 = vst [vmem:[%s6626_s4 + $0xb8] sm:$0xff] %v3845_v10   ;;  %v3123_v25 = vmax.f32 %v2995_v47, %v3059_v0  ;;  %v2411_v17 = vmul.f32 %v6366_v62, %v6299_v30  ;;  %v6466_v59 = vpop.f32.mrb[126].mxu1  ;;  %v6970_v5 = vld [vmem:[#allocation68_spill] sm:$0xff] }
 0x208   :  { %v2996_v8 = vmax.f32 %v6968_v22, %v2804_v50  ;;  %v3840_v18 = vpack.c.bf16 %v3118_v49, %v3117_v2  ;;  %v2546_v45 = vadd.f32 %v6381_v37, %v2283_v57  ;;  %v2288_v28 = vmul.f32 %v6366_v62, %v6327_v51  ;;  %v6473_v2 = vpop.f32.mrb[127].mxu0  ;;  %v6475_v35 = vpop.f32.mrb[127].mxu1 }
 0x209   :  { %v3121_v44 = vmax.f32 %v2993_v11, %v3057_v14  ;;  %v2932_v54 = vmax.f32 %v2676_v53, 0.0  ;;  %v2674_v20 = vadd.f32 %v6381_v37, %v2411_v17  ;;  %v2416_v30 = vmul.f32 %v6366_v62, %v6329_v48  ;;  %v6975_v53 = vld [vmem:[#allocation70_spill] sm:$0xff] }
 0x20a   :  { %v2286_v27 = vmul.f32 %v6366_v62, %v6339_v39  ;;  %3908 = vst [vmem:[%s6626_s4 + $0xb0] sm:$0xff] %v3840_v18   ;;  %v2802_v51 = vmax.f32 %v2546_v45, 0.0  ;;  %v2551_v26 = vadd.f32 %v6381_v37, %v2288_v28  ;;  %v2414_v13 = vmul.f32 %v6366_v62, %v6341_v15  ;;  %v6977_v45 = vld [vmem:[#allocation71_spill] sm:$0xff] }
 0x20b   :  { %v2289_v48 = vmul.f32 %v6366_v62, %v6347_v52  ;;  %v6969_v38 = vmax.f32 %v5679_v19, 0.0  ;;  %v2930_v43 = vmax.f32 %v2674_v20, 0.0  ;;  %v2679_v47 = vadd.f32 %v6381_v37, %v2416_v30 }
 0x20c   :  { %v2549_v16 = vadd.f32 %v6381_v37, %v2286_v27  ;;  %v6971_v10 = vmax.f32 %v6970_v5, 0.0  ;;  %v2807_v42 = vmax.f32 %v2551_v26, 0.0  ;;  %v2677_v0 = vadd.f32 %v6381_v37, %v2414_v13  ;;  %v6981_v27 = vld [vmem:[#allocation73_spill] sm:$0xff]  ;;  %v6983_v5 = vld [vmem:[#allocation74_spill] sm:$0xff] }
 0x20d   :  { %v3060_v39 = vmax.f32 %v6969_v38, %v2932_v54  ;;  %v2552_v50 = vadd.f32 %v6381_v37, %v2289_v48  ;;  %v6973_v49 = vmax.f32 %v6972_v34, 0.0  ;;  %v2935_v29 = vmax.f32 %v2679_v47, 0.0  ;;  %v6979_v54 = vld [vmem:[#allocation72_spill] sm:$0xff] }
 0x20e   :  { %v2994_v40 = vmax.f32 %v6971_v10, %v2802_v51  ;;  %v2805_v19 = vmax.f32 %v2549_v16, 0.0  ;;  %v6974_v55 = vmax.f32 %v5694_v33, 0.0  ;;  %v2933_v6 = vmax.f32 %v2677_v0, 0.0 }
 0x20f   :  { %v3124_v15 = vmax.f32 %v2996_v8, %v3060_v39  ;;  %v3058_v52 = vmax.f32 %v6973_v49, %v2930_v43  ;;  %v2808_v14 = vmax.f32 %v2552_v50, 0.0  ;;  %v2417_v57 = vmul.f32 %v6366_v62, %v6349_v63 }
 0x210   :  { %v2999_v11 = vmax.f32 %v6974_v55, %v2807_v42  ;;  %v6976_v17 = vmax.f32 %v6975_v53, 0.0  ;;  %v6978_v8 = vmax.f32 %v6977_v45, 0.0  ;;  %v6980_v20 = vmax.f32 %v6979_v54, 0.0 }
 0x211   :  { %v3855_v60 = vpack.c.bf16 %v3124_v15, %v3123_v25  ;;  %v3122_v22 = vmax.f32 %v2994_v40, %v3058_v52  ;;  %v6982_v51 = vmax.f32 %v6981_v27, 0.0  ;;  %v2680_v26 = vadd.f32 %v6381_v37, %v2417_v57  ;;  %v6993_v27 = vld [vmem:[#allocation78_spill] sm:$0xff] }
 0x212   :  { %v3063_v18 = vmax.f32 %v6976_v17, %v2935_v29  ;;  %v2997_v28 = vmax.f32 %v6978_v8, %v2805_v19  ;;  %v3061_v30 = vmax.f32 %v6980_v20, %v2933_v6  ;;  %v2287_v13 = vmul.f32 %v6366_v62, %v6355_v36  ;;  %v6990_v17 = vld [vmem:[#allocation77_spill] sm:$0xff] }
 0x213   :  { %v3000_v33 = vmax.f32 %v6982_v51, %v2808_v14  ;;  %3911 = vst [vmem:[%s6626_s4 + $0xc8] sm:$0xff] %v3855_v60   ;;  %v3850_v63 = vpack.c.bf16 %v3122_v22, %v3121_v44  ;;  %v2415_v48 = vmul.f32 %v6366_v62, %v6357_v41  ;;  %v2292_v38 = vmul.f32 %v6366_v62, %v6393_v1 }
 0x214   :  { %v3127_v25 = vmax.f32 %v2999_v11, %v3063_v18  ;;  %v3125_v39 = vmax.f32 %v2997_v28, %v3061_v30  ;;  %v2936_v43 = vmax.f32 %v2680_v26, 0.0  ;;  %v2550_v47 = vadd.f32 %v6381_v37, %v2287_v13  ;;  %v6987_v11 = vld [vmem:[#allocation76_spill] sm:$0xff]  ;;  %v6995_v13 = vld [vmem:[#allocation79_spill] sm:$0xff] }
 0x215   :  { %v2420_v16 = vmul.f32 %v6366_v62, %v6395_v24  ;;  %3910 = vst [vmem:[%s6626_s4 + $0xc0] sm:$0xff] %v3850_v63   ;;  %v2678_v36 = vadd.f32 %v6381_v37, %v2415_v48  ;;  %v2555_v44 = vadd.f32 %v6381_v37, %v2292_v38  ;;  %v2290_v41 = vmul.f32 %v6366_v62, %v6400_v9  ;;  %v6985_v9 = vld [vmem:[#allocation75_spill] sm:$0xff] }
 0x216   :  { %v2418_v1 = vmul.f32 %v6366_v62, %v6402_v56  ;;  %v6984_v10 = vmax.f32 %v6983_v5, 0.0  ;;  %v2806_v42 = vmax.f32 %v2550_v47, 0.0  ;;  %v2293_v0 = vmul.f32 %v6366_v62, %v6413_v31 }
 0x217   :  { %v2683_v24 = vadd.f32 %v6381_v37, %v2420_v16  ;;  %v2934_v50 = vmax.f32 %v2678_v36, 0.0  ;;  %v2811_v15 = vmax.f32 %v2555_v44, 0.0  ;;  %v2553_v34 = vadd.f32 %v6381_v37, %v2290_v41 }
 0x218   :  { %v3064_v40 = vmax.f32 %v6984_v10, %v2936_v43  ;;  %v2681_v49 = vadd.f32 %v6381_v37, %v2418_v1  ;;  %v6986_v29 = vmax.f32 %v6985_v9, 0.0  ;;  %v2556_v55 = vadd.f32 %v6381_v37, %v2293_v0  ;;  %v6997_v1 = vld [vmem:[#allocation80_spill] sm:$0xff] }
 0x219   :  { %v2939_v56 = vmax.f32 %v2683_v24, 0.0  ;;  %v6988_v6 = vmax.f32 %v6987_v11, 0.0  ;;  %v6989_v57 = vmax.f32 %v5739_v23, 0.0  ;;  %v2809_v31 = vmax.f32 %v2553_v34, 0.0 }
 0x21a   :  { %v3128_v52 = vmax.f32 %v3000_v33, %v3064_v40  ;;  %v2998_v19 = vmax.f32 %v6986_v29, %v2806_v42  ;;  %v2937_v22 = vmax.f32 %v2681_v49, 0.0  ;;  %v6991_v18 = vmax.f32 %v6990_v17, 0.0  ;;  %v6999_v42 = vld [vmem:[#allocation81_spill] sm:$0xff]  ;;  %v7001_v49 = vld [vmem:[#allocation82_spill] sm:$0xff] }
 0x21b   :  { %v3062_v14 = vmax.f32 %v6988_v6, %v2934_v50  ;;  %v3003_v60 = vmax.f32 %v6989_v57, %v2811_v15  ;;  %v2812_v8 = vmax.f32 %v2556_v55, 0.0  ;;  %v2421_v28 = vmul.f32 %v6366_v62, %v6415_v12  ;;  %v7007_v17 = vld [vmem:[#allocation85_spill] sm:$0xff] }
 0x21c   :  { %v3865_v53 = vpack.c.bf16 %v3128_v52, %v3127_v25  ;;  %v3067_v45 = vmax.f32 %v6991_v18, %v2939_v56  ;;  %v6992_v20 = vmax.f32 %v5745_v58, 0.0  ;;  %v6994_v51 = vmax.f32 %v6993_v27, 0.0 }
 0x21d   :  { %v3126_v54 = vmax.f32 %v2998_v19, %v3062_v14  ;;  %v2291_v23 = vmul.f32 %v6366_v62, %v6422_v3  ;;  %v6996_v63 = vmax.f32 %v6995_v13, 0.0  ;;  %v2684_v12 = vadd.f32 %v6381_v37, %v2421_v28  ;;  %v7003_v19 = vld [vmem:[#allocation83_spill] sm:$0xff] }
 0x21e   :  { %v3001_v30 = vmax.f32 %v6992_v20, %v2809_v31  ;;  %v3065_v33 = vmax.f32 %v6994_v51, %v2937_v22  ;;  %3913 = vst [vmem:[%s6626_s4 + $0xd8] sm:$0xff] %v3865_v53   ;;  %v3131_v26 = vmax.f32 %v3003_v60, %v3067_v45  ;;  %v2419_v58 = vmul.f32 %v6366_v62, %v6424_v32  ;;  %v7005_v31 = vld [vmem:[#allocation84_spill] sm:$0xff]  ;;  %v7011_v20 = vld [vmem:[#allocation87_spill] sm:$0xff] }
 0x21f   :  { %v3004_v25 = vmax.f32 %v6996_v63, %v2812_v8  ;;  %v3860_v48 = vpack.c.bf16 %v3126_v54, %v3125_v39  ;;  %v2554_v43 = vadd.f32 %v6381_v37, %v2291_v23  ;;  %v2296_v3 = vmul.f32 %v6366_v62, %v6445_v7  ;;  %v7009_v8 = vld [vmem:[#allocation86_spill] sm:$0xff] }
 0x220   :  { %v3129_v38 = vmax.f32 %v3001_v30, %v3065_v33  ;;  %v2940_v47 = vmax.f32 %v2684_v12, 0.0  ;;  %v2682_v16 = vadd.f32 %v6381_v37, %v2419_v58  ;;  %v2424_v36 = vmul.f32 %v6366_v62, %v6447_v61 }
 0x221   :  { %v2294_v44 = vmul.f32 %v6366_v62, %v6457_v4  ;;  %3912 = vst [vmem:[%s6626_s4 + $0xd0] sm:$0xff] %v3860_v48   ;;  %v2810_v32 = vmax.f32 %v2554_v43, 0.0  ;;  %v2559_v39 = vadd.f32 %v6381_v37, %v2296_v3  ;;  %v2422_v41 = vmul.f32 %v6366_v62, %v6459_v46  ;;  %v7015_v3 = vld [vmem:[#allocation90_spill] sm:$0xff] }
 0x222   :  { %v2297_v7 = vmul.f32 %v6366_v62, %v6464_v21  ;;  %v6998_v5 = vmax.f32 %v6997_v1, 0.0  ;;  %v2938_v61 = vmax.f32 %v2682_v16, 0.0  ;;  %v2687_v40 = vadd.f32 %v6381_v37, %v2424_v36 }
 0x223   :  { %v2557_v4 = vadd.f32 %v6381_v37, %v2294_v44  ;;  %v7000_v24 = vmax.f32 %v6999_v42, 0.0  ;;  %v2815_v50 = vmax.f32 %v2559_v39, 0.0  ;;  %v2685_v15 = vadd.f32 %v6381_v37, %v2422_v41 }
 0x224   :  { %v3068_v10 = vmax.f32 %v6998_v5, %v2940_v47  ;;  %v2560_v34 = vadd.f32 %v6381_v37, %v2297_v7  ;;  %v7002_v52 = vmax.f32 %v7001_v49, 0.0  ;;  %v2943_v9 = vmax.f32 %v2687_v40, 0.0 }
 0x225   :  { %v3002_v0 = vmax.f32 %v7000_v24, %v2810_v32  ;;  %v2813_v29 = vmax.f32 %v2557_v4, 0.0  ;;  %v7004_v56 = vmax.f32 %v7003_v19, 0.0  ;;  %v2941_v11 = vmax.f32 %v2685_v15, 0.0 }
 0x226   :  { %v3132_v46 = vmax.f32 %v3004_v25, %v3068_v10  ;;  %v3066_v21 = vmax.f32 %v7002_v52, %v2938_v61  ;;  %v2816_v6 = vmax.f32 %v2560_v34, 0.0  ;;  %v2425_v14 = vmul.f32 %v6366_v62, %v6466_v59  ;;  %v7013_v59 = vld [vmem:[#allocation89_spill] sm:$0xff]  ;;  %v7014_v25 = vld [vmem:[#allocation88_spill] sm:$0xff] }
 0x227   :  { %v3007_v55 = vmax.f32 %v7004_v56, %v2815_v50  ;;  %v7006_v22 = vmax.f32 %v7005_v31, 0.0  ;;  %v7008_v18 = vmax.f32 %v7007_v17, 0.0  ;;  %v7010_v28 = vmax.f32 %v7009_v8, 0.0 }
 0x228   :  { %v3875_v57 = vpack.c.bf16 %v3132_v46, %v3131_v26  ;;  %v3130_v60 = vmax.f32 %v3002_v0, %v3066_v21  ;;  %v7012_v30 = vmax.f32 %v7011_v20, 0.0  ;;  %v2688_v51 = vadd.f32 %v6381_v37, %v2425_v14 }
 0x229   :  { %v3071_v53 = vmax.f32 %v7006_v22, %v2943_v9  ;;  %v3005_v45 = vmax.f32 %v7008_v18, %v2813_v29  ;;  %v3069_v54 = vmax.f32 %v7010_v28, %v2941_v11  ;;  %v2295_v33 = vmul.f32 %v6366_v62, %v6473_v2 }
 0x22a   :  { %v3008_v27 = vmax.f32 %v7012_v30, %v2816_v6  ;;  %v2622_v23 = vadd.f32 %v6381_v37, %v7013_v59  ;;  %3915 = vst [vmem:[%s6626_s4 + $0xe8] sm:$0xff] %v3875_v57   ;;  %v3870_v26 = vpack.c.bf16 %v3130_v60, %v3129_v38  ;;  %v2423_v63 = vmul.f32 %v6366_v62, %v6475_v35 }
 0x22b   :  { %v3135_v13 = vmax.f32 %v3007_v55, %v3071_v53  ;;  %v2880_v12 = vmax.f32 %v7014_v25, 0.0  ;;  %v3133_v58 = vmax.f32 %v3005_v45, %v3069_v54  ;;  %v2944_v48 = vmax.f32 %v2688_v51, 0.0 }
 0x22c   :  { %v2558_v43 = vadd.f32 %v6381_v37, %v2295_v33  ;;  %3914 = vst [vmem:[%s6626_s4 + $0xe0] sm:$0xff] %v3870_v26   ;;  %v2686_v2 = vadd.f32 %v6381_v37, %v2423_v63  ;;  %v2750_v47 = vmax.f32 %v7015_v3, 0.0  ;;  %v2878_v36 = vmax.f32 %v2622_v23, 0.0 }
 0x22d   :  { %v3072_v16 = vmax.f32 %v2880_v12, %v2944_v48 }
 0x22e   :  { %v2814_v38 = vmax.f32 %v2558_v43, 0.0  ;;  %v2942_v44 = vmax.f32 %v2686_v2, 0.0 }
 0x22f   :  { %v3136_v32 = vmax.f32 %v3008_v27, %v3072_v16 }
 0x230   :  { %v3006_v62 = vmax.f32 %v2750_v47, %v2814_v38  ;;  %v3070_v35 = vmax.f32 %v2878_v36, %v2942_v44 }
 0x231   :  { %v3885_v39 = vpack.c.bf16 %v3136_v32, %v3135_v13 }
 0x232   :  { %v3134_v41 = vmax.f32 %v3006_v62, %v3070_v35 }
 0x233   :  { %3917 = vst [vmem:[%s6626_s4 + $0xf8] sm:$0xff] %v3885_v39  }
 0x234   :  { %v3880_v7 = vpack.c.bf16 %v3134_v41, %v3133_v58 }
 0x236   :  { %3916 = vst [vmem:[%s6626_s4 + $0xf0] sm:$0xff] %v3880_v7  }

// kernel: custom_cnn_forward.5
= control target key start
LH: loop header
LB: loop body
LE: loop exit
PB: predicated region body
PF: predicated region fallthrough
CT: control target
= control target key end

     0   :  { %s10414_s15 = smov 0   ;;  %s10416_s16 = smov 0   ;;  %s12262_s0 = inlined_call_operand.vmem [shape: bf16[2,8192], index: 0, kind: input, shape index: {}]   ;;  %s12263_s1 = inlined_call_operand.vmem [shape: bf16[8192,512], index: 1, kind: input, shape index: {}]   ;;  %s12264_s2 = inlined_call_operand.vmem [shape: f32[1,512], index: 2, kind: input, shape index: {}]   ;;  %s12265_s3 = inlined_call_operand.vmem [shape: bf16[512,256], index: 3, kind: input, shape index: {}]   ;;  %s12266_s4 = inlined_call_operand.vmem [shape: f32[2,2,256], index: 4, kind: output, shape index: {}]  }
   0x1   :  { %s10418_s17 = smov 0   ;;  %s10420_s18 = smov 0  }
   0x2   :  { %s10422_s19 = smov 0   ;;  %s10424_s20 = smov 0  }
   0x3   :  { %s10426_s21 = smov 0  }
   0x4 LB: > { %s23_s22 = sadd.s32 1, %s10376_s19  ;;  %s26_s23 = sadd.s32 1, %s10380_s20  ;;  %s10384_s21 = sphi %s10426_s21, %s14_s21   ;;  %s10380_s20 = sphi %s10424_s20, %s12272_s20   ;;  %s10376_s19 = sphi %s10422_s19, %s12271_s19   ;;  %s10372_s18 = sphi %s10420_s18, %s12270_s18   ;;  %s10368_s17 = sphi %s10418_s17, %s12269_s17   ;;  %s10364_s16 = sphi %s10416_s16, %s12268_s16   ;;  %s10360_s15 = sphi %s10414_s15, %s12267_s15  }
   0x5   : > { %p24_p0 = scmp.ge.s32.totalorder %s23_s22, 2  ;;  %p68_p1 = scmp.ne.s32.totalorder %s10364_s16, %s10360_s15 }
   0x6   : > { %p69_p2 = scmp.eq.s32.totalorder %s10384_s21, 0  ;;  %s61_s27 = sadd.s32 1, %s10364_s16 }
   0x7   : > { %s12274_s22 = smov (%p24_p0, %s23_s22), 0  ;;  %s12276_s23 = smov (!%p24_p0, %s26_s23), %s10380_s20 }
   0x8   : > { %p70_p3 = por %p69_p2, %p68_p1  ;;  %p28_p4 = scmp.ge.s32.totalorder %s12276_s23, 2 }
   0x9   : > { %s56_s24 = ssub.s32 %s10376_s19, %s12274_s22  ;;  %p8762_p6 = scmp.ge.s32.totalorder %s10384_s21, 4 }
   0xa   : > { %s12278_s23 = smov (%p28_p4, %s12276_s23), 0 }
   0xb   : > { %s57_s25 = ssub.s32 %s10380_s20, %s12278_s23  ;;  %172 = sbr.rel (%p8762_p6) target bundleno = 281 (0x119), region = 16 }
   0xc   : > { %s58_s26 = sor.u32 %s57_s25, %s56_s24 }
   0xd   : > { %p59_p5 = scmp.eq.s32.totalorder %s58_s26, 0 }
   0xf   : > { %s10465_s28 = scalar_select %p59_p5, %s10364_s16, %s61_s27  }
  0x12   : > { %183 = sbr.rel (!%p70_p3) target bundleno = 281 (0x119), region = 24  ;;  %s185_s29 = sand.u32 (%p70_p3), 1, %s10364_s16  }
  0x13   : > { %s8765_s30 = sshll.u32 (%p70_p3), %s10380_s20, 1  ;;  %s8763_s5 = sshll.u32 (%p70_p3), %s185_s29, 12 }
  0x14   : > { %s9294_s6 = sshll.u32 (%p70_p3), %s10376_s19, 11  ;;  %s10479_s12 = scalar_lea.vmem (%p70_p3), [#allocation3], %s8763_s5 }
  0x15   : > { %s191_s7 = sadd.s32 (%p70_p3), %s9294_s6, %s8765_s30 }
  0x16   : > { %s8767_s8 = sshll.u32 (%p70_p3), %s191_s7, 2 }
  0x17   : > { %s10474_s11 = scalar_lea.vmem (%p70_p3), %s12263_s1, %s8767_s8 }
  0x18   : > { %v1246_v0 = vld [vmem:[%s10474_s11] sm:$0xff] (%p70_p3)  ;;  %v1248_v1 = vld [vmem:[%s10474_s11 + $0x10] sm:$0xff] (%p70_p3) }
  0x19   : > { %v1250_v2 = vld [vmem:[%s10474_s11 + $0x20] sm:$0xff]  ;;  %1247 = vst [vmem:[%s10479_s12] sm:$0xff] %v1246_v0  ;;  %1249 = vst [vmem:[%s10479_s12 + $0x8] sm:$0xff] %v1248_v1  ;;  %v1252_v3 = vld [vmem:[%s10474_s11 + $0x30] sm:$0xff] }
  0x1a   : > { %1251 = vst [vmem:[%s10479_s12 + $0x10] sm:$0xff] %v1250_v2  ;;  %v1254_v4 = vld [vmem:[%s10474_s11 + $0x40] sm:$0xff]  ;;  %v1256_v5 = vld [vmem:[%s10474_s11 + $0x50] sm:$0xff]  ;;  %1253 = vst [vmem:[%s10479_s12 + $0x18] sm:$0xff] %v1252_v3 }
  0x1b   : > { %1255 = vst [vmem:[%s10479_s12 + $0x20] sm:$0xff] %v1254_v4  ;;  %1257 = vst [vmem:[%s10479_s12 + $0x28] sm:$0xff] %v1256_v5  ;;  %v1258_v6 = vld [vmem:[%s10474_s11 + $0x60] sm:$0xff]  ;;  %v1260_v7 = vld [vmem:[%s10474_s11 + $0x70] sm:$0xff] }
  0x1c   : > { %v1262_v8 = vld [vmem:[%s10474_s11 + $0x80] sm:$0xff]  ;;  %1259 = vst [vmem:[%s10479_s12 + $0x30] sm:$0xff] %v1258_v6  ;;  %1261 = vst [vmem:[%s10479_s12 + $0x38] sm:$0xff] %v1260_v7  ;;  %v1264_v9 = vld [vmem:[%s10474_s11 + $0x90] sm:$0xff] }
  0x1d   : > { %1263 = vst [vmem:[%s10479_s12 + $0x40] sm:$0xff] %v1262_v8  ;;  %v1266_v10 = vld [vmem:[%s10474_s11 + $0xa0] sm:$0xff]  ;;  %v1268_v11 = vld [vmem:[%s10474_s11 + $0xb0] sm:$0xff]  ;;  %1265 = vst [vmem:[%s10479_s12 + $0x48] sm:$0xff] %v1264_v9 }
  0x1e   : > { %1267 = vst [vmem:[%s10479_s12 + $0x50] sm:$0xff] %v1266_v10  ;;  %1269 = vst [vmem:[%s10479_s12 + $0x58] sm:$0xff] %v1268_v11  ;;  %v1270_v12 = vld [vmem:[%s10474_s11 + $0xc0] sm:$0xff]  ;;  %v1272_v13 = vld [vmem:[%s10474_s11 + $0xd0] sm:$0xff] }
  0x1f   : > { %v1274_v14 = vld [vmem:[%s10474_s11 + $0xe0] sm:$0xff]  ;;  %1271 = vst [vmem:[%s10479_s12 + $0x60] sm:$0xff] %v1270_v12  ;;  %1273 = vst [vmem:[%s10479_s12 + $0x68] sm:$0xff] %v1272_v13  ;;  %v1276_v15 = vld [vmem:[%s10474_s11 + $0xf0] sm:$0xff] }
  0x20   : > { %1275 = vst [vmem:[%s10479_s12 + $0x70] sm:$0xff] %v1274_v14  ;;  %v1278_v16 = vld [vmem:[%s10474_s11 + $0x100] sm:$0xff]  ;;  %v1280_v17 = vld [vmem:[%s10474_s11 + $0x110] sm:$0xff]  ;;  %1277 = vst [vmem:[%s10479_s12 + $0x78] sm:$0xff] %v1276_v15 }
  0x21   : > { %1279 = vst [vmem:[%s10479_s12 + $0x80] sm:$0xff] %v1278_v16  ;;  %1281 = vst [vmem:[%s10479_s12 + $0x88] sm:$0xff] %v1280_v17  ;;  %v1282_v18 = vld [vmem:[%s10474_s11 + $0x120] sm:$0xff]  ;;  %v1284_v19 = vld [vmem:[%s10474_s11 + $0x130] sm:$0xff] }
  0x22   : > { %v1286_v20 = vld [vmem:[%s10474_s11 + $0x140] sm:$0xff]  ;;  %1283 = vst [vmem:[%s10479_s12 + $0x90] sm:$0xff] %v1282_v18  ;;  %1285 = vst [vmem:[%s10479_s12 + $0x98] sm:$0xff] %v1284_v19  ;;  %v1288_v21 = vld [vmem:[%s10474_s11 + $0x150] sm:$0xff] }
  0x23   : > { %1287 = vst [vmem:[%s10479_s12 + $0xa0] sm:$0xff] %v1286_v20  ;;  %v1290_v22 = vld [vmem:[%s10474_s11 + $0x160] sm:$0xff]  ;;  %v1292_v23 = vld [vmem:[%s10474_s11 + $0x170] sm:$0xff]  ;;  %1289 = vst [vmem:[%s10479_s12 + $0xa8] sm:$0xff] %v1288_v21 }
  0x24   : > { %1291 = vst [vmem:[%s10479_s12 + $0xb0] sm:$0xff] %v1290_v22  ;;  %1293 = vst [vmem:[%s10479_s12 + $0xb8] sm:$0xff] %v1292_v23  ;;  %v1294_v24 = vld [vmem:[%s10474_s11 + $0x180] sm:$0xff]  ;;  %v1296_v25 = vld [vmem:[%s10474_s11 + $0x190] sm:$0xff] }
  0x25   : > { %v1298_v26 = vld [vmem:[%s10474_s11 + $0x1a0] sm:$0xff]  ;;  %1295 = vst [vmem:[%s10479_s12 + $0xc0] sm:$0xff] %v1294_v24  ;;  %1297 = vst [vmem:[%s10479_s12 + $0xc8] sm:$0xff] %v1296_v25  ;;  %v1300_v27 = vld [vmem:[%s10474_s11 + $0x1b0] sm:$0xff] }
  0x26   : > { %1299 = vst [vmem:[%s10479_s12 + $0xd0] sm:$0xff] %v1298_v26  ;;  %v1302_v28 = vld [vmem:[%s10474_s11 + $0x1c0] sm:$0xff]  ;;  %v1304_v29 = vld [vmem:[%s10474_s11 + $0x1d0] sm:$0xff]  ;;  %1301 = vst [vmem:[%s10479_s12 + $0xd8] sm:$0xff] %v1300_v27 }
  0x27   : > { %1303 = vst [vmem:[%s10479_s12 + $0xe0] sm:$0xff] %v1302_v28  ;;  %1305 = vst [vmem:[%s10479_s12 + $0xe8] sm:$0xff] %v1304_v29  ;;  %v1306_v30 = vld [vmem:[%s10474_s11 + $0x1e0] sm:$0xff]  ;;  %v1308_v31 = vld [vmem:[%s10474_s11 + $0x1f0] sm:$0xff] }
  0x28   : > { %v1310_v32 = vld [vmem:[%s10474_s11 + $0x200] sm:$0xff]  ;;  %1307 = vst [vmem:[%s10479_s12 + $0xf0] sm:$0xff] %v1306_v30  ;;  %1309 = vst [vmem:[%s10479_s12 + $0xf8] sm:$0xff] %v1308_v31  ;;  %v1312_v33 = vld [vmem:[%s10474_s11 + $0x210] sm:$0xff] }
  0x29   : > { %1311 = vst [vmem:[%s10479_s12 + $0x100] sm:$0xff] %v1310_v32  ;;  %v1314_v34 = vld [vmem:[%s10474_s11 + $0x220] sm:$0xff]  ;;  %v1316_v35 = vld [vmem:[%s10474_s11 + $0x230] sm:$0xff]  ;;  %1313 = vst [vmem:[%s10479_s12 + $0x108] sm:$0xff] %v1312_v33 }
  0x2a   : > { %1315 = vst [vmem:[%s10479_s12 + $0x110] sm:$0xff] %v1314_v34  ;;  %1317 = vst [vmem:[%s10479_s12 + $0x118] sm:$0xff] %v1316_v35  ;;  %v1318_v36 = vld [vmem:[%s10474_s11 + $0x240] sm:$0xff]  ;;  %v1320_v37 = vld [vmem:[%s10474_s11 + $0x250] sm:$0xff] }
  0x2b   : > { %v1322_v38 = vld [vmem:[%s10474_s11 + $0x260] sm:$0xff]  ;;  %1319 = vst [vmem:[%s10479_s12 + $0x120] sm:$0xff] %v1318_v36  ;;  %1321 = vst [vmem:[%s10479_s12 + $0x128] sm:$0xff] %v1320_v37  ;;  %v1324_v39 = vld [vmem:[%s10474_s11 + $0x270] sm:$0xff] }
  0x2c   : > { %1323 = vst [vmem:[%s10479_s12 + $0x130] sm:$0xff] %v1322_v38  ;;  %v1326_v40 = vld [vmem:[%s10474_s11 + $0x280] sm:$0xff]  ;;  %v1328_v41 = vld [vmem:[%s10474_s11 + $0x290] sm:$0xff]  ;;  %1325 = vst [vmem:[%s10479_s12 + $0x138] sm:$0xff] %v1324_v39 }
  0x2d   : > { %1327 = vst [vmem:[%s10479_s12 + $0x140] sm:$0xff] %v1326_v40  ;;  %1329 = vst [vmem:[%s10479_s12 + $0x148] sm:$0xff] %v1328_v41  ;;  %v1330_v42 = vld [vmem:[%s10474_s11 + $0x2a0] sm:$0xff]  ;;  %v1332_v43 = vld [vmem:[%s10474_s11 + $0x2b0] sm:$0xff] }
  0x2e   : > { %v1334_v44 = vld [vmem:[%s10474_s11 + $0x2c0] sm:$0xff]  ;;  %1331 = vst [vmem:[%s10479_s12 + $0x150] sm:$0xff] %v1330_v42  ;;  %1333 = vst [vmem:[%s10479_s12 + $0x158] sm:$0xff] %v1332_v43  ;;  %v1336_v45 = vld [vmem:[%s10474_s11 + $0x2d0] sm:$0xff] }
  0x2f   : > { %1335 = vst [vmem:[%s10479_s12 + $0x160] sm:$0xff] %v1334_v44  ;;  %v1338_v46 = vld [vmem:[%s10474_s11 + $0x2e0] sm:$0xff]  ;;  %v1340_v47 = vld [vmem:[%s10474_s11 + $0x2f0] sm:$0xff]  ;;  %1337 = vst [vmem:[%s10479_s12 + $0x168] sm:$0xff] %v1336_v45 }
  0x30   : > { %1339 = vst [vmem:[%s10479_s12 + $0x170] sm:$0xff] %v1338_v46  ;;  %1341 = vst [vmem:[%s10479_s12 + $0x178] sm:$0xff] %v1340_v47  ;;  %v1342_v48 = vld [vmem:[%s10474_s11 + $0x300] sm:$0xff]  ;;  %v1344_v49 = vld [vmem:[%s10474_s11 + $0x310] sm:$0xff] }
  0x31   : > { %v1346_v50 = vld [vmem:[%s10474_s11 + $0x320] sm:$0xff]  ;;  %1343 = vst [vmem:[%s10479_s12 + $0x180] sm:$0xff] %v1342_v48  ;;  %1345 = vst [vmem:[%s10479_s12 + $0x188] sm:$0xff] %v1344_v49  ;;  %v1348_v51 = vld [vmem:[%s10474_s11 + $0x330] sm:$0xff] }
  0x32   : > { %1347 = vst [vmem:[%s10479_s12 + $0x190] sm:$0xff] %v1346_v50  ;;  %v1350_v52 = vld [vmem:[%s10474_s11 + $0x340] sm:$0xff]  ;;  %v1352_v53 = vld [vmem:[%s10474_s11 + $0x350] sm:$0xff]  ;;  %1349 = vst [vmem:[%s10479_s12 + $0x198] sm:$0xff] %v1348_v51 }
  0x33   : > { %1351 = vst [vmem:[%s10479_s12 + $0x1a0] sm:$0xff] %v1350_v52  ;;  %1353 = vst [vmem:[%s10479_s12 + $0x1a8] sm:$0xff] %v1352_v53  ;;  %v1354_v54 = vld [vmem:[%s10474_s11 + $0x360] sm:$0xff]  ;;  %v1356_v55 = vld [vmem:[%s10474_s11 + $0x370] sm:$0xff] }
  0x34   : > { %v1358_v56 = vld [vmem:[%s10474_s11 + $0x380] sm:$0xff]  ;;  %1355 = vst [vmem:[%s10479_s12 + $0x1b0] sm:$0xff] %v1354_v54  ;;  %1357 = vst [vmem:[%s10479_s12 + $0x1b8] sm:$0xff] %v1356_v55  ;;  %v1360_v57 = vld [vmem:[%s10474_s11 + $0x390] sm:$0xff] }
  0x35   : > { %1359 = vst [vmem:[%s10479_s12 + $0x1c0] sm:$0xff] %v1358_v56  ;;  %v1362_v58 = vld [vmem:[%s10474_s11 + $0x3a0] sm:$0xff]  ;;  %v1364_v59 = vld [vmem:[%s10474_s11 + $0x3b0] sm:$0xff]  ;;  %1361 = vst [vmem:[%s10479_s12 + $0x1c8] sm:$0xff] %v1360_v57 }
  0x36   : > { %1363 = vst [vmem:[%s10479_s12 + $0x1d0] sm:$0xff] %v1362_v58  ;;  %1365 = vst [vmem:[%s10479_s12 + $0x1d8] sm:$0xff] %v1364_v59  ;;  %v1366_v60 = vld [vmem:[%s10474_s11 + $0x3c0] sm:$0xff]  ;;  %v1368_v61 = vld [vmem:[%s10474_s11 + $0x3d0] sm:$0xff] }
  0x37   : > { %v1370_v62 = vld [vmem:[%s10474_s11 + $0x3e0] sm:$0xff]  ;;  %1367 = vst [vmem:[%s10479_s12 + $0x1e0] sm:$0xff] %v1366_v60  ;;  %1369 = vst [vmem:[%s10479_s12 + $0x1e8] sm:$0xff] %v1368_v61  ;;  %v1372_v63 = vld [vmem:[%s10474_s11 + $0x3f0] sm:$0xff] }
  0x38   : > { %1371 = vst [vmem:[%s10479_s12 + $0x1f0] sm:$0xff] %v1370_v62  ;;  %v1374_v0 = vld [vmem:[%s10474_s11 + $0x400] sm:$0xff]  ;;  %v1376_v1 = vld [vmem:[%s10474_s11 + $0x410] sm:$0xff]  ;;  %1373 = vst [vmem:[%s10479_s12 + $0x1f8] sm:$0xff] %v1372_v63 }
  0x39   : > { %1375 = vst [vmem:[%s10479_s12 + $0x200] sm:$0xff] %v1374_v0  ;;  %1377 = vst [vmem:[%s10479_s12 + $0x208] sm:$0xff] %v1376_v1  ;;  %v1378_v2 = vld [vmem:[%s10474_s11 + $0x420] sm:$0xff]  ;;  %v1380_v3 = vld [vmem:[%s10474_s11 + $0x430] sm:$0xff] }
  0x3a   : > { %v1382_v4 = vld [vmem:[%s10474_s11 + $0x440] sm:$0xff]  ;;  %1379 = vst [vmem:[%s10479_s12 + $0x210] sm:$0xff] %v1378_v2  ;;  %1381 = vst [vmem:[%s10479_s12 + $0x218] sm:$0xff] %v1380_v3  ;;  %v1384_v5 = vld [vmem:[%s10474_s11 + $0x450] sm:$0xff] }
  0x3b   : > { %1383 = vst [vmem:[%s10479_s12 + $0x220] sm:$0xff] %v1382_v4  ;;  %v1386_v6 = vld [vmem:[%s10474_s11 + $0x460] sm:$0xff]  ;;  %v1388_v7 = vld [vmem:[%s10474_s11 + $0x470] sm:$0xff]  ;;  %1385 = vst [vmem:[%s10479_s12 + $0x228] sm:$0xff] %v1384_v5 }
  0x3c   : > { %1387 = vst [vmem:[%s10479_s12 + $0x230] sm:$0xff] %v1386_v6  ;;  %1389 = vst [vmem:[%s10479_s12 + $0x238] sm:$0xff] %v1388_v7  ;;  %v1390_v8 = vld [vmem:[%s10474_s11 + $0x480] sm:$0xff]  ;;  %v1392_v9 = vld [vmem:[%s10474_s11 + $0x490] sm:$0xff] }
  0x3d   : > { %v1394_v10 = vld [vmem:[%s10474_s11 + $0x4a0] sm:$0xff]  ;;  %1391 = vst [vmem:[%s10479_s12 + $0x240] sm:$0xff] %v1390_v8  ;;  %1393 = vst [vmem:[%s10479_s12 + $0x248] sm:$0xff] %v1392_v9  ;;  %v1396_v11 = vld [vmem:[%s10474_s11 + $0x4b0] sm:$0xff] }
  0x3e   : > { %1395 = vst [vmem:[%s10479_s12 + $0x250] sm:$0xff] %v1394_v10  ;;  %v1398_v12 = vld [vmem:[%s10474_s11 + $0x4c0] sm:$0xff]  ;;  %v1400_v13 = vld [vmem:[%s10474_s11 + $0x4d0] sm:$0xff]  ;;  %1397 = vst [vmem:[%s10479_s12 + $0x258] sm:$0xff] %v1396_v11 }
  0x3f   : > { %1399 = vst [vmem:[%s10479_s12 + $0x260] sm:$0xff] %v1398_v12  ;;  %1401 = vst [vmem:[%s10479_s12 + $0x268] sm:$0xff] %v1400_v13  ;;  %v1402_v14 = vld [vmem:[%s10474_s11 + $0x4e0] sm:$0xff]  ;;  %v1404_v15 = vld [vmem:[%s10474_s11 + $0x4f0] sm:$0xff] }
  0x40   : > { %v1406_v16 = vld [vmem:[%s10474_s11 + $0x500] sm:$0xff]  ;;  %1403 = vst [vmem:[%s10479_s12 + $0x270] sm:$0xff] %v1402_v14  ;;  %1405 = vst [vmem:[%s10479_s12 + $0x278] sm:$0xff] %v1404_v15  ;;  %v1408_v17 = vld [vmem:[%s10474_s11 + $0x510] sm:$0xff] }
  0x41   : > { %1407 = vst [vmem:[%s10479_s12 + $0x280] sm:$0xff] %v1406_v16  ;;  %v1410_v18 = vld [vmem:[%s10474_s11 + $0x520] sm:$0xff]  ;;  %v1412_v19 = vld [vmem:[%s10474_s11 + $0x530] sm:$0xff]  ;;  %1409 = vst [vmem:[%s10479_s12 + $0x288] sm:$0xff] %v1408_v17 }
  0x42   : > { %1411 = vst [vmem:[%s10479_s12 + $0x290] sm:$0xff] %v1410_v18  ;;  %1413 = vst [vmem:[%s10479_s12 + $0x298] sm:$0xff] %v1412_v19  ;;  %v1414_v20 = vld [vmem:[%s10474_s11 + $0x540] sm:$0xff]  ;;  %v1416_v21 = vld [vmem:[%s10474_s11 + $0x550] sm:$0xff] }
  0x43   : > { %v1418_v22 = vld [vmem:[%s10474_s11 + $0x560] sm:$0xff]  ;;  %1415 = vst [vmem:[%s10479_s12 + $0x2a0] sm:$0xff] %v1414_v20  ;;  %1417 = vst [vmem:[%s10479_s12 + $0x2a8] sm:$0xff] %v1416_v21  ;;  %v1420_v23 = vld [vmem:[%s10474_s11 + $0x570] sm:$0xff] }
  0x44   : > { %1419 = vst [vmem:[%s10479_s12 + $0x2b0] sm:$0xff] %v1418_v22  ;;  %v1422_v24 = vld [vmem:[%s10474_s11 + $0x580] sm:$0xff]  ;;  %v1424_v25 = vld [vmem:[%s10474_s11 + $0x590] sm:$0xff]  ;;  %1421 = vst [vmem:[%s10479_s12 + $0x2b8] sm:$0xff] %v1420_v23 }
  0x45   : > { %1423 = vst [vmem:[%s10479_s12 + $0x2c0] sm:$0xff] %v1422_v24  ;;  %1425 = vst [vmem:[%s10479_s12 + $0x2c8] sm:$0xff] %v1424_v25  ;;  %v1426_v26 = vld [vmem:[%s10474_s11 + $0x5a0] sm:$0xff]  ;;  %v1428_v27 = vld [vmem:[%s10474_s11 + $0x5b0] sm:$0xff] }
  0x46   : > { %v1430_v28 = vld [vmem:[%s10474_s11 + $0x5c0] sm:$0xff]  ;;  %1427 = vst [vmem:[%s10479_s12 + $0x2d0] sm:$0xff] %v1426_v26  ;;  %1429 = vst [vmem:[%s10479_s12 + $0x2d8] sm:$0xff] %v1428_v27  ;;  %v1432_v29 = vld [vmem:[%s10474_s11 + $0x5d0] sm:$0xff] }
  0x47   : > { %1431 = vst [vmem:[%s10479_s12 + $0x2e0] sm:$0xff] %v1430_v28  ;;  %v1434_v30 = vld [vmem:[%s10474_s11 + $0x5e0] sm:$0xff]  ;;  %v1436_v31 = vld [vmem:[%s10474_s11 + $0x5f0] sm:$0xff]  ;;  %1433 = vst [vmem:[%s10479_s12 + $0x2e8] sm:$0xff] %v1432_v29 }
  0x48   : > { %1435 = vst [vmem:[%s10479_s12 + $0x2f0] sm:$0xff] %v1434_v30  ;;  %1437 = vst [vmem:[%s10479_s12 + $0x2f8] sm:$0xff] %v1436_v31  ;;  %v1438_v32 = vld [vmem:[%s10474_s11 + $0x600] sm:$0xff]  ;;  %v1440_v33 = vld [vmem:[%s10474_s11 + $0x610] sm:$0xff] }
  0x49   : > { %v1442_v34 = vld [vmem:[%s10474_s11 + $0x620] sm:$0xff]  ;;  %1439 = vst [vmem:[%s10479_s12 + $0x300] sm:$0xff] %v1438_v32  ;;  %1441 = vst [vmem:[%s10479_s12 + $0x308] sm:$0xff] %v1440_v33  ;;  %v1444_v35 = vld [vmem:[%s10474_s11 + $0x630] sm:$0xff] }
  0x4a   : > { %1443 = vst [vmem:[%s10479_s12 + $0x310] sm:$0xff] %v1442_v34  ;;  %v1446_v36 = vld [vmem:[%s10474_s11 + $0x640] sm:$0xff]  ;;  %v1448_v37 = vld [vmem:[%s10474_s11 + $0x650] sm:$0xff]  ;;  %1445 = vst [vmem:[%s10479_s12 + $0x318] sm:$0xff] %v1444_v35 }
  0x4b   : > { %1447 = vst [vmem:[%s10479_s12 + $0x320] sm:$0xff] %v1446_v36  ;;  %1449 = vst [vmem:[%s10479_s12 + $0x328] sm:$0xff] %v1448_v37  ;;  %v1450_v38 = vld [vmem:[%s10474_s11 + $0x660] sm:$0xff]  ;;  %v1452_v39 = vld [vmem:[%s10474_s11 + $0x670] sm:$0xff] }
  0x4c   : > { %v1454_v40 = vld [vmem:[%s10474_s11 + $0x680] sm:$0xff]  ;;  %1451 = vst [vmem:[%s10479_s12 + $0x330] sm:$0xff] %v1450_v38  ;;  %1453 = vst [vmem:[%s10479_s12 + $0x338] sm:$0xff] %v1452_v39  ;;  %v1456_v41 = vld [vmem:[%s10474_s11 + $0x690] sm:$0xff] }
  0x4d   : > { %1455 = vst [vmem:[%s10479_s12 + $0x340] sm:$0xff] %v1454_v40  ;;  %v1458_v42 = vld [vmem:[%s10474_s11 + $0x6a0] sm:$0xff]  ;;  %v1460_v43 = vld [vmem:[%s10474_s11 + $0x6b0] sm:$0xff]  ;;  %1457 = vst [vmem:[%s10479_s12 + $0x348] sm:$0xff] %v1456_v41 }
  0x4e   : > { %1459 = vst [vmem:[%s10479_s12 + $0x350] sm:$0xff] %v1458_v42  ;;  %1461 = vst [vmem:[%s10479_s12 + $0x358] sm:$0xff] %v1460_v43  ;;  %v1462_v44 = vld [vmem:[%s10474_s11 + $0x6c0] sm:$0xff]  ;;  %v1464_v45 = vld [vmem:[%s10474_s11 + $0x6d0] sm:$0xff] }
  0x4f   : > { %v1466_v46 = vld [vmem:[%s10474_s11 + $0x6e0] sm:$0xff]  ;;  %1463 = vst [vmem:[%s10479_s12 + $0x360] sm:$0xff] %v1462_v44  ;;  %1465 = vst [vmem:[%s10479_s12 + $0x368] sm:$0xff] %v1464_v45  ;;  %v1468_v47 = vld [vmem:[%s10474_s11 + $0x6f0] sm:$0xff] }
  0x50   : > { %1467 = vst [vmem:[%s10479_s12 + $0x370] sm:$0xff] %v1466_v46  ;;  %v1470_v48 = vld [vmem:[%s10474_s11 + $0x700] sm:$0xff]  ;;  %v1472_v49 = vld [vmem:[%s10474_s11 + $0x710] sm:$0xff]  ;;  %1469 = vst [vmem:[%s10479_s12 + $0x378] sm:$0xff] %v1468_v47 }
  0x51   : > { %1471 = vst [vmem:[%s10479_s12 + $0x380] sm:$0xff] %v1470_v48  ;;  %1473 = vst [vmem:[%s10479_s12 + $0x388] sm:$0xff] %v1472_v49  ;;  %v1474_v50 = vld [vmem:[%s10474_s11 + $0x720] sm:$0xff]  ;;  %v1476_v51 = vld [vmem:[%s10474_s11 + $0x730] sm:$0xff] }
  0x52   : > { %v1478_v52 = vld [vmem:[%s10474_s11 + $0x740] sm:$0xff]  ;;  %1475 = vst [vmem:[%s10479_s12 + $0x390] sm:$0xff] %v1474_v50  ;;  %1477 = vst [vmem:[%s10479_s12 + $0x398] sm:$0xff] %v1476_v51  ;;  %v1480_v53 = vld [vmem:[%s10474_s11 + $0x750] sm:$0xff] }
  0x53   : > { %1479 = vst [vmem:[%s10479_s12 + $0x3a0] sm:$0xff] %v1478_v52  ;;  %v1482_v54 = vld [vmem:[%s10474_s11 + $0x760] sm:$0xff]  ;;  %v1484_v55 = vld [vmem:[%s10474_s11 + $0x770] sm:$0xff]  ;;  %1481 = vst [vmem:[%s10479_s12 + $0x3a8] sm:$0xff] %v1480_v53 }
  0x54   : > { %1483 = vst [vmem:[%s10479_s12 + $0x3b0] sm:$0xff] %v1482_v54  ;;  %1485 = vst [vmem:[%s10479_s12 + $0x3b8] sm:$0xff] %v1484_v55  ;;  %v1486_v56 = vld [vmem:[%s10474_s11 + $0x780] sm:$0xff]  ;;  %v1488_v57 = vld [vmem:[%s10474_s11 + $0x790] sm:$0xff] }
  0x55   : > { %v1490_v58 = vld [vmem:[%s10474_s11 + $0x7a0] sm:$0xff]  ;;  %1487 = vst [vmem:[%s10479_s12 + $0x3c0] sm:$0xff] %v1486_v56  ;;  %1489 = vst [vmem:[%s10479_s12 + $0x3c8] sm:$0xff] %v1488_v57  ;;  %v1492_v59 = vld [vmem:[%s10474_s11 + $0x7b0] sm:$0xff] }
  0x56   : > { %1491 = vst [vmem:[%s10479_s12 + $0x3d0] sm:$0xff] %v1490_v58  ;;  %v1494_v60 = vld [vmem:[%s10474_s11 + $0x7c0] sm:$0xff]  ;;  %v1496_v61 = vld [vmem:[%s10474_s11 + $0x7d0] sm:$0xff]  ;;  %1493 = vst [vmem:[%s10479_s12 + $0x3d8] sm:$0xff] %v1492_v59 }
  0x57   : > { %1495 = vst [vmem:[%s10479_s12 + $0x3e0] sm:$0xff] %v1494_v60  ;;  %1497 = vst [vmem:[%s10479_s12 + $0x3e8] sm:$0xff] %v1496_v61  ;;  %v1498_v62 = vld [vmem:[%s10474_s11 + $0x7e0] sm:$0xff]  ;;  %v1500_v63 = vld [vmem:[%s10474_s11 + $0x7f0] sm:$0xff] }
  0x58   : > { %v1502_v0 = vld [vmem:[%s10474_s11 + $0x800] sm:$0xff]  ;;  %1499 = vst [vmem:[%s10479_s12 + $0x3f0] sm:$0xff] %v1498_v62  ;;  %1501 = vst [vmem:[%s10479_s12 + $0x3f8] sm:$0xff] %v1500_v63  ;;  %v1504_v1 = vld [vmem:[%s10474_s11 + $0x810] sm:$0xff] }
  0x59   : > { %1503 = vst [vmem:[%s10479_s12 + $0x400] sm:$0xff] %v1502_v0  ;;  %v1506_v2 = vld [vmem:[%s10474_s11 + $0x820] sm:$0xff]  ;;  %v1508_v3 = vld [vmem:[%s10474_s11 + $0x830] sm:$0xff]  ;;  %1505 = vst [vmem:[%s10479_s12 + $0x408] sm:$0xff] %v1504_v1 }
  0x5a   : > { %1507 = vst [vmem:[%s10479_s12 + $0x410] sm:$0xff] %v1506_v2  ;;  %1509 = vst [vmem:[%s10479_s12 + $0x418] sm:$0xff] %v1508_v3  ;;  %v1510_v4 = vld [vmem:[%s10474_s11 + $0x840] sm:$0xff]  ;;  %v1512_v5 = vld [vmem:[%s10474_s11 + $0x850] sm:$0xff] }
  0x5b   : > { %v1514_v6 = vld [vmem:[%s10474_s11 + $0x860] sm:$0xff]  ;;  %1511 = vst [vmem:[%s10479_s12 + $0x420] sm:$0xff] %v1510_v4  ;;  %1513 = vst [vmem:[%s10479_s12 + $0x428] sm:$0xff] %v1512_v5  ;;  %v1516_v7 = vld [vmem:[%s10474_s11 + $0x870] sm:$0xff] }
  0x5c   : > { %1515 = vst [vmem:[%s10479_s12 + $0x430] sm:$0xff] %v1514_v6  ;;  %v1518_v8 = vld [vmem:[%s10474_s11 + $0x880] sm:$0xff]  ;;  %v1520_v9 = vld [vmem:[%s10474_s11 + $0x890] sm:$0xff]  ;;  %1517 = vst [vmem:[%s10479_s12 + $0x438] sm:$0xff] %v1516_v7 }
  0x5d   : > { %1519 = vst [vmem:[%s10479_s12 + $0x440] sm:$0xff] %v1518_v8  ;;  %1521 = vst [vmem:[%s10479_s12 + $0x448] sm:$0xff] %v1520_v9  ;;  %v1522_v10 = vld [vmem:[%s10474_s11 + $0x8a0] sm:$0xff]  ;;  %v1524_v11 = vld [vmem:[%s10474_s11 + $0x8b0] sm:$0xff] }
  0x5e   : > { %v1526_v12 = vld [vmem:[%s10474_s11 + $0x8c0] sm:$0xff]  ;;  %1523 = vst [vmem:[%s10479_s12 + $0x450] sm:$0xff] %v1522_v10  ;;  %1525 = vst [vmem:[%s10479_s12 + $0x458] sm:$0xff] %v1524_v11  ;;  %v1528_v13 = vld [vmem:[%s10474_s11 + $0x8d0] sm:$0xff] }
  0x5f   : > { %1527 = vst [vmem:[%s10479_s12 + $0x460] sm:$0xff] %v1526_v12  ;;  %v1530_v14 = vld [vmem:[%s10474_s11 + $0x8e0] sm:$0xff]  ;;  %v1532_v15 = vld [vmem:[%s10474_s11 + $0x8f0] sm:$0xff]  ;;  %1529 = vst [vmem:[%s10479_s12 + $0x468] sm:$0xff] %v1528_v13 }
  0x60   : > { %1531 = vst [vmem:[%s10479_s12 + $0x470] sm:$0xff] %v1530_v14  ;;  %1533 = vst [vmem:[%s10479_s12 + $0x478] sm:$0xff] %v1532_v15  ;;  %v1534_v16 = vld [vmem:[%s10474_s11 + $0x900] sm:$0xff]  ;;  %v1536_v17 = vld [vmem:[%s10474_s11 + $0x910] sm:$0xff] }
  0x61   : > { %v1538_v18 = vld [vmem:[%s10474_s11 + $0x920] sm:$0xff]  ;;  %1535 = vst [vmem:[%s10479_s12 + $0x480] sm:$0xff] %v1534_v16  ;;  %1537 = vst [vmem:[%s10479_s12 + $0x488] sm:$0xff] %v1536_v17  ;;  %v1540_v19 = vld [vmem:[%s10474_s11 + $0x930] sm:$0xff] }
  0x62   : > { %1539 = vst [vmem:[%s10479_s12 + $0x490] sm:$0xff] %v1538_v18  ;;  %v1542_v20 = vld [vmem:[%s10474_s11 + $0x940] sm:$0xff]  ;;  %v1544_v21 = vld [vmem:[%s10474_s11 + $0x950] sm:$0xff]  ;;  %1541 = vst [vmem:[%s10479_s12 + $0x498] sm:$0xff] %v1540_v19 }
  0x63   : > { %1543 = vst [vmem:[%s10479_s12 + $0x4a0] sm:$0xff] %v1542_v20  ;;  %1545 = vst [vmem:[%s10479_s12 + $0x4a8] sm:$0xff] %v1544_v21  ;;  %v1546_v22 = vld [vmem:[%s10474_s11 + $0x960] sm:$0xff]  ;;  %v1548_v23 = vld [vmem:[%s10474_s11 + $0x970] sm:$0xff] }
  0x64   : > { %v1550_v24 = vld [vmem:[%s10474_s11 + $0x980] sm:$0xff]  ;;  %1547 = vst [vmem:[%s10479_s12 + $0x4b0] sm:$0xff] %v1546_v22  ;;  %1549 = vst [vmem:[%s10479_s12 + $0x4b8] sm:$0xff] %v1548_v23  ;;  %v1552_v25 = vld [vmem:[%s10474_s11 + $0x990] sm:$0xff] }
  0x65   : > { %1551 = vst [vmem:[%s10479_s12 + $0x4c0] sm:$0xff] %v1550_v24  ;;  %v1554_v26 = vld [vmem:[%s10474_s11 + $0x9a0] sm:$0xff]  ;;  %v1556_v27 = vld [vmem:[%s10474_s11 + $0x9b0] sm:$0xff]  ;;  %1553 = vst [vmem:[%s10479_s12 + $0x4c8] sm:$0xff] %v1552_v25 }
  0x66   : > { %1555 = vst [vmem:[%s10479_s12 + $0x4d0] sm:$0xff] %v1554_v26  ;;  %1557 = vst [vmem:[%s10479_s12 + $0x4d8] sm:$0xff] %v1556_v27  ;;  %v1558_v28 = vld [vmem:[%s10474_s11 + $0x9c0] sm:$0xff]  ;;  %v1560_v29 = vld [vmem:[%s10474_s11 + $0x9d0] sm:$0xff] }
  0x67   : > { %v1562_v30 = vld [vmem:[%s10474_s11 + $0x9e0] sm:$0xff]  ;;  %1559 = vst [vmem:[%s10479_s12 + $0x4e0] sm:$0xff] %v1558_v28  ;;  %1561 = vst [vmem:[%s10479_s12 + $0x4e8] sm:$0xff] %v1560_v29  ;;  %v1564_v31 = vld [vmem:[%s10474_s11 + $0x9f0] sm:$0xff] }
  0x68   : > { %1563 = vst [vmem:[%s10479_s12 + $0x4f0] sm:$0xff] %v1562_v30  ;;  %v1566_v32 = vld [vmem:[%s10474_s11 + $0xa00] sm:$0xff]  ;;  %v1568_v33 = vld [vmem:[%s10474_s11 + $0xa10] sm:$0xff]  ;;  %1565 = vst [vmem:[%s10479_s12 + $0x4f8] sm:$0xff] %v1564_v31 }
  0x69   : > { %1567 = vst [vmem:[%s10479_s12 + $0x500] sm:$0xff] %v1566_v32  ;;  %1569 = vst [vmem:[%s10479_s12 + $0x508] sm:$0xff] %v1568_v33  ;;  %v1570_v34 = vld [vmem:[%s10474_s11 + $0xa20] sm:$0xff]  ;;  %v1572_v35 = vld [vmem:[%s10474_s11 + $0xa30] sm:$0xff] }
  0x6a   : > { %v1574_v36 = vld [vmem:[%s10474_s11 + $0xa40] sm:$0xff]  ;;  %1571 = vst [vmem:[%s10479_s12 + $0x510] sm:$0xff] %v1570_v34  ;;  %1573 = vst [vmem:[%s10479_s12 + $0x518] sm:$0xff] %v1572_v35  ;;  %v1576_v37 = vld [vmem:[%s10474_s11 + $0xa50] sm:$0xff] }
  0x6b   : > { %1575 = vst [vmem:[%s10479_s12 + $0x520] sm:$0xff] %v1574_v36  ;;  %v1578_v38 = vld [vmem:[%s10474_s11 + $0xa60] sm:$0xff]  ;;  %v1580_v39 = vld [vmem:[%s10474_s11 + $0xa70] sm:$0xff]  ;;  %1577 = vst [vmem:[%s10479_s12 + $0x528] sm:$0xff] %v1576_v37 }
  0x6c   : > { %1579 = vst [vmem:[%s10479_s12 + $0x530] sm:$0xff] %v1578_v38  ;;  %1581 = vst [vmem:[%s10479_s12 + $0x538] sm:$0xff] %v1580_v39  ;;  %v1582_v40 = vld [vmem:[%s10474_s11 + $0xa80] sm:$0xff]  ;;  %v1584_v41 = vld [vmem:[%s10474_s11 + $0xa90] sm:$0xff] }
  0x6d   : > { %v1586_v42 = vld [vmem:[%s10474_s11 + $0xaa0] sm:$0xff]  ;;  %1583 = vst [vmem:[%s10479_s12 + $0x540] sm:$0xff] %v1582_v40  ;;  %1585 = vst [vmem:[%s10479_s12 + $0x548] sm:$0xff] %v1584_v41  ;;  %v1588_v43 = vld [vmem:[%s10474_s11 + $0xab0] sm:$0xff] }
  0x6e   : > { %1587 = vst [vmem:[%s10479_s12 + $0x550] sm:$0xff] %v1586_v42  ;;  %v1590_v44 = vld [vmem:[%s10474_s11 + $0xac0] sm:$0xff]  ;;  %v1592_v45 = vld [vmem:[%s10474_s11 + $0xad0] sm:$0xff]  ;;  %1589 = vst [vmem:[%s10479_s12 + $0x558] sm:$0xff] %v1588_v43 }
  0x6f   : > { %1591 = vst [vmem:[%s10479_s12 + $0x560] sm:$0xff] %v1590_v44  ;;  %1593 = vst [vmem:[%s10479_s12 + $0x568] sm:$0xff] %v1592_v45  ;;  %v1594_v46 = vld [vmem:[%s10474_s11 + $0xae0] sm:$0xff]  ;;  %v1596_v47 = vld [vmem:[%s10474_s11 + $0xaf0] sm:$0xff] }
  0x70   : > { %v1598_v48 = vld [vmem:[%s10474_s11 + $0xb00] sm:$0xff]  ;;  %1595 = vst [vmem:[%s10479_s12 + $0x570] sm:$0xff] %v1594_v46  ;;  %1597 = vst [vmem:[%s10479_s12 + $0x578] sm:$0xff] %v1596_v47  ;;  %v1600_v49 = vld [vmem:[%s10474_s11 + $0xb10] sm:$0xff] }
  0x71   : > { %1599 = vst [vmem:[%s10479_s12 + $0x580] sm:$0xff] %v1598_v48  ;;  %v1602_v50 = vld [vmem:[%s10474_s11 + $0xb20] sm:$0xff]  ;;  %v1604_v51 = vld [vmem:[%s10474_s11 + $0xb30] sm:$0xff]  ;;  %1601 = vst [vmem:[%s10479_s12 + $0x588] sm:$0xff] %v1600_v49 }
  0x72   : > { %1603 = vst [vmem:[%s10479_s12 + $0x590] sm:$0xff] %v1602_v50  ;;  %1605 = vst [vmem:[%s10479_s12 + $0x598] sm:$0xff] %v1604_v51  ;;  %v1606_v52 = vld [vmem:[%s10474_s11 + $0xb40] sm:$0xff]  ;;  %v1608_v53 = vld [vmem:[%s10474_s11 + $0xb50] sm:$0xff] }
  0x73   : > { %v1610_v54 = vld [vmem:[%s10474_s11 + $0xb60] sm:$0xff]  ;;  %1607 = vst [vmem:[%s10479_s12 + $0x5a0] sm:$0xff] %v1606_v52  ;;  %1609 = vst [vmem:[%s10479_s12 + $0x5a8] sm:$0xff] %v1608_v53  ;;  %v1612_v55 = vld [vmem:[%s10474_s11 + $0xb70] sm:$0xff] }
  0x74   : > { %1611 = vst [vmem:[%s10479_s12 + $0x5b0] sm:$0xff] %v1610_v54  ;;  %v1614_v56 = vld [vmem:[%s10474_s11 + $0xb80] sm:$0xff]  ;;  %v1616_v57 = vld [vmem:[%s10474_s11 + $0xb90] sm:$0xff]  ;;  %1613 = vst [vmem:[%s10479_s12 + $0x5b8] sm:$0xff] %v1612_v55 }
  0x75   : > { %1615 = vst [vmem:[%s10479_s12 + $0x5c0] sm:$0xff] %v1614_v56  ;;  %1617 = vst [vmem:[%s10479_s12 + $0x5c8] sm:$0xff] %v1616_v57  ;;  %v1618_v58 = vld [vmem:[%s10474_s11 + $0xba0] sm:$0xff]  ;;  %v1620_v59 = vld [vmem:[%s10474_s11 + $0xbb0] sm:$0xff] }
  0x76   : > { %v1622_v60 = vld [vmem:[%s10474_s11 + $0xbc0] sm:$0xff]  ;;  %1619 = vst [vmem:[%s10479_s12 + $0x5d0] sm:$0xff] %v1618_v58  ;;  %1621 = vst [vmem:[%s10479_s12 + $0x5d8] sm:$0xff] %v1620_v59  ;;  %v1624_v61 = vld [vmem:[%s10474_s11 + $0xbd0] sm:$0xff] }
  0x77   : > { %1623 = vst [vmem:[%s10479_s12 + $0x5e0] sm:$0xff] %v1622_v60  ;;  %v1626_v62 = vld [vmem:[%s10474_s11 + $0xbe0] sm:$0xff]  ;;  %v1628_v63 = vld [vmem:[%s10474_s11 + $0xbf0] sm:$0xff]  ;;  %1625 = vst [vmem:[%s10479_s12 + $0x5e8] sm:$0xff] %v1624_v61 }
  0x78   : > { %1627 = vst [vmem:[%s10479_s12 + $0x5f0] sm:$0xff] %v1626_v62  ;;  %1629 = vst [vmem:[%s10479_s12 + $0x5f8] sm:$0xff] %v1628_v63  ;;  %v1630_v0 = vld [vmem:[%s10474_s11 + $0xc00] sm:$0xff]  ;;  %v1632_v1 = vld [vmem:[%s10474_s11 + $0xc10] sm:$0xff] }
  0x79   : > { %v1634_v2 = vld [vmem:[%s10474_s11 + $0xc20] sm:$0xff]  ;;  %1631 = vst [vmem:[%s10479_s12 + $0x600] sm:$0xff] %v1630_v0  ;;  %1633 = vst [vmem:[%s10479_s12 + $0x608] sm:$0xff] %v1632_v1  ;;  %v1636_v3 = vld [vmem:[%s10474_s11 + $0xc30] sm:$0xff] }
  0x7a   : > { %1635 = vst [vmem:[%s10479_s12 + $0x610] sm:$0xff] %v1634_v2  ;;  %v1638_v4 = vld [vmem:[%s10474_s11 + $0xc40] sm:$0xff]  ;;  %v1640_v5 = vld [vmem:[%s10474_s11 + $0xc50] sm:$0xff]  ;;  %1637 = vst [vmem:[%s10479_s12 + $0x618] sm:$0xff] %v1636_v3 }
  0x7b   : > { %1639 = vst [vmem:[%s10479_s12 + $0x620] sm:$0xff] %v1638_v4  ;;  %1641 = vst [vmem:[%s10479_s12 + $0x628] sm:$0xff] %v1640_v5  ;;  %v1642_v6 = vld [vmem:[%s10474_s11 + $0xc60] sm:$0xff]  ;;  %v1644_v7 = vld [vmem:[%s10474_s11 + $0xc70] sm:$0xff] }
  0x7c   : > { %v1646_v8 = vld [vmem:[%s10474_s11 + $0xc80] sm:$0xff]  ;;  %1643 = vst [vmem:[%s10479_s12 + $0x630] sm:$0xff] %v1642_v6  ;;  %1645 = vst [vmem:[%s10479_s12 + $0x638] sm:$0xff] %v1644_v7  ;;  %v1648_v9 = vld [vmem:[%s10474_s11 + $0xc90] sm:$0xff] }
  0x7d   : > { %1647 = vst [vmem:[%s10479_s12 + $0x640] sm:$0xff] %v1646_v8  ;;  %v1650_v10 = vld [vmem:[%s10474_s11 + $0xca0] sm:$0xff]  ;;  %v1652_v11 = vld [vmem:[%s10474_s11 + $0xcb0] sm:$0xff]  ;;  %1649 = vst [vmem:[%s10479_s12 + $0x648] sm:$0xff] %v1648_v9 }
  0x7e   : > { %1651 = vst [vmem:[%s10479_s12 + $0x650] sm:$0xff] %v1650_v10  ;;  %1653 = vst [vmem:[%s10479_s12 + $0x658] sm:$0xff] %v1652_v11  ;;  %v1654_v12 = vld [vmem:[%s10474_s11 + $0xcc0] sm:$0xff]  ;;  %v1656_v13 = vld [vmem:[%s10474_s11 + $0xcd0] sm:$0xff] }
  0x7f   : > { %v1658_v14 = vld [vmem:[%s10474_s11 + $0xce0] sm:$0xff]  ;;  %1655 = vst [vmem:[%s10479_s12 + $0x660] sm:$0xff] %v1654_v12  ;;  %1657 = vst [vmem:[%s10479_s12 + $0x668] sm:$0xff] %v1656_v13  ;;  %v1660_v15 = vld [vmem:[%s10474_s11 + $0xcf0] sm:$0xff] }
  0x80   : > { %1659 = vst [vmem:[%s10479_s12 + $0x670] sm:$0xff] %v1658_v14  ;;  %v1662_v16 = vld [vmem:[%s10474_s11 + $0xd00] sm:$0xff]  ;;  %v1664_v17 = vld [vmem:[%s10474_s11 + $0xd10] sm:$0xff]  ;;  %1661 = vst [vmem:[%s10479_s12 + $0x678] sm:$0xff] %v1660_v15 }
  0x81   : > { %1663 = vst [vmem:[%s10479_s12 + $0x680] sm:$0xff] %v1662_v16  ;;  %1665 = vst [vmem:[%s10479_s12 + $0x688] sm:$0xff] %v1664_v17  ;;  %v1666_v18 = vld [vmem:[%s10474_s11 + $0xd20] sm:$0xff]  ;;  %v1668_v19 = vld [vmem:[%s10474_s11 + $0xd30] sm:$0xff] }
  0x82   : > { %v1670_v20 = vld [vmem:[%s10474_s11 + $0xd40] sm:$0xff]  ;;  %1667 = vst [vmem:[%s10479_s12 + $0x690] sm:$0xff] %v1666_v18  ;;  %1669 = vst [vmem:[%s10479_s12 + $0x698] sm:$0xff] %v1668_v19  ;;  %v1672_v21 = vld [vmem:[%s10474_s11 + $0xd50] sm:$0xff] }
  0x83   : > { %1671 = vst [vmem:[%s10479_s12 + $0x6a0] sm:$0xff] %v1670_v20  ;;  %v1674_v22 = vld [vmem:[%s10474_s11 + $0xd60] sm:$0xff]  ;;  %v1676_v23 = vld [vmem:[%s10474_s11 + $0xd70] sm:$0xff]  ;;  %1673 = vst [vmem:[%s10479_s12 + $0x6a8] sm:$0xff] %v1672_v21 }
  0x84   : > { %1675 = vst [vmem:[%s10479_s12 + $0x6b0] sm:$0xff] %v1674_v22  ;;  %1677 = vst [vmem:[%s10479_s12 + $0x6b8] sm:$0xff] %v1676_v23  ;;  %v1678_v24 = vld [vmem:[%s10474_s11 + $0xd80] sm:$0xff]  ;;  %v1680_v25 = vld [vmem:[%s10474_s11 + $0xd90] sm:$0xff] }
  0x85   : > { %v1682_v26 = vld [vmem:[%s10474_s11 + $0xda0] sm:$0xff]  ;;  %1679 = vst [vmem:[%s10479_s12 + $0x6c0] sm:$0xff] %v1678_v24  ;;  %1681 = vst [vmem:[%s10479_s12 + $0x6c8] sm:$0xff] %v1680_v25  ;;  %v1684_v27 = vld [vmem:[%s10474_s11 + $0xdb0] sm:$0xff] }
  0x86   : > { %1683 = vst [vmem:[%s10479_s12 + $0x6d0] sm:$0xff] %v1682_v26  ;;  %v1686_v28 = vld [vmem:[%s10474_s11 + $0xdc0] sm:$0xff]  ;;  %v1688_v29 = vld [vmem:[%s10474_s11 + $0xdd0] sm:$0xff]  ;;  %1685 = vst [vmem:[%s10479_s12 + $0x6d8] sm:$0xff] %v1684_v27 }
  0x87   : > { %1687 = vst [vmem:[%s10479_s12 + $0x6e0] sm:$0xff] %v1686_v28  ;;  %1689 = vst [vmem:[%s10479_s12 + $0x6e8] sm:$0xff] %v1688_v29  ;;  %v1690_v30 = vld [vmem:[%s10474_s11 + $0xde0] sm:$0xff]  ;;  %v1692_v31 = vld [vmem:[%s10474_s11 + $0xdf0] sm:$0xff] }
  0x88   : > { %v1694_v32 = vld [vmem:[%s10474_s11 + $0xe00] sm:$0xff]  ;;  %1691 = vst [vmem:[%s10479_s12 + $0x6f0] sm:$0xff] %v1690_v30  ;;  %1693 = vst [vmem:[%s10479_s12 + $0x6f8] sm:$0xff] %v1692_v31  ;;  %v1696_v33 = vld [vmem:[%s10474_s11 + $0xe10] sm:$0xff] }
  0x89   : > { %1695 = vst [vmem:[%s10479_s12 + $0x700] sm:$0xff] %v1694_v32  ;;  %v1698_v34 = vld [vmem:[%s10474_s11 + $0xe20] sm:$0xff]  ;;  %v1700_v35 = vld [vmem:[%s10474_s11 + $0xe30] sm:$0xff]  ;;  %1697 = vst [vmem:[%s10479_s12 + $0x708] sm:$0xff] %v1696_v33 }
  0x8a   : > { %1699 = vst [vmem:[%s10479_s12 + $0x710] sm:$0xff] %v1698_v34  ;;  %1701 = vst [vmem:[%s10479_s12 + $0x718] sm:$0xff] %v1700_v35  ;;  %v1702_v36 = vld [vmem:[%s10474_s11 + $0xe40] sm:$0xff]  ;;  %v1704_v37 = vld [vmem:[%s10474_s11 + $0xe50] sm:$0xff] }
  0x8b   : > { %v1706_v38 = vld [vmem:[%s10474_s11 + $0xe60] sm:$0xff]  ;;  %1703 = vst [vmem:[%s10479_s12 + $0x720] sm:$0xff] %v1702_v36  ;;  %1705 = vst [vmem:[%s10479_s12 + $0x728] sm:$0xff] %v1704_v37  ;;  %v1708_v39 = vld [vmem:[%s10474_s11 + $0xe70] sm:$0xff] }
  0x8c   : > { %1707 = vst [vmem:[%s10479_s12 + $0x730] sm:$0xff] %v1706_v38  ;;  %v1710_v40 = vld [vmem:[%s10474_s11 + $0xe80] sm:$0xff]  ;;  %v1712_v41 = vld [vmem:[%s10474_s11 + $0xe90] sm:$0xff]  ;;  %1709 = vst [vmem:[%s10479_s12 + $0x738] sm:$0xff] %v1708_v39 }
  0x8d   : > { %1711 = vst [vmem:[%s10479_s12 + $0x740] sm:$0xff] %v1710_v40  ;;  %1713 = vst [vmem:[%s10479_s12 + $0x748] sm:$0xff] %v1712_v41  ;;  %v1714_v42 = vld [vmem:[%s10474_s11 + $0xea0] sm:$0xff]  ;;  %v1716_v43 = vld [vmem:[%s10474_s11 + $0xeb0] sm:$0xff] }
  0x8e   : > { %v1718_v44 = vld [vmem:[%s10474_s11 + $0xec0] sm:$0xff]  ;;  %1715 = vst [vmem:[%s10479_s12 + $0x750] sm:$0xff] %v1714_v42  ;;  %1717 = vst [vmem:[%s10479_s12 + $0x758] sm:$0xff] %v1716_v43  ;;  %v1720_v45 = vld [vmem:[%s10474_s11 + $0xed0] sm:$0xff] }
  0x8f   : > { %1719 = vst [vmem:[%s10479_s12 + $0x760] sm:$0xff] %v1718_v44  ;;  %v1722_v46 = vld [vmem:[%s10474_s11 + $0xee0] sm:$0xff]  ;;  %v1724_v47 = vld [vmem:[%s10474_s11 + $0xef0] sm:$0xff]  ;;  %1721 = vst [vmem:[%s10479_s12 + $0x768] sm:$0xff] %v1720_v45 }
  0x90   : > { %1723 = vst [vmem:[%s10479_s12 + $0x770] sm:$0xff] %v1722_v46  ;;  %1725 = vst [vmem:[%s10479_s12 + $0x778] sm:$0xff] %v1724_v47  ;;  %v1726_v48 = vld [vmem:[%s10474_s11 + $0xf00] sm:$0xff]  ;;  %v1728_v49 = vld [vmem:[%s10474_s11 + $0xf10] sm:$0xff] }
  0x91   : > { %v1730_v50 = vld [vmem:[%s10474_s11 + $0xf20] sm:$0xff]  ;;  %1727 = vst [vmem:[%s10479_s12 + $0x780] sm:$0xff] %v1726_v48  ;;  %1729 = vst [vmem:[%s10479_s12 + $0x788] sm:$0xff] %v1728_v49  ;;  %v1732_v51 = vld [vmem:[%s10474_s11 + $0xf30] sm:$0xff] }
  0x92   : > { %1731 = vst [vmem:[%s10479_s12 + $0x790] sm:$0xff] %v1730_v50  ;;  %v1734_v52 = vld [vmem:[%s10474_s11 + $0xf40] sm:$0xff]  ;;  %v1736_v53 = vld [vmem:[%s10474_s11 + $0xf50] sm:$0xff]  ;;  %1733 = vst [vmem:[%s10479_s12 + $0x798] sm:$0xff] %v1732_v51 }
  0x93   : > { %1735 = vst [vmem:[%s10479_s12 + $0x7a0] sm:$0xff] %v1734_v52  ;;  %1737 = vst [vmem:[%s10479_s12 + $0x7a8] sm:$0xff] %v1736_v53  ;;  %v1738_v54 = vld [vmem:[%s10474_s11 + $0xf60] sm:$0xff]  ;;  %v1740_v55 = vld [vmem:[%s10474_s11 + $0xf70] sm:$0xff] }
  0x94   : > { %v1742_v56 = vld [vmem:[%s10474_s11 + $0xf80] sm:$0xff]  ;;  %1739 = vst [vmem:[%s10479_s12 + $0x7b0] sm:$0xff] %v1738_v54  ;;  %1741 = vst [vmem:[%s10479_s12 + $0x7b8] sm:$0xff] %v1740_v55  ;;  %v1744_v57 = vld [vmem:[%s10474_s11 + $0xf90] sm:$0xff] }
  0x95   : > { %1743 = vst [vmem:[%s10479_s12 + $0x7c0] sm:$0xff] %v1742_v56  ;;  %v1746_v58 = vld [vmem:[%s10474_s11 + $0xfa0] sm:$0xff]  ;;  %v1748_v59 = vld [vmem:[%s10474_s11 + $0xfb0] sm:$0xff]  ;;  %1745 = vst [vmem:[%s10479_s12 + $0x7c8] sm:$0xff] %v1744_v57 }
  0x96   : > { %1747 = vst [vmem:[%s10479_s12 + $0x7d0] sm:$0xff] %v1746_v58  ;;  %1749 = vst [vmem:[%s10479_s12 + $0x7d8] sm:$0xff] %v1748_v59  ;;  %v1750_v60 = vld [vmem:[%s10474_s11 + $0xfc0] sm:$0xff]  ;;  %v1752_v61 = vld [vmem:[%s10474_s11 + $0xfd0] sm:$0xff] }
  0x97   : > { %v1754_v62 = vld [vmem:[%s10474_s11 + $0xfe0] sm:$0xff]  ;;  %1751 = vst [vmem:[%s10479_s12 + $0x7e0] sm:$0xff] %v1750_v60  ;;  %1753 = vst [vmem:[%s10479_s12 + $0x7e8] sm:$0xff] %v1752_v61  ;;  %v1756_v63 = vld [vmem:[%s10474_s11 + $0xff0] sm:$0xff] }
  0x98   : > { %1755 = vst [vmem:[%s10479_s12 + $0x7f0] sm:$0xff] %v1754_v62  ;;  %v1758_v0 = vld [vmem:[%s10474_s11 + $0x1000] sm:$0xff]  ;;  %v1760_v1 = vld [vmem:[%s10474_s11 + $0x1010] sm:$0xff]  ;;  %1757 = vst [vmem:[%s10479_s12 + $0x7f8] sm:$0xff] %v1756_v63 }
  0x99   : > { %1759 = vst [vmem:[%s10479_s12 + $0x800] sm:$0xff] %v1758_v0  ;;  %1761 = vst [vmem:[%s10479_s12 + $0x808] sm:$0xff] %v1760_v1  ;;  %v1762_v2 = vld [vmem:[%s10474_s11 + $0x1020] sm:$0xff]  ;;  %v1764_v3 = vld [vmem:[%s10474_s11 + $0x1030] sm:$0xff] }
  0x9a   : > { %v1766_v4 = vld [vmem:[%s10474_s11 + $0x1040] sm:$0xff]  ;;  %1763 = vst [vmem:[%s10479_s12 + $0x810] sm:$0xff] %v1762_v2  ;;  %1765 = vst [vmem:[%s10479_s12 + $0x818] sm:$0xff] %v1764_v3  ;;  %v1768_v5 = vld [vmem:[%s10474_s11 + $0x1050] sm:$0xff] }
  0x9b   : > { %1767 = vst [vmem:[%s10479_s12 + $0x820] sm:$0xff] %v1766_v4  ;;  %v1770_v6 = vld [vmem:[%s10474_s11 + $0x1060] sm:$0xff]  ;;  %v1772_v7 = vld [vmem:[%s10474_s11 + $0x1070] sm:$0xff]  ;;  %1769 = vst [vmem:[%s10479_s12 + $0x828] sm:$0xff] %v1768_v5 }
  0x9c   : > { %1771 = vst [vmem:[%s10479_s12 + $0x830] sm:$0xff] %v1770_v6  ;;  %1773 = vst [vmem:[%s10479_s12 + $0x838] sm:$0xff] %v1772_v7  ;;  %v1774_v8 = vld [vmem:[%s10474_s11 + $0x1080] sm:$0xff]  ;;  %v1776_v9 = vld [vmem:[%s10474_s11 + $0x1090] sm:$0xff] }
  0x9d   : > { %v1778_v10 = vld [vmem:[%s10474_s11 + $0x10a0] sm:$0xff]  ;;  %1775 = vst [vmem:[%s10479_s12 + $0x840] sm:$0xff] %v1774_v8  ;;  %1777 = vst [vmem:[%s10479_s12 + $0x848] sm:$0xff] %v1776_v9  ;;  %v1780_v11 = vld [vmem:[%s10474_s11 + $0x10b0] sm:$0xff] }
  0x9e   : > { %1779 = vst [vmem:[%s10479_s12 + $0x850] sm:$0xff] %v1778_v10  ;;  %v1782_v12 = vld [vmem:[%s10474_s11 + $0x10c0] sm:$0xff]  ;;  %v1784_v13 = vld [vmem:[%s10474_s11 + $0x10d0] sm:$0xff]  ;;  %1781 = vst [vmem:[%s10479_s12 + $0x858] sm:$0xff] %v1780_v11 }
  0x9f   : > { %1783 = vst [vmem:[%s10479_s12 + $0x860] sm:$0xff] %v1782_v12  ;;  %1785 = vst [vmem:[%s10479_s12 + $0x868] sm:$0xff] %v1784_v13  ;;  %v1786_v14 = vld [vmem:[%s10474_s11 + $0x10e0] sm:$0xff]  ;;  %v1788_v15 = vld [vmem:[%s10474_s11 + $0x10f0] sm:$0xff] }
  0xa0   : > { %v1790_v16 = vld [vmem:[%s10474_s11 + $0x1100] sm:$0xff]  ;;  %1787 = vst [vmem:[%s10479_s12 + $0x870] sm:$0xff] %v1786_v14  ;;  %1789 = vst [vmem:[%s10479_s12 + $0x878] sm:$0xff] %v1788_v15  ;;  %v1792_v17 = vld [vmem:[%s10474_s11 + $0x1110] sm:$0xff] }
  0xa1   : > { %1791 = vst [vmem:[%s10479_s12 + $0x880] sm:$0xff] %v1790_v16  ;;  %v1794_v18 = vld [vmem:[%s10474_s11 + $0x1120] sm:$0xff]  ;;  %v1796_v19 = vld [vmem:[%s10474_s11 + $0x1130] sm:$0xff]  ;;  %1793 = vst [vmem:[%s10479_s12 + $0x888] sm:$0xff] %v1792_v17 }
  0xa2   : > { %1795 = vst [vmem:[%s10479_s12 + $0x890] sm:$0xff] %v1794_v18  ;;  %1797 = vst [vmem:[%s10479_s12 + $0x898] sm:$0xff] %v1796_v19  ;;  %v1798_v20 = vld [vmem:[%s10474_s11 + $0x1140] sm:$0xff]  ;;  %v1800_v21 = vld [vmem:[%s10474_s11 + $0x1150] sm:$0xff] }
  0xa3   : > { %v1802_v22 = vld [vmem:[%s10474_s11 + $0x1160] sm:$0xff]  ;;  %1799 = vst [vmem:[%s10479_s12 + $0x8a0] sm:$0xff] %v1798_v20  ;;  %1801 = vst [vmem:[%s10479_s12 + $0x8a8] sm:$0xff] %v1800_v21  ;;  %v1804_v23 = vld [vmem:[%s10474_s11 + $0x1170] sm:$0xff] }
  0xa4   : > { %1803 = vst [vmem:[%s10479_s12 + $0x8b0] sm:$0xff] %v1802_v22  ;;  %v1806_v24 = vld [vmem:[%s10474_s11 + $0x1180] sm:$0xff]  ;;  %v1808_v25 = vld [vmem:[%s10474_s11 + $0x1190] sm:$0xff]  ;;  %1805 = vst [vmem:[%s10479_s12 + $0x8b8] sm:$0xff] %v1804_v23 }
  0xa5   : > { %1807 = vst [vmem:[%s10479_s12 + $0x8c0] sm:$0xff] %v1806_v24  ;;  %1809 = vst [vmem:[%s10479_s12 + $0x8c8] sm:$0xff] %v1808_v25  ;;  %v1810_v26 = vld [vmem:[%s10474_s11 + $0x11a0] sm:$0xff]  ;;  %v1812_v27 = vld [vmem:[%s10474_s11 + $0x11b0] sm:$0xff] }
  0xa6   : > { %v1814_v28 = vld [vmem:[%s10474_s11 + $0x11c0] sm:$0xff]  ;;  %1811 = vst [vmem:[%s10479_s12 + $0x8d0] sm:$0xff] %v1810_v26  ;;  %1813 = vst [vmem:[%s10479_s12 + $0x8d8] sm:$0xff] %v1812_v27  ;;  %v1816_v29 = vld [vmem:[%s10474_s11 + $0x11d0] sm:$0xff] }
  0xa7   : > { %1815 = vst [vmem:[%s10479_s12 + $0x8e0] sm:$0xff] %v1814_v28  ;;  %v1818_v30 = vld [vmem:[%s10474_s11 + $0x11e0] sm:$0xff]  ;;  %v1820_v31 = vld [vmem:[%s10474_s11 + $0x11f0] sm:$0xff]  ;;  %1817 = vst [vmem:[%s10479_s12 + $0x8e8] sm:$0xff] %v1816_v29 }
  0xa8   : > { %1819 = vst [vmem:[%s10479_s12 + $0x8f0] sm:$0xff] %v1818_v30  ;;  %1821 = vst [vmem:[%s10479_s12 + $0x8f8] sm:$0xff] %v1820_v31  ;;  %v1822_v32 = vld [vmem:[%s10474_s11 + $0x1200] sm:$0xff]  ;;  %v1824_v33 = vld [vmem:[%s10474_s11 + $0x1210] sm:$0xff] }
  0xa9   : > { %v1826_v34 = vld [vmem:[%s10474_s11 + $0x1220] sm:$0xff]  ;;  %1823 = vst [vmem:[%s10479_s12 + $0x900] sm:$0xff] %v1822_v32  ;;  %1825 = vst [vmem:[%s10479_s12 + $0x908] sm:$0xff] %v1824_v33  ;;  %v1828_v35 = vld [vmem:[%s10474_s11 + $0x1230] sm:$0xff] }
  0xaa   : > { %1827 = vst [vmem:[%s10479_s12 + $0x910] sm:$0xff] %v1826_v34  ;;  %v1830_v36 = vld [vmem:[%s10474_s11 + $0x1240] sm:$0xff]  ;;  %v1832_v37 = vld [vmem:[%s10474_s11 + $0x1250] sm:$0xff]  ;;  %1829 = vst [vmem:[%s10479_s12 + $0x918] sm:$0xff] %v1828_v35 }
  0xab   : > { %1831 = vst [vmem:[%s10479_s12 + $0x920] sm:$0xff] %v1830_v36  ;;  %1833 = vst [vmem:[%s10479_s12 + $0x928] sm:$0xff] %v1832_v37  ;;  %v1834_v38 = vld [vmem:[%s10474_s11 + $0x1260] sm:$0xff]  ;;  %v1836_v39 = vld [vmem:[%s10474_s11 + $0x1270] sm:$0xff] }
  0xac   : > { %v1838_v40 = vld [vmem:[%s10474_s11 + $0x1280] sm:$0xff]  ;;  %1835 = vst [vmem:[%s10479_s12 + $0x930] sm:$0xff] %v1834_v38  ;;  %1837 = vst [vmem:[%s10479_s12 + $0x938] sm:$0xff] %v1836_v39  ;;  %v1840_v41 = vld [vmem:[%s10474_s11 + $0x1290] sm:$0xff] }
  0xad   : > { %1839 = vst [vmem:[%s10479_s12 + $0x940] sm:$0xff] %v1838_v40  ;;  %v1842_v42 = vld [vmem:[%s10474_s11 + $0x12a0] sm:$0xff]  ;;  %v1844_v43 = vld [vmem:[%s10474_s11 + $0x12b0] sm:$0xff]  ;;  %1841 = vst [vmem:[%s10479_s12 + $0x948] sm:$0xff] %v1840_v41 }
  0xae   : > { %1843 = vst [vmem:[%s10479_s12 + $0x950] sm:$0xff] %v1842_v42  ;;  %1845 = vst [vmem:[%s10479_s12 + $0x958] sm:$0xff] %v1844_v43  ;;  %v1846_v44 = vld [vmem:[%s10474_s11 + $0x12c0] sm:$0xff]  ;;  %v1848_v45 = vld [vmem:[%s10474_s11 + $0x12d0] sm:$0xff] }
  0xaf   : > { %v1850_v46 = vld [vmem:[%s10474_s11 + $0x12e0] sm:$0xff]  ;;  %1847 = vst [vmem:[%s10479_s12 + $0x960] sm:$0xff] %v1846_v44  ;;  %1849 = vst [vmem:[%s10479_s12 + $0x968] sm:$0xff] %v1848_v45  ;;  %v1852_v47 = vld [vmem:[%s10474_s11 + $0x12f0] sm:$0xff] }
  0xb0   : > { %1851 = vst [vmem:[%s10479_s12 + $0x970] sm:$0xff] %v1850_v46  ;;  %v1854_v48 = vld [vmem:[%s10474_s11 + $0x1300] sm:$0xff]  ;;  %v1856_v49 = vld [vmem:[%s10474_s11 + $0x1310] sm:$0xff]  ;;  %1853 = vst [vmem:[%s10479_s12 + $0x978] sm:$0xff] %v1852_v47 }
  0xb1   : > { %1855 = vst [vmem:[%s10479_s12 + $0x980] sm:$0xff] %v1854_v48  ;;  %1857 = vst [vmem:[%s10479_s12 + $0x988] sm:$0xff] %v1856_v49  ;;  %v1858_v50 = vld [vmem:[%s10474_s11 + $0x1320] sm:$0xff]  ;;  %v1860_v51 = vld [vmem:[%s10474_s11 + $0x1330] sm:$0xff] }
  0xb2   : > { %v1862_v52 = vld [vmem:[%s10474_s11 + $0x1340] sm:$0xff]  ;;  %1859 = vst [vmem:[%s10479_s12 + $0x990] sm:$0xff] %v1858_v50  ;;  %1861 = vst [vmem:[%s10479_s12 + $0x998] sm:$0xff] %v1860_v51  ;;  %v1864_v53 = vld [vmem:[%s10474_s11 + $0x1350] sm:$0xff] }
  0xb3   : > { %1863 = vst [vmem:[%s10479_s12 + $0x9a0] sm:$0xff] %v1862_v52  ;;  %v1866_v54 = vld [vmem:[%s10474_s11 + $0x1360] sm:$0xff]  ;;  %v1868_v55 = vld [vmem:[%s10474_s11 + $0x1370] sm:$0xff]  ;;  %1865 = vst [vmem:[%s10479_s12 + $0x9a8] sm:$0xff] %v1864_v53 }
  0xb4   : > { %1867 = vst [vmem:[%s10479_s12 + $0x9b0] sm:$0xff] %v1866_v54  ;;  %1869 = vst [vmem:[%s10479_s12 + $0x9b8] sm:$0xff] %v1868_v55  ;;  %v1870_v56 = vld [vmem:[%s10474_s11 + $0x1380] sm:$0xff]  ;;  %v1872_v57 = vld [vmem:[%s10474_s11 + $0x1390] sm:$0xff] }
  0xb5   : > { %v1874_v58 = vld [vmem:[%s10474_s11 + $0x13a0] sm:$0xff]  ;;  %1871 = vst [vmem:[%s10479_s12 + $0x9c0] sm:$0xff] %v1870_v56  ;;  %1873 = vst [vmem:[%s10479_s12 + $0x9c8] sm:$0xff] %v1872_v57  ;;  %v1876_v59 = vld [vmem:[%s10474_s11 + $0x13b0] sm:$0xff] }
  0xb6   : > { %1875 = vst [vmem:[%s10479_s12 + $0x9d0] sm:$0xff] %v1874_v58  ;;  %v1878_v60 = vld [vmem:[%s10474_s11 + $0x13c0] sm:$0xff]  ;;  %v1880_v61 = vld [vmem:[%s10474_s11 + $0x13d0] sm:$0xff]  ;;  %1877 = vst [vmem:[%s10479_s12 + $0x9d8] sm:$0xff] %v1876_v59 }
  0xb7   : > { %1879 = vst [vmem:[%s10479_s12 + $0x9e0] sm:$0xff] %v1878_v60  ;;  %1881 = vst [vmem:[%s10479_s12 + $0x9e8] sm:$0xff] %v1880_v61  ;;  %v1882_v62 = vld [vmem:[%s10474_s11 + $0x13e0] sm:$0xff]  ;;  %v1884_v63 = vld [vmem:[%s10474_s11 + $0x13f0] sm:$0xff] }
  0xb8   : > { %v1886_v0 = vld [vmem:[%s10474_s11 + $0x1400] sm:$0xff]  ;;  %1883 = vst [vmem:[%s10479_s12 + $0x9f0] sm:$0xff] %v1882_v62  ;;  %1885 = vst [vmem:[%s10479_s12 + $0x9f8] sm:$0xff] %v1884_v63  ;;  %v1888_v1 = vld [vmem:[%s10474_s11 + $0x1410] sm:$0xff] }
  0xb9   : > { %1887 = vst [vmem:[%s10479_s12 + $0xa00] sm:$0xff] %v1886_v0  ;;  %v1890_v2 = vld [vmem:[%s10474_s11 + $0x1420] sm:$0xff]  ;;  %v1892_v3 = vld [vmem:[%s10474_s11 + $0x1430] sm:$0xff]  ;;  %1889 = vst [vmem:[%s10479_s12 + $0xa08] sm:$0xff] %v1888_v1 }
  0xba   : > { %1891 = vst [vmem:[%s10479_s12 + $0xa10] sm:$0xff] %v1890_v2  ;;  %1893 = vst [vmem:[%s10479_s12 + $0xa18] sm:$0xff] %v1892_v3  ;;  %v1894_v4 = vld [vmem:[%s10474_s11 + $0x1440] sm:$0xff]  ;;  %v1896_v5 = vld [vmem:[%s10474_s11 + $0x1450] sm:$0xff] }
  0xbb   : > { %v1898_v6 = vld [vmem:[%s10474_s11 + $0x1460] sm:$0xff]  ;;  %1895 = vst [vmem:[%s10479_s12 + $0xa20] sm:$0xff] %v1894_v4  ;;  %1897 = vst [vmem:[%s10479_s12 + $0xa28] sm:$0xff] %v1896_v5  ;;  %v1900_v7 = vld [vmem:[%s10474_s11 + $0x1470] sm:$0xff] }
  0xbc   : > { %1899 = vst [vmem:[%s10479_s12 + $0xa30] sm:$0xff] %v1898_v6  ;;  %v1902_v8 = vld [vmem:[%s10474_s11 + $0x1480] sm:$0xff]  ;;  %v1904_v9 = vld [vmem:[%s10474_s11 + $0x1490] sm:$0xff]  ;;  %1901 = vst [vmem:[%s10479_s12 + $0xa38] sm:$0xff] %v1900_v7 }
  0xbd   : > { %1903 = vst [vmem:[%s10479_s12 + $0xa40] sm:$0xff] %v1902_v8  ;;  %1905 = vst [vmem:[%s10479_s12 + $0xa48] sm:$0xff] %v1904_v9  ;;  %v1906_v10 = vld [vmem:[%s10474_s11 + $0x14a0] sm:$0xff]  ;;  %v1908_v11 = vld [vmem:[%s10474_s11 + $0x14b0] sm:$0xff] }
  0xbe   : > { %v1910_v12 = vld [vmem:[%s10474_s11 + $0x14c0] sm:$0xff]  ;;  %1907 = vst [vmem:[%s10479_s12 + $0xa50] sm:$0xff] %v1906_v10  ;;  %1909 = vst [vmem:[%s10479_s12 + $0xa58] sm:$0xff] %v1908_v11  ;;  %v1912_v13 = vld [vmem:[%s10474_s11 + $0x14d0] sm:$0xff] }
  0xbf   : > { %1911 = vst [vmem:[%s10479_s12 + $0xa60] sm:$0xff] %v1910_v12  ;;  %v1914_v14 = vld [vmem:[%s10474_s11 + $0x14e0] sm:$0xff]  ;;  %v1916_v15 = vld [vmem:[%s10474_s11 + $0x14f0] sm:$0xff]  ;;  %1913 = vst [vmem:[%s10479_s12 + $0xa68] sm:$0xff] %v1912_v13 }
  0xc0   : > { %1915 = vst [vmem:[%s10479_s12 + $0xa70] sm:$0xff] %v1914_v14  ;;  %1917 = vst [vmem:[%s10479_s12 + $0xa78] sm:$0xff] %v1916_v15  ;;  %v1918_v16 = vld [vmem:[%s10474_s11 + $0x1500] sm:$0xff]  ;;  %v1920_v17 = vld [vmem:[%s10474_s11 + $0x1510] sm:$0xff] }
  0xc1   : > { %v1922_v18 = vld [vmem:[%s10474_s11 + $0x1520] sm:$0xff]  ;;  %1919 = vst [vmem:[%s10479_s12 + $0xa80] sm:$0xff] %v1918_v16  ;;  %1921 = vst [vmem:[%s10479_s12 + $0xa88] sm:$0xff] %v1920_v17  ;;  %v1924_v19 = vld [vmem:[%s10474_s11 + $0x1530] sm:$0xff] }
  0xc2   : > { %1923 = vst [vmem:[%s10479_s12 + $0xa90] sm:$0xff] %v1922_v18  ;;  %v1926_v20 = vld [vmem:[%s10474_s11 + $0x1540] sm:$0xff]  ;;  %v1928_v21 = vld [vmem:[%s10474_s11 + $0x1550] sm:$0xff]  ;;  %1925 = vst [vmem:[%s10479_s12 + $0xa98] sm:$0xff] %v1924_v19 }
  0xc3   : > { %1927 = vst [vmem:[%s10479_s12 + $0xaa0] sm:$0xff] %v1926_v20  ;;  %1929 = vst [vmem:[%s10479_s12 + $0xaa8] sm:$0xff] %v1928_v21  ;;  %v1930_v22 = vld [vmem:[%s10474_s11 + $0x1560] sm:$0xff]  ;;  %v1932_v23 = vld [vmem:[%s10474_s11 + $0x1570] sm:$0xff] }
  0xc4   : > { %v1934_v24 = vld [vmem:[%s10474_s11 + $0x1580] sm:$0xff]  ;;  %1931 = vst [vmem:[%s10479_s12 + $0xab0] sm:$0xff] %v1930_v22  ;;  %1933 = vst [vmem:[%s10479_s12 + $0xab8] sm:$0xff] %v1932_v23  ;;  %v1936_v25 = vld [vmem:[%s10474_s11 + $0x1590] sm:$0xff] }
  0xc5   : > { %1935 = vst [vmem:[%s10479_s12 + $0xac0] sm:$0xff] %v1934_v24  ;;  %v1938_v26 = vld [vmem:[%s10474_s11 + $0x15a0] sm:$0xff]  ;;  %v1940_v27 = vld [vmem:[%s10474_s11 + $0x15b0] sm:$0xff]  ;;  %1937 = vst [vmem:[%s10479_s12 + $0xac8] sm:$0xff] %v1936_v25 }
  0xc6   : > { %1939 = vst [vmem:[%s10479_s12 + $0xad0] sm:$0xff] %v1938_v26  ;;  %1941 = vst [vmem:[%s10479_s12 + $0xad8] sm:$0xff] %v1940_v27  ;;  %v1942_v28 = vld [vmem:[%s10474_s11 + $0x15c0] sm:$0xff]  ;;  %v1944_v29 = vld [vmem:[%s10474_s11 + $0x15d0] sm:$0xff] }
  0xc7   : > { %v1946_v30 = vld [vmem:[%s10474_s11 + $0x15e0] sm:$0xff]  ;;  %1943 = vst [vmem:[%s10479_s12 + $0xae0] sm:$0xff] %v1942_v28  ;;  %1945 = vst [vmem:[%s10479_s12 + $0xae8] sm:$0xff] %v1944_v29  ;;  %v1948_v31 = vld [vmem:[%s10474_s11 + $0x15f0] sm:$0xff] }
  0xc8   : > { %1947 = vst [vmem:[%s10479_s12 + $0xaf0] sm:$0xff] %v1946_v30  ;;  %v1950_v32 = vld [vmem:[%s10474_s11 + $0x1600] sm:$0xff]  ;;  %v1952_v33 = vld [vmem:[%s10474_s11 + $0x1610] sm:$0xff]  ;;  %1949 = vst [vmem:[%s10479_s12 + $0xaf8] sm:$0xff] %v1948_v31 }
  0xc9   : > { %1951 = vst [vmem:[%s10479_s12 + $0xb00] sm:$0xff] %v1950_v32  ;;  %1953 = vst [vmem:[%s10479_s12 + $0xb08] sm:$0xff] %v1952_v33  ;;  %v1954_v34 = vld [vmem:[%s10474_s11 + $0x1620] sm:$0xff]  ;;  %v1956_v35 = vld [vmem:[%s10474_s11 + $0x1630] sm:$0xff] }
  0xca   : > { %v1958_v36 = vld [vmem:[%s10474_s11 + $0x1640] sm:$0xff]  ;;  %1955 = vst [vmem:[%s10479_s12 + $0xb10] sm:$0xff] %v1954_v34  ;;  %1957 = vst [vmem:[%s10479_s12 + $0xb18] sm:$0xff] %v1956_v35  ;;  %v1960_v37 = vld [vmem:[%s10474_s11 + $0x1650] sm:$0xff] }
  0xcb   : > { %1959 = vst [vmem:[%s10479_s12 + $0xb20] sm:$0xff] %v1958_v36  ;;  %v1962_v38 = vld [vmem:[%s10474_s11 + $0x1660] sm:$0xff]  ;;  %v1964_v39 = vld [vmem:[%s10474_s11 + $0x1670] sm:$0xff]  ;;  %1961 = vst [vmem:[%s10479_s12 + $0xb28] sm:$0xff] %v1960_v37 }
  0xcc   : > { %1963 = vst [vmem:[%s10479_s12 + $0xb30] sm:$0xff] %v1962_v38  ;;  %1965 = vst [vmem:[%s10479_s12 + $0xb38] sm:$0xff] %v1964_v39  ;;  %v1966_v40 = vld [vmem:[%s10474_s11 + $0x1680] sm:$0xff]  ;;  %v1968_v41 = vld [vmem:[%s10474_s11 + $0x1690] sm:$0xff] }
  0xcd   : > { %v1970_v42 = vld [vmem:[%s10474_s11 + $0x16a0] sm:$0xff]  ;;  %1967 = vst [vmem:[%s10479_s12 + $0xb40] sm:$0xff] %v1966_v40  ;;  %1969 = vst [vmem:[%s10479_s12 + $0xb48] sm:$0xff] %v1968_v41  ;;  %v1972_v43 = vld [vmem:[%s10474_s11 + $0x16b0] sm:$0xff] }
  0xce   : > { %1971 = vst [vmem:[%s10479_s12 + $0xb50] sm:$0xff] %v1970_v42  ;;  %v1974_v44 = vld [vmem:[%s10474_s11 + $0x16c0] sm:$0xff]  ;;  %v1976_v45 = vld [vmem:[%s10474_s11 + $0x16d0] sm:$0xff]  ;;  %1973 = vst [vmem:[%s10479_s12 + $0xb58] sm:$0xff] %v1972_v43 }
  0xcf   : > { %1975 = vst [vmem:[%s10479_s12 + $0xb60] sm:$0xff] %v1974_v44  ;;  %1977 = vst [vmem:[%s10479_s12 + $0xb68] sm:$0xff] %v1976_v45  ;;  %v1978_v46 = vld [vmem:[%s10474_s11 + $0x16e0] sm:$0xff]  ;;  %v1980_v47 = vld [vmem:[%s10474_s11 + $0x16f0] sm:$0xff] }
  0xd0   : > { %v1982_v48 = vld [vmem:[%s10474_s11 + $0x1700] sm:$0xff]  ;;  %1979 = vst [vmem:[%s10479_s12 + $0xb70] sm:$0xff] %v1978_v46  ;;  %1981 = vst [vmem:[%s10479_s12 + $0xb78] sm:$0xff] %v1980_v47  ;;  %v1984_v49 = vld [vmem:[%s10474_s11 + $0x1710] sm:$0xff] }
  0xd1   : > { %1983 = vst [vmem:[%s10479_s12 + $0xb80] sm:$0xff] %v1982_v48  ;;  %v1986_v50 = vld [vmem:[%s10474_s11 + $0x1720] sm:$0xff]  ;;  %v1988_v51 = vld [vmem:[%s10474_s11 + $0x1730] sm:$0xff]  ;;  %1985 = vst [vmem:[%s10479_s12 + $0xb88] sm:$0xff] %v1984_v49 }
  0xd2   : > { %1987 = vst [vmem:[%s10479_s12 + $0xb90] sm:$0xff] %v1986_v50  ;;  %1989 = vst [vmem:[%s10479_s12 + $0xb98] sm:$0xff] %v1988_v51  ;;  %v1990_v52 = vld [vmem:[%s10474_s11 + $0x1740] sm:$0xff]  ;;  %v1992_v53 = vld [vmem:[%s10474_s11 + $0x1750] sm:$0xff] }
  0xd3   : > { %v1994_v54 = vld [vmem:[%s10474_s11 + $0x1760] sm:$0xff]  ;;  %1991 = vst [vmem:[%s10479_s12 + $0xba0] sm:$0xff] %v1990_v52  ;;  %1993 = vst [vmem:[%s10479_s12 + $0xba8] sm:$0xff] %v1992_v53  ;;  %v1996_v55 = vld [vmem:[%s10474_s11 + $0x1770] sm:$0xff] }
  0xd4   : > { %1995 = vst [vmem:[%s10479_s12 + $0xbb0] sm:$0xff] %v1994_v54  ;;  %v1998_v56 = vld [vmem:[%s10474_s11 + $0x1780] sm:$0xff]  ;;  %v2000_v57 = vld [vmem:[%s10474_s11 + $0x1790] sm:$0xff]  ;;  %1997 = vst [vmem:[%s10479_s12 + $0xbb8] sm:$0xff] %v1996_v55 }
  0xd5   : > { %1999 = vst [vmem:[%s10479_s12 + $0xbc0] sm:$0xff] %v1998_v56  ;;  %2001 = vst [vmem:[%s10479_s12 + $0xbc8] sm:$0xff] %v2000_v57  ;;  %v2002_v58 = vld [vmem:[%s10474_s11 + $0x17a0] sm:$0xff]  ;;  %v2004_v59 = vld [vmem:[%s10474_s11 + $0x17b0] sm:$0xff] }
  0xd6   : > { %v2006_v60 = vld [vmem:[%s10474_s11 + $0x17c0] sm:$0xff]  ;;  %2003 = vst [vmem:[%s10479_s12 + $0xbd0] sm:$0xff] %v2002_v58  ;;  %2005 = vst [vmem:[%s10479_s12 + $0xbd8] sm:$0xff] %v2004_v59  ;;  %v2008_v61 = vld [vmem:[%s10474_s11 + $0x17d0] sm:$0xff] }
  0xd7   : > { %2007 = vst [vmem:[%s10479_s12 + $0xbe0] sm:$0xff] %v2006_v60  ;;  %v2010_v62 = vld [vmem:[%s10474_s11 + $0x17e0] sm:$0xff]  ;;  %v2012_v63 = vld [vmem:[%s10474_s11 + $0x17f0] sm:$0xff]  ;;  %2009 = vst [vmem:[%s10479_s12 + $0xbe8] sm:$0xff] %v2008_v61 }
  0xd8   : > { %2011 = vst [vmem:[%s10479_s12 + $0xbf0] sm:$0xff] %v2010_v62  ;;  %2013 = vst [vmem:[%s10479_s12 + $0xbf8] sm:$0xff] %v2012_v63  ;;  %v2014_v0 = vld [vmem:[%s10474_s11 + $0x1800] sm:$0xff]  ;;  %v2016_v1 = vld [vmem:[%s10474_s11 + $0x1810] sm:$0xff] }
  0xd9   : > { %v2018_v2 = vld [vmem:[%s10474_s11 + $0x1820] sm:$0xff]  ;;  %2015 = vst [vmem:[%s10479_s12 + $0xc00] sm:$0xff] %v2014_v0  ;;  %2017 = vst [vmem:[%s10479_s12 + $0xc08] sm:$0xff] %v2016_v1  ;;  %v2020_v3 = vld [vmem:[%s10474_s11 + $0x1830] sm:$0xff] }
  0xda   : > { %2019 = vst [vmem:[%s10479_s12 + $0xc10] sm:$0xff] %v2018_v2  ;;  %v2022_v4 = vld [vmem:[%s10474_s11 + $0x1840] sm:$0xff]  ;;  %v2024_v5 = vld [vmem:[%s10474_s11 + $0x1850] sm:$0xff]  ;;  %2021 = vst [vmem:[%s10479_s12 + $0xc18] sm:$0xff] %v2020_v3 }
  0xdb   : > { %2023 = vst [vmem:[%s10479_s12 + $0xc20] sm:$0xff] %v2022_v4  ;;  %2025 = vst [vmem:[%s10479_s12 + $0xc28] sm:$0xff] %v2024_v5  ;;  %v2026_v6 = vld [vmem:[%s10474_s11 + $0x1860] sm:$0xff]  ;;  %v2028_v7 = vld [vmem:[%s10474_s11 + $0x1870] sm:$0xff] }
  0xdc   : > { %v2030_v8 = vld [vmem:[%s10474_s11 + $0x1880] sm:$0xff]  ;;  %2027 = vst [vmem:[%s10479_s12 + $0xc30] sm:$0xff] %v2026_v6  ;;  %2029 = vst [vmem:[%s10479_s12 + $0xc38] sm:$0xff] %v2028_v7  ;;  %v2032_v9 = vld [vmem:[%s10474_s11 + $0x1890] sm:$0xff] }
  0xdd   : > { %2031 = vst [vmem:[%s10479_s12 + $0xc40] sm:$0xff] %v2030_v8  ;;  %v2034_v10 = vld [vmem:[%s10474_s11 + $0x18a0] sm:$0xff]  ;;  %v2036_v11 = vld [vmem:[%s10474_s11 + $0x18b0] sm:$0xff]  ;;  %2033 = vst [vmem:[%s10479_s12 + $0xc48] sm:$0xff] %v2032_v9 }
  0xde   : > { %2035 = vst [vmem:[%s10479_s12 + $0xc50] sm:$0xff] %v2034_v10  ;;  %2037 = vst [vmem:[%s10479_s12 + $0xc58] sm:$0xff] %v2036_v11  ;;  %v2038_v12 = vld [vmem:[%s10474_s11 + $0x18c0] sm:$0xff]  ;;  %v2040_v13 = vld [vmem:[%s10474_s11 + $0x18d0] sm:$0xff] }
  0xdf   : > { %v2042_v14 = vld [vmem:[%s10474_s11 + $0x18e0] sm:$0xff]  ;;  %2039 = vst [vmem:[%s10479_s12 + $0xc60] sm:$0xff] %v2038_v12  ;;  %2041 = vst [vmem:[%s10479_s12 + $0xc68] sm:$0xff] %v2040_v13  ;;  %v2044_v15 = vld [vmem:[%s10474_s11 + $0x18f0] sm:$0xff] }
  0xe0   : > { %2043 = vst [vmem:[%s10479_s12 + $0xc70] sm:$0xff] %v2042_v14  ;;  %v2046_v16 = vld [vmem:[%s10474_s11 + $0x1900] sm:$0xff]  ;;  %v2048_v17 = vld [vmem:[%s10474_s11 + $0x1910] sm:$0xff]  ;;  %2045 = vst [vmem:[%s10479_s12 + $0xc78] sm:$0xff] %v2044_v15 }
  0xe1   : > { %2047 = vst [vmem:[%s10479_s12 + $0xc80] sm:$0xff] %v2046_v16  ;;  %2049 = vst [vmem:[%s10479_s12 + $0xc88] sm:$0xff] %v2048_v17  ;;  %v2050_v18 = vld [vmem:[%s10474_s11 + $0x1920] sm:$0xff]  ;;  %v2052_v19 = vld [vmem:[%s10474_s11 + $0x1930] sm:$0xff] }
  0xe2   : > { %v2054_v20 = vld [vmem:[%s10474_s11 + $0x1940] sm:$0xff]  ;;  %2051 = vst [vmem:[%s10479_s12 + $0xc90] sm:$0xff] %v2050_v18  ;;  %2053 = vst [vmem:[%s10479_s12 + $0xc98] sm:$0xff] %v2052_v19  ;;  %v2056_v21 = vld [vmem:[%s10474_s11 + $0x1950] sm:$0xff] }
  0xe3   : > { %2055 = vst [vmem:[%s10479_s12 + $0xca0] sm:$0xff] %v2054_v20  ;;  %v2058_v22 = vld [vmem:[%s10474_s11 + $0x1960] sm:$0xff]  ;;  %v2060_v23 = vld [vmem:[%s10474_s11 + $0x1970] sm:$0xff]  ;;  %2057 = vst [vmem:[%s10479_s12 + $0xca8] sm:$0xff] %v2056_v21 }
  0xe4   : > { %2059 = vst [vmem:[%s10479_s12 + $0xcb0] sm:$0xff] %v2058_v22  ;;  %2061 = vst [vmem:[%s10479_s12 + $0xcb8] sm:$0xff] %v2060_v23  ;;  %v2062_v24 = vld [vmem:[%s10474_s11 + $0x1980] sm:$0xff]  ;;  %v2064_v25 = vld [vmem:[%s10474_s11 + $0x1990] sm:$0xff] }
  0xe5   : > { %v2066_v26 = vld [vmem:[%s10474_s11 + $0x19a0] sm:$0xff]  ;;  %2063 = vst [vmem:[%s10479_s12 + $0xcc0] sm:$0xff] %v2062_v24  ;;  %2065 = vst [vmem:[%s10479_s12 + $0xcc8] sm:$0xff] %v2064_v25  ;;  %v2068_v27 = vld [vmem:[%s10474_s11 + $0x19b0] sm:$0xff] }
  0xe6   : > { %2067 = vst [vmem:[%s10479_s12 + $0xcd0] sm:$0xff] %v2066_v26  ;;  %v2070_v28 = vld [vmem:[%s10474_s11 + $0x19c0] sm:$0xff]  ;;  %v2072_v29 = vld [vmem:[%s10474_s11 + $0x19d0] sm:$0xff]  ;;  %2069 = vst [vmem:[%s10479_s12 + $0xcd8] sm:$0xff] %v2068_v27 }
  0xe7   : > { %2071 = vst [vmem:[%s10479_s12 + $0xce0] sm:$0xff] %v2070_v28  ;;  %2073 = vst [vmem:[%s10479_s12 + $0xce8] sm:$0xff] %v2072_v29  ;;  %v2074_v30 = vld [vmem:[%s10474_s11 + $0x19e0] sm:$0xff]  ;;  %v2076_v31 = vld [vmem:[%s10474_s11 + $0x19f0] sm:$0xff] }
  0xe8   : > { %v2078_v32 = vld [vmem:[%s10474_s11 + $0x1a00] sm:$0xff]  ;;  %2075 = vst [vmem:[%s10479_s12 + $0xcf0] sm:$0xff] %v2074_v30  ;;  %2077 = vst [vmem:[%s10479_s12 + $0xcf8] sm:$0xff] %v2076_v31  ;;  %v2080_v33 = vld [vmem:[%s10474_s11 + $0x1a10] sm:$0xff] }
  0xe9   : > { %2079 = vst [vmem:[%s10479_s12 + $0xd00] sm:$0xff] %v2078_v32  ;;  %v2082_v34 = vld [vmem:[%s10474_s11 + $0x1a20] sm:$0xff]  ;;  %v2084_v35 = vld [vmem:[%s10474_s11 + $0x1a30] sm:$0xff]  ;;  %2081 = vst [vmem:[%s10479_s12 + $0xd08] sm:$0xff] %v2080_v33 }
  0xea   : > { %2083 = vst [vmem:[%s10479_s12 + $0xd10] sm:$0xff] %v2082_v34  ;;  %2085 = vst [vmem:[%s10479_s12 + $0xd18] sm:$0xff] %v2084_v35  ;;  %v2086_v36 = vld [vmem:[%s10474_s11 + $0x1a40] sm:$0xff]  ;;  %v2088_v37 = vld [vmem:[%s10474_s11 + $0x1a50] sm:$0xff] }
  0xeb   : > { %v2090_v38 = vld [vmem:[%s10474_s11 + $0x1a60] sm:$0xff]  ;;  %2087 = vst [vmem:[%s10479_s12 + $0xd20] sm:$0xff] %v2086_v36  ;;  %2089 = vst [vmem:[%s10479_s12 + $0xd28] sm:$0xff] %v2088_v37  ;;  %v2092_v39 = vld [vmem:[%s10474_s11 + $0x1a70] sm:$0xff] }
  0xec   : > { %2091 = vst [vmem:[%s10479_s12 + $0xd30] sm:$0xff] %v2090_v38  ;;  %v2094_v40 = vld [vmem:[%s10474_s11 + $0x1a80] sm:$0xff]  ;;  %v2096_v41 = vld [vmem:[%s10474_s11 + $0x1a90] sm:$0xff]  ;;  %2093 = vst [vmem:[%s10479_s12 + $0xd38] sm:$0xff] %v2092_v39 }
  0xed   : > { %2095 = vst [vmem:[%s10479_s12 + $0xd40] sm:$0xff] %v2094_v40  ;;  %2097 = vst [vmem:[%s10479_s12 + $0xd48] sm:$0xff] %v2096_v41  ;;  %v2098_v42 = vld [vmem:[%s10474_s11 + $0x1aa0] sm:$0xff]  ;;  %v2100_v43 = vld [vmem:[%s10474_s11 + $0x1ab0] sm:$0xff] }
  0xee   : > { %v2102_v44 = vld [vmem:[%s10474_s11 + $0x1ac0] sm:$0xff]  ;;  %2099 = vst [vmem:[%s10479_s12 + $0xd50] sm:$0xff] %v2098_v42  ;;  %2101 = vst [vmem:[%s10479_s12 + $0xd58] sm:$0xff] %v2100_v43  ;;  %v2104_v45 = vld [vmem:[%s10474_s11 + $0x1ad0] sm:$0xff] }
  0xef   : > { %2103 = vst [vmem:[%s10479_s12 + $0xd60] sm:$0xff] %v2102_v44  ;;  %v2106_v46 = vld [vmem:[%s10474_s11 + $0x1ae0] sm:$0xff]  ;;  %v2108_v47 = vld [vmem:[%s10474_s11 + $0x1af0] sm:$0xff]  ;;  %2105 = vst [vmem:[%s10479_s12 + $0xd68] sm:$0xff] %v2104_v45 }
  0xf0   : > { %2107 = vst [vmem:[%s10479_s12 + $0xd70] sm:$0xff] %v2106_v46  ;;  %2109 = vst [vmem:[%s10479_s12 + $0xd78] sm:$0xff] %v2108_v47  ;;  %v2110_v48 = vld [vmem:[%s10474_s11 + $0x1b00] sm:$0xff]  ;;  %v2112_v49 = vld [vmem:[%s10474_s11 + $0x1b10] sm:$0xff] }
  0xf1   : > { %v2114_v50 = vld [vmem:[%s10474_s11 + $0x1b20] sm:$0xff]  ;;  %2111 = vst [vmem:[%s10479_s12 + $0xd80] sm:$0xff] %v2110_v48  ;;  %2113 = vst [vmem:[%s10479_s12 + $0xd88] sm:$0xff] %v2112_v49  ;;  %v2116_v51 = vld [vmem:[%s10474_s11 + $0x1b30] sm:$0xff] }
  0xf2   : > { %2115 = vst [vmem:[%s10479_s12 + $0xd90] sm:$0xff] %v2114_v50  ;;  %v2118_v52 = vld [vmem:[%s10474_s11 + $0x1b40] sm:$0xff]  ;;  %v2120_v53 = vld [vmem:[%s10474_s11 + $0x1b50] sm:$0xff]  ;;  %2117 = vst [vmem:[%s10479_s12 + $0xd98] sm:$0xff] %v2116_v51 }
  0xf3   : > { %2119 = vst [vmem:[%s10479_s12 + $0xda0] sm:$0xff] %v2118_v52  ;;  %2121 = vst [vmem:[%s10479_s12 + $0xda8] sm:$0xff] %v2120_v53  ;;  %v2122_v54 = vld [vmem:[%s10474_s11 + $0x1b60] sm:$0xff]  ;;  %v2124_v55 = vld [vmem:[%s10474_s11 + $0x1b70] sm:$0xff] }
  0xf4   : > { %v2126_v56 = vld [vmem:[%s10474_s11 + $0x1b80] sm:$0xff]  ;;  %2123 = vst [vmem:[%s10479_s12 + $0xdb0] sm:$0xff] %v2122_v54  ;;  %2125 = vst [vmem:[%s10479_s12 + $0xdb8] sm:$0xff] %v2124_v55  ;;  %v2128_v57 = vld [vmem:[%s10474_s11 + $0x1b90] sm:$0xff] }
  0xf5   : > { %2127 = vst [vmem:[%s10479_s12 + $0xdc0] sm:$0xff] %v2126_v56  ;;  %v2130_v58 = vld [vmem:[%s10474_s11 + $0x1ba0] sm:$0xff]  ;;  %v2132_v59 = vld [vmem:[%s10474_s11 + $0x1bb0] sm:$0xff]  ;;  %2129 = vst [vmem:[%s10479_s12 + $0xdc8] sm:$0xff] %v2128_v57 }
  0xf6   : > { %2131 = vst [vmem:[%s10479_s12 + $0xdd0] sm:$0xff] %v2130_v58  ;;  %2133 = vst [vmem:[%s10479_s12 + $0xdd8] sm:$0xff] %v2132_v59  ;;  %v2134_v60 = vld [vmem:[%s10474_s11 + $0x1bc0] sm:$0xff]  ;;  %v2136_v61 = vld [vmem:[%s10474_s11 + $0x1bd0] sm:$0xff] }
  0xf7   : > { %v2138_v62 = vld [vmem:[%s10474_s11 + $0x1be0] sm:$0xff]  ;;  %2135 = vst [vmem:[%s10479_s12 + $0xde0] sm:$0xff] %v2134_v60  ;;  %2137 = vst [vmem:[%s10479_s12 + $0xde8] sm:$0xff] %v2136_v61  ;;  %v2140_v63 = vld [vmem:[%s10474_s11 + $0x1bf0] sm:$0xff] }
  0xf8   : > { %2139 = vst [vmem:[%s10479_s12 + $0xdf0] sm:$0xff] %v2138_v62  ;;  %v2142_v0 = vld [vmem:[%s10474_s11 + $0x1c00] sm:$0xff]  ;;  %v2144_v1 = vld [vmem:[%s10474_s11 + $0x1c10] sm:$0xff]  ;;  %2141 = vst [vmem:[%s10479_s12 + $0xdf8] sm:$0xff] %v2140_v63 }
  0xf9   : > { %2143 = vst [vmem:[%s10479_s12 + $0xe00] sm:$0xff] %v2142_v0  ;;  %2145 = vst [vmem:[%s10479_s12 + $0xe08] sm:$0xff] %v2144_v1  ;;  %v2146_v2 = vld [vmem:[%s10474_s11 + $0x1c20] sm:$0xff]  ;;  %v2148_v3 = vld [vmem:[%s10474_s11 + $0x1c30] sm:$0xff] }
  0xfa   : > { %v2150_v4 = vld [vmem:[%s10474_s11 + $0x1c40] sm:$0xff]  ;;  %2147 = vst [vmem:[%s10479_s12 + $0xe10] sm:$0xff] %v2146_v2  ;;  %2149 = vst [vmem:[%s10479_s12 + $0xe18] sm:$0xff] %v2148_v3  ;;  %v2152_v5 = vld [vmem:[%s10474_s11 + $0x1c50] sm:$0xff] }
  0xfb   : > { %2151 = vst [vmem:[%s10479_s12 + $0xe20] sm:$0xff] %v2150_v4  ;;  %v2154_v6 = vld [vmem:[%s10474_s11 + $0x1c60] sm:$0xff]  ;;  %v2156_v7 = vld [vmem:[%s10474_s11 + $0x1c70] sm:$0xff]  ;;  %2153 = vst [vmem:[%s10479_s12 + $0xe28] sm:$0xff] %v2152_v5 }
  0xfc   : > { %2155 = vst [vmem:[%s10479_s12 + $0xe30] sm:$0xff] %v2154_v6  ;;  %2157 = vst [vmem:[%s10479_s12 + $0xe38] sm:$0xff] %v2156_v7  ;;  %v2158_v8 = vld [vmem:[%s10474_s11 + $0x1c80] sm:$0xff]  ;;  %v2160_v9 = vld [vmem:[%s10474_s11 + $0x1c90] sm:$0xff] }
  0xfd   : > { %v2162_v10 = vld [vmem:[%s10474_s11 + $0x1ca0] sm:$0xff]  ;;  %2159 = vst [vmem:[%s10479_s12 + $0xe40] sm:$0xff] %v2158_v8  ;;  %2161 = vst [vmem:[%s10479_s12 + $0xe48] sm:$0xff] %v2160_v9  ;;  %v2164_v11 = vld [vmem:[%s10474_s11 + $0x1cb0] sm:$0xff] }
  0xfe   : > { %2163 = vst [vmem:[%s10479_s12 + $0xe50] sm:$0xff] %v2162_v10  ;;  %v2166_v12 = vld [vmem:[%s10474_s11 + $0x1cc0] sm:$0xff]  ;;  %v2168_v13 = vld [vmem:[%s10474_s11 + $0x1cd0] sm:$0xff]  ;;  %2165 = vst [vmem:[%s10479_s12 + $0xe58] sm:$0xff] %v2164_v11 }
  0xff   : > { %2167 = vst [vmem:[%s10479_s12 + $0xe60] sm:$0xff] %v2166_v12  ;;  %2169 = vst [vmem:[%s10479_s12 + $0xe68] sm:$0xff] %v2168_v13  ;;  %v2170_v14 = vld [vmem:[%s10474_s11 + $0x1ce0] sm:$0xff]  ;;  %v2172_v15 = vld [vmem:[%s10474_s11 + $0x1cf0] sm:$0xff] }
 0x100   : > { %v2174_v16 = vld [vmem:[%s10474_s11 + $0x1d00] sm:$0xff]  ;;  %2171 = vst [vmem:[%s10479_s12 + $0xe70] sm:$0xff] %v2170_v14  ;;  %2173 = vst [vmem:[%s10479_s12 + $0xe78] sm:$0xff] %v2172_v15  ;;  %v2176_v17 = vld [vmem:[%s10474_s11 + $0x1d10] sm:$0xff] }
 0x101   : > { %2175 = vst [vmem:[%s10479_s12 + $0xe80] sm:$0xff] %v2174_v16  ;;  %v2178_v18 = vld [vmem:[%s10474_s11 + $0x1d20] sm:$0xff]  ;;  %v2180_v19 = vld [vmem:[%s10474_s11 + $0x1d30] sm:$0xff]  ;;  %2177 = vst [vmem:[%s10479_s12 + $0xe88] sm:$0xff] %v2176_v17 }
 0x102   : > { %2179 = vst [vmem:[%s10479_s12 + $0xe90] sm:$0xff] %v2178_v18  ;;  %2181 = vst [vmem:[%s10479_s12 + $0xe98] sm:$0xff] %v2180_v19  ;;  %v2182_v20 = vld [vmem:[%s10474_s11 + $0x1d40] sm:$0xff]  ;;  %v2184_v21 = vld [vmem:[%s10474_s11 + $0x1d50] sm:$0xff] }
 0x103   : > { %v2186_v22 = vld [vmem:[%s10474_s11 + $0x1d60] sm:$0xff]  ;;  %2183 = vst [vmem:[%s10479_s12 + $0xea0] sm:$0xff] %v2182_v20  ;;  %2185 = vst [vmem:[%s10479_s12 + $0xea8] sm:$0xff] %v2184_v21  ;;  %v2188_v23 = vld [vmem:[%s10474_s11 + $0x1d70] sm:$0xff] }
 0x104   : > { %2187 = vst [vmem:[%s10479_s12 + $0xeb0] sm:$0xff] %v2186_v22  ;;  %v2190_v24 = vld [vmem:[%s10474_s11 + $0x1d80] sm:$0xff]  ;;  %v2192_v25 = vld [vmem:[%s10474_s11 + $0x1d90] sm:$0xff]  ;;  %2189 = vst [vmem:[%s10479_s12 + $0xeb8] sm:$0xff] %v2188_v23 }
 0x105   : > { %2191 = vst [vmem:[%s10479_s12 + $0xec0] sm:$0xff] %v2190_v24  ;;  %2193 = vst [vmem:[%s10479_s12 + $0xec8] sm:$0xff] %v2192_v25  ;;  %v2194_v26 = vld [vmem:[%s10474_s11 + $0x1da0] sm:$0xff]  ;;  %v2196_v27 = vld [vmem:[%s10474_s11 + $0x1db0] sm:$0xff] }
 0x106   : > { %v2198_v28 = vld [vmem:[%s10474_s11 + $0x1dc0] sm:$0xff]  ;;  %2195 = vst [vmem:[%s10479_s12 + $0xed0] sm:$0xff] %v2194_v26  ;;  %2197 = vst [vmem:[%s10479_s12 + $0xed8] sm:$0xff] %v2196_v27  ;;  %v2200_v29 = vld [vmem:[%s10474_s11 + $0x1dd0] sm:$0xff] }
 0x107   : > { %2199 = vst [vmem:[%s10479_s12 + $0xee0] sm:$0xff] %v2198_v28  ;;  %v2202_v30 = vld [vmem:[%s10474_s11 + $0x1de0] sm:$0xff]  ;;  %v2204_v31 = vld [vmem:[%s10474_s11 + $0x1df0] sm:$0xff]  ;;  %2201 = vst [vmem:[%s10479_s12 + $0xee8] sm:$0xff] %v2200_v29 }
 0x108   : > { %2203 = vst [vmem:[%s10479_s12 + $0xef0] sm:$0xff] %v2202_v30  ;;  %2205 = vst [vmem:[%s10479_s12 + $0xef8] sm:$0xff] %v2204_v31  ;;  %v2206_v32 = vld [vmem:[%s10474_s11 + $0x1e00] sm:$0xff]  ;;  %v2208_v33 = vld [vmem:[%s10474_s11 + $0x1e10] sm:$0xff] }
 0x109   : > { %v2210_v34 = vld [vmem:[%s10474_s11 + $0x1e20] sm:$0xff]  ;;  %2207 = vst [vmem:[%s10479_s12 + $0xf00] sm:$0xff] %v2206_v32  ;;  %2209 = vst [vmem:[%s10479_s12 + $0xf08] sm:$0xff] %v2208_v33  ;;  %v2212_v35 = vld [vmem:[%s10474_s11 + $0x1e30] sm:$0xff] }
 0x10a   : > { %2211 = vst [vmem:[%s10479_s12 + $0xf10] sm:$0xff] %v2210_v34  ;;  %v2214_v36 = vld [vmem:[%s10474_s11 + $0x1e40] sm:$0xff]  ;;  %v2216_v37 = vld [vmem:[%s10474_s11 + $0x1e50] sm:$0xff]  ;;  %2213 = vst [vmem:[%s10479_s12 + $0xf18] sm:$0xff] %v2212_v35 }
 0x10b   : > { %2215 = vst [vmem:[%s10479_s12 + $0xf20] sm:$0xff] %v2214_v36  ;;  %2217 = vst [vmem:[%s10479_s12 + $0xf28] sm:$0xff] %v2216_v37  ;;  %v2218_v38 = vld [vmem:[%s10474_s11 + $0x1e60] sm:$0xff]  ;;  %v2220_v39 = vld [vmem:[%s10474_s11 + $0x1e70] sm:$0xff] }
 0x10c   : > { %v2222_v40 = vld [vmem:[%s10474_s11 + $0x1e80] sm:$0xff]  ;;  %2219 = vst [vmem:[%s10479_s12 + $0xf30] sm:$0xff] %v2218_v38  ;;  %2221 = vst [vmem:[%s10479_s12 + $0xf38] sm:$0xff] %v2220_v39  ;;  %v2224_v41 = vld [vmem:[%s10474_s11 + $0x1e90] sm:$0xff] }
 0x10d   : > { %2223 = vst [vmem:[%s10479_s12 + $0xf40] sm:$0xff] %v2222_v40  ;;  %v2226_v42 = vld [vmem:[%s10474_s11 + $0x1ea0] sm:$0xff]  ;;  %v2228_v43 = vld [vmem:[%s10474_s11 + $0x1eb0] sm:$0xff]  ;;  %2225 = vst [vmem:[%s10479_s12 + $0xf48] sm:$0xff] %v2224_v41 }
 0x10e   : > { %2227 = vst [vmem:[%s10479_s12 + $0xf50] sm:$0xff] %v2226_v42  ;;  %2229 = vst [vmem:[%s10479_s12 + $0xf58] sm:$0xff] %v2228_v43  ;;  %v2230_v44 = vld [vmem:[%s10474_s11 + $0x1ec0] sm:$0xff]  ;;  %v2232_v45 = vld [vmem:[%s10474_s11 + $0x1ed0] sm:$0xff] }
 0x10f   : > { %v2234_v46 = vld [vmem:[%s10474_s11 + $0x1ee0] sm:$0xff]  ;;  %2231 = vst [vmem:[%s10479_s12 + $0xf60] sm:$0xff] %v2230_v44  ;;  %2233 = vst [vmem:[%s10479_s12 + $0xf68] sm:$0xff] %v2232_v45  ;;  %v2236_v47 = vld [vmem:[%s10474_s11 + $0x1ef0] sm:$0xff] }
 0x110   : > { %2235 = vst [vmem:[%s10479_s12 + $0xf70] sm:$0xff] %v2234_v46  ;;  %v2238_v48 = vld [vmem:[%s10474_s11 + $0x1f00] sm:$0xff]  ;;  %v2240_v49 = vld [vmem:[%s10474_s11 + $0x1f10] sm:$0xff]  ;;  %2237 = vst [vmem:[%s10479_s12 + $0xf78] sm:$0xff] %v2236_v47 }
 0x111   : > { %2239 = vst [vmem:[%s10479_s12 + $0xf80] sm:$0xff] %v2238_v48  ;;  %2241 = vst [vmem:[%s10479_s12 + $0xf88] sm:$0xff] %v2240_v49  ;;  %v2242_v50 = vld [vmem:[%s10474_s11 + $0x1f20] sm:$0xff]  ;;  %v2244_v51 = vld [vmem:[%s10474_s11 + $0x1f30] sm:$0xff] }
 0x112   : > { %v2246_v52 = vld [vmem:[%s10474_s11 + $0x1f40] sm:$0xff]  ;;  %2243 = vst [vmem:[%s10479_s12 + $0xf90] sm:$0xff] %v2242_v50  ;;  %2245 = vst [vmem:[%s10479_s12 + $0xf98] sm:$0xff] %v2244_v51  ;;  %v2248_v53 = vld [vmem:[%s10474_s11 + $0x1f50] sm:$0xff] }
 0x113   : > { %2247 = vst [vmem:[%s10479_s12 + $0xfa0] sm:$0xff] %v2246_v52  ;;  %v2250_v54 = vld [vmem:[%s10474_s11 + $0x1f60] sm:$0xff]  ;;  %v2252_v55 = vld [vmem:[%s10474_s11 + $0x1f70] sm:$0xff]  ;;  %2249 = vst [vmem:[%s10479_s12 + $0xfa8] sm:$0xff] %v2248_v53 }
 0x114   : > { %2251 = vst [vmem:[%s10479_s12 + $0xfb0] sm:$0xff] %v2250_v54  ;;  %2253 = vst [vmem:[%s10479_s12 + $0xfb8] sm:$0xff] %v2252_v55  ;;  %v2254_v56 = vld [vmem:[%s10474_s11 + $0x1f80] sm:$0xff]  ;;  %v2256_v57 = vld [vmem:[%s10474_s11 + $0x1f90] sm:$0xff] }
 0x115   : > { %v2258_v58 = vld [vmem:[%s10474_s11 + $0x1fa0] sm:$0xff]  ;;  %2255 = vst [vmem:[%s10479_s12 + $0xfc0] sm:$0xff] %v2254_v56  ;;  %2257 = vst [vmem:[%s10479_s12 + $0xfc8] sm:$0xff] %v2256_v57  ;;  %v2260_v59 = vld [vmem:[%s10474_s11 + $0x1fb0] sm:$0xff] }
 0x116   : > { %2259 = vst [vmem:[%s10479_s12 + $0xfd0] sm:$0xff] %v2258_v58  ;;  %v2262_v60 = vld [vmem:[%s10474_s11 + $0x1fc0] sm:$0xff]  ;;  %v2264_v61 = vld [vmem:[%s10474_s11 + $0x1fd0] sm:$0xff]  ;;  %2261 = vst [vmem:[%s10479_s12 + $0xfd8] sm:$0xff] %v2260_v59 }
 0x117   : > { %2263 = vst [vmem:[%s10479_s12 + $0xfe0] sm:$0xff] %v2262_v60  ;;  %2265 = vst [vmem:[%s10479_s12 + $0xfe8] sm:$0xff] %v2264_v61  ;;  %v2266_v62 = vld [vmem:[%s10474_s11 + $0x1fe0] sm:$0xff]  ;;  %v2268_v63 = vld [vmem:[%s10474_s11 + $0x1ff0] sm:$0xff] }
 0x118   : > { %2267 = vst [vmem:[%s10479_s12 + $0xff0] sm:$0xff] %v2266_v62  ;;  %2269 = vst [vmem:[%s10479_s12 + $0xff8] sm:$0xff] %v2268_v63 }
 0x119 PF: > { %p8768_p7 = scmp.ge.s32.totalorder %s10384_s21, 1  ;;  %p4376_p8 = scmp.lt.s32.totalorder %s10384_s21, 5 }
 0x11b   : > { %p4377_p9 = pnand %p8768_p7, %p4376_p8 }
 0x11c   : > { %s4383_s13 = sand.u32 (!%p4377_p9), 1, %s10360_s15   ;;  %s8770_s14 = sshll.u32 (!%p4377_p9), %s10368_s17, 5 }
 0x11d   : > { %4380 = sbr.rel (%p4377_p9) target bundleno = 1271 (0x4f7), region = 84  ;;  %s8769_s24 = sshll.u32 (!%p4377_p9), %s4383_s13, 12 }
 0x11e   : > { %p4423_p10 = scmp.lt.s32.totalorder (!%p4377_p9), %s8770_s14, 63  ;;  %s8771_s25 = sshll.u32 (!%p4377_p9), %s10372_s18, 1 }
 0x11f   : > { %p4430_p11 = scmp.lt.s32.totalorder (!%p4377_p9), %s8771_s25, 3  ;;  %s8772_s26 = sshll.u32 (!%p4377_p9), %s10372_s18, 5 }
 0x120   : > { %p4435_p12 = scmp.lt.s32.totalorder (!%p4377_p9), %s8772_s26, 63  ;;  %p4441_p13 = scmp.lt.s32.totalorder (!%p4377_p9), %s10372_s18, 1 }
 0x121   : > { %s11531_s27 = scalar_lea.vmem (!%p4377_p9), [#allocation3], %s8769_s24  ;;  %p8777_p0 = scmp.ne.s32.totalorder (!%p4377_p9), %s10368_s17, 0 }
 0x124   : > { %s12280_s14 = smov (!%p4423_p10, %s8770_s14), 63  ;;  %s12282_s25 = smov (!%p4430_p11, %s8771_s25), 3 }
 0x125   : > { %s11511_s30 = scalar_lea.vmem %s12262_s0, %s12280_s14  ;;  %s12284_s26 = smov (!%p4435_p12, %s8772_s26), 63  ;;  %v10386_v0 = vmov (!%p8777_p0), 0.0  }
 0x126   : > { %s4432_s6 = scalar_lea.vmem %s12264_s2, %s12282_s25  ;;  %s9295_s7 = sshll.u32 %s12284_s26, 3  ;;  %4450 = vst [vmem:[#allocation2] sm:$0xf] (!%p8777_p0), %v10386_v0 }
 0x127   : > { %s11523_s10 = scalar_lea.vmem %s12265_s3, %s9295_s7  ;;  %s12286_s18 = smov (!%p4441_p13, %s10372_s18), 1 }
 0x128   : > { %s9296_s11 = sshll.u32 %s12286_s18, 2  ;;  %4449 = sbr.rel (%p8777_p0) target bundleno = 303 (0x12f), region = 92 }
 0x129   : > { %s11529_s14 = scalar_lea.vmem %s12266_s4, %s9296_s11 }
 0x12f PF: > { %v9510_v1 = vld [vmem:[%s11531_s27 + $0x4] ss:$8 sps:$4 sm:$0xff]   ;;  %v9514_v3 = vld [vmem:[%s11531_s27] ss:$8 sps:$4 sm:$0xff]   ;;  %v9516_v5 = vld [vmem:[%s11531_s27 + $0x14] ss:$8 sps:$4 sm:$0xff]   ;;  %v4976_v39 = vlaneseq }
 0x130   : > { %v9512_v2 = vld [vmem:[%s11531_s27 + $0x804] ss:$8 sps:$4 sm:$0xff]   ;;  %7760 = vmatprep.subr.bf16.mxu1 %v9510_v1  ;;  %v9515_v4 = vld [vmem:[%s11531_s27 + $0x800] ss:$8 sps:$4 sm:$0xff]   ;;  %v9518_v6 = vld [vmem:[%s11531_s27 + $0x814] ss:$8 sps:$4 sm:$0xff]  }
 0x131   : > { %8088 = vmatprep.subr.bf16.mxu0 %v9512_v2  ;;  %7761 = vmatpush1.bf16.msra.mxu1 %v9514_v3  ;;  %v9520_v7 = vld [vmem:[%s11531_s27 + $0x10] ss:$8 sps:$4 sm:$0xff]   ;;  %v9522_v9 = vld [vmem:[%s11531_s27 + $0x24] ss:$8 sps:$4 sm:$0xff]   ;;  %v9526_v11 = vld [vmem:[%s11531_s27 + $0x20] ss:$8 sps:$4 sm:$0xff]  }
 0x132   : > { %8089 = vmatpush1.bf16.msra.mxu0 %v9515_v4  ;;  %7762 = vmatprep.subr.bf16.mxu1 %v9516_v5  ;;  %v9521_v8 = vld [vmem:[%s11531_s27 + $0x810] ss:$8 sps:$4 sm:$0xff]   ;;  %v9524_v10 = vld [vmem:[%s11531_s27 + $0x824] ss:$8 sps:$4 sm:$0xff]   ;;  %v9527_v12 = vld [vmem:[%s11531_s27 + $0x820] ss:$8 sps:$4 sm:$0xff]  }
 0x133   : > { %8090 = vmatprep.subr.bf16.mxu0 %v9518_v6  ;;  %v9528_v13 = vld [vmem:[%s11531_s27 + $0x34] ss:$8 sps:$4 sm:$0xff]   ;;  %v9532_v15 = vld [vmem:[%s11531_s27 + $0x30] ss:$8 sps:$4 sm:$0xff]   ;;  %v9534_v17 = vld [vmem:[%s11531_s27 + $0x44] ss:$8 sps:$4 sm:$0xff]  }
 0x134   : > { %v9530_v14 = vld [vmem:[%s11531_s27 + $0x834] ss:$8 sps:$4 sm:$0xff]   ;;  %v9533_v16 = vld [vmem:[%s11531_s27 + $0x830] ss:$8 sps:$4 sm:$0xff]   ;;  %v9536_v18 = vld [vmem:[%s11531_s27 + $0x844] ss:$8 sps:$4 sm:$0xff]  }
 0x135   : > { %7763 = vmatpush1.bf16.msra.mxu1 %v9520_v7  ;;  %v9538_v19 = vld [vmem:[%s11531_s27 + $0x40] ss:$8 sps:$4 sm:$0xff]   ;;  %v9540_v21 = vld [vmem:[%s11531_s27 + $0x54] ss:$8 sps:$4 sm:$0xff]   ;;  %v9544_v23 = vld [vmem:[%s11531_s27 + $0x50] ss:$8 sps:$4 sm:$0xff]  }
 0x136   : > { %8091 = vmatpush1.bf16.msra.mxu0 %v9521_v8  ;;  %7764 = vmatprep.subr.bf16.mxu1 %v9522_v9  ;;  %v9539_v20 = vld [vmem:[%s11531_s27 + $0x840] ss:$8 sps:$4 sm:$0xff]   ;;  %v9542_v22 = vld [vmem:[%s11531_s27 + $0x854] ss:$8 sps:$4 sm:$0xff]   ;;  %v9545_v24 = vld [vmem:[%s11531_s27 + $0x850] ss:$8 sps:$4 sm:$0xff]  }
 0x137   : > { %8092 = vmatprep.subr.bf16.mxu0 %v9524_v10  ;;  %v9546_v25 = vld [vmem:[%s11531_s27 + $0x64] ss:$8 sps:$4 sm:$0xff]   ;;  %v9550_v27 = vld [vmem:[%s11531_s27 + $0x60] ss:$8 sps:$4 sm:$0xff]   ;;  %v9552_v29 = vld [vmem:[%s11531_s27 + $0x74] ss:$8 sps:$4 sm:$0xff]  }
 0x138   : > { %v9548_v26 = vld [vmem:[%s11531_s27 + $0x864] ss:$8 sps:$4 sm:$0xff]   ;;  %v9551_v28 = vld [vmem:[%s11531_s27 + $0x860] ss:$8 sps:$4 sm:$0xff]   ;;  %v9554_v30 = vld [vmem:[%s11531_s27 + $0x874] ss:$8 sps:$4 sm:$0xff]  }
 0x139   : > { %7765 = vmatpush1.bf16.msra.mxu1 %v9526_v11  ;;  %v9556_v31 = vld [vmem:[%s11531_s27 + $0x70] ss:$8 sps:$4 sm:$0xff]   ;;  %v9558_v33 = vld [vmem:[%s11531_s27 + $0x84] ss:$8 sps:$4 sm:$0xff]   ;;  %v9562_v35 = vld [vmem:[%s11531_s27 + $0x80] ss:$8 sps:$4 sm:$0xff]  }
 0x13a   : > { %8093 = vmatpush1.bf16.msra.mxu0 %v9527_v12  ;;  %7766 = vmatprep.subr.bf16.mxu1 %v9528_v13  ;;  %v9557_v32 = vld [vmem:[%s11531_s27 + $0x870] ss:$8 sps:$4 sm:$0xff]   ;;  %v9560_v34 = vld [vmem:[%s11531_s27 + $0x884] ss:$8 sps:$4 sm:$0xff]   ;;  %v9563_v36 = vld [vmem:[%s11531_s27 + $0x880] ss:$8 sps:$4 sm:$0xff]  }
 0x13b   : > { %8094 = vmatprep.subr.bf16.mxu0 %v9530_v14  ;;  %v10387_v37 = vmov 1966171168   ;;  %v9564_v40 = vld [vmem:[%s11531_s27 + $0x94] ss:$8 sps:$4 sm:$0xff]   ;;  %v9568_v42 = vld [vmem:[%s11531_s27 + $0x90] ss:$8 sps:$4 sm:$0xff]  }
 0x13c   : > { %v4974_v38 = vunpack.c.l.s4 %v10387_v37  ;;  %v9566_v41 = vld [vmem:[%s11531_s27 + $0x894] ss:$8 sps:$4 sm:$0xff]   ;;  %v11573_v44 = vshrl.u32 %v4976_v39, 7  ;;  %v9569_v45 = vld [vmem:[%s11531_s27 + $0x890] ss:$8 sps:$4 sm:$0xff]   ;;  %p9290_p1 = scmp.ne.s32.totalorder %s10368_s17, 1 }
 0x13d   : > { %7767 = vmatpush1.bf16.msra.mxu1 %v9532_v15  ;;  %v9570_v46 = vld [vmem:[%s11531_s27 + $0xa4] ss:$8 sps:$4 sm:$0xff]   ;;  %v9574_v48 = vld [vmem:[%s11531_s27 + $0xa0] ss:$8 sps:$4 sm:$0xff]   ;;  %v9576_v51 = vld [vmem:[%s11531_s27 + $0xb4] ss:$8 sps:$4 sm:$0xff]  }
 0x13e   : > { %8095 = vmatpush1.bf16.msra.mxu0 %v9533_v16  ;;  %7768 = vmatprep.subr.bf16.mxu1 %v9534_v17  ;;  %v4975_v43 = vunpack.c.0.s8 %v4974_v38  ;;  %v9572_v47 = vld [vmem:[%s11531_s27 + $0x8a4] ss:$8 sps:$4 sm:$0xff]   ;;  %v9575_v49 = vld [vmem:[%s11531_s27 + $0x8a0] ss:$8 sps:$4 sm:$0xff]   ;;  %v9578_v52 = vld [vmem:[%s11531_s27 + $0x8b4] ss:$8 sps:$4 sm:$0xff]  }
 0x13f   : > { %8096 = vmatprep.subr.bf16.mxu0 %v9536_v18  ;;  %v11586_v53 = vld [vmem:[%s11511_s30] sm:$0xff]  ;;  %v9580_v54 = vld [vmem:[%s11531_s27 + $0xb0] ss:$8 sps:$4 sm:$0xff]   ;;  %v9582_v58 = vld [vmem:[%s11531_s27 + $0xc4] ss:$8 sps:$4 sm:$0xff]  }
 0x140   : > { %v11581_v50 = vsub.s32 %v4975_v43, %v11573_v44  ;;  %v9581_v56 = vld [vmem:[%s11531_s27 + $0x8b0] ss:$8 sps:$4 sm:$0xff]   ;;  %v9584_v59 = vld [vmem:[%s11531_s27 + $0x8c4] ss:$8 sps:$4 sm:$0xff]   ;;  %v9586_v0 = vld [vmem:[%s11531_s27 + $0xc0] ss:$8 sps:$4 sm:$0xff]  }
 0x141   : > { %7769 = vmatpush1.bf16.msra.mxu1 %v9538_v19  ;;  %v11593_v57 = vld [vmem:[%s11511_s30 + $0x10] sm:$0xff]  ;;  %v9587_v1 = vld [vmem:[%s11531_s27 + $0x8c0] ss:$8 sps:$4 sm:$0xff]   ;;  %v9588_v2 = vld [vmem:[%s11531_s27 + $0xd4] ss:$8 sps:$4 sm:$0xff]  }
 0x142   : > { %8097 = vmatpush1.bf16.msra.mxu0 %v9539_v20  ;;  %7770 = vmatprep.subr.bf16.mxu1 %v9540_v21  ;;  %v4979_v55 = vrot.slane %v11586_v53, %v11581_v50  ;;  %v5077_v61 = vrot.slane %v11593_v57, %v11581_v50  ;;  %v9590_v3 = vld [vmem:[%s11531_s27 + $0x8d4] ss:$8 sps:$4 sm:$0xff]   ;;  %v9592_v5 = vld [vmem:[%s11531_s27 + $0xd0] ss:$8 sps:$4 sm:$0xff]   ;;  %v9594_v7 = vld [vmem:[%s11531_s27 + $0xe4] ss:$8 sps:$4 sm:$0xff]  }
 0x143   : > { %8098 = vmatprep.subr.bf16.mxu0 %v9542_v22  ;;  %v9593_v6 = vld [vmem:[%s11531_s27 + $0x8d0] ss:$8 sps:$4 sm:$0xff]   ;;  %v9596_v8 = vld [vmem:[%s11531_s27 + $0x8e4] ss:$8 sps:$4 sm:$0xff]   ;;  %v9598_v9 = vld [vmem:[%s11531_s27 + $0xe0] ss:$8 sps:$4 sm:$0xff]  }
 0x144   : > { %v4987_v60 = vcombine.high %v4979_v55, %v4979_v55  ;;  %v5085_v63 = vcombine.high %v5077_v61, %v5077_v61  ;;  %v9599_v10 = vld [vmem:[%s11531_s27 + $0x8e0] ss:$8 sps:$4 sm:$0xff]   ;;  %v9600_v11 = vld [vmem:[%s11531_s27 + $0xf4] ss:$8 sps:$4 sm:$0xff]   ;;  %v9604_v13 = vld [vmem:[%s11531_s27 + $0xf0] ss:$8 sps:$4 sm:$0xff]   ;;  %v11618_v17 = vrot.slane %v4979_v55, %v11581_v50  ;;  %v11621_v18 = vrot.slane %v5077_v61, %v11581_v50 }
 0x145   : > { %7771 = vmatpush1.bf16.msra.mxu1 %v9544_v23  ;;  %v9602_v12 = vld [vmem:[%s11531_s27 + $0x8f4] ss:$8 sps:$4 sm:$0xff]   ;;  %v9605_v14 = vld [vmem:[%s11531_s27 + $0x8f0] ss:$8 sps:$4 sm:$0xff]   ;;  %v9609_v15 = vld [vmem:[%s11531_s27 + $0x104] ss:$8 sps:$4 sm:$0xff]  }
 0x146   : > { %8099 = vmatpush1.bf16.msra.mxu0 %v9545_v24  ;;  %7772 = vmatprep.subr.bf16.mxu1 %v9546_v25  ;;  %v5009_v62 = vrot.slane %v4987_v60, %v11581_v50  ;;  %v5107_v4 = vrot.slane %v5085_v63, %v11581_v50  ;;  %v9613_v16 = vld [vmem:[%s11531_s27 + $0x904] ss:$8 sps:$4 sm:$0xff]   ;;  %v9607_v19 = vld [vmem:[%s11531_s27 + $0x100] ss:$8 sps:$4 sm:$0xff]   ;;  %v9616_v21 = vld [vmem:[%s11531_s27 + $0x114] ss:$8 sps:$4 sm:$0xff]  }
 0x147   : > { %8100 = vmatprep.subr.bf16.mxu0 %v9548_v26  ;;  %v9611_v20 = vld [vmem:[%s11531_s27 + $0x900] ss:$8 sps:$4 sm:$0xff]   ;;  %v9619_v22 = vld [vmem:[%s11531_s27 + $0x914] ss:$8 sps:$4 sm:$0xff]   ;;  %v9614_v25 = vld [vmem:[%s11531_s27 + $0x110] ss:$8 sps:$4 sm:$0xff]  }
 0x148   : > { %7792 = vmatprep.mubr.bf16.mxu1 %v5009_v62  ;;  %8120 = vmatprep.mubr.bf16.mxu0 %v5107_v4  ;;  %v5019_v23 = vcombine.high %v5009_v62, %v5009_v62  ;;  %v5117_v24 = vcombine.high %v5107_v4, %v5107_v4  ;;  %v9617_v26 = vld [vmem:[%s11531_s27 + $0x910] ss:$8 sps:$4 sm:$0xff]   ;;  %v9632_v37 = vld [vmem:[%s11531_s27 + $0x140] ss:$8 sps:$4 sm:$0xff]   ;;  %v9640_v39 = vld [vmem:[%s11531_s27 + $0x154] ss:$8 sps:$4 sm:$0xff]  }
 0x149   : > { %7773 = vmatpush1.bf16.msra.mxu1 %v9550_v27  ;;  %v9622_v27 = vld [vmem:[%s11531_s27 + $0x124] ss:$8 sps:$4 sm:$0xff]   ;;  %v9635_v38 = vld [vmem:[%s11531_s27 + $0x940] ss:$8 sps:$4 sm:$0xff]   ;;  %v9667_v60 = vld [vmem:[%s11531_s27 + $0x994] ss:$8 sps:$4 sm:$0xff]  }
 0x14a   : > { %8101 = vmatpush1.bf16.msra.mxu0 %v9551_v28  ;;  %7774 = vmatprep.subr.bf16.mxu1 %v9552_v29  ;;  %v9625_v28 = vld [vmem:[%s11531_s27 + $0x924] ss:$8 sps:$4 sm:$0xff]   ;;  %v9620_v29 = vld [vmem:[%s11531_s27 + $0x120] ss:$8 sps:$4 sm:$0xff]   ;;  %v9662_v61 = vld [vmem:[%s11531_s27 + $0x190] ss:$8 sps:$4 sm:$0xff]  }
 0x14b   : > { %8102 = vmatprep.subr.bf16.mxu0 %v9554_v30  ;;  %v9623_v30 = vld [vmem:[%s11531_s27 + $0x920] ss:$8 sps:$4 sm:$0xff]   ;;  %v9646_v43 = vld [vmem:[%s11531_s27 + $0x164] ss:$8 sps:$4 sm:$0xff]   ;;  %v9665_v62 = vld [vmem:[%s11531_s27 + $0x990] ss:$8 sps:$4 sm:$0xff]  }
 0x14c   : > { %v9661_v55 = vld [vmem:[%s11531_s27 + $0x984] ss:$8 sps:$4 sm:$0xff]   ;;  %v9679_v4 = vld [vmem:[%s11531_s27 + $0x9b4] ss:$8 sps:$4 sm:$0xff]  }
 0x14d   : > { %7775 = vmatpush1.bf16.msra.mxu1 %v9556_v31  ;;  %v9628_v31 = vld [vmem:[%s11531_s27 + $0x134] ss:$8 sps:$4 sm:$0xff]   ;;  %v9670_v63 = vld [vmem:[%s11531_s27 + $0x1a4] ss:$8 sps:$4 sm:$0xff]  }
 0x14e   : > { %8103 = vmatpush1.bf16.msra.mxu0 %v9557_v32  ;;  %7776 = vmatprep.subr.bf16.mxu1 %v9558_v33  ;;  %v9631_v32 = vld [vmem:[%s11531_s27 + $0x934] ss:$8 sps:$4 sm:$0xff]   ;;  %v9626_v33 = vld [vmem:[%s11531_s27 + $0x130] ss:$8 sps:$4 sm:$0xff]  }
 0x14f   : > { %8104 = vmatprep.subr.bf16.mxu0 %v9560_v34  ;;  %v9629_v34 = vld [vmem:[%s11531_s27 + $0x930] ss:$8 sps:$4 sm:$0xff]  }
 0x151   : > { %7777 = vmatpush1.bf16.msra.mxu1 %v9562_v35  ;;  %v9634_v35 = vld [vmem:[%s11531_s27 + $0x144] ss:$8 sps:$4 sm:$0xff]  }
 0x152   : > { %8105 = vmatpush1.bf16.msra.mxu0 %v9563_v36  ;;  %7778 = vmatprep.subr.bf16.mxu1 %v9564_v40  ;;  %v9637_v36 = vld [vmem:[%s11531_s27 + $0x944] ss:$8 sps:$4 sm:$0xff]   ;;  %v9643_v40 = vld [vmem:[%s11531_s27 + $0x954] ss:$8 sps:$4 sm:$0xff]  }
 0x153   : > { %8106 = vmatprep.subr.bf16.mxu0 %v9566_v41  ;;  %v9638_v41 = vld [vmem:[%s11531_s27 + $0x150] ss:$8 sps:$4 sm:$0xff]  }
 0x155   : > { %7779 = vmatpush1.bf16.msra.mxu1 %v9568_v42  ;;  %v9641_v42 = vld [vmem:[%s11531_s27 + $0x950] ss:$8 sps:$4 sm:$0xff]  }
 0x156   : > { %8107 = vmatpush1.bf16.msra.mxu0 %v9569_v45  ;;  %7780 = vmatprep.subr.bf16.mxu1 %v9570_v46  ;;  %v9649_v45 = vld [vmem:[%s11531_s27 + $0x964] ss:$8 sps:$4 sm:$0xff]   ;;  %v9644_v46 = vld [vmem:[%s11531_s27 + $0x160] ss:$8 sps:$4 sm:$0xff]  }
 0x157   : > { %8108 = vmatprep.subr.bf16.mxu0 %v9572_v47  ;;  %v9647_v47 = vld [vmem:[%s11531_s27 + $0x960] ss:$8 sps:$4 sm:$0xff]  }
 0x159   : > { %7781 = vmatpush1.bf16.msra.mxu1 %v9574_v48  ;;  %v9652_v48 = vld [vmem:[%s11531_s27 + $0x174] ss:$8 sps:$4 sm:$0xff]  }
 0x15a   : > { %8109 = vmatpush1.bf16.msra.mxu0 %v9575_v49  ;;  %7782 = vmatprep.subr.bf16.mxu1 %v9576_v51  ;;  %v9655_v49 = vld [vmem:[%s11531_s27 + $0x974] ss:$8 sps:$4 sm:$0xff]   ;;  %v9650_v51 = vld [vmem:[%s11531_s27 + $0x170] ss:$8 sps:$4 sm:$0xff]  }
 0x15b   : > { %8110 = vmatprep.subr.bf16.mxu0 %v9578_v52  ;;  %v9653_v52 = vld [vmem:[%s11531_s27 + $0x970] ss:$8 sps:$4 sm:$0xff]  }
 0x15d   : > { %7783 = vmatpush1.bf16.msra.mxu1 %v9580_v54  ;;  %v9658_v54 = vld [vmem:[%s11531_s27 + $0x184] ss:$8 sps:$4 sm:$0xff]  }
 0x15e   : > { %8111 = vmatpush1.bf16.msra.mxu0 %v9581_v56  ;;  %7784 = vmatprep.subr.bf16.mxu1 %v9582_v58  ;;  %v9656_v56 = vld [vmem:[%s11531_s27 + $0x180] ss:$8 sps:$4 sm:$0xff]  }
 0x15f   : > { %8112 = vmatprep.subr.bf16.mxu0 %v9584_v59  ;;  %v9659_v58 = vld [vmem:[%s11531_s27 + $0x980] ss:$8 sps:$4 sm:$0xff]   ;;  %v9664_v59 = vld [vmem:[%s11531_s27 + $0x194] ss:$8 sps:$4 sm:$0xff]  }
 0x161   : > { %7785 = vmatpush1.bf16.msra.mxu1 %v9586_v0  ;;  %v9673_v0 = vld [vmem:[%s11531_s27 + $0x9a4] ss:$8 sps:$4 sm:$0xff]  }
 0x162   : > { %8113 = vmatpush1.bf16.msra.mxu0 %v9587_v1  ;;  %7786 = vmatprep.subr.bf16.mxu1 %v9588_v2  ;;  %v9668_v1 = vld [vmem:[%s11531_s27 + $0x1a0] ss:$8 sps:$4 sm:$0xff]  }
 0x163   : > { %8114 = vmatprep.subr.bf16.mxu0 %v9590_v3  ;;  %v9671_v2 = vld [vmem:[%s11531_s27 + $0x9a0] ss:$8 sps:$4 sm:$0xff]   ;;  %v9676_v3 = vld [vmem:[%s11531_s27 + $0x1b4] ss:$8 sps:$4 sm:$0xff]  }
 0x165   : > { %7787 = vmatpush1.bf16.msra.mxu1 %v9592_v5  ;;  %v9674_v5 = vld [vmem:[%s11531_s27 + $0x1b0] ss:$8 sps:$4 sm:$0xff]  }
 0x166   : > { %8115 = vmatpush1.bf16.msra.mxu0 %v9593_v6  ;;  %7788 = vmatprep.subr.bf16.mxu1 %v9594_v7  ;;  %v9677_v6 = vld [vmem:[%s11531_s27 + $0x9b0] ss:$8 sps:$4 sm:$0xff]   ;;  %v9682_v7 = vld [vmem:[%s11531_s27 + $0x1c4] ss:$8 sps:$4 sm:$0xff]  }
 0x167   : > { %8116 = vmatprep.subr.bf16.mxu0 %v9596_v8  ;;  %v9685_v8 = vld [vmem:[%s11531_s27 + $0x9c4] ss:$8 sps:$4 sm:$0xff]  }
 0x169   : > { %7789 = vmatpush1.bf16.msra.mxu1 %v9598_v9  ;;  %v9680_v9 = vld [vmem:[%s11531_s27 + $0x1c0] ss:$8 sps:$4 sm:$0xff]  }
 0x16a   : > { %8117 = vmatpush1.bf16.msra.mxu0 %v9599_v10  ;;  %7790 = vmatprep.subr.bf16.mxu1 %v9600_v11  ;;  %v9683_v10 = vld [vmem:[%s11531_s27 + $0x9c0] ss:$8 sps:$4 sm:$0xff]   ;;  %v9688_v11 = vld [vmem:[%s11531_s27 + $0x1d4] ss:$8 sps:$4 sm:$0xff]  }
 0x16b   : > { %8118 = vmatprep.subr.bf16.mxu0 %v9602_v12  ;;  %v9691_v12 = vld [vmem:[%s11531_s27 + $0x9d4] ss:$8 sps:$4 sm:$0xff]  }
 0x16d   : > { %7791 = vmatpush1.bf16.msra.mxu1 %v9604_v13  ;;  %v9686_v13 = vld [vmem:[%s11531_s27 + $0x1d0] ss:$8 sps:$4 sm:$0xff]  }
 0x16e   : > { %8119 = vmatpush1.bf16.msra.mxu0 %v9605_v14  ;;  %7801 = vmatprep.subr.bf16.mxu1 %v9609_v15  ;;  %v9689_v14 = vld [vmem:[%s11531_s27 + $0x9d0] ss:$8 sps:$4 sm:$0xff]   ;;  %v9694_v15 = vld [vmem:[%s11531_s27 + $0x1e4] ss:$8 sps:$4 sm:$0xff]  }
 0x16f   : > { %8129 = vmatprep.subr.bf16.mxu0 %v9613_v16  ;;  %v9697_v16 = vld [vmem:[%s11531_s27 + $0x9e4] ss:$8 sps:$4 sm:$0xff]  }
 0x170   : > { %7793 = vmatmul.mubr.bf16.vlgmr.msra.gmra.mrb[0].mxu1 %v11618_v17 }
 0x171   : > { %8121 = vmatmul.mubr.bf16.vlgmr.msra.gmra.mrb[0].mxu0 %v11621_v18  ;;  %7802 = vmatpush1.bf16.msra.mxu1 %v9607_v19  ;;  %v4972_v19 = vcombine.high %v11586_v53, %v11586_v53  ;;  %v9698_v53 = vld [vmem:[%s11531_s27 + $0x1f0] ss:$8 sps:$4 sm:$0xff]  }
 0x172   : > { %8130 = vmatpush1.bf16.msra.mxu0 %v9611_v20  ;;  %7803 = vmatprep.subr.bf16.mxu1 %v9616_v21  ;;  %v5070_v20 = vcombine.high %v11593_v57, %v11593_v57  ;;  %v9692_v21 = vld [vmem:[%s11531_s27 + $0x1e0] ss:$8 sps:$4 sm:$0xff]   ;;  %v9701_v57 = vld [vmem:[%s11531_s27 + $0x9f0] ss:$8 sps:$4 sm:$0xff]  }
 0x173   : > { %8131 = vmatprep.subr.bf16.mxu0 %v9619_v22  ;;  %7833 = vmatprep.mubr.bf16.mxu1 %v5019_v23  ;;  %v9695_v22 = vld [vmem:[%s11531_s27 + $0x9e0] ss:$8 sps:$4 sm:$0xff]   ;;  %v9700_v23 = vld [vmem:[%s11531_s27 + $0x1f4] ss:$8 sps:$4 sm:$0xff]  }
 0x174   : > { %8161 = vmatprep.mubr.bf16.mxu0 %v5117_v24  ;;  %v9703_v24 = vld [vmem:[%s11531_s27 + $0x9f4] ss:$8 sps:$4 sm:$0xff]  }
 0x175   : > { %7804 = vmatpush1.bf16.msra.mxu1 %v9614_v25  ;;  %v11690_v25 = vrot.slane %v4972_v19, %v11581_v50  ;;  %v9770_v19 = vld [vmem:[%s11531_s27 + $0x2b0] ss:$8 sps:$4 sm:$0xff]  }
 0x176   : > { %8132 = vmatpush1.bf16.msra.mxu0 %v9617_v26  ;;  %7805 = vmatprep.subr.bf16.mxu1 %v9622_v27  ;;  %v11693_v26 = vrot.slane %v5070_v20, %v11581_v50  ;;  %v9706_v27 = vld [vmem:[%s11531_s27 + $0x204] ss:$8 sps:$4 sm:$0xff]   ;;  %v9773_v20 = vld [vmem:[%s11531_s27 + $0xab0] ss:$8 sps:$4 sm:$0xff]  }
 0x177   : > { %8133 = vmatprep.subr.bf16.mxu0 %v9625_v28  ;;  %v9709_v28 = vld [vmem:[%s11531_s27 + $0xa04] ss:$8 sps:$4 sm:$0xff]  }
 0x179   : > { %7806 = vmatpush1.bf16.msra.mxu1 %v9620_v29  ;;  %v4988_v29 = vcombine.high %v11690_v25, %v11690_v25 }
 0x17a   : > { %8134 = vmatpush1.bf16.msra.mxu0 %v9623_v30  ;;  %7807 = vmatprep.subr.bf16.mxu1 %v9628_v31  ;;  %v5086_v30 = vcombine.high %v11693_v26, %v11693_v26  ;;  %v5017_v31 = vcombine.high %v11618_v17, %v11618_v17 }
 0x17b   : > { %8135 = vmatprep.subr.bf16.mxu0 %v9631_v32  ;;  %v5115_v32 = vcombine.high %v11621_v18, %v11621_v18  ;;  %v9710_v18 = vld [vmem:[%s11531_s27 + $0x210] ss:$8 sps:$4 sm:$0xff]  }
 0x17c   : > { %v11715_v17 = vrot.slane %v5086_v30, %v11581_v50  ;;  %v9793_v30 = vld [vmem:[%s11531_s27 + $0xae4] ss:$8 sps:$4 sm:$0xff]  }
 0x17d   : > { %7808 = vmatpush1.bf16.msra.mxu1 %v9626_v33  ;;  %v9704_v33 = vld [vmem:[%s11531_s27 + $0x200] ss:$8 sps:$4 sm:$0xff]  }
 0x17e   : > { %8136 = vmatpush1.bf16.msra.mxu0 %v9629_v34  ;;  %7809 = vmatprep.subr.bf16.mxu1 %v9634_v35  ;;  %v9707_v34 = vld [vmem:[%s11531_s27 + $0xa00] ss:$8 sps:$4 sm:$0xff]   ;;  %v9712_v35 = vld [vmem:[%s11531_s27 + $0x214] ss:$8 sps:$4 sm:$0xff]  }
 0x17f   : > { %8137 = vmatprep.subr.bf16.mxu0 %v9637_v36  ;;  %v9715_v36 = vld [vmem:[%s11531_s27 + $0xa14] ss:$8 sps:$4 sm:$0xff]  }
 0x181   : > { %7810 = vmatpush1.bf16.msra.mxu1 %v9632_v37  ;;  %v11712_v37 = vrot.slane %v4988_v29, %v11581_v50  ;;  %v9790_v29 = vld [vmem:[%s11531_s27 + $0x2e4] ss:$8 sps:$4 sm:$0xff]  }
 0x182   : > { %8138 = vmatpush1.bf16.msra.mxu0 %v9635_v38  ;;  %7811 = vmatprep.subr.bf16.mxu1 %v9640_v39  ;;  %v9713_v38 = vld [vmem:[%s11531_s27 + $0xa10] ss:$8 sps:$4 sm:$0xff]   ;;  %v9718_v39 = vld [vmem:[%s11531_s27 + $0x224] ss:$8 sps:$4 sm:$0xff]  }
 0x183   : > { %8139 = vmatprep.subr.bf16.mxu0 %v9643_v40  ;;  %v9721_v40 = vld [vmem:[%s11531_s27 + $0xa24] ss:$8 sps:$4 sm:$0xff]  }
 0x185   : > { %7812 = vmatpush1.bf16.msra.mxu1 %v9638_v41  ;;  %v9716_v41 = vld [vmem:[%s11531_s27 + $0x220] ss:$8 sps:$4 sm:$0xff]  }
 0x186   : > { %8140 = vmatpush1.bf16.msra.mxu0 %v9641_v42  ;;  %7813 = vmatprep.subr.bf16.mxu1 %v9646_v43  ;;  %v9719_v42 = vld [vmem:[%s11531_s27 + $0xa20] ss:$8 sps:$4 sm:$0xff]   ;;  %v9724_v43 = vld [vmem:[%s11531_s27 + $0x234] ss:$8 sps:$4 sm:$0xff]  }
 0x187   : > { %8141 = vmatprep.subr.bf16.mxu0 %v9649_v45  ;;  %v9727_v45 = vld [vmem:[%s11531_s27 + $0xa34] ss:$8 sps:$4 sm:$0xff]  }
 0x189   : > { %7814 = vmatpush1.bf16.msra.mxu1 %v9644_v46  ;;  %v9722_v46 = vld [vmem:[%s11531_s27 + $0x230] ss:$8 sps:$4 sm:$0xff]  }
 0x18a   : > { %8142 = vmatpush1.bf16.msra.mxu0 %v9647_v47  ;;  %7815 = vmatprep.subr.bf16.mxu1 %v9652_v48  ;;  %v9725_v47 = vld [vmem:[%s11531_s27 + $0xa30] ss:$8 sps:$4 sm:$0xff]   ;;  %v9730_v48 = vld [vmem:[%s11531_s27 + $0x244] ss:$8 sps:$4 sm:$0xff]  }
 0x18b   : > { %8143 = vmatprep.subr.bf16.mxu0 %v9655_v49  ;;  %v9733_v49 = vld [vmem:[%s11531_s27 + $0xa44] ss:$8 sps:$4 sm:$0xff]  }
 0x18d   : > { %7816 = vmatpush1.bf16.msra.mxu1 %v9650_v51  ;;  %v9728_v51 = vld [vmem:[%s11531_s27 + $0x240] ss:$8 sps:$4 sm:$0xff]  }
 0x18e   : > { %8144 = vmatpush1.bf16.msra.mxu0 %v9653_v52  ;;  %7817 = vmatprep.subr.bf16.mxu1 %v9658_v54  ;;  %v9731_v52 = vld [vmem:[%s11531_s27 + $0xa40] ss:$8 sps:$4 sm:$0xff]   ;;  %v9736_v54 = vld [vmem:[%s11531_s27 + $0x254] ss:$8 sps:$4 sm:$0xff]  }
 0x18f   : > { %8145 = vmatprep.subr.bf16.mxu0 %v9661_v55  ;;  %v9739_v55 = vld [vmem:[%s11531_s27 + $0xa54] ss:$8 sps:$4 sm:$0xff]  }
 0x191   : > { %7818 = vmatpush1.bf16.msra.mxu1 %v9656_v56  ;;  %v9734_v56 = vld [vmem:[%s11531_s27 + $0x250] ss:$8 sps:$4 sm:$0xff]  }
 0x192   : > { %8146 = vmatpush1.bf16.msra.mxu0 %v9659_v58  ;;  %7819 = vmatprep.subr.bf16.mxu1 %v9664_v59  ;;  %v9737_v58 = vld [vmem:[%s11531_s27 + $0xa50] ss:$8 sps:$4 sm:$0xff]   ;;  %v9742_v59 = vld [vmem:[%s11531_s27 + $0x264] ss:$8 sps:$4 sm:$0xff]  }
 0x193   : > { %8147 = vmatprep.subr.bf16.mxu0 %v9667_v60  ;;  %v9745_v60 = vld [vmem:[%s11531_s27 + $0xa64] ss:$8 sps:$4 sm:$0xff]  }
 0x195   : > { %7820 = vmatpush1.bf16.msra.mxu1 %v9662_v61  ;;  %v9740_v61 = vld [vmem:[%s11531_s27 + $0x260] ss:$8 sps:$4 sm:$0xff]  }
 0x196   : > { %8148 = vmatpush1.bf16.msra.mxu0 %v9665_v62  ;;  %7821 = vmatprep.subr.bf16.mxu1 %v9670_v63  ;;  %v9743_v62 = vld [vmem:[%s11531_s27 + $0xa60] ss:$8 sps:$4 sm:$0xff]   ;;  %v9748_v63 = vld [vmem:[%s11531_s27 + $0x274] ss:$8 sps:$4 sm:$0xff]  }
 0x197   : > { %8149 = vmatprep.subr.bf16.mxu0 %v9673_v0  ;;  %v9751_v0 = vld [vmem:[%s11531_s27 + $0xa74] ss:$8 sps:$4 sm:$0xff]  }
 0x199   : > { %7822 = vmatpush1.bf16.msra.mxu1 %v9668_v1  ;;  %v9746_v1 = vld [vmem:[%s11531_s27 + $0x270] ss:$8 sps:$4 sm:$0xff]  }
 0x19a   : > { %8150 = vmatpush1.bf16.msra.mxu0 %v9671_v2  ;;  %7823 = vmatprep.subr.bf16.mxu1 %v9676_v3  ;;  %v9749_v2 = vld [vmem:[%s11531_s27 + $0xa70] ss:$8 sps:$4 sm:$0xff]   ;;  %v9754_v3 = vld [vmem:[%s11531_s27 + $0x284] ss:$8 sps:$4 sm:$0xff]  }
 0x19b   : > { %8151 = vmatprep.subr.bf16.mxu0 %v9679_v4  ;;  %v9757_v4 = vld [vmem:[%s11531_s27 + $0xa84] ss:$8 sps:$4 sm:$0xff]  }
 0x19d   : > { %7824 = vmatpush1.bf16.msra.mxu1 %v9674_v5  ;;  %v9752_v5 = vld [vmem:[%s11531_s27 + $0x280] ss:$8 sps:$4 sm:$0xff]  }
 0x19e   : > { %8152 = vmatpush1.bf16.msra.mxu0 %v9677_v6  ;;  %7825 = vmatprep.subr.bf16.mxu1 %v9682_v7  ;;  %v9755_v6 = vld [vmem:[%s11531_s27 + $0xa80] ss:$8 sps:$4 sm:$0xff]   ;;  %v9760_v7 = vld [vmem:[%s11531_s27 + $0x294] ss:$8 sps:$4 sm:$0xff]  }
 0x19f   : > { %8153 = vmatprep.subr.bf16.mxu0 %v9685_v8  ;;  %v9763_v8 = vld [vmem:[%s11531_s27 + $0xa94] ss:$8 sps:$4 sm:$0xff]  }
 0x1a1   : > { %7826 = vmatpush1.bf16.msra.mxu1 %v9680_v9  ;;  %v9758_v9 = vld [vmem:[%s11531_s27 + $0x290] ss:$8 sps:$4 sm:$0xff]  }
 0x1a2   : > { %8154 = vmatpush1.bf16.msra.mxu0 %v9683_v10  ;;  %7827 = vmatprep.subr.bf16.mxu1 %v9688_v11  ;;  %v9761_v10 = vld [vmem:[%s11531_s27 + $0xa90] ss:$8 sps:$4 sm:$0xff]   ;;  %v9766_v11 = vld [vmem:[%s11531_s27 + $0x2a4] ss:$8 sps:$4 sm:$0xff]  }
 0x1a3   : > { %8155 = vmatprep.subr.bf16.mxu0 %v9691_v12  ;;  %v9769_v12 = vld [vmem:[%s11531_s27 + $0xaa4] ss:$8 sps:$4 sm:$0xff]  }
 0x1a5   : > { %7828 = vmatpush1.bf16.msra.mxu1 %v9686_v13  ;;  %v9764_v13 = vld [vmem:[%s11531_s27 + $0x2a0] ss:$8 sps:$4 sm:$0xff]  }
 0x1a6   : > { %8156 = vmatpush1.bf16.msra.mxu0 %v9689_v14  ;;  %7829 = vmatprep.subr.bf16.mxu1 %v9694_v15  ;;  %v9767_v14 = vld [vmem:[%s11531_s27 + $0xaa0] ss:$8 sps:$4 sm:$0xff]   ;;  %v9772_v15 = vld [vmem:[%s11531_s27 + $0x2b4] ss:$8 sps:$4 sm:$0xff]  }
 0x1a7   : > { %8157 = vmatprep.subr.bf16.mxu0 %v9697_v16  ;;  %v9775_v16 = vld [vmem:[%s11531_s27 + $0xab4] ss:$8 sps:$4 sm:$0xff]  }
 0x1a9   : > { %7830 = vmatpush1.bf16.msra.mxu1 %v9692_v21  ;;  %v9778_v21 = vld [vmem:[%s11531_s27 + $0x2c4] ss:$8 sps:$4 sm:$0xff]  }
 0x1aa   : > { %8158 = vmatpush1.bf16.msra.mxu0 %v9695_v22  ;;  %7831 = vmatprep.subr.bf16.mxu1 %v9700_v23  ;;  %v9781_v22 = vld [vmem:[%s11531_s27 + $0xac4] ss:$8 sps:$4 sm:$0xff]   ;;  %v9776_v23 = vld [vmem:[%s11531_s27 + $0x2c0] ss:$8 sps:$4 sm:$0xff]  }
 0x1ab   : > { %8159 = vmatprep.subr.bf16.mxu0 %v9703_v24  ;;  %v9779_v24 = vld [vmem:[%s11531_s27 + $0xac0] ss:$8 sps:$4 sm:$0xff]  }
 0x1ad   : > { %7832 = vmatpush1.bf16.msra.mxu1 %v9698_v53  ;;  %v9784_v53 = vld [vmem:[%s11531_s27 + $0x2d4] ss:$8 sps:$4 sm:$0xff]  }
 0x1ae   : > { %8160 = vmatpush1.bf16.msra.mxu0 %v9701_v57  ;;  %7842 = vmatprep.subr.bf16.mxu1 %v9706_v27  ;;  %v9787_v57 = vld [vmem:[%s11531_s27 + $0xad4] ss:$8 sps:$4 sm:$0xff]   ;;  %v9782_v27 = vld [vmem:[%s11531_s27 + $0x2d0] ss:$8 sps:$4 sm:$0xff]  }
 0x1af   : > { %8170 = vmatprep.subr.bf16.mxu0 %v9709_v28  ;;  %v9785_v28 = vld [vmem:[%s11531_s27 + $0xad0] ss:$8 sps:$4 sm:$0xff]  }
 0x1b0   : > { %7834 = vmatmul.mubr.bf16.vlgmr.msra.gmra.mrb[0].mxu1 %v5017_v31  ;;  %v9788_v31 = vld [vmem:[%s11531_s27 + $0x2e0] ss:$8 sps:$4 sm:$0xff]  }
 0x1b1   : > { %8162 = vmatmul.mubr.bf16.vlgmr.msra.gmra.mrb[0].mxu0 %v5115_v32  ;;  %7843 = vmatpush1.bf16.msra.mxu1 %v9704_v33  ;;  %v9791_v32 = vld [vmem:[%s11531_s27 + $0xae0] ss:$8 sps:$4 sm:$0xff]   ;;  %v9796_v33 = vld [vmem:[%s11531_s27 + $0x2f4] ss:$8 sps:$4 sm:$0xff]  }
 0x1b2   : > { %8171 = vmatpush1.bf16.msra.mxu0 %v9707_v34  ;;  %7844 = vmatprep.subr.bf16.mxu1 %v9712_v35  ;;  %v9799_v34 = vld [vmem:[%s11531_s27 + $0xaf4] ss:$8 sps:$4 sm:$0xff]   ;;  %v9794_v35 = vld [vmem:[%s11531_s27 + $0x2f0] ss:$8 sps:$4 sm:$0xff]  }
 0x1b3   : > { %8172 = vmatprep.subr.bf16.mxu0 %v9715_v36  ;;  %7874 = vmatprep.mubr.bf16.mxu1 %v11712_v37  ;;  %v9797_v36 = vld [vmem:[%s11531_s27 + $0xaf0] ss:$8 sps:$4 sm:$0xff]  }
 0x1b4   : > { %8202 = vmatprep.mubr.bf16.mxu0 %v11715_v17 }
 0x1b5   : > { %7845 = vmatpush1.bf16.msra.mxu1 %v9710_v18  ;;  %v9802_v18 = vld [vmem:[%s11531_s27 + $0x304] ss:$8 sps:$4 sm:$0xff]  }
 0x1b6   : > { %8173 = vmatpush1.bf16.msra.mxu0 %v9713_v38  ;;  %7846 = vmatprep.subr.bf16.mxu1 %v9718_v39  ;;  %v9805_v38 = vld [vmem:[%s11531_s27 + $0xb04] ss:$8 sps:$4 sm:$0xff]   ;;  %v11781_v39 = vrot.slane %v11690_v25, %v11581_v50  ;;  %v5020_v25 = vcombine.high %v11712_v37, %v11712_v37 }
 0x1b7   : > { %8174 = vmatprep.subr.bf16.mxu0 %v9721_v40  ;;  %v11785_v40 = vrot.slane %v11693_v26, %v11581_v50  ;;  %v9806_v26 = vld [vmem:[%s11531_s27 + $0x310] ss:$8 sps:$4 sm:$0xff]   ;;  %v9814_v37 = vld [vmem:[%s11531_s27 + $0x324] ss:$8 sps:$4 sm:$0xff]  }
 0x1b9   : > { %7847 = vmatpush1.bf16.msra.mxu1 %v9716_v41  ;;  %v9800_v41 = vld [vmem:[%s11531_s27 + $0x300] ss:$8 sps:$4 sm:$0xff]  }
 0x1ba   : > { %8175 = vmatpush1.bf16.msra.mxu0 %v9719_v42  ;;  %7848 = vmatprep.subr.bf16.mxu1 %v9724_v43  ;;  %v9803_v42 = vld [vmem:[%s11531_s27 + $0xb00] ss:$8 sps:$4 sm:$0xff]   ;;  %v9808_v43 = vld [vmem:[%s11531_s27 + $0x314] ss:$8 sps:$4 sm:$0xff]  }
 0x1bb   : > { %8176 = vmatprep.subr.bf16.mxu0 %v9727_v45  ;;  %v9811_v45 = vld [vmem:[%s11531_s27 + $0xb14] ss:$8 sps:$4 sm:$0xff]  }
 0x1bd   : > { %7849 = vmatpush1.bf16.msra.mxu1 %v9722_v46  ;;  %v5118_v46 = vcombine.high %v11715_v17, %v11715_v17  ;;  %v9812_v17 = vld [vmem:[%s11531_s27 + $0x320] ss:$8 sps:$4 sm:$0xff]  }
 0x1be   : > { %8177 = vmatpush1.bf16.msra.mxu0 %v9725_v47  ;;  %7850 = vmatprep.subr.bf16.mxu1 %v9730_v48  ;;  %v9809_v47 = vld [vmem:[%s11531_s27 + $0xb10] ss:$8 sps:$4 sm:$0xff]   ;;  %v9817_v48 = vld [vmem:[%s11531_s27 + $0xb24] ss:$8 sps:$4 sm:$0xff]  }
 0x1bf   : > { %8178 = vmatprep.subr.bf16.mxu0 %v9733_v49  ;;  %v9815_v49 = vld [vmem:[%s11531_s27 + $0xb20] ss:$8 sps:$4 sm:$0xff]  }
 0x1c1   : > { %7851 = vmatpush1.bf16.msra.mxu1 %v9728_v51  ;;  %v9820_v51 = vld [vmem:[%s11531_s27 + $0x334] ss:$8 sps:$4 sm:$0xff]  }
 0x1c2   : > { %8179 = vmatpush1.bf16.msra.mxu0 %v9731_v52  ;;  %7852 = vmatprep.subr.bf16.mxu1 %v9736_v54  ;;  %v9823_v52 = vld [vmem:[%s11531_s27 + $0xb34] ss:$8 sps:$4 sm:$0xff]   ;;  %v9818_v54 = vld [vmem:[%s11531_s27 + $0x330] ss:$8 sps:$4 sm:$0xff]  }
 0x1c3   : > { %8180 = vmatprep.subr.bf16.mxu0 %v9739_v55  ;;  %v9821_v55 = vld [vmem:[%s11531_s27 + $0xb30] ss:$8 sps:$4 sm:$0xff]  }
 0x1c5   : > { %7853 = vmatpush1.bf16.msra.mxu1 %v9734_v56  ;;  %v9826_v56 = vld [vmem:[%s11531_s27 + $0x344] ss:$8 sps:$4 sm:$0xff]  }
 0x1c6   : > { %8181 = vmatpush1.bf16.msra.mxu0 %v9737_v58  ;;  %7854 = vmatprep.subr.bf16.mxu1 %v9742_v59  ;;  %v9829_v58 = vld [vmem:[%s11531_s27 + $0xb44] ss:$8 sps:$4 sm:$0xff]   ;;  %v9824_v59 = vld [vmem:[%s11531_s27 + $0x340] ss:$8 sps:$4 sm:$0xff]  }
 0x1c7   : > { %8182 = vmatprep.subr.bf16.mxu0 %v9745_v60  ;;  %v9827_v60 = vld [vmem:[%s11531_s27 + $0xb40] ss:$8 sps:$4 sm:$0xff]  }
 0x1c9   : > { %7855 = vmatpush1.bf16.msra.mxu1 %v9740_v61  ;;  %v9832_v61 = vld [vmem:[%s11531_s27 + $0x354] ss:$8 sps:$4 sm:$0xff]  }
 0x1ca   : > { %8183 = vmatpush1.bf16.msra.mxu0 %v9743_v62  ;;  %7856 = vmatprep.subr.bf16.mxu1 %v9748_v63  ;;  %v9835_v62 = vld [vmem:[%s11531_s27 + $0xb54] ss:$8 sps:$4 sm:$0xff]   ;;  %v9830_v63 = vld [vmem:[%s11531_s27 + $0x350] ss:$8 sps:$4 sm:$0xff]  }
 0x1cb   : > { %8184 = vmatprep.subr.bf16.mxu0 %v9751_v0  ;;  %v9833_v0 = vld [vmem:[%s11531_s27 + $0xb50] ss:$8 sps:$4 sm:$0xff]  }
 0x1cd   : > { %7857 = vmatpush1.bf16.msra.mxu1 %v9746_v1  ;;  %v9838_v1 = vld [vmem:[%s11531_s27 + $0x364] ss:$8 sps:$4 sm:$0xff]  }
 0x1ce   : > { %8185 = vmatpush1.bf16.msra.mxu0 %v9749_v2  ;;  %7858 = vmatprep.subr.bf16.mxu1 %v9754_v3  ;;  %v9841_v2 = vld [vmem:[%s11531_s27 + $0xb64] ss:$8 sps:$4 sm:$0xff]   ;;  %v9836_v3 = vld [vmem:[%s11531_s27 + $0x360] ss:$8 sps:$4 sm:$0xff]  }
 0x1cf   : > { %8186 = vmatprep.subr.bf16.mxu0 %v9757_v4  ;;  %v9839_v4 = vld [vmem:[%s11531_s27 + $0xb60] ss:$8 sps:$4 sm:$0xff]  }
 0x1d1   : > { %7859 = vmatpush1.bf16.msra.mxu1 %v9752_v5  ;;  %v9844_v5 = vld [vmem:[%s11531_s27 + $0x374] ss:$8 sps:$4 sm:$0xff]  }
 0x1d2   : > { %8187 = vmatpush1.bf16.msra.mxu0 %v9755_v6  ;;  %7860 = vmatprep.subr.bf16.mxu1 %v9760_v7  ;;  %v9847_v6 = vld [vmem:[%s11531_s27 + $0xb74] ss:$8 sps:$4 sm:$0xff]   ;;  %v9842_v7 = vld [vmem:[%s11531_s27 + $0x370] ss:$8 sps:$4 sm:$0xff]  }
 0x1d3   : > { %8188 = vmatprep.subr.bf16.mxu0 %v9763_v8  ;;  %v9845_v8 = vld [vmem:[%s11531_s27 + $0xb70] ss:$8 sps:$4 sm:$0xff]  }
 0x1d5   : > { %7861 = vmatpush1.bf16.msra.mxu1 %v9758_v9  ;;  %v9850_v9 = vld [vmem:[%s11531_s27 + $0x384] ss:$8 sps:$4 sm:$0xff]  }
 0x1d6   : > { %8189 = vmatpush1.bf16.msra.mxu0 %v9761_v10  ;;  %7862 = vmatprep.subr.bf16.mxu1 %v9766_v11  ;;  %v9853_v10 = vld [vmem:[%s11531_s27 + $0xb84] ss:$8 sps:$4 sm:$0xff]   ;;  %v9848_v11 = vld [vmem:[%s11531_s27 + $0x380] ss:$8 sps:$4 sm:$0xff]  }
 0x1d7   : > { %8190 = vmatprep.subr.bf16.mxu0 %v9769_v12  ;;  %v9851_v12 = vld [vmem:[%s11531_s27 + $0xb80] ss:$8 sps:$4 sm:$0xff]  }
 0x1d9   : > { %7863 = vmatpush1.bf16.msra.mxu1 %v9764_v13  ;;  %v9856_v13 = vld [vmem:[%s11531_s27 + $0x394] ss:$8 sps:$4 sm:$0xff]  }
 0x1da   : > { %8191 = vmatpush1.bf16.msra.mxu0 %v9767_v14  ;;  %7864 = vmatprep.subr.bf16.mxu1 %v9772_v15  ;;  %v9859_v14 = vld [vmem:[%s11531_s27 + $0xb94] ss:$8 sps:$4 sm:$0xff]   ;;  %v9854_v15 = vld [vmem:[%s11531_s27 + $0x390] ss:$8 sps:$4 sm:$0xff]  }
 0x1db   : > { %8192 = vmatprep.subr.bf16.mxu0 %v9775_v16  ;;  %v9857_v16 = vld [vmem:[%s11531_s27 + $0xb90] ss:$8 sps:$4 sm:$0xff]  }
 0x1dd   : > { %7865 = vmatpush1.bf16.msra.mxu1 %v9770_v19  ;;  %v9862_v19 = vld [vmem:[%s11531_s27 + $0x3a4] ss:$8 sps:$4 sm:$0xff]  }
 0x1de   : > { %8193 = vmatpush1.bf16.msra.mxu0 %v9773_v20  ;;  %7866 = vmatprep.subr.bf16.mxu1 %v9778_v21  ;;  %v9865_v20 = vld [vmem:[%s11531_s27 + $0xba4] ss:$8 sps:$4 sm:$0xff]   ;;  %v9860_v21 = vld [vmem:[%s11531_s27 + $0x3a0] ss:$8 sps:$4 sm:$0xff]  }
 0x1df   : > { %8194 = vmatprep.subr.bf16.mxu0 %v9781_v22  ;;  %v9863_v22 = vld [vmem:[%s11531_s27 + $0xba0] ss:$8 sps:$4 sm:$0xff]  }
 0x1e1   : > { %7867 = vmatpush1.bf16.msra.mxu1 %v9776_v23  ;;  %v9868_v23 = vld [vmem:[%s11531_s27 + $0x3b4] ss:$8 sps:$4 sm:$0xff]  }
 0x1e2   : > { %8195 = vmatpush1.bf16.msra.mxu0 %v9779_v24  ;;  %7868 = vmatprep.subr.bf16.mxu1 %v9784_v53  ;;  %v9871_v24 = vld [vmem:[%s11531_s27 + $0xbb4] ss:$8 sps:$4 sm:$0xff]   ;;  %v9866_v53 = vld [vmem:[%s11531_s27 + $0x3b0] ss:$8 sps:$4 sm:$0xff]  }
 0x1e3   : > { %8196 = vmatprep.subr.bf16.mxu0 %v9787_v57  ;;  %v9869_v57 = vld [vmem:[%s11531_s27 + $0xbb0] ss:$8 sps:$4 sm:$0xff]  }
 0x1e5   : > { %7869 = vmatpush1.bf16.msra.mxu1 %v9782_v27  ;;  %v9874_v27 = vld [vmem:[%s11531_s27 + $0x3c4] ss:$8 sps:$4 sm:$0xff]  }
 0x1e6   : > { %8197 = vmatpush1.bf16.msra.mxu0 %v9785_v28  ;;  %7870 = vmatprep.subr.bf16.mxu1 %v9790_v29  ;;  %v9877_v28 = vld [vmem:[%s11531_s27 + $0xbc4] ss:$8 sps:$4 sm:$0xff]   ;;  %v9872_v29 = vld [vmem:[%s11531_s27 + $0x3c0] ss:$8 sps:$4 sm:$0xff]  }
 0x1e7   : > { %8198 = vmatprep.subr.bf16.mxu0 %v9793_v30  ;;  %v9875_v30 = vld [vmem:[%s11531_s27 + $0xbc0] ss:$8 sps:$4 sm:$0xff]  }
 0x1e9   : > { %7871 = vmatpush1.bf16.msra.mxu1 %v9788_v31  ;;  %v9880_v31 = vld [vmem:[%s11531_s27 + $0x3d4] ss:$8 sps:$4 sm:$0xff]  }
 0x1ea   : > { %8199 = vmatpush1.bf16.msra.mxu0 %v9791_v32  ;;  %7872 = vmatprep.subr.bf16.mxu1 %v9796_v33  ;;  %v9883_v32 = vld [vmem:[%s11531_s27 + $0xbd4] ss:$8 sps:$4 sm:$0xff]   ;;  %v9878_v33 = vld [vmem:[%s11531_s27 + $0x3d0] ss:$8 sps:$4 sm:$0xff]  }
 0x1eb   : > { %8200 = vmatprep.subr.bf16.mxu0 %v9799_v34  ;;  %v9881_v34 = vld [vmem:[%s11531_s27 + $0xbd0] ss:$8 sps:$4 sm:$0xff]  }
 0x1ed   : > { %7873 = vmatpush1.bf16.msra.mxu1 %v9794_v35  ;;  %v9886_v35 = vld [vmem:[%s11531_s27 + $0x3e4] ss:$8 sps:$4 sm:$0xff]  }
 0x1ee   : > { %8201 = vmatpush1.bf16.msra.mxu0 %v9797_v36  ;;  %7883 = vmatprep.subr.bf16.mxu1 %v9802_v18  ;;  %v9889_v36 = vld [vmem:[%s11531_s27 + $0xbe4] ss:$8 sps:$4 sm:$0xff]   ;;  %v9884_v18 = vld [vmem:[%s11531_s27 + $0x3e0] ss:$8 sps:$4 sm:$0xff]  }
 0x1ef   : > { %8211 = vmatprep.subr.bf16.mxu0 %v9805_v38  ;;  %v9887_v38 = vld [vmem:[%s11531_s27 + $0xbe0] ss:$8 sps:$4 sm:$0xff]  }
 0x1f0   : > { %7875 = vmatmul.mubr.bf16.vlgmr.msra.gmra.mrb[0].mxu1 %v11781_v39 }
 0x1f1   : > { %8203 = vmatmul.mubr.bf16.vlgmr.msra.gmra.mrb[0].mxu0 %v11785_v40  ;;  %7884 = vmatpush1.bf16.msra.mxu1 %v9800_v41  ;;  %v11852_v41 = vld [vmem:[%s11511_s30 + $0x8] sm:$0xff] }
 0x1f2   : > { %8212 = vmatpush1.bf16.msra.mxu0 %v9803_v42  ;;  %7885 = vmatprep.subr.bf16.mxu1 %v9808_v43  ;;  %v11855_v42 = vld [vmem:[%s11511_s30 + $0x18] sm:$0xff] }
 0x1f3   : > { %8213 = vmatprep.subr.bf16.mxu0 %v9811_v45  ;;  %7915 = vmatprep.mubr.bf16.mxu1 %v5020_v25  ;;  %v9892_v43 = vld [vmem:[%s11531_s27 + $0x3f4] ss:$8 sps:$4 sm:$0xff]   ;;  %v11861_v25 = vrot.slane %v11852_v41, %v11581_v50 }
 0x1f4   : > { %8243 = vmatprep.mubr.bf16.mxu0 %v5118_v46  ;;  %v9895_v45 = vld [vmem:[%s11531_s27 + $0xbf4] ss:$8 sps:$4 sm:$0xff]   ;;  %v11865_v46 = vrot.slane %v11855_v42, %v11581_v50 }
 0x1f5   : > { %7886 = vmatpush1.bf16.msra.mxu1 %v9806_v26  ;;  %v9890_v26 = vld [vmem:[%s11531_s27 + $0x3f0] ss:$8 sps:$4 sm:$0xff]  }
 0x1f6   : > { %8214 = vmatpush1.bf16.msra.mxu0 %v9809_v47  ;;  %7887 = vmatprep.subr.bf16.mxu1 %v9814_v37  ;;  %v9893_v47 = vld [vmem:[%s11531_s27 + $0xbf0] ss:$8 sps:$4 sm:$0xff]   ;;  %v9898_v37 = vld [vmem:[%s11531_s27 + $0x404] ss:$8 sps:$4 sm:$0xff]  }
 0x1f7   : > { %8215 = vmatprep.subr.bf16.mxu0 %v9817_v48  ;;  %v9901_v48 = vld [vmem:[%s11531_s27 + $0xc04] ss:$8 sps:$4 sm:$0xff]  }
 0x1f9   : > { %7888 = vmatpush1.bf16.msra.mxu1 %v9812_v17  ;;  %v5036_v17 = vcombine.high %v11861_v25, %v11861_v25 }
 0x1fa   : > { %8216 = vmatpush1.bf16.msra.mxu0 %v9815_v49  ;;  %7889 = vmatprep.subr.bf16.mxu1 %v9820_v51  ;;  %v5134_v49 = vcombine.high %v11865_v46, %v11865_v46  ;;  %v9896_v51 = vld [vmem:[%s11531_s27 + $0x400] ss:$8 sps:$4 sm:$0xff]  }
 0x1fb   : > { %8217 = vmatprep.subr.bf16.mxu0 %v9823_v52  ;;  %v9899_v52 = vld [vmem:[%s11531_s27 + $0xc00] ss:$8 sps:$4 sm:$0xff]  }
 0x1fd   : > { %7890 = vmatpush1.bf16.msra.mxu1 %v9818_v54  ;;  %v5018_v54 = vcombine.high %v11781_v39, %v11781_v39  ;;  %v9902_v39 = vld [vmem:[%s11531_s27 + $0x410] ss:$8 sps:$4 sm:$0xff]  }
 0x1fe   : > { %8218 = vmatpush1.bf16.msra.mxu0 %v9821_v55  ;;  %7891 = vmatprep.subr.bf16.mxu1 %v9826_v56  ;;  %v5116_v55 = vcombine.high %v11785_v40, %v11785_v40  ;;  %v9904_v56 = vld [vmem:[%s11531_s27 + $0x414] ss:$8 sps:$4 sm:$0xff]   ;;  %v9905_v40 = vld [vmem:[%s11531_s27 + $0xc10] ss:$8 sps:$4 sm:$0xff]  }
 0x1ff   : > { %8219 = vmatprep.subr.bf16.mxu0 %v9829_v58  ;;  %v9907_v58 = vld [vmem:[%s11531_s27 + $0xc14] ss:$8 sps:$4 sm:$0xff]  }
 0x201   : > { %7892 = vmatpush1.bf16.msra.mxu1 %v9824_v59  ;;  %v11884_v59 = vrot.slane %v5036_v17, %v11581_v50  ;;  %v9974_v17 = vld [vmem:[%s11531_s27 + $0x4d0] ss:$8 sps:$4 sm:$0xff]  }
 0x202   : > { %8220 = vmatpush1.bf16.msra.mxu0 %v9827_v60  ;;  %7893 = vmatprep.subr.bf16.mxu1 %v9832_v61  ;;  %v11887_v60 = vrot.slane %v5134_v49, %v11581_v50  ;;  %v9910_v61 = vld [vmem:[%s11531_s27 + $0x424] ss:$8 sps:$4 sm:$0xff]   ;;  %v9977_v49 = vld [vmem:[%s11531_s27 + $0xcd0] ss:$8 sps:$4 sm:$0xff]  }
 0x203   : > { %8221 = vmatprep.subr.bf16.mxu0 %v9835_v62  ;;  %v9913_v62 = vld [vmem:[%s11531_s27 + $0xc24] ss:$8 sps:$4 sm:$0xff]  }
 0x205   : > { %7894 = vmatpush1.bf16.msra.mxu1 %v9830_v63  ;;  %v9908_v63 = vld [vmem:[%s11531_s27 + $0x420] ss:$8 sps:$4 sm:$0xff]  }
 0x206   : > { %8222 = vmatpush1.bf16.msra.mxu0 %v9833_v0  ;;  %7895 = vmatprep.subr.bf16.mxu1 %v9838_v1  ;;  %v9911_v0 = vld [vmem:[%s11531_s27 + $0xc20] ss:$8 sps:$4 sm:$0xff]   ;;  %v9916_v1 = vld [vmem:[%s11531_s27 + $0x434] ss:$8 sps:$4 sm:$0xff]  }
 0x207   : > { %8223 = vmatprep.subr.bf16.mxu0 %v9841_v2  ;;  %v9919_v2 = vld [vmem:[%s11531_s27 + $0xc34] ss:$8 sps:$4 sm:$0xff]  }
 0x209   : > { %7896 = vmatpush1.bf16.msra.mxu1 %v9836_v3  ;;  %v9914_v3 = vld [vmem:[%s11531_s27 + $0x430] ss:$8 sps:$4 sm:$0xff]  }
 0x20a   : > { %8224 = vmatpush1.bf16.msra.mxu0 %v9839_v4  ;;  %7897 = vmatprep.subr.bf16.mxu1 %v9844_v5  ;;  %v9917_v4 = vld [vmem:[%s11531_s27 + $0xc30] ss:$8 sps:$4 sm:$0xff]   ;;  %v9922_v5 = vld [vmem:[%s11531_s27 + $0x444] ss:$8 sps:$4 sm:$0xff]  }
 0x20b   : > { %8225 = vmatprep.subr.bf16.mxu0 %v9847_v6  ;;  %v9925_v6 = vld [vmem:[%s11531_s27 + $0xc44] ss:$8 sps:$4 sm:$0xff]  }
 0x20d   : > { %7898 = vmatpush1.bf16.msra.mxu1 %v9842_v7  ;;  %v9920_v7 = vld [vmem:[%s11531_s27 + $0x440] ss:$8 sps:$4 sm:$0xff]  }
 0x20e   : > { %8226 = vmatpush1.bf16.msra.mxu0 %v9845_v8  ;;  %7899 = vmatprep.subr.bf16.mxu1 %v9850_v9  ;;  %v9923_v8 = vld [vmem:[%s11531_s27 + $0xc40] ss:$8 sps:$4 sm:$0xff]   ;;  %v9928_v9 = vld [vmem:[%s11531_s27 + $0x454] ss:$8 sps:$4 sm:$0xff]  }
 0x20f   : > { %8227 = vmatprep.subr.bf16.mxu0 %v9853_v10  ;;  %v9931_v10 = vld [vmem:[%s11531_s27 + $0xc54] ss:$8 sps:$4 sm:$0xff]  }
 0x211   : > { %7900 = vmatpush1.bf16.msra.mxu1 %v9848_v11  ;;  %v9926_v11 = vld [vmem:[%s11531_s27 + $0x450] ss:$8 sps:$4 sm:$0xff]  }
 0x212   : > { %8228 = vmatpush1.bf16.msra.mxu0 %v9851_v12  ;;  %7901 = vmatprep.subr.bf16.mxu1 %v9856_v13  ;;  %v9929_v12 = vld [vmem:[%s11531_s27 + $0xc50] ss:$8 sps:$4 sm:$0xff]   ;;  %v9934_v13 = vld [vmem:[%s11531_s27 + $0x464] ss:$8 sps:$4 sm:$0xff]  }
 0x213   : > { %8229 = vmatprep.subr.bf16.mxu0 %v9859_v14  ;;  %v9937_v14 = vld [vmem:[%s11531_s27 + $0xc64] ss:$8 sps:$4 sm:$0xff]  }
 0x215   : > { %7902 = vmatpush1.bf16.msra.mxu1 %v9854_v15  ;;  %v9932_v15 = vld [vmem:[%s11531_s27 + $0x460] ss:$8 sps:$4 sm:$0xff]  }
 0x216   : > { %8230 = vmatpush1.bf16.msra.mxu0 %v9857_v16  ;;  %7903 = vmatprep.subr.bf16.mxu1 %v9862_v19  ;;  %v9935_v16 = vld [vmem:[%s11531_s27 + $0xc60] ss:$8 sps:$4 sm:$0xff]   ;;  %v9940_v19 = vld [vmem:[%s11531_s27 + $0x474] ss:$8 sps:$4 sm:$0xff]  }
 0x217   : > { %8231 = vmatprep.subr.bf16.mxu0 %v9865_v20  ;;  %v9943_v20 = vld [vmem:[%s11531_s27 + $0xc74] ss:$8 sps:$4 sm:$0xff]  }
 0x219   : > { %7904 = vmatpush1.bf16.msra.mxu1 %v9860_v21  ;;  %v9938_v21 = vld [vmem:[%s11531_s27 + $0x470] ss:$8 sps:$4 sm:$0xff]  }
 0x21a   : > { %8232 = vmatpush1.bf16.msra.mxu0 %v9863_v22  ;;  %7905 = vmatprep.subr.bf16.mxu1 %v9868_v23  ;;  %v9941_v22 = vld [vmem:[%s11531_s27 + $0xc70] ss:$8 sps:$4 sm:$0xff]   ;;  %v9946_v23 = vld [vmem:[%s11531_s27 + $0x484] ss:$8 sps:$4 sm:$0xff]  }
 0x21b   : > { %8233 = vmatprep.subr.bf16.mxu0 %v9871_v24  ;;  %v9949_v24 = vld [vmem:[%s11531_s27 + $0xc84] ss:$8 sps:$4 sm:$0xff]  }
 0x21d   : > { %7906 = vmatpush1.bf16.msra.mxu1 %v9866_v53  ;;  %v9944_v53 = vld [vmem:[%s11531_s27 + $0x480] ss:$8 sps:$4 sm:$0xff]  }
 0x21e   : > { %8234 = vmatpush1.bf16.msra.mxu0 %v9869_v57  ;;  %7907 = vmatprep.subr.bf16.mxu1 %v9874_v27  ;;  %v9947_v57 = vld [vmem:[%s11531_s27 + $0xc80] ss:$8 sps:$4 sm:$0xff]   ;;  %v9952_v27 = vld [vmem:[%s11531_s27 + $0x494] ss:$8 sps:$4 sm:$0xff]  }
 0x21f   : > { %8235 = vmatprep.subr.bf16.mxu0 %v9877_v28  ;;  %v9955_v28 = vld [vmem:[%s11531_s27 + $0xc94] ss:$8 sps:$4 sm:$0xff]  }
 0x221   : > { %7908 = vmatpush1.bf16.msra.mxu1 %v9872_v29  ;;  %v9950_v29 = vld [vmem:[%s11531_s27 + $0x490] ss:$8 sps:$4 sm:$0xff]  }
 0x222   : > { %8236 = vmatpush1.bf16.msra.mxu0 %v9875_v30  ;;  %7909 = vmatprep.subr.bf16.mxu1 %v9880_v31  ;;  %v9953_v30 = vld [vmem:[%s11531_s27 + $0xc90] ss:$8 sps:$4 sm:$0xff]   ;;  %v9958_v31 = vld [vmem:[%s11531_s27 + $0x4a4] ss:$8 sps:$4 sm:$0xff]  }
 0x223   : > { %8237 = vmatprep.subr.bf16.mxu0 %v9883_v32  ;;  %v9961_v32 = vld [vmem:[%s11531_s27 + $0xca4] ss:$8 sps:$4 sm:$0xff]  }
 0x225   : > { %7910 = vmatpush1.bf16.msra.mxu1 %v9878_v33  ;;  %v9956_v33 = vld [vmem:[%s11531_s27 + $0x4a0] ss:$8 sps:$4 sm:$0xff]  }
 0x226   : > { %8238 = vmatpush1.bf16.msra.mxu0 %v9881_v34  ;;  %7911 = vmatprep.subr.bf16.mxu1 %v9886_v35  ;;  %v9959_v34 = vld [vmem:[%s11531_s27 + $0xca0] ss:$8 sps:$4 sm:$0xff]   ;;  %v9964_v35 = vld [vmem:[%s11531_s27 + $0x4b4] ss:$8 sps:$4 sm:$0xff]  }
 0x227   : > { %8239 = vmatprep.subr.bf16.mxu0 %v9889_v36  ;;  %v9967_v36 = vld [vmem:[%s11531_s27 + $0xcb4] ss:$8 sps:$4 sm:$0xff]  }
 0x229   : > { %7912 = vmatpush1.bf16.msra.mxu1 %v9884_v18  ;;  %v9962_v18 = vld [vmem:[%s11531_s27 + $0x4b0] ss:$8 sps:$4 sm:$0xff]  }
 0x22a   : > { %8240 = vmatpush1.bf16.msra.mxu0 %v9887_v38  ;;  %7913 = vmatprep.subr.bf16.mxu1 %v9892_v43  ;;  %v9965_v38 = vld [vmem:[%s11531_s27 + $0xcb0] ss:$8 sps:$4 sm:$0xff]   ;;  %v9970_v43 = vld [vmem:[%s11531_s27 + $0x4c4] ss:$8 sps:$4 sm:$0xff]  }
 0x22b   : > { %8241 = vmatprep.subr.bf16.mxu0 %v9895_v45  ;;  %v9973_v45 = vld [vmem:[%s11531_s27 + $0xcc4] ss:$8 sps:$4 sm:$0xff]  }
 0x22d   : > { %7914 = vmatpush1.bf16.msra.mxu1 %v9890_v26  ;;  %v9968_v26 = vld [vmem:[%s11531_s27 + $0x4c0] ss:$8 sps:$4 sm:$0xff]  }
 0x22e   : > { %8242 = vmatpush1.bf16.msra.mxu0 %v9893_v47  ;;  %7924 = vmatprep.subr.bf16.mxu1 %v9898_v37  ;;  %v9971_v47 = vld [vmem:[%s11531_s27 + $0xcc0] ss:$8 sps:$4 sm:$0xff]   ;;  %v9976_v37 = vld [vmem:[%s11531_s27 + $0x4d4] ss:$8 sps:$4 sm:$0xff]  }
 0x22f   : > { %8252 = vmatprep.subr.bf16.mxu0 %v9901_v48  ;;  %v9979_v48 = vld [vmem:[%s11531_s27 + $0xcd4] ss:$8 sps:$4 sm:$0xff]  }
 0x230   : > { %7916 = vmatmul.mubr.bf16.vlgmr.msra.gmra.mrb[0].mxu1 %v5018_v54  ;;  %v9980_v54 = vld [vmem:[%s11531_s27 + $0x4e0] ss:$8 sps:$4 sm:$0xff]  }
 0x231   : > { %8244 = vmatmul.mubr.bf16.vlgmr.msra.gmra.mrb[0].mxu0 %v5116_v55  ;;  %7925 = vmatpush1.bf16.msra.mxu1 %v9896_v51  ;;  %v9982_v51 = vld [vmem:[%s11531_s27 + $0x4e4] ss:$8 sps:$4 sm:$0xff]   ;;  %v9983_v55 = vld [vmem:[%s11531_s27 + $0xce0] ss:$8 sps:$4 sm:$0xff]  }
 0x232   : > { %8253 = vmatpush1.bf16.msra.mxu0 %v9899_v52  ;;  %7926 = vmatprep.subr.bf16.mxu1 %v9904_v56  ;;  %v9985_v52 = vld [vmem:[%s11531_s27 + $0xce4] ss:$8 sps:$4 sm:$0xff]   ;;  %v9988_v56 = vld [vmem:[%s11531_s27 + $0x4f4] ss:$8 sps:$4 sm:$0xff]  }
 0x233   : > { %8254 = vmatprep.subr.bf16.mxu0 %v9907_v58  ;;  %7956 = vmatprep.mubr.bf16.mxu1 %v11884_v59  ;;  %v9991_v58 = vld [vmem:[%s11531_s27 + $0xcf4] ss:$8 sps:$4 sm:$0xff]  }
 0x234   : > { %8284 = vmatprep.mubr.bf16.mxu0 %v11887_v60 }
 0x235   : > { %7927 = vmatpush1.bf16.msra.mxu1 %v9902_v39  ;;  %v9986_v39 = vld [vmem:[%s11531_s27 + $0x4f0] ss:$8 sps:$4 sm:$0xff]  }
 0x236   : > { %8255 = vmatpush1.bf16.msra.mxu0 %v9905_v40  ;;  %7928 = vmatprep.subr.bf16.mxu1 %v9910_v61  ;;  %v9989_v40 = vld [vmem:[%s11531_s27 + $0xcf0] ss:$8 sps:$4 sm:$0xff]   ;;  %v9994_v61 = vld [vmem:[%s11531_s27 + $0x504] ss:$8 sps:$4 sm:$0xff]  }
 0x237   : > { %8256 = vmatprep.subr.bf16.mxu0 %v9913_v62  ;;  %v9997_v62 = vld [vmem:[%s11531_s27 + $0xd04] ss:$8 sps:$4 sm:$0xff]  }
 0x239   : > { %7929 = vmatpush1.bf16.msra.mxu1 %v9908_v63  ;;  %v11953_v63 = vrot.slane %v11861_v25, %v11581_v50  ;;  %v5068_v25 = vcombine.high %v11884_v59, %v11884_v59  ;;  %v10006_v59 = vld [vmem:[%s11531_s27 + $0x524] ss:$8 sps:$4 sm:$0xff]  }
 0x23a   : > { %8257 = vmatpush1.bf16.msra.mxu0 %v9911_v0  ;;  %7930 = vmatprep.subr.bf16.mxu1 %v9916_v1  ;;  %v11957_v0 = vrot.slane %v11865_v46, %v11581_v50  ;;  %v9992_v1 = vld [vmem:[%s11531_s27 + $0x500] ss:$8 sps:$4 sm:$0xff]   ;;  %v9998_v46 = vld [vmem:[%s11531_s27 + $0x510] ss:$8 sps:$4 sm:$0xff]  }
 0x23b   : > { %8258 = vmatprep.subr.bf16.mxu0 %v9919_v2  ;;  %v9995_v2 = vld [vmem:[%s11531_s27 + $0xd00] ss:$8 sps:$4 sm:$0xff]  }
 0x23d   : > { %7931 = vmatpush1.bf16.msra.mxu1 %v9914_v3  ;;  %v10000_v3 = vld [vmem:[%s11531_s27 + $0x514] ss:$8 sps:$4 sm:$0xff]  }
 0x23e   : > { %8259 = vmatpush1.bf16.msra.mxu0 %v9917_v4  ;;  %7932 = vmatprep.subr.bf16.mxu1 %v9922_v5  ;;  %v10003_v4 = vld [vmem:[%s11531_s27 + $0xd14] ss:$8 sps:$4 sm:$0xff]   ;;  %v5166_v5 = vcombine.high %v11887_v60, %v11887_v60  ;;  %v10004_v60 = vld [vmem:[%s11531_s27 + $0x520] ss:$8 sps:$4 sm:$0xff]  }
 0x23f   : > { %8260 = vmatprep.subr.bf16.mxu0 %v9925_v6  ;;  %v10001_v6 = vld [vmem:[%s11531_s27 + $0xd10] ss:$8 sps:$4 sm:$0xff]  }
 0x241   : > { %7933 = vmatpush1.bf16.msra.mxu1 %v9920_v7  ;;  %v10009_v7 = vld [vmem:[%s11531_s27 + $0xd24] ss:$8 sps:$4 sm:$0xff]  }
 0x242   : > { %8261 = vmatpush1.bf16.msra.mxu0 %v9923_v8  ;;  %7934 = vmatprep.subr.bf16.mxu1 %v9928_v9  ;;  %v10007_v8 = vld [vmem:[%s11531_s27 + $0xd20] ss:$8 sps:$4 sm:$0xff]   ;;  %v10012_v9 = vld [vmem:[%s11531_s27 + $0x534] ss:$8 sps:$4 sm:$0xff]  }
 0x243   : > { %8262 = vmatprep.subr.bf16.mxu0 %v9931_v10  ;;  %v10015_v10 = vld [vmem:[%s11531_s27 + $0xd34] ss:$8 sps:$4 sm:$0xff]  }
 0x245   : > { %7935 = vmatpush1.bf16.msra.mxu1 %v9926_v11  ;;  %v10010_v11 = vld [vmem:[%s11531_s27 + $0x530] ss:$8 sps:$4 sm:$0xff]  }
 0x246   : > { %8263 = vmatpush1.bf16.msra.mxu0 %v9929_v12  ;;  %7936 = vmatprep.subr.bf16.mxu1 %v9934_v13  ;;  %v10013_v12 = vld [vmem:[%s11531_s27 + $0xd30] ss:$8 sps:$4 sm:$0xff]   ;;  %v10018_v13 = vld [vmem:[%s11531_s27 + $0x544] ss:$8 sps:$4 sm:$0xff]  }
 0x247   : > { %8264 = vmatprep.subr.bf16.mxu0 %v9937_v14  ;;  %v10021_v14 = vld [vmem:[%s11531_s27 + $0xd44] ss:$8 sps:$4 sm:$0xff]  }
 0x249   : > { %7937 = vmatpush1.bf16.msra.mxu1 %v9932_v15  ;;  %v10016_v15 = vld [vmem:[%s11531_s27 + $0x540] ss:$8 sps:$4 sm:$0xff]  }
 0x24a   : > { %8265 = vmatpush1.bf16.msra.mxu0 %v9935_v16  ;;  %7938 = vmatprep.subr.bf16.mxu1 %v9940_v19  ;;  %v10019_v16 = vld [vmem:[%s11531_s27 + $0xd40] ss:$8 sps:$4 sm:$0xff]   ;;  %v10024_v19 = vld [vmem:[%s11531_s27 + $0x554] ss:$8 sps:$4 sm:$0xff]  }
 0x24b   : > { %8266 = vmatprep.subr.bf16.mxu0 %v9943_v20  ;;  %v10027_v20 = vld [vmem:[%s11531_s27 + $0xd54] ss:$8 sps:$4 sm:$0xff]  }
 0x24d   : > { %7939 = vmatpush1.bf16.msra.mxu1 %v9938_v21  ;;  %v10022_v21 = vld [vmem:[%s11531_s27 + $0x550] ss:$8 sps:$4 sm:$0xff]  }
 0x24e   : > { %8267 = vmatpush1.bf16.msra.mxu0 %v9941_v22  ;;  %7940 = vmatprep.subr.bf16.mxu1 %v9946_v23  ;;  %v10025_v22 = vld [vmem:[%s11531_s27 + $0xd50] ss:$8 sps:$4 sm:$0xff]   ;;  %v10030_v23 = vld [vmem:[%s11531_s27 + $0x564] ss:$8 sps:$4 sm:$0xff]  }
 0x24f   : > { %8268 = vmatprep.subr.bf16.mxu0 %v9949_v24  ;;  %v10033_v24 = vld [vmem:[%s11531_s27 + $0xd64] ss:$8 sps:$4 sm:$0xff]  }
 0x251   : > { %7941 = vmatpush1.bf16.msra.mxu1 %v9944_v53  ;;  %v10028_v53 = vld [vmem:[%s11531_s27 + $0x560] ss:$8 sps:$4 sm:$0xff]  }
 0x252   : > { %8269 = vmatpush1.bf16.msra.mxu0 %v9947_v57  ;;  %7942 = vmatprep.subr.bf16.mxu1 %v9952_v27  ;;  %v10031_v57 = vld [vmem:[%s11531_s27 + $0xd60] ss:$8 sps:$4 sm:$0xff]   ;;  %v10036_v27 = vld [vmem:[%s11531_s27 + $0x574] ss:$8 sps:$4 sm:$0xff]  }
 0x253   : > { %8270 = vmatprep.subr.bf16.mxu0 %v9955_v28  ;;  %v10039_v28 = vld [vmem:[%s11531_s27 + $0xd74] ss:$8 sps:$4 sm:$0xff]  }
 0x255   : > { %7943 = vmatpush1.bf16.msra.mxu1 %v9950_v29  ;;  %v10034_v29 = vld [vmem:[%s11531_s27 + $0x570] ss:$8 sps:$4 sm:$0xff]  }
 0x256   : > { %8271 = vmatpush1.bf16.msra.mxu0 %v9953_v30  ;;  %7944 = vmatprep.subr.bf16.mxu1 %v9958_v31  ;;  %v10037_v30 = vld [vmem:[%s11531_s27 + $0xd70] ss:$8 sps:$4 sm:$0xff]   ;;  %v10042_v31 = vld [vmem:[%s11531_s27 + $0x584] ss:$8 sps:$4 sm:$0xff]  }
 0x257   : > { %8272 = vmatprep.subr.bf16.mxu0 %v9961_v32  ;;  %v10045_v32 = vld [vmem:[%s11531_s27 + $0xd84] ss:$8 sps:$4 sm:$0xff]  }
 0x259   : > { %7945 = vmatpush1.bf16.msra.mxu1 %v9956_v33  ;;  %v10040_v33 = vld [vmem:[%s11531_s27 + $0x580] ss:$8 sps:$4 sm:$0xff]  }
 0x25a   : > { %8273 = vmatpush1.bf16.msra.mxu0 %v9959_v34  ;;  %7946 = vmatprep.subr.bf16.mxu1 %v9964_v35  ;;  %v10043_v34 = vld [vmem:[%s11531_s27 + $0xd80] ss:$8 sps:$4 sm:$0xff]   ;;  %v10048_v35 = vld [vmem:[%s11531_s27 + $0x594] ss:$8 sps:$4 sm:$0xff]  }
 0x25b   : > { %8274 = vmatprep.subr.bf16.mxu0 %v9967_v36  ;;  %v10051_v36 = vld [vmem:[%s11531_s27 + $0xd94] ss:$8 sps:$4 sm:$0xff]  }
 0x25d   : > { %7947 = vmatpush1.bf16.msra.mxu1 %v9962_v18  ;;  %v10046_v18 = vld [vmem:[%s11531_s27 + $0x590] ss:$8 sps:$4 sm:$0xff]  }
 0x25e   : > { %8275 = vmatpush1.bf16.msra.mxu0 %v9965_v38  ;;  %7948 = vmatprep.subr.bf16.mxu1 %v9970_v43  ;;  %v10049_v38 = vld [vmem:[%s11531_s27 + $0xd90] ss:$8 sps:$4 sm:$0xff]   ;;  %v10054_v43 = vld [vmem:[%s11531_s27 + $0x5a4] ss:$8 sps:$4 sm:$0xff]  }
 0x25f   : > { %8276 = vmatprep.subr.bf16.mxu0 %v9973_v45  ;;  %v10057_v45 = vld [vmem:[%s11531_s27 + $0xda4] ss:$8 sps:$4 sm:$0xff]  }
 0x261   : > { %7949 = vmatpush1.bf16.msra.mxu1 %v9968_v26  ;;  %v10052_v26 = vld [vmem:[%s11531_s27 + $0x5a0] ss:$8 sps:$4 sm:$0xff]  }
 0x262   : > { %8277 = vmatpush1.bf16.msra.mxu0 %v9971_v47  ;;  %7950 = vmatprep.subr.bf16.mxu1 %v9976_v37  ;;  %v10055_v47 = vld [vmem:[%s11531_s27 + $0xda0] ss:$8 sps:$4 sm:$0xff]   ;;  %v10060_v37 = vld [vmem:[%s11531_s27 + $0x5b4] ss:$8 sps:$4 sm:$0xff]  }
 0x263   : > { %8278 = vmatprep.subr.bf16.mxu0 %v9979_v48  ;;  %v10063_v48 = vld [vmem:[%s11531_s27 + $0xdb4] ss:$8 sps:$4 sm:$0xff]  }
 0x265   : > { %7951 = vmatpush1.bf16.msra.mxu1 %v9974_v17  ;;  %v10058_v17 = vld [vmem:[%s11531_s27 + $0x5b0] ss:$8 sps:$4 sm:$0xff]  }
 0x266   : > { %8279 = vmatpush1.bf16.msra.mxu0 %v9977_v49  ;;  %7952 = vmatprep.subr.bf16.mxu1 %v9982_v51  ;;  %v10061_v49 = vld [vmem:[%s11531_s27 + $0xdb0] ss:$8 sps:$4 sm:$0xff]   ;;  %v10066_v51 = vld [vmem:[%s11531_s27 + $0x5c4] ss:$8 sps:$4 sm:$0xff]  }
 0x267   : > { %8280 = vmatprep.subr.bf16.mxu0 %v9985_v52  ;;  %v10069_v52 = vld [vmem:[%s11531_s27 + $0xdc4] ss:$8 sps:$4 sm:$0xff]  }
 0x269   : > { %7953 = vmatpush1.bf16.msra.mxu1 %v9980_v54  ;;  %v10064_v54 = vld [vmem:[%s11531_s27 + $0x5c0] ss:$8 sps:$4 sm:$0xff]  }
 0x26a   : > { %8281 = vmatpush1.bf16.msra.mxu0 %v9983_v55  ;;  %7954 = vmatprep.subr.bf16.mxu1 %v9988_v56  ;;  %v10067_v55 = vld [vmem:[%s11531_s27 + $0xdc0] ss:$8 sps:$4 sm:$0xff]   ;;  %v10072_v56 = vld [vmem:[%s11531_s27 + $0x5d4] ss:$8 sps:$4 sm:$0xff]  }
 0x26b   : > { %8282 = vmatprep.subr.bf16.mxu0 %v9991_v58  ;;  %v10075_v58 = vld [vmem:[%s11531_s27 + $0xdd4] ss:$8 sps:$4 sm:$0xff]  }
 0x26d   : > { %7955 = vmatpush1.bf16.msra.mxu1 %v9986_v39  ;;  %v10070_v39 = vld [vmem:[%s11531_s27 + $0x5d0] ss:$8 sps:$4 sm:$0xff]  }
 0x26e   : > { %8283 = vmatpush1.bf16.msra.mxu0 %v9989_v40  ;;  %7965 = vmatprep.subr.bf16.mxu1 %v9994_v61  ;;  %v10073_v40 = vld [vmem:[%s11531_s27 + $0xdd0] ss:$8 sps:$4 sm:$0xff]   ;;  %v10078_v61 = vld [vmem:[%s11531_s27 + $0x5e4] ss:$8 sps:$4 sm:$0xff]  }
 0x26f   : > { %8293 = vmatprep.subr.bf16.mxu0 %v9997_v62  ;;  %v10081_v62 = vld [vmem:[%s11531_s27 + $0xde4] ss:$8 sps:$4 sm:$0xff]  }
 0x270   : > { %7957 = vmatmul.mubr.bf16.vlgmr.msra.gmra.mrb[0].mxu1 %v11953_v63 }
 0x271   : > { %8285 = vmatmul.mubr.bf16.vlgmr.msra.gmra.mrb[0].mxu0 %v11957_v0  ;;  %7966 = vmatpush1.bf16.msra.mxu1 %v9992_v1  ;;  %v5021_v1 = vcombine.high %v11852_v41, %v11852_v41  ;;  %v10082_v41 = vld [vmem:[%s11531_s27 + $0x5f0] ss:$8 sps:$4 sm:$0xff]  }
 0x272   : > { %8294 = vmatpush1.bf16.msra.mxu0 %v9995_v2  ;;  %7967 = vmatprep.subr.bf16.mxu1 %v10000_v3  ;;  %v5119_v2 = vcombine.high %v11855_v42, %v11855_v42  ;;  %v10076_v3 = vld [vmem:[%s11531_s27 + $0x5e0] ss:$8 sps:$4 sm:$0xff]   ;;  %v10085_v42 = vld [vmem:[%s11531_s27 + $0xdf0] ss:$8 sps:$4 sm:$0xff]  }
 0x273   : > { %8295 = vmatprep.subr.bf16.mxu0 %v10003_v4  ;;  %7997 = vmatprep.mubr.bf16.mxu1 %v5068_v25  ;;  %v10079_v4 = vld [vmem:[%s11531_s27 + $0xde0] ss:$8 sps:$4 sm:$0xff]   ;;  %v10084_v25 = vld [vmem:[%s11531_s27 + $0x5f4] ss:$8 sps:$4 sm:$0xff]  }
 0x274   : > { %8325 = vmatprep.mubr.bf16.mxu0 %v5166_v5  ;;  %v10087_v5 = vld [vmem:[%s11531_s27 + $0xdf4] ss:$8 sps:$4 sm:$0xff]  }
 0x275   : > { %7968 = vmatpush1.bf16.msra.mxu1 %v9998_v46  ;;  %v12030_v46 = vrot.slane %v5021_v1, %v11581_v50  ;;  %v10154_v1 = vld [vmem:[%s11531_s27 + $0x6b0] ss:$8 sps:$4 sm:$0xff]  }
 0x276   : > { %8296 = vmatpush1.bf16.msra.mxu0 %v10001_v6  ;;  %7969 = vmatprep.subr.bf16.mxu1 %v10006_v59  ;;  %v12033_v6 = vrot.slane %v5119_v2, %v11581_v50  ;;  %v10090_v59 = vld [vmem:[%s11531_s27 + $0x604] ss:$8 sps:$4 sm:$0xff]   ;;  %v10157_v2 = vld [vmem:[%s11531_s27 + $0xeb0] ss:$8 sps:$4 sm:$0xff]  }
 0x277   : > { %8297 = vmatprep.subr.bf16.mxu0 %v10009_v7  ;;  %v10093_v7 = vld [vmem:[%s11531_s27 + $0xe04] ss:$8 sps:$4 sm:$0xff]  }
 0x279   : > { %7970 = vmatpush1.bf16.msra.mxu1 %v10004_v60  ;;  %v5037_v60 = vcombine.high %v12030_v46, %v12030_v46 }
 0x27a   : > { %8298 = vmatpush1.bf16.msra.mxu0 %v10007_v8  ;;  %7971 = vmatprep.subr.bf16.mxu1 %v10012_v9  ;;  %v5135_v8 = vcombine.high %v12033_v6, %v12033_v6  ;;  %v5066_v9 = vcombine.high %v11953_v63, %v11953_v63 }
 0x27b   : > { %8299 = vmatprep.subr.bf16.mxu0 %v10015_v10  ;;  %v5164_v10 = vcombine.high %v11957_v0, %v11957_v0  ;;  %v10094_v0 = vld [vmem:[%s11531_s27 + $0x610] ss:$8 sps:$4 sm:$0xff]  }
 0x27c   : > { %v12055_v63 = vrot.slane %v5135_v8, %v11581_v50  ;;  %v10177_v8 = vld [vmem:[%s11531_s27 + $0xee4] ss:$8 sps:$4 sm:$0xff]  }
 0x27d   : > { %7972 = vmatpush1.bf16.msra.mxu1 %v10010_v11  ;;  %v10088_v11 = vld [vmem:[%s11531_s27 + $0x600] ss:$8 sps:$4 sm:$0xff]  }
 0x27e   : > { %8300 = vmatpush1.bf16.msra.mxu0 %v10013_v12  ;;  %7973 = vmatprep.subr.bf16.mxu1 %v10018_v13  ;;  %v10091_v12 = vld [vmem:[%s11531_s27 + $0xe00] ss:$8 sps:$4 sm:$0xff]   ;;  %v10096_v13 = vld [vmem:[%s11531_s27 + $0x614] ss:$8 sps:$4 sm:$0xff]  }
 0x27f   : > { %8301 = vmatprep.subr.bf16.mxu0 %v10021_v14  ;;  %v10099_v14 = vld [vmem:[%s11531_s27 + $0xe14] ss:$8 sps:$4 sm:$0xff]  }
 0x281   : > { %7974 = vmatpush1.bf16.msra.mxu1 %v10016_v15  ;;  %v12052_v15 = vrot.slane %v5037_v60, %v11581_v50  ;;  %v10174_v60 = vld [vmem:[%s11531_s27 + $0x6e4] ss:$8 sps:$4 sm:$0xff]  }
 0x282   : > { %8302 = vmatpush1.bf16.msra.mxu0 %v10019_v16  ;;  %7975 = vmatprep.subr.bf16.mxu1 %v10024_v19  ;;  %v10097_v16 = vld [vmem:[%s11531_s27 + $0xe10] ss:$8 sps:$4 sm:$0xff]   ;;  %v10102_v19 = vld [vmem:[%s11531_s27 + $0x624] ss:$8 sps:$4 sm:$0xff]  }
 0x283   : > { %8303 = vmatprep.subr.bf16.mxu0 %v10027_v20  ;;  %v10105_v20 = vld [vmem:[%s11531_s27 + $0xe24] ss:$8 sps:$4 sm:$0xff]  }
 0x285   : > { %7976 = vmatpush1.bf16.msra.mxu1 %v10022_v21  ;;  %v10100_v21 = vld [vmem:[%s11531_s27 + $0x620] ss:$8 sps:$4 sm:$0xff]  }
 0x286   : > { %8304 = vmatpush1.bf16.msra.mxu0 %v10025_v22  ;;  %7977 = vmatprep.subr.bf16.mxu1 %v10030_v23  ;;  %v10103_v22 = vld [vmem:[%s11531_s27 + $0xe20] ss:$8 sps:$4 sm:$0xff]   ;;  %v10108_v23 = vld [vmem:[%s11531_s27 + $0x634] ss:$8 sps:$4 sm:$0xff]  }
 0x287   : > { %8305 = vmatprep.subr.bf16.mxu0 %v10033_v24  ;;  %v10111_v24 = vld [vmem:[%s11531_s27 + $0xe34] ss:$8 sps:$4 sm:$0xff]  }
 0x289   : > { %7978 = vmatpush1.bf16.msra.mxu1 %v10028_v53  ;;  %v10106_v53 = vld [vmem:[%s11531_s27 + $0x630] ss:$8 sps:$4 sm:$0xff]  }
 0x28a   : > { %8306 = vmatpush1.bf16.msra.mxu0 %v10031_v57  ;;  %7979 = vmatprep.subr.bf16.mxu1 %v10036_v27  ;;  %v10109_v57 = vld [vmem:[%s11531_s27 + $0xe30] ss:$8 sps:$4 sm:$0xff]   ;;  %v10114_v27 = vld [vmem:[%s11531_s27 + $0x644] ss:$8 sps:$4 sm:$0xff]  }
 0x28b   : > { %8307 = vmatprep.subr.bf16.mxu0 %v10039_v28  ;;  %v10117_v28 = vld [vmem:[%s11531_s27 + $0xe44] ss:$8 sps:$4 sm:$0xff]  }
 0x28d   : > { %7980 = vmatpush1.bf16.msra.mxu1 %v10034_v29  ;;  %v10112_v29 = vld [vmem:[%s11531_s27 + $0x640] ss:$8 sps:$4 sm:$0xff]  }
 0x28e   : > { %8308 = vmatpush1.bf16.msra.mxu0 %v10037_v30  ;;  %7981 = vmatprep.subr.bf16.mxu1 %v10042_v31  ;;  %v10115_v30 = vld [vmem:[%s11531_s27 + $0xe40] ss:$8 sps:$4 sm:$0xff]   ;;  %v10120_v31 = vld [vmem:[%s11531_s27 + $0x654] ss:$8 sps:$4 sm:$0xff]  }
 0x28f   : > { %8309 = vmatprep.subr.bf16.mxu0 %v10045_v32  ;;  %v10123_v32 = vld [vmem:[%s11531_s27 + $0xe54] ss:$8 sps:$4 sm:$0xff]  }
 0x291   : > { %7982 = vmatpush1.bf16.msra.mxu1 %v10040_v33  ;;  %v10118_v33 = vld [vmem:[%s11531_s27 + $0x650] ss:$8 sps:$4 sm:$0xff]  }
 0x292   : > { %8310 = vmatpush1.bf16.msra.mxu0 %v10043_v34  ;;  %7983 = vmatprep.subr.bf16.mxu1 %v10048_v35  ;;  %v10121_v34 = vld [vmem:[%s11531_s27 + $0xe50] ss:$8 sps:$4 sm:$0xff]   ;;  %v10126_v35 = vld [vmem:[%s11531_s27 + $0x664] ss:$8 sps:$4 sm:$0xff]  }
 0x293   : > { %8311 = vmatprep.subr.bf16.mxu0 %v10051_v36  ;;  %v10129_v36 = vld [vmem:[%s11531_s27 + $0xe64] ss:$8 sps:$4 sm:$0xff]  }
 0x295   : > { %7984 = vmatpush1.bf16.msra.mxu1 %v10046_v18  ;;  %v10124_v18 = vld [vmem:[%s11531_s27 + $0x660] ss:$8 sps:$4 sm:$0xff]  }
 0x296   : > { %8312 = vmatpush1.bf16.msra.mxu0 %v10049_v38  ;;  %7985 = vmatprep.subr.bf16.mxu1 %v10054_v43  ;;  %v10127_v38 = vld [vmem:[%s11531_s27 + $0xe60] ss:$8 sps:$4 sm:$0xff]   ;;  %v10132_v43 = vld [vmem:[%s11531_s27 + $0x674] ss:$8 sps:$4 sm:$0xff]  }
 0x297   : > { %8313 = vmatprep.subr.bf16.mxu0 %v10057_v45  ;;  %v10135_v45 = vld [vmem:[%s11531_s27 + $0xe74] ss:$8 sps:$4 sm:$0xff]  }
 0x299   : > { %7986 = vmatpush1.bf16.msra.mxu1 %v10052_v26  ;;  %v10130_v26 = vld [vmem:[%s11531_s27 + $0x670] ss:$8 sps:$4 sm:$0xff]  }
 0x29a   : > { %8314 = vmatpush1.bf16.msra.mxu0 %v10055_v47  ;;  %7987 = vmatprep.subr.bf16.mxu1 %v10060_v37  ;;  %v10133_v47 = vld [vmem:[%s11531_s27 + $0xe70] ss:$8 sps:$4 sm:$0xff]   ;;  %v10138_v37 = vld [vmem:[%s11531_s27 + $0x684] ss:$8 sps:$4 sm:$0xff]  }
 0x29b   : > { %8315 = vmatprep.subr.bf16.mxu0 %v10063_v48  ;;  %v10141_v48 = vld [vmem:[%s11531_s27 + $0xe84] ss:$8 sps:$4 sm:$0xff]  }
 0x29d   : > { %7988 = vmatpush1.bf16.msra.mxu1 %v10058_v17  ;;  %v10136_v17 = vld [vmem:[%s11531_s27 + $0x680] ss:$8 sps:$4 sm:$0xff]  }
 0x29e   : > { %8316 = vmatpush1.bf16.msra.mxu0 %v10061_v49  ;;  %7989 = vmatprep.subr.bf16.mxu1 %v10066_v51  ;;  %v10139_v49 = vld [vmem:[%s11531_s27 + $0xe80] ss:$8 sps:$4 sm:$0xff]   ;;  %v10144_v51 = vld [vmem:[%s11531_s27 + $0x694] ss:$8 sps:$4 sm:$0xff]  }
 0x29f   : > { %8317 = vmatprep.subr.bf16.mxu0 %v10069_v52  ;;  %v10147_v52 = vld [vmem:[%s11531_s27 + $0xe94] ss:$8 sps:$4 sm:$0xff]  }
 0x2a1   : > { %7990 = vmatpush1.bf16.msra.mxu1 %v10064_v54  ;;  %v10142_v54 = vld [vmem:[%s11531_s27 + $0x690] ss:$8 sps:$4 sm:$0xff]  }
 0x2a2   : > { %8318 = vmatpush1.bf16.msra.mxu0 %v10067_v55  ;;  %7991 = vmatprep.subr.bf16.mxu1 %v10072_v56  ;;  %v10145_v55 = vld [vmem:[%s11531_s27 + $0xe90] ss:$8 sps:$4 sm:$0xff]   ;;  %v10150_v56 = vld [vmem:[%s11531_s27 + $0x6a4] ss:$8 sps:$4 sm:$0xff]  }
 0x2a3   : > { %8319 = vmatprep.subr.bf16.mxu0 %v10075_v58  ;;  %v10153_v58 = vld [vmem:[%s11531_s27 + $0xea4] ss:$8 sps:$4 sm:$0xff]  }
 0x2a5   : > { %7992 = vmatpush1.bf16.msra.mxu1 %v10070_v39  ;;  %v10148_v39 = vld [vmem:[%s11531_s27 + $0x6a0] ss:$8 sps:$4 sm:$0xff]  }
 0x2a6   : > { %8320 = vmatpush1.bf16.msra.mxu0 %v10073_v40  ;;  %7993 = vmatprep.subr.bf16.mxu1 %v10078_v61  ;;  %v10151_v40 = vld [vmem:[%s11531_s27 + $0xea0] ss:$8 sps:$4 sm:$0xff]   ;;  %v10156_v61 = vld [vmem:[%s11531_s27 + $0x6b4] ss:$8 sps:$4 sm:$0xff]  }
 0x2a7   : > { %8321 = vmatprep.subr.bf16.mxu0 %v10081_v62  ;;  %v10159_v62 = vld [vmem:[%s11531_s27 + $0xeb4] ss:$8 sps:$4 sm:$0xff]  }
 0x2a9   : > { %7994 = vmatpush1.bf16.msra.mxu1 %v10076_v3  ;;  %v10162_v3 = vld [vmem:[%s11531_s27 + $0x6c4] ss:$8 sps:$4 sm:$0xff]  }
 0x2aa   : > { %8322 = vmatpush1.bf16.msra.mxu0 %v10079_v4  ;;  %7995 = vmatprep.subr.bf16.mxu1 %v10084_v25  ;;  %v10165_v4 = vld [vmem:[%s11531_s27 + $0xec4] ss:$8 sps:$4 sm:$0xff]   ;;  %v10160_v25 = vld [vmem:[%s11531_s27 + $0x6c0] ss:$8 sps:$4 sm:$0xff]  }
 0x2ab   : > { %8323 = vmatprep.subr.bf16.mxu0 %v10087_v5  ;;  %v10163_v5 = vld [vmem:[%s11531_s27 + $0xec0] ss:$8 sps:$4 sm:$0xff]  }
 0x2ad   : > { %7996 = vmatpush1.bf16.msra.mxu1 %v10082_v41  ;;  %v10168_v41 = vld [vmem:[%s11531_s27 + $0x6d4] ss:$8 sps:$4 sm:$0xff]  }
 0x2ae   : > { %8324 = vmatpush1.bf16.msra.mxu0 %v10085_v42  ;;  %8006 = vmatprep.subr.bf16.mxu1 %v10090_v59  ;;  %v10171_v42 = vld [vmem:[%s11531_s27 + $0xed4] ss:$8 sps:$4 sm:$0xff]   ;;  %v10166_v59 = vld [vmem:[%s11531_s27 + $0x6d0] ss:$8 sps:$4 sm:$0xff]  }
 0x2af   : > { %8334 = vmatprep.subr.bf16.mxu0 %v10093_v7  ;;  %v10169_v7 = vld [vmem:[%s11531_s27 + $0xed0] ss:$8 sps:$4 sm:$0xff]  }
 0x2b0   : > { %7998 = vmatmul.mubr.bf16.vlgmr.msra.gmra.mrb[0].mxu1 %v5066_v9  ;;  %v10172_v9 = vld [vmem:[%s11531_s27 + $0x6e0] ss:$8 sps:$4 sm:$0xff]  }
 0x2b1   : > { %8326 = vmatmul.mubr.bf16.vlgmr.msra.gmra.mrb[0].mxu0 %v5164_v10  ;;  %8007 = vmatpush1.bf16.msra.mxu1 %v10088_v11  ;;  %v10175_v10 = vld [vmem:[%s11531_s27 + $0xee0] ss:$8 sps:$4 sm:$0xff]   ;;  %v10180_v11 = vld [vmem:[%s11531_s27 + $0x6f4] ss:$8 sps:$4 sm:$0xff]  }
 0x2b2   : > { %8335 = vmatpush1.bf16.msra.mxu0 %v10091_v12  ;;  %8008 = vmatprep.subr.bf16.mxu1 %v10096_v13  ;;  %v10183_v12 = vld [vmem:[%s11531_s27 + $0xef4] ss:$8 sps:$4 sm:$0xff]   ;;  %v10178_v13 = vld [vmem:[%s11531_s27 + $0x6f0] ss:$8 sps:$4 sm:$0xff]  }
 0x2b3   : > { %8336 = vmatprep.subr.bf16.mxu0 %v10099_v14  ;;  %8038 = vmatprep.mubr.bf16.mxu1 %v12052_v15  ;;  %v10181_v14 = vld [vmem:[%s11531_s27 + $0xef0] ss:$8 sps:$4 sm:$0xff]  }
 0x2b4   : > { %8366 = vmatprep.mubr.bf16.mxu0 %v12055_v63 }
 0x2b5   : > { %8009 = vmatpush1.bf16.msra.mxu1 %v10094_v0  ;;  %v10187_v0 = vld [vmem:[%s11531_s27 + $0x704] ss:$8 sps:$4 sm:$0xff]  }
 0x2b6   : > { %8337 = vmatpush1.bf16.msra.mxu0 %v10097_v16  ;;  %8010 = vmatprep.subr.bf16.mxu1 %v10102_v19  ;;  %v10191_v16 = vld [vmem:[%s11531_s27 + $0xf04] ss:$8 sps:$4 sm:$0xff]   ;;  %v12121_v19 = vrot.slane %v12030_v46, %v11581_v50  ;;  %v5069_v46 = vcombine.high %v12052_v15, %v12052_v15 }
 0x2b7   : > { %8338 = vmatprep.subr.bf16.mxu0 %v10105_v20  ;;  %v12125_v20 = vrot.slane %v12033_v6, %v11581_v50  ;;  %v10192_v50 = vld [vmem:[%s11531_s27 + $0x710] ss:$8 sps:$4 sm:$0xff]   ;;  %v10200_v15 = vld [vmem:[%s11531_s27 + $0x724] ss:$8 sps:$4 sm:$0xff]  }
 0x2b8   : > { %v10195_v6 = vld [vmem:[%s11531_s27 + $0xf10] ss:$8 sps:$4 sm:$0xff]  }
 0x2b9   : > { %8011 = vmatpush1.bf16.msra.mxu1 %v10100_v21  ;;  %v10185_v21 = vld [vmem:[%s11531_s27 + $0x700] ss:$8 sps:$4 sm:$0xff]  }
 0x2ba   : > { %8339 = vmatpush1.bf16.msra.mxu0 %v10103_v22  ;;  %8012 = vmatprep.subr.bf16.mxu1 %v10108_v23  ;;  %v10189_v22 = vld [vmem:[%s11531_s27 + $0xf00] ss:$8 sps:$4 sm:$0xff]   ;;  %v10194_v23 = vld [vmem:[%s11531_s27 + $0x714] ss:$8 sps:$4 sm:$0xff]  }
 0x2bb   : > { %8340 = vmatprep.subr.bf16.mxu0 %v10111_v24  ;;  %v10197_v24 = vld [vmem:[%s11531_s27 + $0xf14] ss:$8 sps:$4 sm:$0xff]  }
 0x2bd   : > { %8013 = vmatpush1.bf16.msra.mxu1 %v10106_v53  ;;  %v5167_v53 = vcombine.high %v12055_v63, %v12055_v63  ;;  %v10198_v63 = vld [vmem:[%s11531_s27 + $0x720] ss:$8 sps:$4 sm:$0xff]  }
 0x2be   : > { %8341 = vmatpush1.bf16.msra.mxu0 %v10109_v57  ;;  %8014 = vmatprep.subr.bf16.mxu1 %v10114_v27  ;;  %v10203_v57 = vld [vmem:[%s11531_s27 + $0xf24] ss:$8 sps:$4 sm:$0xff]   ;;  %v10201_v27 = vld [vmem:[%s11531_s27 + $0xf20] ss:$8 sps:$4 sm:$0xff]  }
 0x2bf   : > { %8342 = vmatprep.subr.bf16.mxu0 %v10117_v28  ;;  %v10206_v28 = vld [vmem:[%s11531_s27 + $0x734] ss:$8 sps:$4 sm:$0xff]  }
 0x2c1   : > { %8015 = vmatpush1.bf16.msra.mxu1 %v10112_v29  ;;  %v10209_v29 = vld [vmem:[%s11531_s27 + $0xf34] ss:$8 sps:$4 sm:$0xff]  }
 0x2c2   : > { %8343 = vmatpush1.bf16.msra.mxu0 %v10115_v30  ;;  %8016 = vmatprep.subr.bf16.mxu1 %v10120_v31  ;;  %v10204_v30 = vld [vmem:[%s11531_s27 + $0x730] ss:$8 sps:$4 sm:$0xff]  }
 0x2c3   : > { %8344 = vmatprep.subr.bf16.mxu0 %v10123_v32  ;;  %v10207_v31 = vld [vmem:[%s11531_s27 + $0xf30] ss:$8 sps:$4 sm:$0xff]   ;;  %v10212_v32 = vld [vmem:[%s11531_s27 + $0x744] ss:$8 sps:$4 sm:$0xff]  }
 0x2c5   : > { %8017 = vmatpush1.bf16.msra.mxu1 %v10118_v33  ;;  %v10215_v33 = vld [vmem:[%s11531_s27 + $0xf44] ss:$8 sps:$4 sm:$0xff]  }
 0x2c6   : > { %8345 = vmatpush1.bf16.msra.mxu0 %v10121_v34  ;;  %8018 = vmatprep.subr.bf16.mxu1 %v10126_v35  ;;  %v10210_v34 = vld [vmem:[%s11531_s27 + $0x740] ss:$8 sps:$4 sm:$0xff]  }
 0x2c7   : > { %8346 = vmatprep.subr.bf16.mxu0 %v10129_v36  ;;  %v10213_v35 = vld [vmem:[%s11531_s27 + $0xf40] ss:$8 sps:$4 sm:$0xff]   ;;  %v10218_v36 = vld [vmem:[%s11531_s27 + $0x754] ss:$8 sps:$4 sm:$0xff]  }
 0x2c9   : > { %8019 = vmatpush1.bf16.msra.mxu1 %v10124_v18  ;;  %v10221_v18 = vld [vmem:[%s11531_s27 + $0xf54] ss:$8 sps:$4 sm:$0xff]  }
 0x2ca   : > { %8347 = vmatpush1.bf16.msra.mxu0 %v10127_v38  ;;  %8020 = vmatprep.subr.bf16.mxu1 %v10132_v43  ;;  %v10216_v38 = vld [vmem:[%s11531_s27 + $0x750] ss:$8 sps:$4 sm:$0xff]  }
 0x2cb   : > { %8348 = vmatprep.subr.bf16.mxu0 %v10135_v45  ;;  %v10219_v43 = vld [vmem:[%s11531_s27 + $0xf50] ss:$8 sps:$4 sm:$0xff]   ;;  %v10224_v45 = vld [vmem:[%s11531_s27 + $0x764] ss:$8 sps:$4 sm:$0xff]  }
 0x2cd   : > { %8021 = vmatpush1.bf16.msra.mxu1 %v10130_v26  ;;  %v10227_v26 = vld [vmem:[%s11531_s27 + $0xf64] ss:$8 sps:$4 sm:$0xff]  }
 0x2ce   : > { %8349 = vmatpush1.bf16.msra.mxu0 %v10133_v47  ;;  %8022 = vmatprep.subr.bf16.mxu1 %v10138_v37  ;;  %v10222_v47 = vld [vmem:[%s11531_s27 + $0x760] ss:$8 sps:$4 sm:$0xff]  }
 0x2cf   : > { %8350 = vmatprep.subr.bf16.mxu0 %v10141_v48  ;;  %v10225_v37 = vld [vmem:[%s11531_s27 + $0xf60] ss:$8 sps:$4 sm:$0xff]   ;;  %v10230_v48 = vld [vmem:[%s11531_s27 + $0x774] ss:$8 sps:$4 sm:$0xff]  }
 0x2d1   : > { %8023 = vmatpush1.bf16.msra.mxu1 %v10136_v17  ;;  %v10233_v17 = vld [vmem:[%s11531_s27 + $0xf74] ss:$8 sps:$4 sm:$0xff]  }
 0x2d2   : > { %8351 = vmatpush1.bf16.msra.mxu0 %v10139_v49  ;;  %8024 = vmatprep.subr.bf16.mxu1 %v10144_v51  ;;  %v10228_v49 = vld [vmem:[%s11531_s27 + $0x770] ss:$8 sps:$4 sm:$0xff]  }
 0x2d3   : > { %8352 = vmatprep.subr.bf16.mxu0 %v10147_v52  ;;  %v10231_v51 = vld [vmem:[%s11531_s27 + $0xf70] ss:$8 sps:$4 sm:$0xff]   ;;  %v10236_v52 = vld [vmem:[%s11531_s27 + $0x784] ss:$8 sps:$4 sm:$0xff]  }
 0x2d5   : > { %8025 = vmatpush1.bf16.msra.mxu1 %v10142_v54  ;;  %v10239_v54 = vld [vmem:[%s11531_s27 + $0xf84] ss:$8 sps:$4 sm:$0xff]  }
 0x2d6   : > { %8353 = vmatpush1.bf16.msra.mxu0 %v10145_v55  ;;  %8026 = vmatprep.subr.bf16.mxu1 %v10150_v56  ;;  %v10234_v55 = vld [vmem:[%s11531_s27 + $0x780] ss:$8 sps:$4 sm:$0xff]  }
 0x2d7   : > { %8354 = vmatprep.subr.bf16.mxu0 %v10153_v58  ;;  %v10237_v56 = vld [vmem:[%s11531_s27 + $0xf80] ss:$8 sps:$4 sm:$0xff]   ;;  %v10242_v58 = vld [vmem:[%s11531_s27 + $0x794] ss:$8 sps:$4 sm:$0xff]  }
 0x2d9   : > { %8027 = vmatpush1.bf16.msra.mxu1 %v10148_v39  ;;  %v10245_v39 = vld [vmem:[%s11531_s27 + $0xf94] ss:$8 sps:$4 sm:$0xff]  }
 0x2da   : > { %8355 = vmatpush1.bf16.msra.mxu0 %v10151_v40  ;;  %8028 = vmatprep.subr.bf16.mxu1 %v10156_v61  ;;  %v10240_v40 = vld [vmem:[%s11531_s27 + $0x790] ss:$8 sps:$4 sm:$0xff]  }
 0x2db   : > { %8356 = vmatprep.subr.bf16.mxu0 %v10159_v62  ;;  %v10243_v61 = vld [vmem:[%s11531_s27 + $0xf90] ss:$8 sps:$4 sm:$0xff]   ;;  %v10248_v62 = vld [vmem:[%s11531_s27 + $0x7a4] ss:$8 sps:$4 sm:$0xff]  }
 0x2dd   : > { %8029 = vmatpush1.bf16.msra.mxu1 %v10154_v1  ;;  %v10251_v1 = vld [vmem:[%s11531_s27 + $0xfa4] ss:$8 sps:$4 sm:$0xff]  }
 0x2de   : > { %8357 = vmatpush1.bf16.msra.mxu0 %v10157_v2  ;;  %8030 = vmatprep.subr.bf16.mxu1 %v10162_v3  ;;  %v10246_v2 = vld [vmem:[%s11531_s27 + $0x7a0] ss:$8 sps:$4 sm:$0xff]  }
 0x2df   : > { %8358 = vmatprep.subr.bf16.mxu0 %v10165_v4  ;;  %v10249_v3 = vld [vmem:[%s11531_s27 + $0xfa0] ss:$8 sps:$4 sm:$0xff]   ;;  %v10254_v4 = vld [vmem:[%s11531_s27 + $0x7b4] ss:$8 sps:$4 sm:$0xff]  }
 0x2e1   : > { %8031 = vmatpush1.bf16.msra.mxu1 %v10160_v25  ;;  %v10257_v25 = vld [vmem:[%s11531_s27 + $0xfb4] ss:$8 sps:$4 sm:$0xff]  }
 0x2e2   : > { %8359 = vmatpush1.bf16.msra.mxu0 %v10163_v5  ;;  %8032 = vmatprep.subr.bf16.mxu1 %v10168_v41  ;;  %v10252_v5 = vld [vmem:[%s11531_s27 + $0x7b0] ss:$8 sps:$4 sm:$0xff]  }
 0x2e3   : > { %8360 = vmatprep.subr.bf16.mxu0 %v10171_v42  ;;  %v10255_v41 = vld [vmem:[%s11531_s27 + $0xfb0] ss:$8 sps:$4 sm:$0xff]   ;;  %v10260_v42 = vld [vmem:[%s11531_s27 + $0x7c4] ss:$8 sps:$4 sm:$0xff]  }
 0x2e5   : > { %8033 = vmatpush1.bf16.msra.mxu1 %v10166_v59  ;;  %v10263_v59 = vld [vmem:[%s11531_s27 + $0xfc4] ss:$8 sps:$4 sm:$0xff]  }
 0x2e6   : > { %8361 = vmatpush1.bf16.msra.mxu0 %v10169_v7  ;;  %8034 = vmatprep.subr.bf16.mxu1 %v10174_v60  ;;  %v10258_v7 = vld [vmem:[%s11531_s27 + $0x7c0] ss:$8 sps:$4 sm:$0xff]  }
 0x2e7   : > { %8362 = vmatprep.subr.bf16.mxu0 %v10177_v8  ;;  %v10261_v60 = vld [vmem:[%s11531_s27 + $0xfc0] ss:$8 sps:$4 sm:$0xff]   ;;  %v10266_v8 = vld [vmem:[%s11531_s27 + $0x7d4] ss:$8 sps:$4 sm:$0xff]  }
 0x2e9   : > { %8035 = vmatpush1.bf16.msra.mxu1 %v10172_v9  ;;  %v10269_v9 = vld [vmem:[%s11531_s27 + $0xfd4] ss:$8 sps:$4 sm:$0xff]  }
 0x2ea   : > { %8363 = vmatpush1.bf16.msra.mxu0 %v10175_v10  ;;  %8036 = vmatprep.subr.bf16.mxu1 %v10180_v11  ;;  %v10264_v10 = vld [vmem:[%s11531_s27 + $0x7d0] ss:$8 sps:$4 sm:$0xff]  }
 0x2eb   : > { %8364 = vmatprep.subr.bf16.mxu0 %v10183_v12  ;;  %v10267_v11 = vld [vmem:[%s11531_s27 + $0xfd0] ss:$8 sps:$4 sm:$0xff]   ;;  %v10272_v12 = vld [vmem:[%s11531_s27 + $0x7e4] ss:$8 sps:$4 sm:$0xff]  }
 0x2ed   : > { %8037 = vmatpush1.bf16.msra.mxu1 %v10178_v13  ;;  %v10275_v13 = vld [vmem:[%s11531_s27 + $0xfe4] ss:$8 sps:$4 sm:$0xff]  }
 0x2ee   : > { %8365 = vmatpush1.bf16.msra.mxu0 %v10181_v14  ;;  %8047 = vmatprep.subr.bf16.mxu1 %v10187_v0  ;;  %v10270_v14 = vld [vmem:[%s11531_s27 + $0x7e0] ss:$8 sps:$4 sm:$0xff]  }
 0x2ef   : > { %8375 = vmatprep.subr.bf16.mxu0 %v10191_v16  ;;  %v10273_v0 = vld [vmem:[%s11531_s27 + $0xfe0] ss:$8 sps:$4 sm:$0xff]   ;;  %v10278_v16 = vld [vmem:[%s11531_s27 + $0x7f4] ss:$8 sps:$4 sm:$0xff]  }
 0x2f0   : > { %8039 = vmatmul.mubr.bf16.vlgmr.msra.gmra.mrb[0].mxu1 %v12121_v19 }
 0x2f1   : > { %8367 = vmatmul.mubr.bf16.vlgmr.msra.gmra.mrb[0].mxu0 %v12125_v20  ;;  %8048 = vmatpush1.bf16.msra.mxu1 %v10185_v21  ;;  %v10281_v21 = vld [vmem:[%s11531_s27 + $0xff4] ss:$8 sps:$4 sm:$0xff]  }
 0x2f2   : > { %8376 = vmatpush1.bf16.msra.mxu0 %v10189_v22  ;;  %8049 = vmatprep.subr.bf16.mxu1 %v10194_v23  ;;  %v10276_v22 = vld [vmem:[%s11531_s27 + $0x7f0] ss:$8 sps:$4 sm:$0xff]  }
 0x2f3   : > { %8377 = vmatprep.subr.bf16.mxu0 %v10197_v24  ;;  %8079 = vmatprep.mubr.bf16.mxu1 %v5069_v46  ;;  %v10279_v23 = vld [vmem:[%s11531_s27 + $0xff0] ss:$8 sps:$4 sm:$0xff]   ;;  %v5067_v24 = vcombine.high %v12121_v19, %v12121_v19  ;;  %v5165_v46 = vcombine.high %v12125_v20, %v12125_v20 }
 0x2f4   : > { %8407 = vmatprep.mubr.bf16.mxu0 %v5167_v53  ;;  %v10388_v53 = vmov 1983009808  }
 0x2f5   : > { %8050 = vmatpush1.bf16.msra.mxu1 %v10192_v50  ;;  %v8420_v50 = vunpack.c.l.s4 %v10388_v53 }
 0x2f6   : > { %8378 = vmatpush1.bf16.msra.mxu0 %v10195_v6  ;;  %8051 = vmatprep.subr.bf16.mxu1 %v10200_v15 }
 0x2f7   : > { %8379 = vmatprep.subr.bf16.mxu0 %v10203_v57  ;;  %v8421_v6 = vunpack.c.0.s8 %v8420_v50 }
 0x2f9   : > { %8052 = vmatpush1.bf16.msra.mxu1 %v10198_v63 }
 0x2fa   : > { %8380 = vmatpush1.bf16.msra.mxu0 %v10201_v27  ;;  %8053 = vmatprep.subr.bf16.mxu1 %v10206_v28 }
 0x2fb   : > { %8381 = vmatprep.subr.bf16.mxu0 %v10209_v29 }
 0x2fd   : > { %8054 = vmatpush1.bf16.msra.mxu1 %v10204_v30  ;;  %v8424_v30 = vsub.s32 %v8421_v6, %v11573_v44 }
 0x2fe   : > { %8382 = vmatpush1.bf16.msra.mxu0 %v10207_v31  ;;  %8055 = vmatprep.subr.bf16.mxu1 %v10212_v32 }
 0x2ff   : > { %8383 = vmatprep.subr.bf16.mxu0 %v10215_v33 }
 0x301   : > { %8056 = vmatpush1.bf16.msra.mxu1 %v10210_v34  ;;  %v4451_v34 = vld [vmem:[#allocation2] sm:$0xf] }
 0x302   : > { %8384 = vmatpush1.bf16.msra.mxu0 %v10213_v35  ;;  %8057 = vmatprep.subr.bf16.mxu1 %v10218_v36 }
 0x303   : > { %8385 = vmatprep.subr.bf16.mxu0 %v10221_v18  ;;  %v10282_v18 = vld [vmem:[%s11523_s10 + $0x4] ss:$8 sps:$4 sm:$0xff] (!%p9290_p1)  }
 0x305   : > { %8058 = vmatpush1.bf16.msra.mxu1 %v10216_v38  ;;  %v10284_v38 = vld [vmem:[%s11523_s10] ss:$8 sps:$4 sm:$0xff] (!%p9290_p1)  }
 0x306   : > { %8386 = vmatpush1.bf16.msra.mxu0 %v10219_v43  ;;  %8059 = vmatprep.subr.bf16.mxu1 %v10224_v45  ;;  %v10285_v43 = vld [vmem:[%s11523_s10 + $0x14] ss:$8 sps:$4 sm:$0xff] (!%p9290_p1)   ;;  %v10287_v45 = vld [vmem:[%s11523_s10 + $0x10] ss:$8 sps:$4 sm:$0xff] (!%p9290_p1)  }
 0x307   : > { %8387 = vmatprep.subr.bf16.mxu0 %v10227_v26  ;;  %v10288_v26 = vld [vmem:[%s11523_s10 + $0x24] ss:$8 sps:$4 sm:$0xff] (!%p9290_p1)  }
 0x309   : > { %8060 = vmatpush1.bf16.msra.mxu1 %v10222_v47  ;;  %v10290_v47 = vld [vmem:[%s11523_s10 + $0x20] ss:$8 sps:$4 sm:$0xff] (!%p9290_p1)  }
 0x30a   : > { %8388 = vmatpush1.bf16.msra.mxu0 %v10225_v37  ;;  %8061 = vmatprep.subr.bf16.mxu1 %v10230_v48  ;;  %v10291_v37 = vld [vmem:[%s11523_s10 + $0x34] ss:$8 sps:$4 sm:$0xff] (!%p9290_p1)   ;;  %v10293_v48 = vld [vmem:[%s11523_s10 + $0x30] ss:$8 sps:$4 sm:$0xff] (!%p9290_p1)  }
 0x30b   : > { %8389 = vmatprep.subr.bf16.mxu0 %v10233_v17  ;;  %v10294_v17 = vld [vmem:[%s11523_s10 + $0x44] ss:$8 sps:$4 sm:$0xff] (!%p9290_p1)  }
 0x30d   : > { %8062 = vmatpush1.bf16.msra.mxu1 %v10228_v49  ;;  %v10296_v49 = vld [vmem:[%s11523_s10 + $0x40] ss:$8 sps:$4 sm:$0xff] (!%p9290_p1)  }
 0x30e   : > { %8390 = vmatpush1.bf16.msra.mxu0 %v10231_v51  ;;  %8063 = vmatprep.subr.bf16.mxu1 %v10236_v52  ;;  %v10297_v51 = vld [vmem:[%s11523_s10 + $0x54] ss:$8 sps:$4 sm:$0xff] (!%p9290_p1)   ;;  %v8438_v52 = vsub.s32 (!%p9290_p1), 0, %v11573_v44 }
 0x30f   : > { %8391 = vmatprep.subr.bf16.mxu0 %v10239_v54  ;;  %v8442_v54 = vsub.s32 (!%p9290_p1), 1, %v11573_v44 }
 0x311   : > { %8064 = vmatpush1.bf16.msra.mxu1 %v10234_v55  ;;  %v10299_v55 = vld [vmem:[%s11523_s10 + $0x50] ss:$8 sps:$4 sm:$0xff] (!%p9290_p1)  }
 0x312   : > { %8392 = vmatpush1.bf16.msra.mxu0 %v10237_v56  ;;  %8065 = vmatprep.subr.bf16.mxu1 %v10242_v58  ;;  %v10300_v56 = vld [vmem:[%s11523_s10 + $0x64] ss:$8 sps:$4 sm:$0xff] (!%p9290_p1)   ;;  %v8434_v58 = vld [vmem:[%s4432_s6] sm:$0x3] (!%p9290_p1) }
 0x313   : > { %8393 = vmatprep.subr.bf16.mxu0 %v10245_v39  ;;  %v8439_v39 = vrot.slane (!%p9290_p1), %v8434_v58, %v8438_v52 }
 0x315   : > { %8066 = vmatpush1.bf16.msra.mxu1 %v10240_v40  ;;  %v8443_v40 = vrot.slane (!%p9290_p1), %v8434_v58, %v8442_v54 }
 0x316   : > { %8394 = vmatpush1.bf16.msra.mxu0 %v10243_v61  ;;  %8067 = vmatprep.subr.bf16.mxu1 %v10248_v62  ;;  %v10302_v61 = vld [vmem:[%s11523_s10 + $0x60] ss:$8 sps:$4 sm:$0xff] (!%p9290_p1)   ;;  %v10303_v62 = vld [vmem:[%s11523_s10 + $0x74] ss:$8 sps:$4 sm:$0xff] (!%p9290_p1)  }
 0x317   : > { %8395 = vmatprep.subr.bf16.mxu0 %v10251_v1  ;;  %v8444_v44 = vcombine.low (!%p9290_p1), %v8439_v39, %v8443_v40 }
 0x319   : > { %8068 = vmatpush1.bf16.msra.mxu1 %v10246_v2  ;;  %v8451_v2 = vrot.slane (!%p9290_p1), %v8444_v44, %v8424_v30 }
 0x31a   : > { %8396 = vmatpush1.bf16.msra.mxu0 %v10249_v3  ;;  %8069 = vmatprep.subr.bf16.mxu1 %v10254_v4  ;;  %v10305_v3 = vld [vmem:[%s11523_s10 + $0x70] ss:$8 sps:$4 sm:$0xff] (!%p9290_p1)   ;;  %v10306_v4 = vld [vmem:[%s11523_s10 + $0x84] ss:$8 sps:$4 sm:$0xff] (!%p9290_p1)  }
 0x31b   : > { %8397 = vmatprep.subr.bf16.mxu0 %v10257_v25 }
 0x31d   : > { %8070 = vmatpush1.bf16.msra.mxu1 %v10252_v5 }
 0x31e   : > { %8398 = vmatpush1.bf16.msra.mxu0 %v10255_v41  ;;  %8071 = vmatprep.subr.bf16.mxu1 %v10260_v42  ;;  %v10308_v41 = vld [vmem:[%s11523_s10 + $0x80] ss:$8 sps:$4 sm:$0xff] (!%p9290_p1)   ;;  %v10309_v42 = vld [vmem:[%s11523_s10 + $0x94] ss:$8 sps:$4 sm:$0xff] (!%p9290_p1)  }
 0x31f   : > { %8399 = vmatprep.subr.bf16.mxu0 %v10263_v59 }
 0x321   : > { %8072 = vmatpush1.bf16.msra.mxu1 %v10258_v7 }
 0x322   : > { %8400 = vmatpush1.bf16.msra.mxu0 %v10261_v60  ;;  %8073 = vmatprep.subr.bf16.mxu1 %v10266_v8  ;;  %v10311_v60 = vld [vmem:[%s11523_s10 + $0x90] ss:$8 sps:$4 sm:$0xff] (!%p9290_p1)   ;;  %v10312_v8 = vld [vmem:[%s11523_s10 + $0xa4] ss:$8 sps:$4 sm:$0xff] (!%p9290_p1)  }
 0x323   : > { %8401 = vmatprep.subr.bf16.mxu0 %v10269_v9  ;;  %v10314_v9 = vld [vmem:[%s11523_s10 + $0xa0] ss:$8 sps:$4 sm:$0xff] (!%p9290_p1)  }
 0x325   : > { %8074 = vmatpush1.bf16.msra.mxu1 %v10264_v10  ;;  %v10315_v10 = vld [vmem:[%s11523_s10 + $0xb4] ss:$8 sps:$4 sm:$0xff] (!%p9290_p1)  }
 0x326   : > { %8402 = vmatpush1.bf16.msra.mxu0 %v10267_v11  ;;  %8075 = vmatprep.subr.bf16.mxu1 %v10272_v12  ;;  %v10317_v11 = vld [vmem:[%s11523_s10 + $0xb0] ss:$8 sps:$4 sm:$0xff] (!%p9290_p1)   ;;  %v10318_v12 = vld [vmem:[%s11523_s10 + $0xc4] ss:$8 sps:$4 sm:$0xff] (!%p9290_p1)  }
 0x327   : > { %8403 = vmatprep.subr.bf16.mxu0 %v10275_v13  ;;  %v10320_v13 = vld [vmem:[%s11523_s10 + $0xc0] ss:$8 sps:$4 sm:$0xff] (!%p9290_p1)  }
 0x329   : > { %8076 = vmatpush1.bf16.msra.mxu1 %v10270_v14  ;;  %v10321_v14 = vld [vmem:[%s11523_s10 + $0xd4] ss:$8 sps:$4 sm:$0xff] (!%p9290_p1)  }
 0x32a   : > { %8404 = vmatpush1.bf16.msra.mxu0 %v10273_v0  ;;  %8077 = vmatprep.subr.bf16.mxu1 %v10278_v16  ;;  %v10323_v0 = vld [vmem:[%s11523_s10 + $0xd0] ss:$8 sps:$4 sm:$0xff] (!%p9290_p1)   ;;  %v10324_v16 = vld [vmem:[%s11523_s10 + $0xe4] ss:$8 sps:$4 sm:$0xff] (!%p9290_p1)  }
 0x32b   : > { %8405 = vmatprep.subr.bf16.mxu0 %v10281_v21  ;;  %v10326_v21 = vld [vmem:[%s11523_s10 + $0xe0] ss:$8 sps:$4 sm:$0xff] (!%p9290_p1)  }
 0x32d   : > { %8078 = vmatpush1.bf16.msra.mxu1 %v10276_v22  ;;  %v10327_v22 = vld [vmem:[%s11523_s10 + $0xf4] ss:$8 sps:$4 sm:$0xff] (!%p9290_p1)  }
 0x32e   : > { %8406 = vmatpush1.bf16.msra.mxu0 %v10279_v23  ;;  %v10329_v23 = vld [vmem:[%s11523_s10 + $0xf0] ss:$8 sps:$4 sm:$0xff] (!%p9290_p1)  }
 0x32f   : > { %9298 = vmatprep.subr.bf16.mxu0 (!%p9290_p1), %v10282_v18 }
 0x330   : > { %8080 = vmatmul.mubr.bf16.vlgmr.msra.gmra.mrb[0].mxu1 %v5067_v24 }
 0x331   : > { %8408 = vmatmul.mubr.bf16.vlgmr.msra.gmra.mrb[0].mxu0 %v5165_v46 }
 0x332   : > { %9300 = vmatpush1.bf16.msra.mxu0 (!%p9290_p1), %v10284_v38 }
 0x333   : > { %9302 = vmatprep.subr.bf16.mxu0 (!%p9290_p1), %v10285_v43 }
 0x336   : > { %9304 = vmatpush1.bf16.msra.mxu0 (!%p9290_p1), %v10287_v45 }
 0x337   : > { %9306 = vmatprep.subr.bf16.mxu0 (!%p9290_p1), %v10288_v26 }
 0x33a   : > { %9308 = vmatpush1.bf16.msra.mxu0 (!%p9290_p1), %v10290_v47 }
 0x33b   : > { %9310 = vmatprep.subr.bf16.mxu0 (!%p9290_p1), %v10291_v37 }
 0x33e   : > { %9312 = vmatpush1.bf16.msra.mxu0 (!%p9290_p1), %v10293_v48 }
 0x33f   : > { %9314 = vmatprep.subr.bf16.mxu0 (!%p9290_p1), %v10294_v17 }
 0x342   : > { %9316 = vmatpush1.bf16.msra.mxu0 (!%p9290_p1), %v10296_v49 }
 0x343   : > { %9318 = vmatprep.subr.bf16.mxu0 (!%p9290_p1), %v10297_v51 }
 0x346   : > { %9320 = vmatpush1.bf16.msra.mxu0 (!%p9290_p1), %v10299_v55 }
 0x347   : > { %9322 = vmatprep.subr.bf16.mxu0 (!%p9290_p1), %v10300_v56 }
 0x34a   : > { %9324 = vmatpush1.bf16.msra.mxu0 (!%p9290_p1), %v10302_v61 }
 0x34b   : > { %9326 = vmatprep.subr.bf16.mxu0 (!%p9290_p1), %v10303_v62 }
 0x34e   : > { %9328 = vmatpush1.bf16.msra.mxu0 (!%p9290_p1), %v10305_v3 }
 0x34f   : > { %9330 = vmatprep.subr.bf16.mxu0 (!%p9290_p1), %v10306_v4 }
 0x352   : > { %9332 = vmatpush1.bf16.msra.mxu0 (!%p9290_p1), %v10308_v41 }
 0x353   : > { %9334 = vmatprep.subr.bf16.mxu0 (!%p9290_p1), %v10309_v42 }
 0x356   : > { %9336 = vmatpush1.bf16.msra.mxu0 (!%p9290_p1), %v10311_v60 }
 0x357   : > { %9338 = vmatprep.subr.bf16.mxu0 (!%p9290_p1), %v10312_v8 }
 0x35a   : > { %9340 = vmatpush1.bf16.msra.mxu0 (!%p9290_p1), %v10314_v9 }
 0x35b   : > { %9342 = vmatprep.subr.bf16.mxu0 (!%p9290_p1), %v10315_v10 }
 0x35e   : > { %9344 = vmatpush1.bf16.msra.mxu0 (!%p9290_p1), %v10317_v11 }
 0x35f   : > { %9346 = vmatprep.subr.bf16.mxu0 (!%p9290_p1), %v10318_v12 }
 0x362   : > { %9348 = vmatpush1.bf16.msra.mxu0 (!%p9290_p1), %v10320_v13 }
 0x363   : > { %9350 = vmatprep.subr.bf16.mxu0 (!%p9290_p1), %v10321_v14 }
 0x366   : > { %9352 = vmatpush1.bf16.msra.mxu0 (!%p9290_p1), %v10323_v0 }
 0x367   : > { %9354 = vmatprep.subr.bf16.mxu0 (!%p9290_p1), %v10324_v16 }
 0x36a   : > { %9356 = vmatpush1.bf16.msra.mxu0 (!%p9290_p1), %v10326_v21 }
 0x36b   : > { %9358 = vmatprep.subr.bf16.mxu0 (!%p9290_p1), %v10327_v22 }
 0x36e   : > { %9360 = vmatpush1.bf16.msra.mxu0 (!%p9290_p1), %v10329_v23 }
 0x403   : > { %v8081_v15 = vpop.f32.mrb[0].mxu1 }
 0x404   : > { %v8409_v57 = vpop.f32.mrb[0].mxu0  ;;  %v8083_v27 = vpop.f32.mrb[1].mxu1 }
 0x405   : > { %v9361_v63 = vadd.f32 %v8409_v57, %v8081_v15  ;;  %v8411_v28 = vpop.f32.mrb[1].mxu0  ;;  %v8085_v31 = vpop.f32.mrb[2].mxu1 }
 0x406   : > { %v9362_v29 = vadd.f32 %v8411_v28, %v8083_v27  ;;  %v8413_v19 = vpop.f32.mrb[2].mxu0  ;;  %v8086_v32 = vpop.f32.mrb[3].mxu1 }
 0x407   : > { %v8414_v33 = vpop.f32.mrb[3].mxu0 }
 0x408   : > { %v8418_v20 = vcombine.low %v9361_v63, %v9362_v29  ;;  %8432 = sbr.rel (%p9290_p1) target bundleno = 1271 (0x4f7), region = 96 }
 0x40a   : > { %v8425_v35 = vrot.slane %v8418_v20, %v8424_v30 }
 0x40c   : > { %v8427_v36 = vadd.f32 %v8425_v35, %v4451_v34 }
 0x40e   : > { %8428 = vst [vmem:[#allocation2] sm:$0xf] %v8427_v36 }
 0x415   : > { %v8433_v1 = vld [vmem:[#allocation2] sm:$0xf] }
 0x416   : > { %v8453_v25 = vadd.f32 %v8451_v2, %v8433_v1 }
 0x418   : > { %v8454_v5 = vmax.f32 %v8453_v25, 0.0 }
 0x41a   : > { %v8558_v59 = vrot.slane %v8454_v5, %v8424_v30 }
 0x41c   : > { %v8559_v7 = vcombine.high %v8558_v59, %v8558_v59 }
 0x41e   : > { %8626 = vmatprep.mubr.f32.mxu0 %v8559_v7 }
 0x41f   : > { %8627 = vmatmul.mubr.f32.vlgmr.msra.gmra.mrb[0].mxu0 %v8558_v59 }
 0x4f2   : > { %v8628_v24 = vpop.f32.mrb[0].mxu0 }
 0x4f3   : > { %v8630_v46 = vpop.f32.mrb[1].mxu0 }
 0x4f4   : > { %v8635_v53 = vcombine.low %v8628_v24, %v8630_v46 }
 0x4f6   : > { %9291 = vst.sshfl [vmem:[%s11529_s14] sm:$0x33 pattern:$0x76325410] %v8635_v53 }
 0x4f7 PF: > { %s14_s21 = sadd.s32 1, %s10384_s21   ;;  %s12267_s15 = smov %s10364_s16 }
 0x4f8   : > { %p11_p2 = scmp.ge.s32.totalorder %s14_s21, 6   ;;  %s12268_s16 = smov %s10465_s28 }
 0x4f9   : > { %s12269_s17 = smov %s10376_s19  ;;  %s12270_s18 = smov %s10380_s20 }
 0x4fa   : > { %s12271_s19 = smov %s12274_s22  ;;  %s12272_s20 = smov %s12278_s23 }
 0x4fb   :  { %13 = sbr.rel (!%p11_p2) target bundleno = 4 (0x4), region = 146 }

// kernel: custom_cnn_forward.4
= control target key start
LH: loop header
LB: loop body
LE: loop exit
PB: predicated region body
PF: predicated region fallthrough
CT: control target
= control target key end

     0   :  { %v5571_v0 = vmov 0   ;;  %s7471_s1 = inlined_call_operand.vmem [shape: bf16[1152,128], index: 1, kind: input, shape index: {}]   ;;  %s7472_s0 = inlined_call_operand.vmem [shape: bf16[4,128,1152], index: 0, kind: input, shape index: {}]   ;;  %s7473_s2 = inlined_call_operand.vmem [shape: f32[1,128], index: 2, kind: input, shape index: {}]   ;;  %s7474_s3 = inlined_call_operand.vmem [shape: f32[1,128], index: 3, kind: input, shape index: {}]   ;;  %s7475_s4 = inlined_call_operand.vmem [shape: bf16[128,128], index: 4, kind: output, shape index: {}]  }
   0x1   :  { %2386 = vmatprep.subr.bf16.mxu1 %v5571_v0  ;;  %2675 = vmatprep.subr.bf16.mxu0 %v5571_v0  ;;  %v5083_v1 = vld [vmem:[%s7471_s1] sm:$0xff]   ;;  %v5085_v3 = vld [vmem:[%s7471_s1 + $0x8] sm:$0xff]   ;;  %v5087_v5 = vld [vmem:[%s7471_s1 + $0x10] sm:$0xff]  }
   0x2   :  { %v5605_v2 = vld [vmem:[%s7471_s1 + $0x80] sm:$0xff]   ;;  %2387 = vmatpush1.bf16.msra.mxu1 %v5083_v1  ;;  %v5615_v4 = vld [vmem:[%s7471_s1 + $0x88] sm:$0xff]   ;;  %v5626_v6 = vld [vmem:[%s7471_s1 + $0x90] sm:$0xff]  }
   0x3   :  { %2676 = vmatpush1.bf16.msra.mxu0 %v5605_v2  ;;  %2388 = vmatprep.subr.bf16.mxu1 %v5571_v0  ;;  %v5089_v7 = vld [vmem:[%s7471_s1 + $0x18] sm:$0xff]   ;;  %v5091_v9 = vld [vmem:[%s7471_s1 + $0x20] sm:$0xff]   ;;  %v5093_v11 = vld [vmem:[%s7471_s1 + $0x28] sm:$0xff]  }
   0x4   :  { %2677 = vmatprep.subr.bf16.mxu0 %v5571_v0  ;;  %v5637_v8 = vld [vmem:[%s7471_s1 + $0x98] sm:$0xff]   ;;  %v5648_v10 = vld [vmem:[%s7471_s1 + $0xa0] sm:$0xff]   ;;  %v5659_v12 = vld [vmem:[%s7471_s1 + $0xa8] sm:$0xff]  }
   0x5   :  { %v5095_v13 = vld [vmem:[%s7471_s1 + $0x30] sm:$0xff]   ;;  %v5097_v15 = vld [vmem:[%s7471_s1 + $0x38] sm:$0xff]   ;;  %v5099_v17 = vld [vmem:[%s7471_s1 + $0x40] sm:$0xff]  }
   0x6   :  { %2389 = vmatpush1.bf16.msra.mxu1 %v5085_v3  ;;  %v5670_v14 = vld [vmem:[%s7471_s1 + $0xb0] sm:$0xff]   ;;  %v5681_v16 = vld [vmem:[%s7471_s1 + $0xb8] sm:$0xff]   ;;  %v5692_v18 = vld [vmem:[%s7471_s1 + $0xc0] sm:$0xff]  }
   0x7   :  { %2678 = vmatpush1.bf16.msra.mxu0 %v5615_v4  ;;  %2390 = vmatprep.subr.bf16.mxu1 %v5571_v0  ;;  %v5117_v19 = vld [vmem:[%s7472_s0 + $0x4] ss:$36 sps:$4 sm:$0xff]   ;;  %v5120_v21 = vld [vmem:[%s7472_s0 + $0xc] ss:$36 sps:$4 sm:$0xff]   ;;  %v5105_v25 = vld [vmem:[%s7471_s1 + $0x58] sm:$0xff]  }
   0x8   :  { %2679 = vmatprep.subr.bf16.mxu0 %v5571_v0  ;;  %v5101_v20 = vld [vmem:[%s7471_s1 + $0x48] sm:$0xff]   ;;  %2418 = vmatprep.mubr.bf16.mxu1 %v5117_v19  ;;  %v5103_v23 = vld [vmem:[%s7471_s1 + $0x50] sm:$0xff]   ;;  %v5731_v26 = vld [vmem:[%s7471_s1 + $0xd8] sm:$0xff]  }
   0x9   :  { %v5709_v22 = vld [vmem:[%s7471_s1 + $0xc8] sm:$0xff]   ;;  %2707 = vmatprep.mubr.bf16.mxu0 %v5120_v21  ;;  %v5720_v24 = vld [vmem:[%s7471_s1 + $0xd0] sm:$0xff]   ;;  %v5107_v27 = vld [vmem:[%s7471_s1 + $0x60] sm:$0xff]  }
   0xa   :  { %2391 = vmatpush1.bf16.msra.mxu1 %v5087_v5  ;;  %v5742_v28 = vld [vmem:[%s7471_s1 + $0xe0] sm:$0xff]   ;;  %v5109_v29 = vld [vmem:[%s7471_s1 + $0x68] sm:$0xff]   ;;  %v5111_v31 = vld [vmem:[%s7471_s1 + $0x70] sm:$0xff]  }
   0xb   :  { %2680 = vmatpush1.bf16.msra.mxu0 %v5626_v6  ;;  %2392 = vmatprep.subr.bf16.mxu1 %v5571_v0  ;;  %v5753_v30 = vld [vmem:[%s7471_s1 + $0xe8] sm:$0xff]   ;;  %v5764_v32 = vld [vmem:[%s7471_s1 + $0xf0] sm:$0xff]   ;;  %v5113_v33 = vld [vmem:[%s7471_s1 + $0x78] sm:$0xff]  }
   0xc   :  { %2681 = vmatprep.subr.bf16.mxu0 %v5571_v0  ;;  %v5775_v34 = vld [vmem:[%s7471_s1 + $0xf8] sm:$0xff]   ;;  %v5115_v35 = vld [vmem:[%s7472_s0] ss:$36 sps:$4 sm:$0xff]   ;;  %v5118_v36 = vld [vmem:[%s7472_s0 + $0x8] ss:$36 sps:$4 sm:$0xff]  }
   0xd   :  { %v5121_v37 = vld [vmem:[%s7471_s1 + $0x100] sm:$0xff]   ;;  %v5123_v38 = vld [vmem:[%s7472_s0 + $0x4c] ss:$36 sps:$4 sm:$0xff]   ;;  %v5125_v39 = vld [vmem:[%s7472_s0 + $0x54] ss:$36 sps:$4 sm:$0xff]  }
   0xe   :  { %2393 = vmatpush1.bf16.msra.mxu1 %v5089_v7  ;;  %v5122_v40 = vld [vmem:[%s7471_s1 + $0x108] sm:$0xff]   ;;  %v5128_v42 = vld [vmem:[%s7472_s0 + $0x50] ss:$36 sps:$4 sm:$0xff]   ;;  %v5133_v45 = vld [vmem:[%s7472_s0 + $0x9c] ss:$36 sps:$4 sm:$0xff]  }
   0xf   :  { %2682 = vmatpush1.bf16.msra.mxu0 %v5637_v8  ;;  %2394 = vmatprep.subr.bf16.mxu1 %v5571_v0  ;;  %v5127_v41 = vld [vmem:[%s7472_s0 + $0x48] ss:$36 sps:$4 sm:$0xff]   ;;  %v5131_v43 = vld [vmem:[%s7472_s0 + $0x94] ss:$36 sps:$4 sm:$0xff]   ;;  %v5137_v49 = vld [vmem:[%s7471_s1 + $0x120] sm:$0xff]  }
  0x10   :  { %2683 = vmatprep.subr.bf16.mxu0 %v5571_v0  ;;  %v5129_v44 = vld [vmem:[%s7471_s1 + $0x110] sm:$0xff]   ;;  %v5130_v46 = vld [vmem:[%s7471_s1 + $0x118] sm:$0xff]   ;;  %v5141_v51 = vld [vmem:[%s7472_s0 + $0xe4] ss:$36 sps:$4 sm:$0xff]  }
  0x11   :  { %v5135_v47 = vld [vmem:[%s7472_s0 + $0x90] ss:$36 sps:$4 sm:$0xff]   ;;  %v5136_v48 = vld [vmem:[%s7472_s0 + $0x98] ss:$36 sps:$4 sm:$0xff]   ;;  %v5138_v52 = vld [vmem:[%s7471_s1 + $0x128] sm:$0xff]  }
  0x12   :  { %2395 = vmatpush1.bf16.msra.mxu1 %v5091_v9  ;;  %v5139_v50 = vld [vmem:[%s7472_s0 + $0xdc] ss:$36 sps:$4 sm:$0xff]   ;;  %v5147_v55 = vld [vmem:[%s7472_s0 + $0x124] ss:$36 sps:$4 sm:$0xff]   ;;  %v5145_v56 = vld [vmem:[%s7471_s1 + $0x130] sm:$0xff]  }
  0x13   :  { %2684 = vmatpush1.bf16.msra.mxu0 %v5648_v10  ;;  %2396 = vmatprep.subr.bf16.mxu1 %v5571_v0  ;;  %v5143_v53 = vld [vmem:[%s7472_s0 + $0xd8] ss:$36 sps:$4 sm:$0xff]   ;;  %v5144_v54 = vld [vmem:[%s7472_s0 + $0xe0] ss:$36 sps:$4 sm:$0xff]   ;;  %v5149_v57 = vld [vmem:[%s7472_s0 + $0x12c] ss:$36 sps:$4 sm:$0xff]  }
  0x14   :  { %2685 = vmatprep.subr.bf16.mxu0 %v5571_v0  ;;  %v5146_v58 = vld [vmem:[%s7471_s1 + $0x138] sm:$0xff]   ;;  %v5151_v59 = vld [vmem:[%s7472_s0 + $0x120] ss:$36 sps:$4 sm:$0xff]   ;;  %v5152_v60 = vld [vmem:[%s7472_s0 + $0x128] ss:$36 sps:$4 sm:$0xff]  }
  0x15   :  { %v5153_v61 = vld [vmem:[%s7471_s1 + $0x140] sm:$0xff]   ;;  %v5155_v62 = vld [vmem:[%s7472_s0 + $0x16c] ss:$36 sps:$4 sm:$0xff]   ;;  %v5157_v63 = vld [vmem:[%s7472_s0 + $0x174] ss:$36 sps:$4 sm:$0xff]  }
  0x16   :  { %2397 = vmatpush1.bf16.msra.mxu1 %v5093_v11  ;;  %v5154_v1 = vld [vmem:[%s7471_s1 + $0x148] sm:$0xff]   ;;  %v5160_v3 = vld [vmem:[%s7472_s0 + $0x170] ss:$36 sps:$4 sm:$0xff]   ;;  %v5162_v7 = vld [vmem:[%s7471_s1 + $0x158] sm:$0xff]  }
  0x17   :  { %2686 = vmatpush1.bf16.msra.mxu0 %v5659_v12  ;;  %2398 = vmatprep.subr.bf16.mxu1 %v5571_v0  ;;  %v5161_v5 = vld [vmem:[%s7471_s1 + $0x150] sm:$0xff]   ;;  %v5168_v9 = vld [vmem:[%s7472_s0 + $0x1b8] ss:$36 sps:$4 sm:$0xff]  }
  0x18   :  { %2687 = vmatprep.subr.bf16.mxu0 %v5571_v0  ;;  %v5171_v11 = vld [vmem:[%s7472_s0 + $0x1fc] ss:$36 sps:$4 sm:$0xff]   ;;  %v5181_v21 = vld [vmem:[%s7472_s0 + $0x10] ss:$36 sps:$4 sm:$0xff]  }
  0x19   :  { %v5178_v19 = vld [vmem:[%s7471_s1 + $0x178] sm:$0xff]  }
  0x1a   :  { %2399 = vmatpush1.bf16.msra.mxu1 %v5095_v13  ;;  %v5170_v13 = vld [vmem:[%s7471_s1 + $0x168] sm:$0xff]  }
  0x1b   :  { %2688 = vmatpush1.bf16.msra.mxu0 %v5670_v14  ;;  %2400 = vmatprep.subr.bf16.mxu1 %v5571_v0 }
  0x1c   :  { %2689 = vmatprep.subr.bf16.mxu0 %v5571_v0 }
  0x1e   :  { %2401 = vmatpush1.bf16.msra.mxu1 %v5097_v15  ;;  %v5176_v15 = vld [vmem:[%s7472_s0 + $0x200] ss:$36 sps:$4 sm:$0xff]  }
  0x1f   :  { %2690 = vmatpush1.bf16.msra.mxu0 %v5681_v16  ;;  %2402 = vmatprep.subr.bf16.mxu1 %v5571_v0 }
  0x20   :  { %2691 = vmatprep.subr.bf16.mxu0 %v5571_v0 }
  0x22   :  { %2403 = vmatpush1.bf16.msra.mxu1 %v5099_v17  ;;  %v5177_v17 = vld [vmem:[%s7471_s1 + $0x170] sm:$0xff]  }
  0x23   :  { %2692 = vmatpush1.bf16.msra.mxu0 %v5692_v18  ;;  %2404 = vmatprep.subr.bf16.mxu1 %v5571_v0 }
  0x24   :  { %2693 = vmatprep.subr.bf16.mxu0 %v5571_v0 }
  0x26   :  { %2405 = vmatpush1.bf16.msra.mxu1 %v5101_v20  ;;  %v5184_v20 = vld [vmem:[%s7472_s0 + $0x240] ss:$36 sps:$4 sm:$0xff]  }
  0x27   :  { %2694 = vmatpush1.bf16.msra.mxu0 %v5709_v22  ;;  %2406 = vmatprep.subr.bf16.mxu1 %v5571_v0 }
  0x28   :  { %2695 = vmatprep.subr.bf16.mxu0 %v5571_v0 }
  0x2a   :  { %2407 = vmatpush1.bf16.msra.mxu1 %v5103_v23  ;;  %v5185_v23 = vld [vmem:[%s7471_s1 + $0x180] sm:$0xff]  }
  0x2b   :  { %2696 = vmatpush1.bf16.msra.mxu0 %v5720_v24  ;;  %2408 = vmatprep.subr.bf16.mxu1 %v5571_v0 }
  0x2c   :  { %2697 = vmatprep.subr.bf16.mxu0 %v5571_v0 }
  0x2e   :  { %2409 = vmatpush1.bf16.msra.mxu1 %v5105_v25  ;;  %v5190_v25 = vld [vmem:[%s7472_s0 + $0x288] ss:$36 sps:$4 sm:$0xff]  }
  0x2f   :  { %2698 = vmatpush1.bf16.msra.mxu0 %v5731_v26  ;;  %2410 = vmatprep.subr.bf16.mxu1 %v5571_v0 }
  0x30   :  { %2699 = vmatprep.subr.bf16.mxu0 %v5571_v0 }
  0x32   :  { %2411 = vmatpush1.bf16.msra.mxu1 %v5107_v27  ;;  %v5191_v27 = vld [vmem:[%s7472_s0 + $0x58] ss:$36 sps:$4 sm:$0xff]  }
  0x33   :  { %2700 = vmatpush1.bf16.msra.mxu0 %v5742_v28  ;;  %2412 = vmatprep.subr.bf16.mxu1 %v5571_v0 }
  0x34   :  { %2701 = vmatprep.subr.bf16.mxu0 %v5571_v0 }
  0x36   :  { %2413 = vmatpush1.bf16.msra.mxu1 %v5109_v29  ;;  %v5194_v29 = vld [vmem:[%s7472_s0 + $0xa4] ss:$36 sps:$4 sm:$0xff]  }
  0x37   :  { %2702 = vmatpush1.bf16.msra.mxu0 %v5753_v30  ;;  %2414 = vmatprep.subr.bf16.mxu1 %v5571_v0 }
  0x38   :  { %2703 = vmatprep.subr.bf16.mxu0 %v5571_v0 }
  0x3a   :  { %2415 = vmatpush1.bf16.msra.mxu1 %v5111_v31  ;;  %v5196_v31 = vld [vmem:[%s7472_s0 + $0x2d0] ss:$36 sps:$4 sm:$0xff]  }
  0x3b   :  { %2704 = vmatpush1.bf16.msra.mxu0 %v5764_v32  ;;  %2416 = vmatprep.subr.bf16.mxu1 %v5571_v0 }
  0x3c   :  { %2705 = vmatprep.subr.bf16.mxu0 %v5571_v0 }
  0x3e   :  { %2417 = vmatpush1.bf16.msra.mxu1 %v5113_v33  ;;  %v5197_v33 = vld [vmem:[%s7472_s0 + $0xa0] ss:$36 sps:$4 sm:$0xff]  }
  0x3f   :  { %2706 = vmatpush1.bf16.msra.mxu0 %v5775_v34  ;;  %4730 = vmatprep.subr.bf16.mxu1 %v5571_v0 }
  0x40   :  { %2964 = vmatprep.subr.bf16.mxu0 %v5571_v0 }
  0x41   :  { %2419 = vmatmul.mubr.bf16.vlgmr.msra.gmra.mrb[0].mxu1 %v5115_v35  ;;  %v5201_v35 = vld [vmem:[%s7472_s0 + $0xec] ss:$36 sps:$4 sm:$0xff]  }
  0x42   :  { %2708 = vmatmul.mubr.bf16.vlgmr.msra.gmra.mrb[0].mxu0 %v5118_v36  ;;  %4746 = vmatpush1.bf16.msra.mxu1 %v5605_v2  ;;  %v5159_v2 = vld [vmem:[%s7472_s0 + $0x168] ss:$36 sps:$4 sm:$0xff]   ;;  %v5237_v36 = vld [vmem:[%s7471_s1 + $0x1a0] sm:$0xff]  }
  0x43   :  { %2965 = vmatpush1.bf16.msra.mxu0 %v5121_v37  ;;  %2426 = vmatprep.mubr.bf16.mxu1 %v5123_v38  ;;  %v5250_v37 = vld [vmem:[%s7471_s1 + $0x1a8] sm:$0xff]   ;;  %v5203_v38 = vld [vmem:[%s7472_s0 + $0x318] ss:$36 sps:$4 sm:$0xff]  }
  0x44   :  { %2966 = vmatprep.subr.bf16.mxu0 %v5571_v0  ;;  %2715 = vmatprep.mubr.bf16.mxu0 %v5125_v39  ;;  %v5204_v39 = vld [vmem:[%s7472_s0 + $0xe8] ss:$36 sps:$4 sm:$0xff]  }
  0x45   :  { %4731 = vmatprep.subr.bf16.mxu1 %v5571_v0 }
  0x46   :  { %4747 = vmatpush1.bf16.msra.mxu1 %v5615_v4  ;;  %v5163_v4 = vld [vmem:[%s7472_s0 + $0x1b4] ss:$36 sps:$4 sm:$0xff]  }
  0x47   :  { %2967 = vmatpush1.bf16.msra.mxu0 %v5122_v40  ;;  %4732 = vmatprep.subr.bf16.mxu1 %v5571_v0  ;;  %v5205_v40 = vld [vmem:[%s7472_s0 + $0x364] ss:$36 sps:$4 sm:$0xff]  }
  0x48   :  { %2968 = vmatprep.subr.bf16.mxu0 %v5571_v0 }
  0x49   :  { %2427 = vmatmul.mubr.bf16.gmra.mrb[4].mxu1 %v5127_v41  ;;  %v5207_v41 = vld [vmem:[%s7472_s0 + $0x134] ss:$36 sps:$4 sm:$0xff]  }
  0x4a   :  { %2716 = vmatmul.mubr.bf16.gmra.mrb[4].mxu0 %v5128_v42  ;;  %2434 = vmatprep.mubr.bf16.mxu1 %v5131_v43  ;;  %v5263_v42 = vld [vmem:[%s7471_s1 + $0x1b0] sm:$0xff]   ;;  %v5276_v43 = vld [vmem:[%s7471_s1 + $0x1b8] sm:$0xff]  }
  0x4b   :  { %2969 = vmatpush1.bf16.msra.mxu0 %v5129_v44  ;;  %2723 = vmatprep.mubr.bf16.mxu0 %v5133_v45  ;;  %v5209_v44 = vld [vmem:[%s7472_s0 + $0x360] ss:$36 sps:$4 sm:$0xff]   ;;  %v5210_v45 = vld [vmem:[%s7472_s0 + $0x130] ss:$36 sps:$4 sm:$0xff]  }
  0x4c   :  { %2970 = vmatprep.subr.bf16.mxu0 %v5571_v0  ;;  %4748 = vmatpush1.bf16.msra.mxu1 %v5626_v6  ;;  %v5165_v6 = vld [vmem:[%s7472_s0 + $0x1bc] ss:$36 sps:$4 sm:$0xff]  }
  0x4d   :  { %4733 = vmatprep.subr.bf16.mxu1 %v5571_v0 }
  0x4f   :  { %2971 = vmatpush1.bf16.msra.mxu0 %v5130_v46  ;;  %v5212_v46 = vld [vmem:[%s7472_s0 + $0x3ac] ss:$36 sps:$4 sm:$0xff]  }
  0x50   :  { %2972 = vmatprep.subr.bf16.mxu0 %v5571_v0  ;;  %4749 = vmatpush1.bf16.msra.mxu1 %v5637_v8  ;;  %v5167_v8 = vld [vmem:[%s7472_s0 + $0x1b0] ss:$36 sps:$4 sm:$0xff]  }
  0x51   :  { %2435 = vmatmul.mubr.bf16.gmra.mrb[8].mxu1 %v5135_v47  ;;  %4734 = vmatprep.subr.bf16.mxu1 %v5571_v0  ;;  %v5214_v47 = vld [vmem:[%s7472_s0 + $0x17c] ss:$36 sps:$4 sm:$0xff]  }
  0x52   :  { %2724 = vmatmul.mubr.bf16.gmra.mrb[8].mxu0 %v5136_v48  ;;  %2442 = vmatprep.mubr.bf16.mxu1 %v5139_v50  ;;  %v5289_v48 = vld [vmem:[%s7471_s1 + $0x1c0] sm:$0xff]   ;;  %v5216_v50 = vld [vmem:[%s7472_s0 + $0x3a8] ss:$36 sps:$4 sm:$0xff]  }
  0x53   :  { %2973 = vmatpush1.bf16.msra.mxu0 %v5137_v49  ;;  %2731 = vmatprep.mubr.bf16.mxu0 %v5141_v51  ;;  %v5302_v49 = vld [vmem:[%s7471_s1 + $0x1c8] sm:$0xff]   ;;  %v5217_v51 = vld [vmem:[%s7472_s0 + $0x178] ss:$36 sps:$4 sm:$0xff]  }
  0x54   :  { %2974 = vmatprep.subr.bf16.mxu0 %v5571_v0  ;;  %4750 = vmatpush1.bf16.msra.mxu1 %v5648_v10  ;;  %v5169_v10 = vld [vmem:[%s7471_s1 + $0x160] sm:$0xff]  }
  0x55   :  { %4735 = vmatprep.subr.bf16.mxu1 %v5571_v0 }
  0x57   :  { %2975 = vmatpush1.bf16.msra.mxu0 %v5138_v52  ;;  %v5218_v52 = vld [vmem:[%s7472_s0 + $0x3f4] ss:$36 sps:$4 sm:$0xff]  }
  0x58   :  { %2976 = vmatprep.subr.bf16.mxu0 %v5571_v0  ;;  %4751 = vmatpush1.bf16.msra.mxu1 %v5659_v12  ;;  %v5173_v12 = vld [vmem:[%s7472_s0 + $0x204] ss:$36 sps:$4 sm:$0xff]  }
  0x59   :  { %2443 = vmatmul.mubr.bf16.gmra.mrb[12].mxu1 %v5143_v53  ;;  %4736 = vmatprep.subr.bf16.mxu1 %v5571_v0  ;;  %v5220_v53 = vld [vmem:[%s7472_s0 + $0x1c4] ss:$36 sps:$4 sm:$0xff]  }
  0x5a   :  { %2732 = vmatmul.mubr.bf16.gmra.mrb[12].mxu0 %v5144_v54  ;;  %2450 = vmatprep.mubr.bf16.mxu1 %v5147_v55  ;;  %v5315_v54 = vld [vmem:[%s7471_s1 + $0x1d0] sm:$0xff]  }
  0x5b   :  { %2977 = vmatpush1.bf16.msra.mxu0 %v5145_v56  ;;  %2739 = vmatprep.mubr.bf16.mxu0 %v5149_v57  ;;  %v5222_v55 = vld [vmem:[%s7472_s0 + $0x3f0] ss:$36 sps:$4 sm:$0xff]   ;;  %v5223_v56 = vld [vmem:[%s7472_s0 + $0x1c0] ss:$36 sps:$4 sm:$0xff]  }
  0x5c   :  { %2978 = vmatprep.subr.bf16.mxu0 %v5571_v0  ;;  %4752 = vmatpush1.bf16.msra.mxu1 %v5670_v14  ;;  %v5175_v14 = vld [vmem:[%s7472_s0 + $0x1f8] ss:$36 sps:$4 sm:$0xff]  }
  0x5d   :  { %4737 = vmatprep.subr.bf16.mxu1 %v5571_v0  ;;  %v5225_v57 = vld [vmem:[%s7472_s0 + $0x43c] ss:$36 sps:$4 sm:$0xff]  }
  0x5f   :  { %2979 = vmatpush1.bf16.msra.mxu0 %v5146_v58  ;;  %v5227_v58 = vld [vmem:[%s7472_s0 + $0x20c] ss:$36 sps:$4 sm:$0xff]  }
  0x60   :  { %2980 = vmatprep.subr.bf16.mxu0 %v5571_v0  ;;  %4753 = vmatpush1.bf16.msra.mxu1 %v5681_v16  ;;  %v5179_v16 = vld [vmem:[%s7472_s0 + $0x244] ss:$36 sps:$4 sm:$0xff]  }
  0x61   :  { %2451 = vmatmul.mubr.bf16.gmra.mrb[16].mxu1 %v5151_v59  ;;  %4738 = vmatprep.subr.bf16.mxu1 %v5571_v0  ;;  %v5328_v59 = vld [vmem:[%s7471_s1 + $0x1d8] sm:$0xff]  }
  0x62   :  { %2740 = vmatmul.mubr.bf16.gmra.mrb[16].mxu0 %v5152_v60  ;;  %2458 = vmatprep.mubr.bf16.mxu1 %v5155_v62  ;;  %v5229_v60 = vld [vmem:[%s7472_s0 + $0x438] ss:$36 sps:$4 sm:$0xff]   ;;  %v5231_v62 = vld [vmem:[%s7472_s0 + $0x484] ss:$36 sps:$4 sm:$0xff]  }
  0x63   :  { %2981 = vmatpush1.bf16.msra.mxu0 %v5153_v61  ;;  %2747 = vmatprep.mubr.bf16.mxu0 %v5157_v63  ;;  %v5230_v61 = vld [vmem:[%s7472_s0 + $0x208] ss:$36 sps:$4 sm:$0xff]   ;;  %v5233_v63 = vld [vmem:[%s7472_s0 + $0x254] ss:$36 sps:$4 sm:$0xff]  }
  0x64   :  { %2982 = vmatprep.subr.bf16.mxu0 %v5571_v0  ;;  %4754 = vmatpush1.bf16.msra.mxu1 %v5692_v18  ;;  %v5183_v18 = vld [vmem:[%s7472_s0 + $0x14] ss:$36 sps:$4 sm:$0xff]  }
  0x65   :  { %4739 = vmatprep.subr.bf16.mxu1 %v5571_v0 }
  0x67   :  { %2983 = vmatpush1.bf16.msra.mxu0 %v5154_v1  ;;  %v5235_v1 = vld [vmem:[%s7472_s0 + $0x480] ss:$36 sps:$4 sm:$0xff]  }
  0x68   :  { %2984 = vmatprep.subr.bf16.mxu0 %v5571_v0  ;;  %4755 = vmatpush1.bf16.msra.mxu1 %v5709_v22  ;;  %v5186_v22 = vld [vmem:[%s7472_s0 + $0x28c] ss:$36 sps:$4 sm:$0xff]  }
  0x69   :  { %2459 = vmatmul.mubr.bf16.gmra.mrb[20].mxu1 %v5159_v2  ;;  %4740 = vmatprep.subr.bf16.mxu1 %v5571_v0  ;;  %v5236_v2 = vld [vmem:[%s7472_s0 + $0x250] ss:$36 sps:$4 sm:$0xff]  }
  0x6a   :  { %2748 = vmatmul.mubr.bf16.gmra.mrb[20].mxu0 %v5160_v3  ;;  %2466 = vmatprep.mubr.bf16.mxu1 %v5163_v4  ;;  %v5238_v3 = vld [vmem:[%s7472_s0 + $0x4cc] ss:$36 sps:$4 sm:$0xff]   ;;  %v5240_v4 = vld [vmem:[%s7472_s0 + $0x29c] ss:$36 sps:$4 sm:$0xff]  }
  0x6b   :  { %2985 = vmatpush1.bf16.msra.mxu0 %v5161_v5  ;;  %2755 = vmatprep.mubr.bf16.mxu0 %v5165_v6  ;;  %v5341_v5 = vld [vmem:[%s7471_s1 + $0x1e0] sm:$0xff]  }
  0x6c   :  { %2986 = vmatprep.subr.bf16.mxu0 %v5571_v0  ;;  %4756 = vmatpush1.bf16.msra.mxu1 %v5720_v24  ;;  %v5188_v24 = vld [vmem:[%s7472_s0 + $0x5c] ss:$36 sps:$4 sm:$0xff]  }
  0x6d   :  { %4741 = vmatprep.subr.bf16.mxu1 %v5571_v0  ;;  %v6134_v6 = vld [vmem:[%s7471_s1 + $0x200] sm:$0xff]  }
  0x6f   :  { %2987 = vmatpush1.bf16.msra.mxu0 %v5162_v7  ;;  %v5242_v7 = vld [vmem:[%s7472_s0 + $0x4c8] ss:$36 sps:$4 sm:$0xff]  }
  0x70   :  { %2988 = vmatprep.subr.bf16.mxu0 %v5571_v0  ;;  %4757 = vmatpush1.bf16.msra.mxu1 %v5731_v26  ;;  %v5198_v26 = vld [vmem:[%s7471_s1 + $0x188] sm:$0xff]  }
  0x71   :  { %2467 = vmatmul.mubr.bf16.gmra.mrb[24].mxu1 %v5167_v8  ;;  %4742 = vmatprep.subr.bf16.mxu1 %v5571_v0  ;;  %v5243_v8 = vld [vmem:[%s7472_s0 + $0x298] ss:$36 sps:$4 sm:$0xff]  }
  0x72   :  { %2756 = vmatmul.mubr.bf16.gmra.mrb[24].mxu0 %v5168_v9  ;;  %2474 = vmatprep.mubr.bf16.mxu1 %v5171_v11  ;;  %v5244_v9 = vld [vmem:[%s7472_s0 + $0x514] ss:$36 sps:$4 sm:$0xff]  }
  0x73   :  { %2989 = vmatpush1.bf16.msra.mxu0 %v5169_v10  ;;  %2763 = vmatprep.mubr.bf16.mxu0 %v5173_v12  ;;  %v5246_v10 = vld [vmem:[%s7472_s0 + $0x2e4] ss:$36 sps:$4 sm:$0xff]   ;;  %v5248_v11 = vld [vmem:[%s7472_s0 + $0x510] ss:$36 sps:$4 sm:$0xff]  }
  0x74   :  { %2990 = vmatprep.subr.bf16.mxu0 %v5571_v0  ;;  %4758 = vmatpush1.bf16.msra.mxu1 %v5742_v28  ;;  %v5192_v28 = vld [vmem:[%s7472_s0 + $0x2d4] ss:$36 sps:$4 sm:$0xff]   ;;  %v5249_v12 = vld [vmem:[%s7472_s0 + $0x2e0] ss:$36 sps:$4 sm:$0xff]  }
  0x75   :  { %4743 = vmatprep.subr.bf16.mxu1 %v5571_v0 }
  0x77   :  { %2991 = vmatpush1.bf16.msra.mxu0 %v5170_v13  ;;  %v5251_v13 = vld [vmem:[%s7472_s0 + $0x55c] ss:$36 sps:$4 sm:$0xff]  }
  0x78   :  { %2992 = vmatprep.subr.bf16.mxu0 %v5571_v0  ;;  %4759 = vmatpush1.bf16.msra.mxu1 %v5753_v30  ;;  %v5211_v30 = vld [vmem:[%s7471_s1 + $0x190] sm:$0xff]  }
  0x79   :  { %2475 = vmatmul.mubr.bf16.gmra.mrb[28].mxu1 %v5175_v14  ;;  %4744 = vmatprep.subr.bf16.mxu1 %v5571_v0  ;;  %v5253_v14 = vld [vmem:[%s7472_s0 + $0x32c] ss:$36 sps:$4 sm:$0xff]  }
  0x7a   :  { %2764 = vmatmul.mubr.bf16.gmra.mrb[28].mxu0 %v5176_v15  ;;  %2482 = vmatprep.mubr.bf16.mxu1 %v5179_v16  ;;  %v5355_v15 = vld [vmem:[%s7471_s1 + $0x1e8] sm:$0xff]   ;;  %v5255_v16 = vld [vmem:[%s7472_s0 + $0x558] ss:$36 sps:$4 sm:$0xff]  }
  0x7b   :  { %2993 = vmatpush1.bf16.msra.mxu0 %v5177_v17  ;;  %2996 = vmatprep.mubr.bf16.mxu0 %v5183_v18  ;;  %v5256_v17 = vld [vmem:[%s7472_s0 + $0x328] ss:$36 sps:$4 sm:$0xff]  }
  0x7c   :  { %2994 = vmatprep.subr.bf16.mxu0 %v5571_v0  ;;  %4760 = vmatpush1.bf16.msra.mxu1 %v5764_v32  ;;  %v5224_v32 = vld [vmem:[%s7471_s1 + $0x198] sm:$0xff]   ;;  %v5257_v18 = vld [vmem:[%s7472_s0 + $0x5a4] ss:$36 sps:$4 sm:$0xff]  }
  0x7d   :  { %4745 = vmatprep.subr.bf16.mxu1 %v5571_v0 }
  0x7f   :  { %2995 = vmatpush1.bf16.msra.mxu0 %v5178_v19  ;;  %v5259_v19 = vld [vmem:[%s7472_s0 + $0x374] ss:$36 sps:$4 sm:$0xff]  }
  0x80   :  { %3253 = vmatprep.subr.bf16.mxu0 %v5571_v0  ;;  %4761 = vmatpush1.bf16.msra.mxu1 %v5775_v34  ;;  %v5199_v34 = vld [vmem:[%s7472_s0 + $0x31c] ss:$36 sps:$4 sm:$0xff]  }
  0x81   :  { %2483 = vmatmul.mubr.bf16.gmra.mrb[32].mxu1 %v5184_v20  ;;  %4650 = vmatprep.subr.bf16.mxu1 %v6134_v6  ;;  %v5261_v20 = vld [vmem:[%s7472_s0 + $0x5a0] ss:$36 sps:$4 sm:$0xff]  }
  0x82   :  { %2997 = vmatmul.mubr.bf16.vlgmr.msra.gmra.mrb[0].mxu0 %v5181_v21  ;;  %2490 = vmatprep.mubr.bf16.mxu1 %v5186_v22  ;;  %v5262_v21 = vld [vmem:[%s7472_s0 + $0x370] ss:$36 sps:$4 sm:$0xff]  }
  0x83   :  { %3254 = vmatpush1.bf16.msra.mxu0 %v5185_v23  ;;  %3004 = vmatprep.mubr.bf16.mxu0 %v5188_v24  ;;  %v5264_v22 = vld [vmem:[%s7472_s0 + $0x5ec] ss:$36 sps:$4 sm:$0xff]   ;;  %v5266_v23 = vld [vmem:[%s7472_s0 + $0x3bc] ss:$36 sps:$4 sm:$0xff]  }
  0x84   :  { %3255 = vmatprep.subr.bf16.mxu0 %v5571_v0  ;;  %v5369_v24 = vld [vmem:[%s7471_s1 + $0x1f0] sm:$0xff]  }
  0x87   :  { %3256 = vmatpush1.bf16.msra.mxu0 %v5198_v26  ;;  %v5269_v26 = vld [vmem:[%s7472_s0 + $0x3b8] ss:$36 sps:$4 sm:$0xff]  }
  0x88   :  { %3257 = vmatprep.subr.bf16.mxu0 %v5571_v0 }
  0x89   :  { %2491 = vmatmul.mubr.bf16.gmra.mrb[36].mxu1 %v5190_v25  ;;  %v5268_v25 = vld [vmem:[%s7472_s0 + $0x5e8] ss:$36 sps:$4 sm:$0xff]  }
  0x8a   :  { %3005 = vmatmul.mubr.bf16.gmra.mrb[4].mxu0 %v5191_v27  ;;  %2498 = vmatprep.mubr.bf16.mxu1 %v5192_v28  ;;  %v5270_v27 = vld [vmem:[%s7472_s0 + $0x634] ss:$36 sps:$4 sm:$0xff]   ;;  %v5272_v28 = vld [vmem:[%s7472_s0 + $0x404] ss:$36 sps:$4 sm:$0xff]  }
  0x8b   :  { %3012 = vmatprep.mubr.bf16.mxu0 %v5194_v29  ;;  %3258 = vmatpush1.bf16.msra.mxu0 %v5211_v30  ;;  %v5275_v29 = vld [vmem:[%s7472_s0 + $0x400] ss:$36 sps:$4 sm:$0xff]  }
  0x8c   :  { %3259 = vmatprep.subr.bf16.mxu0 %v5571_v0  ;;  %v5277_v30 = vld [vmem:[%s7472_s0 + $0x67c] ss:$36 sps:$4 sm:$0xff]  }
  0x8f   :  { %3260 = vmatpush1.bf16.msra.mxu0 %v5224_v32  ;;  %v5382_v32 = vld [vmem:[%s7471_s1 + $0x1f8] sm:$0xff]  }
  0x90   :  { %3261 = vmatprep.subr.bf16.mxu0 %v5571_v0 }
  0x91   :  { %2499 = vmatmul.mubr.bf16.gmra.mrb[40].mxu1 %v5196_v31  ;;  %v5279_v31 = vld [vmem:[%s7472_s0 + $0x44c] ss:$36 sps:$4 sm:$0xff]  }
  0x92   :  { %3013 = vmatmul.mubr.bf16.gmra.mrb[8].mxu0 %v5197_v33  ;;  %2506 = vmatprep.mubr.bf16.mxu1 %v5199_v34  ;;  %v5281_v33 = vld [vmem:[%s7472_s0 + $0x678] ss:$36 sps:$4 sm:$0xff]   ;;  %v5282_v34 = vld [vmem:[%s7472_s0 + $0x448] ss:$36 sps:$4 sm:$0xff]  }
  0x93   :  { %3020 = vmatprep.mubr.bf16.mxu0 %v5201_v35  ;;  %3262 = vmatpush1.bf16.msra.mxu0 %v5237_v36  ;;  %v5283_v35 = vld [vmem:[%s7472_s0 + $0x6c4] ss:$36 sps:$4 sm:$0xff]   ;;  %v5285_v36 = vld [vmem:[%s7472_s0 + $0x494] ss:$36 sps:$4 sm:$0xff]  }
  0x94   :  { %3263 = vmatprep.subr.bf16.mxu0 %v5571_v0 }
  0x97   :  { %3264 = vmatpush1.bf16.msra.mxu0 %v5250_v37  ;;  %v5287_v37 = vld [vmem:[%s7472_s0 + $0x6c0] ss:$36 sps:$4 sm:$0xff]  }
  0x98   :  { %3265 = vmatprep.subr.bf16.mxu0 %v5571_v0 }
  0x99   :  { %2507 = vmatmul.mubr.bf16.gmra.mrb[44].mxu1 %v5203_v38  ;;  %v5288_v38 = vld [vmem:[%s7472_s0 + $0x490] ss:$36 sps:$4 sm:$0xff]  }
  0x9a   :  { %3021 = vmatmul.mubr.bf16.gmra.mrb[12].mxu0 %v5204_v39  ;;  %2514 = vmatprep.mubr.bf16.mxu1 %v5205_v40  ;;  %v5290_v39 = vld [vmem:[%s7472_s0 + $0x70c] ss:$36 sps:$4 sm:$0xff]   ;;  %v5292_v40 = vld [vmem:[%s7472_s0 + $0x4dc] ss:$36 sps:$4 sm:$0xff]  }
  0x9b   :  { %3028 = vmatprep.mubr.bf16.mxu0 %v5207_v41  ;;  %3266 = vmatpush1.bf16.msra.mxu0 %v5263_v42  ;;  %v5294_v41 = vld [vmem:[%s7472_s0 + $0x708] ss:$36 sps:$4 sm:$0xff]   ;;  %v5295_v42 = vld [vmem:[%s7472_s0 + $0x4d8] ss:$36 sps:$4 sm:$0xff]  }
  0x9c   :  { %3267 = vmatprep.subr.bf16.mxu0 %v5571_v0 }
  0x9f   :  { %3268 = vmatpush1.bf16.msra.mxu0 %v5276_v43  ;;  %v5296_v43 = vld [vmem:[%s7472_s0 + $0x754] ss:$36 sps:$4 sm:$0xff]  }
  0xa0   :  { %3269 = vmatprep.subr.bf16.mxu0 %v5571_v0 }
  0xa1   :  { %2515 = vmatmul.mubr.bf16.gmra.mrb[48].mxu1 %v5209_v44  ;;  %v5298_v44 = vld [vmem:[%s7472_s0 + $0x524] ss:$36 sps:$4 sm:$0xff]  }
  0xa2   :  { %3029 = vmatmul.mubr.bf16.gmra.mrb[16].mxu0 %v5210_v45  ;;  %2522 = vmatprep.mubr.bf16.mxu1 %v5212_v46  ;;  %v5300_v45 = vld [vmem:[%s7472_s0 + $0x750] ss:$36 sps:$4 sm:$0xff]   ;;  %v5301_v46 = vld [vmem:[%s7472_s0 + $0x520] ss:$36 sps:$4 sm:$0xff]  }
  0xa3   :  { %3036 = vmatprep.mubr.bf16.mxu0 %v5214_v47  ;;  %3270 = vmatpush1.bf16.msra.mxu0 %v5289_v48  ;;  %v5303_v47 = vld [vmem:[%s7472_s0 + $0x79c] ss:$36 sps:$4 sm:$0xff]   ;;  %v5305_v48 = vld [vmem:[%s7472_s0 + $0x56c] ss:$36 sps:$4 sm:$0xff]  }
  0xa4   :  { %3271 = vmatprep.subr.bf16.mxu0 %v5571_v0 }
  0xa7   :  { %3272 = vmatpush1.bf16.msra.mxu0 %v5302_v49 }
  0xa8   :  { %3273 = vmatprep.subr.bf16.mxu0 %v5571_v0 }
  0xa9   :  { %2523 = vmatmul.mubr.bf16.gmra.mrb[52].mxu1 %v5216_v50 }
  0xaa   :  { %3037 = vmatmul.mubr.bf16.gmra.mrb[20].mxu0 %v5217_v51  ;;  %2530 = vmatprep.mubr.bf16.mxu1 %v5218_v52  ;;  %v5307_v51 = vld [vmem:[%s7472_s0 + $0x798] ss:$36 sps:$4 sm:$0xff]  }
  0xab   :  { %3044 = vmatprep.mubr.bf16.mxu0 %v5220_v53  ;;  %3274 = vmatpush1.bf16.msra.mxu0 %v5315_v54  ;;  %v5308_v53 = vld [vmem:[%s7472_s0 + $0x568] ss:$36 sps:$4 sm:$0xff]  }
  0xac   :  { %3275 = vmatprep.subr.bf16.mxu0 %v5571_v0  ;;  %v5309_v54 = vld [vmem:[%s7472_s0 + $0x7e4] ss:$36 sps:$4 sm:$0xff]  }
  0xaf   :  { %3276 = vmatpush1.bf16.msra.mxu0 %v5328_v59  ;;  %v5313_v59 = vld [vmem:[%s7472_s0 + $0x7e0] ss:$36 sps:$4 sm:$0xff]  }
  0xb0   :  { %3277 = vmatprep.subr.bf16.mxu0 %v5571_v0 }
  0xb1   :  { %2531 = vmatmul.mubr.bf16.gmra.mrb[56].mxu1 %v5222_v55 }
  0xb2   :  { %3045 = vmatmul.mubr.bf16.gmra.mrb[24].mxu0 %v5223_v56  ;;  %2538 = vmatprep.mubr.bf16.mxu1 %v5225_v57  ;;  %v5311_v56 = vld [vmem:[%s7472_s0 + $0x5b4] ss:$36 sps:$4 sm:$0xff]  }
  0xb3   :  { %3052 = vmatprep.mubr.bf16.mxu0 %v5227_v58  ;;  %3278 = vmatpush1.bf16.msra.mxu0 %v5341_v5 }
  0xb4   :  { %3279 = vmatprep.subr.bf16.mxu0 %v5571_v0 }
  0xb7   :  { %3280 = vmatpush1.bf16.msra.mxu0 %v5355_v15  ;;  %v5327_v15 = vld [vmem:[%s7472_s0 + $0x640] ss:$36 sps:$4 sm:$0xff]  }
  0xb8   :  { %3281 = vmatprep.subr.bf16.mxu0 %v5571_v0 }
  0xb9   :  { %2539 = vmatmul.mubr.bf16.gmra.mrb[60].mxu1 %v5229_v60 }
  0xba   :  { %3053 = vmatmul.mubr.bf16.gmra.mrb[28].mxu0 %v5230_v61  ;;  %2546 = vmatprep.mubr.bf16.mxu1 %v5231_v62  ;;  %v5314_v61 = vld [vmem:[%s7472_s0 + $0x5b0] ss:$36 sps:$4 sm:$0xff]  }
  0xbb   :  { %3060 = vmatprep.mubr.bf16.mxu0 %v5233_v63  ;;  %3282 = vmatpush1.bf16.msra.mxu0 %v5369_v24  ;;  %v5316_v62 = vld [vmem:[%s7472_s0 + $0x82c] ss:$36 sps:$4 sm:$0xff]  }
  0xbc   :  { %3283 = vmatprep.subr.bf16.mxu0 %v5571_v0  ;;  %v5274_v0 = vld [vmem:[%s7472_s0 + $0x630] ss:$36 sps:$4 sm:$0xff]  }
  0xbd   :  { %v5337_v24 = vld [vmem:[%s7472_s0 + $0x24c] ss:$36 sps:$4 sm:$0xff]  }
  0xbf   :  { %3284 = vmatpush1.bf16.msra.mxu0 %v5382_v32  ;;  %v5343_v32 = vld [vmem:[%s7472_s0 + $0x294] ss:$36 sps:$4 sm:$0xff]  }
  0xc1   :  { %2547 = vmatmul.mubr.bf16.gmra.mrb[64].mxu1 %v5235_v1  ;;  %v5318_v1 = vld [vmem:[%s7472_s0 + $0x5fc] ss:$36 sps:$4 sm:$0xff]  }
  0xc2   :  { %3061 = vmatmul.mubr.bf16.gmra.mrb[32].mxu0 %v5236_v2  ;;  %2554 = vmatprep.mubr.bf16.mxu1 %v5238_v3 }
  0xc3   :  { %3068 = vmatprep.mubr.bf16.mxu0 %v5240_v4  ;;  %v5320_v4 = vld [vmem:[%s7472_s0 + $0x828] ss:$36 sps:$4 sm:$0xff]  }
  0xc9   :  { %2555 = vmatmul.mubr.bf16.gmra.mrb[68].mxu1 %v5242_v7  ;;  %v5321_v7 = vld [vmem:[%s7472_s0 + $0x5f8] ss:$36 sps:$4 sm:$0xff]  }
  0xca   :  { %3069 = vmatmul.mubr.bf16.gmra.mrb[36].mxu0 %v5243_v8  ;;  %2562 = vmatprep.mubr.bf16.mxu1 %v5244_v9  ;;  %v5322_v8 = vld [vmem:[%s7472_s0 + $0x874] ss:$36 sps:$4 sm:$0xff]  }
  0xcb   :  { %3076 = vmatprep.mubr.bf16.mxu0 %v5246_v10  ;;  %v5324_v10 = vld [vmem:[%s7472_s0 + $0x644] ss:$36 sps:$4 sm:$0xff]  }
  0xd1   :  { %2563 = vmatmul.mubr.bf16.gmra.mrb[72].mxu1 %v5248_v11 }
  0xd2   :  { %3077 = vmatmul.mubr.bf16.gmra.mrb[40].mxu0 %v5249_v12  ;;  %2570 = vmatprep.mubr.bf16.mxu1 %v5251_v13  ;;  %v5326_v13 = vld [vmem:[%s7472_s0 + $0x870] ss:$36 sps:$4 sm:$0xff]  }
  0xd3   :  { %3084 = vmatprep.mubr.bf16.mxu0 %v5253_v14 }
  0xd9   :  { %2571 = vmatmul.mubr.bf16.gmra.mrb[76].mxu1 %v5255_v16  ;;  %v5329_v16 = vld [vmem:[%s7472_s0 + $0x8bc] ss:$36 sps:$4 sm:$0xff]  }
  0xda   :  { %3085 = vmatmul.mubr.bf16.gmra.mrb[44].mxu0 %v5256_v17  ;;  %2578 = vmatprep.mubr.bf16.mxu1 %v5257_v18  ;;  %v5331_v18 = vld [vmem:[%s7472_s0 + $0x68c] ss:$36 sps:$4 sm:$0xff]  }
  0xdb   :  { %3092 = vmatprep.mubr.bf16.mxu0 %v5259_v19 }
  0xe1   :  { %2579 = vmatmul.mubr.bf16.gmra.mrb[80].mxu1 %v5261_v20 }
  0xe2   :  { %3093 = vmatmul.mubr.bf16.gmra.mrb[48].mxu0 %v5262_v21  ;;  %2586 = vmatprep.mubr.bf16.mxu1 %v5264_v22  ;;  %v5333_v21 = vld [vmem:[%s7472_s0 + $0x8b8] ss:$36 sps:$4 sm:$0xff]  }
  0xe3   :  { %3100 = vmatprep.mubr.bf16.mxu0 %v5266_v23  ;;  %v5334_v23 = vld [vmem:[%s7472_s0 + $0x688] ss:$36 sps:$4 sm:$0xff]  }
  0xe9   :  { %2587 = vmatmul.mubr.bf16.gmra.mrb[84].mxu1 %v5268_v25 }
  0xea   :  { %3101 = vmatmul.mubr.bf16.gmra.mrb[52].mxu0 %v5269_v26  ;;  %2594 = vmatprep.mubr.bf16.mxu1 %v5270_v27  ;;  %v5338_v26 = vld [vmem:[%s7472_s0 + $0x6d4] ss:$36 sps:$4 sm:$0xff]  }
  0xeb   :  { %3108 = vmatprep.mubr.bf16.mxu0 %v5272_v28 }
  0xf1   :  { %2595 = vmatmul.mubr.bf16.gmra.mrb[88].mxu1 %v5274_v0  ;;  %v5335_v0 = vld [vmem:[%s7472_s0 + $0x248] ss:$36 sps:$4 sm:$0xff]  }
  0xf2   :  { %3109 = vmatmul.mubr.bf16.gmra.mrb[56].mxu0 %v5275_v29  ;;  %2602 = vmatprep.mubr.bf16.mxu1 %v5277_v30  ;;  %v5340_v30 = vld [vmem:[%s7472_s0 + $0x6d0] ss:$36 sps:$4 sm:$0xff]  }
  0xf3   :  { %3116 = vmatprep.mubr.bf16.mxu0 %v5279_v31 }
  0xf9   :  { %2603 = vmatmul.mubr.bf16.gmra.mrb[92].mxu1 %v5281_v33  ;;  %v5345_v33 = vld [vmem:[%s7472_s0 + $0x71c] ss:$36 sps:$4 sm:$0xff]  }
  0xfa   :  { %3117 = vmatmul.mubr.bf16.gmra.mrb[60].mxu0 %v5282_v34  ;;  %2610 = vmatprep.mubr.bf16.mxu1 %v5283_v35  ;;  %v5362_v34 = vld [vmem:[%s7471_s1 + $0x208] sm:$0xff]   ;;  %v5383_v35 = vld [vmem:[%s7471_s1 + $0x210] sm:$0xff]  }
  0xfb   :  { %3124 = vmatprep.mubr.bf16.mxu0 %v5285_v36 }
 0x101   :  { %2611 = vmatmul.mubr.bf16.gmra.mrb[96].mxu1 %v5287_v37 }
 0x102   :  { %3125 = vmatmul.mubr.bf16.gmra.mrb[64].mxu0 %v5288_v38  ;;  %2618 = vmatprep.mubr.bf16.mxu1 %v5290_v39  ;;  %v5347_v38 = vld [vmem:[%s7472_s0 + $0x290] ss:$36 sps:$4 sm:$0xff]  }
 0x103   :  { %3132 = vmatprep.mubr.bf16.mxu0 %v5292_v40  ;;  %v5349_v40 = vld [vmem:[%s7472_s0 + $0x2dc] ss:$36 sps:$4 sm:$0xff]  }
 0x109   :  { %2619 = vmatmul.mubr.bf16.gmra.mrb[100].mxu1 %v5294_v41 }
 0x10a   :  { %3133 = vmatmul.mubr.bf16.gmra.mrb[68].mxu0 %v5295_v42  ;;  %2626 = vmatprep.mubr.bf16.mxu1 %v5296_v43  ;;  %v5351_v42 = vld [vmem:[%s7472_s0 + $0x764] ss:$36 sps:$4 sm:$0xff]   ;;  %v5402_v43 = vld [vmem:[%s7471_s1 + $0x218] sm:$0xff]  }
 0x10b   :  { %3140 = vmatprep.mubr.bf16.mxu0 %v5298_v44 }
 0x111   :  { %2627 = vmatmul.mubr.bf16.gmra.mrb[104].mxu1 %v5300_v45  ;;  %v5421_v45 = vld [vmem:[%s7471_s1 + $0x220] sm:$0xff]  }
 0x112   :  { %3141 = vmatmul.mubr.bf16.gmra.mrb[72].mxu0 %v5301_v46  ;;  %2634 = vmatprep.mubr.bf16.mxu1 %v5303_v47  ;;  %v5353_v47 = vld [vmem:[%s7472_s0 + $0x2d8] ss:$36 sps:$4 sm:$0xff]  }
 0x113   :  { %3148 = vmatprep.mubr.bf16.mxu0 %v5305_v48 }
 0x114   :  { %v6269_v49 = vpop.f32.mrb[0].mxu1 }
 0x115   :  { %v2422_v50 = vpop.f32.mrb[1].mxu1 }
 0x116   :  { %v6274_v52 = vpop.f32.mrb[2].mxu1  ;;  %v5354_v50 = vld [vmem:[%s7472_s0 + $0x760] ss:$36 sps:$4 sm:$0xff]  }
 0x117   :  { %v2425_v55 = vpop.f32.mrb[3].mxu1 }
 0x118   :  { %v5440_v55 = vld [vmem:[%s7471_s1 + $0x228] sm:$0xff]  }
 0x119   :  { %2635 = vmatmul.mubr.bf16.gmra.mrb[108].mxu1 %v5307_v51  ;;  %v5356_v51 = vld [vmem:[%s7472_s0 + $0x324] ss:$36 sps:$4 sm:$0xff]  }
 0x11a   :  { %3149 = vmatmul.mubr.bf16.gmra.mrb[76].mxu0 %v5308_v53  ;;  %2642 = vmatprep.mubr.bf16.mxu1 %v5309_v54  ;;  %v5358_v54 = vld [vmem:[%s7472_s0 + $0x7ac] ss:$36 sps:$4 sm:$0xff]  }
 0x11b   :  { %3156 = vmatprep.mubr.bf16.mxu0 %v5311_v56  ;;  %v5459_v56 = vld [vmem:[%s7471_s1 + $0x230] sm:$0xff]  }
 0x11c   :  { %v6285_v57 = vpop.f32.mrb[4].mxu1 }
 0x11d   :  { %v2430_v58 = vpop.f32.mrb[5].mxu1 }
 0x11e   :  { %v6290_v60 = vpop.f32.mrb[6].mxu1  ;;  %v5360_v58 = vld [vmem:[%s7472_s0 + $0x320] ss:$36 sps:$4 sm:$0xff]  }
 0x11f   :  { %v2433_v63 = vpop.f32.mrb[7].mxu1 }
 0x120   :  { %v5367_v63 = vld [vmem:[%s7472_s0 + $0x368] ss:$36 sps:$4 sm:$0xff]  }
 0x121   :  { %2643 = vmatmul.mubr.bf16.gmra.mrb[112].mxu1 %v5313_v59  ;;  %v5361_v59 = vld [vmem:[%s7472_s0 + $0x7a8] ss:$36 sps:$4 sm:$0xff]  }
 0x122   :  { %3157 = vmatmul.mubr.bf16.gmra.mrb[80].mxu0 %v5314_v61  ;;  %2650 = vmatprep.mubr.bf16.mxu1 %v5316_v62  ;;  %v5363_v61 = vld [vmem:[%s7472_s0 + $0x36c] ss:$36 sps:$4 sm:$0xff]   ;;  %v5365_v62 = vld [vmem:[%s7472_s0 + $0x7f4] ss:$36 sps:$4 sm:$0xff]  }
 0x123   :  { %3164 = vmatprep.mubr.bf16.mxu0 %v5318_v1  ;;  %v5368_v1 = vld [vmem:[%s7472_s0 + $0x7f0] ss:$36 sps:$4 sm:$0xff]  }
 0x124   :  { %v6301_v2 = vpop.f32.mrb[8].mxu1 }
 0x125   :  { %v2438_v3 = vpop.f32.mrb[9].mxu1 }
 0x126   :  { %v6306_v5 = vpop.f32.mrb[10].mxu1  ;;  %v5370_v3 = vld [vmem:[%s7472_s0 + $0x3b4] ss:$36 sps:$4 sm:$0xff]  }
 0x127   :  { %v2441_v9 = vpop.f32.mrb[11].mxu1 }
 0x128   :  { %v5376_v9 = vld [vmem:[%s7472_s0 + $0x3fc] ss:$36 sps:$4 sm:$0xff]  }
 0x129   :  { %2651 = vmatmul.mubr.bf16.gmra.mrb[116].mxu1 %v5320_v4  ;;  %v5372_v4 = vld [vmem:[%s7472_s0 + $0x83c] ss:$36 sps:$4 sm:$0xff]  }
 0x12a   :  { %3165 = vmatmul.mubr.bf16.gmra.mrb[84].mxu0 %v5321_v7  ;;  %2658 = vmatprep.mubr.bf16.mxu1 %v5322_v8  ;;  %v5374_v7 = vld [vmem:[%s7472_s0 + $0x3b0] ss:$36 sps:$4 sm:$0xff]   ;;  %v5375_v8 = vld [vmem:[%s7472_s0 + $0x838] ss:$36 sps:$4 sm:$0xff]  }
 0x12b   :  { %3172 = vmatprep.mubr.bf16.mxu0 %v5324_v10  ;;  %v5378_v10 = vld [vmem:[%s7472_s0 + $0x884] ss:$36 sps:$4 sm:$0xff]  }
 0x12c   :  { %v6317_v11 = vpop.f32.mrb[12].mxu1 }
 0x12d   :  { %v2446_v12 = vpop.f32.mrb[13].mxu1 }
 0x12e   :  { %v6322_v14 = vpop.f32.mrb[14].mxu1  ;;  %v5478_v12 = vld [vmem:[%s7471_s1 + $0x238] sm:$0xff]  }
 0x12f   :  { %v2449_v17 = vpop.f32.mrb[15].mxu1 }
 0x130   :  { %v5386_v17 = vld [vmem:[%s7472_s0 + $0x8cc] ss:$36 sps:$4 sm:$0xff]  }
 0x131   :  { %2659 = vmatmul.mubr.bf16.gmra.mrb[120].mxu1 %v5326_v13  ;;  %v5380_v13 = vld [vmem:[%s7472_s0 + $0x3f8] ss:$36 sps:$4 sm:$0xff]  }
 0x132   :  { %3173 = vmatmul.mubr.bf16.gmra.mrb[88].mxu0 %v5327_v15  ;;  %2666 = vmatprep.mubr.bf16.mxu1 %v5329_v16  ;;  %v5381_v15 = vld [vmem:[%s7472_s0 + $0x880] ss:$36 sps:$4 sm:$0xff]  }
 0x133   :  { %3180 = vmatprep.mubr.bf16.mxu0 %v5331_v18  ;;  %v5384_v16 = vld [vmem:[%s7472_s0 + $0x444] ss:$36 sps:$4 sm:$0xff]  }
 0x134   :  { %v6333_v19 = vpop.f32.mrb[16].mxu1  ;;  %v5388_v18 = vld [vmem:[%s7472_s0 + $0x440] ss:$36 sps:$4 sm:$0xff]  }
 0x135   :  { %v2454_v20 = vpop.f32.mrb[17].mxu1 }
 0x136   :  { %v6338_v22 = vpop.f32.mrb[18].mxu1  ;;  %v5389_v20 = vld [vmem:[%s7472_s0 + $0x8c8] ss:$36 sps:$4 sm:$0xff]  }
 0x137   :  { %v2457_v25 = vpop.f32.mrb[19].mxu1 }
 0x138   :  { %v5392_v25 = vld [vmem:[%s7472_s0 + $0x18] ss:$36 sps:$4 sm:$0xff]  }
 0x139   :  { %2667 = vmatmul.mubr.bf16.gmra.mrb[124].mxu1 %v5333_v21  ;;  %v5390_v21 = vld [vmem:[%s7472_s0 + $0x48c] ss:$36 sps:$4 sm:$0xff]  }
 0x13a   :  { %3181 = vmatmul.mubr.bf16.gmra.mrb[92].mxu0 %v5334_v23  ;;  %2771 = vmatprep.mubr.bf16.mxu1 %v5337_v24  ;;  %v5394_v23 = vld [vmem:[%s7472_s0 + $0x1c] ss:$36 sps:$4 sm:$0xff]   ;;  %v5395_v24 = vld [vmem:[%s7472_s0 + $0x488] ss:$36 sps:$4 sm:$0xff]  }
 0x13b   :  { %3188 = vmatprep.mubr.bf16.mxu0 %v5338_v26  ;;  %v5396_v26 = vld [vmem:[%s7472_s0 + $0x4d4] ss:$36 sps:$4 sm:$0xff]  }
 0x13c   :  { %v6349_v27 = vpop.f32.mrb[20].mxu1 }
 0x13d   :  { %v2462_v28 = vpop.f32.mrb[21].mxu1 }
 0x13e   :  { %v6354_v29 = vpop.f32.mrb[22].mxu1  ;;  %v5398_v28 = vld [vmem:[%s7472_s0 + $0x64] ss:$36 sps:$4 sm:$0xff]  }
 0x13f   :  { %v2465_v31 = vpop.f32.mrb[23].mxu1 }
 0x140   :  { %v5403_v31 = vld [vmem:[%s7472_s0 + $0x51c] ss:$36 sps:$4 sm:$0xff]  }
 0x141   :  { %2772 = vmatmul.mubr.bf16.vlgmr.msra.gmra.mrb[32].mxu1 %v5335_v0  ;;  %v5400_v0 = vld [vmem:[%s7472_s0 + $0x4d0] ss:$36 sps:$4 sm:$0xff]  }
 0x142   :  { %3189 = vmatmul.mubr.bf16.gmra.mrb[96].mxu0 %v5340_v30  ;;  %4651 = vmatpush3.bf16.msra.mxu1 %v6134_v6  ;;  %v5348_v6 = vld [vmem:[%s7472_s0 + $0x718] ss:$36 sps:$4 sm:$0xff]   ;;  %v5401_v30 = vld [vmem:[%s7472_s0 + $0x60] ss:$36 sps:$4 sm:$0xff]  }
 0x143   :  { %2779 = vmatprep.mubr.bf16.mxu1 %v5343_v32  ;;  %3196 = vmatprep.mubr.bf16.mxu0 %v5345_v33  ;;  %v5405_v32 = vld [vmem:[%s7472_s0 + $0xac] ss:$36 sps:$4 sm:$0xff]   ;;  %v5407_v33 = vld [vmem:[%s7472_s0 + $0x518] ss:$36 sps:$4 sm:$0xff]  }
 0x144   :  { %v6372_v36 = vpop.f32.mrb[24].mxu1  ;;  %4652 = vmatprep.subr.bf16.mxu1 %v5362_v34 }
 0x145   :  { %v2470_v37 = vpop.f32.mrb[25].mxu1 }
 0x146   :  { %v6377_v39 = vpop.f32.mrb[26].mxu1  ;;  %4653 = vmatpush3.bf16.msra.mxu1 %v5362_v34  ;;  %v5408_v34 = vld [vmem:[%s7472_s0 + $0xa8] ss:$36 sps:$4 sm:$0xff]   ;;  %v5411_v37 = vld [vmem:[%s7472_s0 + $0xf4] ss:$36 sps:$4 sm:$0xff]  }
 0x147   :  { %v2473_v41 = vpop.f32.mrb[27].mxu1  ;;  %4654 = vmatprep.subr.bf16.mxu1 %v5383_v35 }
 0x148   :  { %v5417_v41 = vld [vmem:[%s7472_s0 + $0x13c] ss:$36 sps:$4 sm:$0xff]  }
 0x149   :  { %2780 = vmatmul.mubr.bf16.gmra.mrb[36].mxu1 %v5347_v38  ;;  %v5413_v38 = vld [vmem:[%s7472_s0 + $0x560] ss:$36 sps:$4 sm:$0xff]  }
 0x14a   :  { %3197 = vmatmul.mubr.bf16.gmra.mrb[100].mxu0 %v5348_v6  ;;  %2787 = vmatprep.mubr.bf16.mxu1 %v5349_v40  ;;  %v5414_v6 = vld [vmem:[%s7472_s0 + $0xf0] ss:$36 sps:$4 sm:$0xff]  }
 0x14b   :  { %3204 = vmatprep.mubr.bf16.mxu0 %v5351_v42  ;;  %4655 = vmatpush3.bf16.msra.mxu1 %v5383_v35  ;;  %v5409_v35 = vld [vmem:[%s7472_s0 + $0x564] ss:$36 sps:$4 sm:$0xff]   ;;  %v5415_v40 = vld [vmem:[%s7472_s0 + $0x5ac] ss:$36 sps:$4 sm:$0xff]  }
 0x14c   :  { %v6391_v44 = vpop.f32.mrb[28].mxu1  ;;  %4656 = vmatprep.subr.bf16.mxu1 %v5402_v43  ;;  %v5419_v42 = vld [vmem:[%s7472_s0 + $0x5a8] ss:$36 sps:$4 sm:$0xff]  }
 0x14d   :  { %v2478_v46 = vpop.f32.mrb[29].mxu1 }
 0x14e   :  { %v6399_v48 = vpop.f32.mrb[30].mxu1  ;;  %v5424_v46 = vld [vmem:[%s7472_s0 + $0x184] ss:$36 sps:$4 sm:$0xff]  }
 0x14f   :  { %v2481_v53 = vpop.f32.mrb[31].mxu1  ;;  %4657 = vmatpush3.bf16.msra.mxu1 %v5402_v43  ;;  %v5420_v43 = vld [vmem:[%s7472_s0 + $0x138] ss:$36 sps:$4 sm:$0xff]  }
 0x150   :  { %4658 = vmatprep.subr.bf16.mxu1 %v5421_v45  ;;  %v5430_v53 = vld [vmem:[%s7472_s0 + $0x1cc] ss:$36 sps:$4 sm:$0xff]  }
 0x151   :  { %2788 = vmatmul.mubr.bf16.gmra.mrb[40].mxu1 %v5353_v47  ;;  %v5426_v47 = vld [vmem:[%s7472_s0 + $0x5f0] ss:$36 sps:$4 sm:$0xff]  }
 0x152   :  { %3205 = vmatmul.mubr.bf16.gmra.mrb[104].mxu0 %v5354_v50  ;;  %2795 = vmatprep.mubr.bf16.mxu1 %v5356_v51  ;;  %v5427_v50 = vld [vmem:[%s7472_s0 + $0x180] ss:$36 sps:$4 sm:$0xff]  }
 0x153   :  { %3212 = vmatprep.mubr.bf16.mxu0 %v5358_v54  ;;  %4659 = vmatpush3.bf16.msra.mxu1 %v5421_v45  ;;  %v5422_v45 = vld [vmem:[%s7472_s0 + $0x5f4] ss:$36 sps:$4 sm:$0xff]   ;;  %v5428_v51 = vld [vmem:[%s7472_s0 + $0x63c] ss:$36 sps:$4 sm:$0xff]  }
 0x154   :  { %4660 = vmatprep.subr.bf16.mxu1 %v5440_v55  ;;  %v5432_v54 = vld [vmem:[%s7472_s0 + $0x638] ss:$36 sps:$4 sm:$0xff]  }
 0x157   :  { %4661 = vmatpush3.bf16.msra.mxu1 %v5440_v55  ;;  %v5433_v55 = vld [vmem:[%s7472_s0 + $0x1c8] ss:$36 sps:$4 sm:$0xff]  }
 0x158   :  { %4662 = vmatprep.subr.bf16.mxu1 %v5459_v56 }
 0x159   :  { %2796 = vmatmul.mubr.bf16.gmra.mrb[44].mxu1 %v5360_v58  ;;  %v5436_v58 = vld [vmem:[%s7472_s0 + $0x214] ss:$36 sps:$4 sm:$0xff]  }
 0x15a   :  { %3213 = vmatmul.mubr.bf16.gmra.mrb[108].mxu0 %v5361_v59  ;;  %2803 = vmatprep.mubr.bf16.mxu1 %v5363_v61  ;;  %v5438_v59 = vld [vmem:[%s7472_s0 + $0x680] ss:$36 sps:$4 sm:$0xff]   ;;  %v5439_v61 = vld [vmem:[%s7472_s0 + $0x210] ss:$36 sps:$4 sm:$0xff]  }
 0x15b   :  { %3220 = vmatprep.mubr.bf16.mxu0 %v5365_v62  ;;  %4663 = vmatpush3.bf16.msra.mxu1 %v5459_v56  ;;  %v5434_v56 = vld [vmem:[%s7472_s0 + $0x684] ss:$36 sps:$4 sm:$0xff]   ;;  %v5441_v62 = vld [vmem:[%s7472_s0 + $0x6cc] ss:$36 sps:$4 sm:$0xff]  }
 0x15c   :  { %4664 = vmatprep.subr.bf16.mxu1 %v5478_v12 }
 0x15f   :  { %4665 = vmatpush3.bf16.msra.mxu1 %v5478_v12  ;;  %v5455_v12 = vld [vmem:[%s7472_s0 + $0x2ec] ss:$36 sps:$4 sm:$0xff]  }
 0x161   :  { %2804 = vmatmul.mubr.bf16.gmra.mrb[48].mxu1 %v5367_v63  ;;  %v5443_v63 = vld [vmem:[%s7472_s0 + $0x25c] ss:$36 sps:$4 sm:$0xff]  }
 0x162   :  { %3221 = vmatmul.mubr.bf16.gmra.mrb[112].mxu0 %v5368_v1  ;;  %2811 = vmatprep.mubr.bf16.mxu1 %v5370_v3  ;;  %v5445_v1 = vld [vmem:[%s7472_s0 + $0x6c8] ss:$36 sps:$4 sm:$0xff]   ;;  %v5446_v3 = vld [vmem:[%s7472_s0 + $0x258] ss:$36 sps:$4 sm:$0xff]  }
 0x163   :  { %3228 = vmatprep.mubr.bf16.mxu0 %v5372_v4  ;;  %v5447_v4 = vld [vmem:[%s7472_s0 + $0x714] ss:$36 sps:$4 sm:$0xff]  }
 0x169   :  { %2812 = vmatmul.mubr.bf16.gmra.mrb[52].mxu1 %v5374_v7  ;;  %v5449_v7 = vld [vmem:[%s7472_s0 + $0x2a4] ss:$36 sps:$4 sm:$0xff]  }
 0x16a   :  { %3229 = vmatmul.mubr.bf16.gmra.mrb[116].mxu0 %v5375_v8  ;;  %2819 = vmatprep.mubr.bf16.mxu1 %v5376_v9  ;;  %v5451_v8 = vld [vmem:[%s7472_s0 + $0x710] ss:$36 sps:$4 sm:$0xff]   ;;  %v5452_v9 = vld [vmem:[%s7472_s0 + $0x2a0] ss:$36 sps:$4 sm:$0xff]  }
 0x16b   :  { %3236 = vmatprep.mubr.bf16.mxu0 %v5378_v10  ;;  %v5453_v10 = vld [vmem:[%s7472_s0 + $0x75c] ss:$36 sps:$4 sm:$0xff]  }
 0x171   :  { %2820 = vmatmul.mubr.bf16.gmra.mrb[56].mxu1 %v5380_v13  ;;  %v5457_v13 = vld [vmem:[%s7472_s0 + $0x758] ss:$36 sps:$4 sm:$0xff]  }
 0x172   :  { %3237 = vmatmul.mubr.bf16.gmra.mrb[120].mxu0 %v5381_v15  ;;  %2827 = vmatprep.mubr.bf16.mxu1 %v5384_v16  ;;  %v5458_v15 = vld [vmem:[%s7472_s0 + $0x2e8] ss:$36 sps:$4 sm:$0xff]  }
 0x173   :  { %3244 = vmatprep.mubr.bf16.mxu0 %v5386_v17  ;;  %v5460_v16 = vld [vmem:[%s7472_s0 + $0x7a4] ss:$36 sps:$4 sm:$0xff]   ;;  %v5462_v17 = vld [vmem:[%s7472_s0 + $0x334] ss:$36 sps:$4 sm:$0xff]  }
 0x179   :  { %2828 = vmatmul.mubr.bf16.gmra.mrb[60].mxu1 %v5388_v18  ;;  %v5464_v18 = vld [vmem:[%s7472_s0 + $0x7a0] ss:$36 sps:$4 sm:$0xff]  }
 0x17a   :  { %3245 = vmatmul.mubr.bf16.gmra.mrb[124].mxu0 %v5389_v20  ;;  %2835 = vmatprep.mubr.bf16.mxu1 %v5390_v21  ;;  %v5465_v20 = vld [vmem:[%s7472_s0 + $0x330] ss:$36 sps:$4 sm:$0xff]  }
 0x17b   :  { %3285 = vmatprep.mubr.bf16.mxu0 %v5394_v23  ;;  %v5466_v21 = vld [vmem:[%s7472_s0 + $0x7ec] ss:$36 sps:$4 sm:$0xff]   ;;  %v5468_v23 = vld [vmem:[%s7472_s0 + $0x37c] ss:$36 sps:$4 sm:$0xff]  }
 0x181   :  { %2836 = vmatmul.mubr.bf16.gmra.mrb[64].mxu1 %v5395_v24  ;;  %v5470_v24 = vld [vmem:[%s7472_s0 + $0x7e8] ss:$36 sps:$4 sm:$0xff]  }
 0x182   :  { %3286 = vmatmul.mubr.bf16.vlgmr.msra.gmra.mrb[0].mxu0 %v5392_v25  ;;  %2843 = vmatprep.mubr.bf16.mxu1 %v5396_v26  ;;  %v5471_v25 = vld [vmem:[%s7472_s0 + $0x378] ss:$36 sps:$4 sm:$0xff]  }
 0x183   :  { %3293 = vmatprep.mubr.bf16.mxu0 %v5398_v28  ;;  %v5472_v26 = vld [vmem:[%s7472_s0 + $0x834] ss:$36 sps:$4 sm:$0xff]   ;;  %v5474_v28 = vld [vmem:[%s7472_s0 + $0x3c4] ss:$36 sps:$4 sm:$0xff]  }
 0x189   :  { %2844 = vmatmul.mubr.bf16.gmra.mrb[68].mxu1 %v5400_v0  ;;  %v5476_v0 = vld [vmem:[%s7472_s0 + $0x830] ss:$36 sps:$4 sm:$0xff]  }
 0x18a   :  { %3294 = vmatmul.mubr.bf16.gmra.mrb[4].mxu0 %v5401_v30  ;;  %2851 = vmatprep.mubr.bf16.mxu1 %v5403_v31  ;;  %v5477_v30 = vld [vmem:[%s7472_s0 + $0x3c0] ss:$36 sps:$4 sm:$0xff]  }
 0x18b   :  { %3301 = vmatprep.mubr.bf16.mxu0 %v5405_v32  ;;  %v5479_v31 = vld [vmem:[%s7472_s0 + $0x87c] ss:$36 sps:$4 sm:$0xff]   ;;  %v5481_v32 = vld [vmem:[%s7472_s0 + $0x40c] ss:$36 sps:$4 sm:$0xff]  }
 0x191   :  { %2852 = vmatmul.mubr.bf16.gmra.mrb[72].mxu1 %v5407_v33  ;;  %v5483_v33 = vld [vmem:[%s7472_s0 + $0x878] ss:$36 sps:$4 sm:$0xff]  }
 0x192   :  { %3302 = vmatmul.mubr.bf16.gmra.mrb[8].mxu0 %v5408_v34  ;;  %2859 = vmatprep.mubr.bf16.mxu1 %v5409_v35  ;;  %v5484_v34 = vld [vmem:[%s7472_s0 + $0x408] ss:$36 sps:$4 sm:$0xff]  }
 0x193   :  { %3309 = vmatprep.mubr.bf16.mxu0 %v5411_v37  ;;  %v5485_v35 = vld [vmem:[%s7472_s0 + $0x8c4] ss:$36 sps:$4 sm:$0xff]   ;;  %v5487_v37 = vld [vmem:[%s7472_s0 + $0x454] ss:$36 sps:$4 sm:$0xff]  }
 0x199   :  { %2860 = vmatmul.mubr.bf16.gmra.mrb[76].mxu1 %v5413_v38  ;;  %v5489_v38 = vld [vmem:[%s7472_s0 + $0x8c0] ss:$36 sps:$4 sm:$0xff]  }
 0x19a   :  { %3310 = vmatmul.mubr.bf16.gmra.mrb[12].mxu0 %v5414_v6  ;;  %2867 = vmatprep.mubr.bf16.mxu1 %v5415_v40  ;;  %v5490_v6 = vld [vmem:[%s7472_s0 + $0x450] ss:$36 sps:$4 sm:$0xff]   ;;  %v5493_v40 = vld [vmem:[%s7472_s0 + $0x20] ss:$36 sps:$4 sm:$0xff]  }
 0x19b   :  { %3317 = vmatprep.mubr.bf16.mxu0 %v5417_v41  ;;  %v5491_v41 = vld [vmem:[%s7472_s0 + $0x49c] ss:$36 sps:$4 sm:$0xff]  }
 0x1a1   :  { %2868 = vmatmul.mubr.bf16.gmra.mrb[80].mxu1 %v5419_v42  ;;  %v5495_v42 = vld [vmem:[%s7472_s0 + $0x68] ss:$36 sps:$4 sm:$0xff]  }
 0x1a2   :  { %3318 = vmatmul.mubr.bf16.gmra.mrb[16].mxu0 %v5420_v43  ;;  %2875 = vmatprep.mubr.bf16.mxu1 %v5422_v45  ;;  %v5494_v43 = vld [vmem:[%s7472_s0 + $0x498] ss:$36 sps:$4 sm:$0xff]   ;;  %v5498_v45 = vld [vmem:[%s7472_s0 + $0xb0] ss:$36 sps:$4 sm:$0xff]  }
 0x1a3   :  { %3325 = vmatprep.mubr.bf16.mxu0 %v5424_v46  ;;  %v5496_v46 = vld [vmem:[%s7472_s0 + $0x4e4] ss:$36 sps:$4 sm:$0xff]  }
 0x1a9   :  { %2876 = vmatmul.mubr.bf16.gmra.mrb[84].mxu1 %v5426_v47  ;;  %v5500_v47 = vld [vmem:[%s7472_s0 + $0xf8] ss:$36 sps:$4 sm:$0xff]  }
 0x1aa   :  { %3326 = vmatmul.mubr.bf16.gmra.mrb[20].mxu0 %v5427_v50  ;;  %2883 = vmatprep.mubr.bf16.mxu1 %v5428_v51  ;;  %v5499_v50 = vld [vmem:[%s7472_s0 + $0x4e0] ss:$36 sps:$4 sm:$0xff]  }
 0x1ab   :  { %3333 = vmatprep.mubr.bf16.mxu0 %v5430_v53  ;;  %v5503_v51 = vld [vmem:[%s7472_s0 + $0x140] ss:$36 sps:$4 sm:$0xff]   ;;  %v5501_v53 = vld [vmem:[%s7472_s0 + $0x52c] ss:$36 sps:$4 sm:$0xff]  }
 0x1b1   :  { %2884 = vmatmul.mubr.bf16.gmra.mrb[88].mxu1 %v5432_v54  ;;  %v5505_v54 = vld [vmem:[%s7472_s0 + $0x188] ss:$36 sps:$4 sm:$0xff]  }
 0x1b2   :  { %3334 = vmatmul.mubr.bf16.gmra.mrb[24].mxu0 %v5433_v55  ;;  %2891 = vmatprep.mubr.bf16.mxu1 %v5434_v56  ;;  %v5504_v55 = vld [vmem:[%s7472_s0 + $0x528] ss:$36 sps:$4 sm:$0xff]   ;;  %v5508_v56 = vld [vmem:[%s7472_s0 + $0x1d0] ss:$36 sps:$4 sm:$0xff]  }
 0x1b3   :  { %3341 = vmatprep.mubr.bf16.mxu0 %v5436_v58  ;;  %v5506_v58 = vld [vmem:[%s7472_s0 + $0x574] ss:$36 sps:$4 sm:$0xff]  }
 0x1b9   :  { %2892 = vmatmul.mubr.bf16.gmra.mrb[92].mxu1 %v5438_v59 }
 0x1ba   :  { %3342 = vmatmul.mubr.bf16.gmra.mrb[28].mxu0 %v5439_v61  ;;  %2899 = vmatprep.mubr.bf16.mxu1 %v5441_v62  ;;  %v5510_v62 = vld [vmem:[%s7472_s0 + $0x218] ss:$36 sps:$4 sm:$0xff]  }
 0x1bb   :  { %3349 = vmatprep.mubr.bf16.mxu0 %v5443_v63 }
 0x1c1   :  { %2900 = vmatmul.mubr.bf16.gmra.mrb[96].mxu1 %v5445_v1  ;;  %v5509_v1 = vld [vmem:[%s7472_s0 + $0x570] ss:$36 sps:$4 sm:$0xff]  }
 0x1c2   :  { %3350 = vmatmul.mubr.bf16.gmra.mrb[32].mxu0 %v5446_v3  ;;  %2907 = vmatprep.mubr.bf16.mxu1 %v5447_v4  ;;  %v5513_v3 = vld [vmem:[%s7472_s0 + $0x260] ss:$36 sps:$4 sm:$0xff]  }
 0x1c3   :  { %3357 = vmatprep.mubr.bf16.mxu0 %v5449_v7  ;;  %v5511_v7 = vld [vmem:[%s7472_s0 + $0x5bc] ss:$36 sps:$4 sm:$0xff]  }
 0x1c9   :  { %2908 = vmatmul.mubr.bf16.gmra.mrb[100].mxu1 %v5451_v8 }
 0x1ca   :  { %3358 = vmatmul.mubr.bf16.gmra.mrb[36].mxu0 %v5452_v9  ;;  %2915 = vmatprep.mubr.bf16.mxu1 %v5453_v10  ;;  %v5515_v10 = vld [vmem:[%s7472_s0 + $0x2a8] ss:$36 sps:$4 sm:$0xff]  }
 0x1cb   :  { %3365 = vmatprep.mubr.bf16.mxu0 %v5455_v12 }
 0x1d1   :  { %2916 = vmatmul.mubr.bf16.gmra.mrb[104].mxu1 %v5457_v13  ;;  %v5514_v13 = vld [vmem:[%s7472_s0 + $0x5b8] ss:$36 sps:$4 sm:$0xff]  }
 0x1d2   :  { %3366 = vmatmul.mubr.bf16.gmra.mrb[40].mxu0 %v5458_v15  ;;  %2923 = vmatprep.mubr.bf16.mxu1 %v5460_v16  ;;  %v5518_v15 = vld [vmem:[%s7472_s0 + $0x2f0] ss:$36 sps:$4 sm:$0xff]  }
 0x1d3   :  { %3373 = vmatprep.mubr.bf16.mxu0 %v5462_v17  ;;  %v5516_v17 = vld [vmem:[%s7472_s0 + $0x604] ss:$36 sps:$4 sm:$0xff]  }
 0x1d9   :  { %2924 = vmatmul.mubr.bf16.gmra.mrb[108].mxu1 %v5464_v18 }
 0x1da   :  { %3374 = vmatmul.mubr.bf16.gmra.mrb[44].mxu0 %v5465_v20  ;;  %2931 = vmatprep.mubr.bf16.mxu1 %v5466_v21  ;;  %v5520_v21 = vld [vmem:[%s7472_s0 + $0x338] ss:$36 sps:$4 sm:$0xff]  }
 0x1db   :  { %3381 = vmatprep.mubr.bf16.mxu0 %v5468_v23 }
 0x1e1   :  { %2932 = vmatmul.mubr.bf16.gmra.mrb[112].mxu1 %v5470_v24  ;;  %v5519_v24 = vld [vmem:[%s7472_s0 + $0x600] ss:$36 sps:$4 sm:$0xff]  }
 0x1e2   :  { %3382 = vmatmul.mubr.bf16.gmra.mrb[48].mxu0 %v5471_v25  ;;  %2939 = vmatprep.mubr.bf16.mxu1 %v5472_v26  ;;  %v5523_v25 = vld [vmem:[%s7472_s0 + $0x380] ss:$36 sps:$4 sm:$0xff]  }
 0x1e3   :  { %3389 = vmatprep.mubr.bf16.mxu0 %v5474_v28  ;;  %v5521_v28 = vld [vmem:[%s7472_s0 + $0x64c] ss:$36 sps:$4 sm:$0xff]  }
 0x1e9   :  { %2940 = vmatmul.mubr.bf16.gmra.mrb[116].mxu1 %v5476_v0 }
 0x1ea   :  { %3390 = vmatmul.mubr.bf16.gmra.mrb[52].mxu0 %v5477_v30  ;;  %2947 = vmatprep.mubr.bf16.mxu1 %v5479_v31  ;;  %v5525_v31 = vld [vmem:[%s7472_s0 + $0x3c8] ss:$36 sps:$4 sm:$0xff]  }
 0x1eb   :  { %3397 = vmatprep.mubr.bf16.mxu0 %v5481_v32 }
 0x1f1   :  { %2948 = vmatmul.mubr.bf16.gmra.mrb[120].mxu1 %v5483_v33  ;;  %v5524_v33 = vld [vmem:[%s7472_s0 + $0x648] ss:$36 sps:$4 sm:$0xff]  }
 0x1f2   :  { %3398 = vmatmul.mubr.bf16.gmra.mrb[56].mxu0 %v5484_v34  ;;  %2955 = vmatprep.mubr.bf16.mxu1 %v5485_v35  ;;  %v5528_v34 = vld [vmem:[%s7472_s0 + $0x410] ss:$36 sps:$4 sm:$0xff]  }
 0x1f3   :  { %3405 = vmatprep.mubr.bf16.mxu0 %v5487_v37  ;;  %v5526_v37 = vld [vmem:[%s7472_s0 + $0x694] ss:$36 sps:$4 sm:$0xff]  }
 0x1f9   :  { %2956 = vmatmul.mubr.bf16.gmra.mrb[124].mxu1 %v5489_v38 }
 0x1fa   :  { %3406 = vmatmul.mubr.bf16.gmra.mrb[60].mxu0 %v5490_v6  ;;  %4666 = vmatprep.mubr.bf16.mxu1 %v5493_v40  ;;  %v5530_v40 = vld [vmem:[%s7472_s0 + $0x458] ss:$36 sps:$4 sm:$0xff]  }
 0x1fb   :  { %3413 = vmatprep.mubr.bf16.mxu0 %v5491_v41 }
 0x201   :  { %4667 = vmatmul.mubr.bf16.vlgmr.msra.gmra.mrb[128].mxu1 %v5495_v42  ;;  %v5529_v42 = vld [vmem:[%s7472_s0 + $0x690] ss:$36 sps:$4 sm:$0xff]  }
 0x202   :  { %3414 = vmatmul.mubr.bf16.gmra.mrb[64].mxu0 %v5494_v43  ;;  %4670 = vmatprep.mubr.bf16.mxu1 %v5498_v45  ;;  %v5533_v43 = vld [vmem:[%s7472_s0 + $0x4a0] ss:$36 sps:$4 sm:$0xff]  }
 0x203   :  { %3421 = vmatprep.mubr.bf16.mxu0 %v5496_v46  ;;  %v5531_v46 = vld [vmem:[%s7472_s0 + $0x6dc] ss:$36 sps:$4 sm:$0xff]  }
 0x209   :  { %4671 = vmatmul.mubr.bf16.gmra.mrb[132].mxu1 %v5500_v47 }
 0x20a   :  { %3422 = vmatmul.mubr.bf16.gmra.mrb[68].mxu0 %v5499_v50  ;;  %4674 = vmatprep.mubr.bf16.mxu1 %v5503_v51  ;;  %v5535_v51 = vld [vmem:[%s7472_s0 + $0x4e8] ss:$36 sps:$4 sm:$0xff]  }
 0x20b   :  { %3429 = vmatprep.mubr.bf16.mxu0 %v5501_v53 }
 0x211   :  { %4675 = vmatmul.mubr.bf16.gmra.mrb[136].mxu1 %v5505_v54  ;;  %v5534_v54 = vld [vmem:[%s7472_s0 + $0x6d8] ss:$36 sps:$4 sm:$0xff]  }
 0x212   :  { %3430 = vmatmul.mubr.bf16.gmra.mrb[72].mxu0 %v5504_v55  ;;  %4678 = vmatprep.mubr.bf16.mxu1 %v5508_v56  ;;  %v5538_v55 = vld [vmem:[%s7472_s0 + $0x530] ss:$36 sps:$4 sm:$0xff]  }
 0x213   :  { %3437 = vmatprep.mubr.bf16.mxu0 %v5506_v58  ;;  %v5536_v58 = vld [vmem:[%s7472_s0 + $0x724] ss:$36 sps:$4 sm:$0xff]  }
 0x214   :  { %v6707_v59 = vpop.f32.mrb[32].mxu1 }
 0x215   :  { %v2775_v61 = vpop.f32.mrb[33].mxu1 }
 0x216   :  { %v6712_v63 = vpop.f32.mrb[34].mxu1 }
 0x217   :  { %v2778_v4 = vpop.f32.mrb[35].mxu1 }
 0x218   :  { %v5539_v4 = vld [vmem:[%s7472_s0 + $0x720] ss:$36 sps:$4 sm:$0xff]  }
 0x219   :  { %4679 = vmatmul.mubr.bf16.gmra.mrb[140].mxu1 %v5510_v62 }
 0x21a   :  { %3438 = vmatmul.mubr.bf16.gmra.mrb[76].mxu0 %v5509_v1  ;;  %4682 = vmatprep.mubr.bf16.mxu1 %v5513_v3  ;;  %v5540_v1 = vld [vmem:[%s7472_s0 + $0x578] ss:$36 sps:$4 sm:$0xff]  }
 0x21b   :  { %3445 = vmatprep.mubr.bf16.mxu0 %v5511_v7  ;;  %v5543_v7 = vld [vmem:[%s7472_s0 + $0x5c0] ss:$36 sps:$4 sm:$0xff]  }
 0x21c   :  { %v6723_v8 = vpop.f32.mrb[36].mxu1 }
 0x21d   :  { %v2783_v9 = vpop.f32.mrb[37].mxu1 }
 0x21e   :  { %v6728_v12 = vpop.f32.mrb[38].mxu1 }
 0x21f   :  { %v2786_v16 = vpop.f32.mrb[39].mxu1 }
 0x220   :  { %v5545_v16 = vld [vmem:[%s7472_s0 + $0x608] ss:$36 sps:$4 sm:$0xff]  }
 0x221   :  { %4683 = vmatmul.mubr.bf16.gmra.mrb[144].mxu1 %v5515_v10  ;;  %v5541_v10 = vld [vmem:[%s7472_s0 + $0x76c] ss:$36 sps:$4 sm:$0xff]  }
 0x222   :  { %3446 = vmatmul.mubr.bf16.gmra.mrb[80].mxu0 %v5514_v13  ;;  %4686 = vmatprep.mubr.bf16.mxu1 %v5518_v15 }
 0x223   :  { %3453 = vmatprep.mubr.bf16.mxu0 %v5516_v17 }
 0x224   :  { %v6739_v18 = vpop.f32.mrb[40].mxu1 }
 0x225   :  { %v2791_v20 = vpop.f32.mrb[41].mxu1 }
 0x226   :  { %v6744_v23 = vpop.f32.mrb[42].mxu1  ;;  %v5544_v20 = vld [vmem:[%s7472_s0 + $0x768] ss:$36 sps:$4 sm:$0xff]  }
 0x227   :  { %v2794_v26 = vpop.f32.mrb[43].mxu1 }
 0x229   :  { %4687 = vmatmul.mubr.bf16.gmra.mrb[148].mxu1 %v5520_v21  ;;  %v5548_v21 = vld [vmem:[%s7472_s0 + $0x650] ss:$36 sps:$4 sm:$0xff]  }
 0x22a   :  { %3454 = vmatmul.mubr.bf16.gmra.mrb[84].mxu0 %v5519_v24  ;;  %4690 = vmatprep.mubr.bf16.mxu1 %v5523_v25  ;;  %v5546_v25 = vld [vmem:[%s7472_s0 + $0x7b4] ss:$36 sps:$4 sm:$0xff]  }
 0x22b   :  { %3461 = vmatprep.mubr.bf16.mxu0 %v5521_v28 }
 0x22c   :  { %v6755_v0 = vpop.f32.mrb[44].mxu1 }
 0x22d   :  { %v2799_v30 = vpop.f32.mrb[45].mxu1 }
 0x22e   :  { %v6760_v32 = vpop.f32.mrb[46].mxu1 }
 0x22f   :  { %v2802_v35 = vpop.f32.mrb[47].mxu1 }
 0x231   :  { %4691 = vmatmul.mubr.bf16.gmra.mrb[152].mxu1 %v5525_v31  ;;  %v5550_v31 = vld [vmem:[%s7472_s0 + $0x698] ss:$36 sps:$4 sm:$0xff]  }
 0x232   :  { %3462 = vmatmul.mubr.bf16.gmra.mrb[88].mxu0 %v5524_v33  ;;  %4694 = vmatprep.mubr.bf16.mxu1 %v5528_v34 }
 0x233   :  { %3469 = vmatprep.mubr.bf16.mxu0 %v5526_v37  ;;  %v5549_v37 = vld [vmem:[%s7472_s0 + $0x7b0] ss:$36 sps:$4 sm:$0xff]  }
 0x234   :  { %v6771_v38 = vpop.f32.mrb[48].mxu1 }
 0x235   :  { %v2807_v6 = vpop.f32.mrb[49].mxu1 }
 0x236   :  { %v6776_v41 = vpop.f32.mrb[50].mxu1  ;;  %v5553_v6 = vld [vmem:[%s7472_s0 + $0x6e0] ss:$36 sps:$4 sm:$0xff]  }
 0x237   :  { %v2810_v45 = vpop.f32.mrb[51].mxu1 }
 0x239   :  { %4695 = vmatmul.mubr.bf16.gmra.mrb[156].mxu1 %v5530_v40 }
 0x23a   :  { %3470 = vmatmul.mubr.bf16.gmra.mrb[92].mxu0 %v5529_v42  ;;  %4698 = vmatprep.mubr.bf16.mxu1 %v5533_v43  ;;  %v5551_v43 = vld [vmem:[%s7472_s0 + $0x7fc] ss:$36 sps:$4 sm:$0xff]  }
 0x23b   :  { %3477 = vmatprep.mubr.bf16.mxu0 %v5531_v46 }
 0x23c   :  { %v6787_v47 = vpop.f32.mrb[52].mxu1 }
 0x23d   :  { %v2815_v50 = vpop.f32.mrb[53].mxu1 }
 0x23e   :  { %v6792_v53 = vpop.f32.mrb[54].mxu1 }
 0x23f   :  { %v2818_v56 = vpop.f32.mrb[55].mxu1 }
 0x241   :  { %4699 = vmatmul.mubr.bf16.gmra.mrb[160].mxu1 %v5535_v51 }
 0x242   :  { %3478 = vmatmul.mubr.bf16.gmra.mrb[96].mxu0 %v5534_v54  ;;  %4702 = vmatprep.mubr.bf16.mxu1 %v5538_v55  ;;  %v5555_v54 = vld [vmem:[%s7472_s0 + $0x728] ss:$36 sps:$4 sm:$0xff]  }
 0x243   :  { %3485 = vmatprep.mubr.bf16.mxu0 %v5536_v58 }
 0x244   :  { %v6803_v61 = vpop.f32.mrb[56].mxu1 }
 0x245   :  { %v2823_v62 = vpop.f32.mrb[57].mxu1 }
 0x246   :  { %v6808_v3 = vpop.f32.mrb[58].mxu1  ;;  %v5558_v62 = vld [vmem:[%s7472_s0 + $0x770] ss:$36 sps:$4 sm:$0xff]  }
 0x247   :  { %v2826_v9 = vpop.f32.mrb[59].mxu1 }
 0x249   :  { %4703 = vmatmul.mubr.bf16.gmra.mrb[164].mxu1 %v5540_v1 }
 0x24a   :  { %3486 = vmatmul.mubr.bf16.gmra.mrb[100].mxu0 %v5539_v4  ;;  %4706 = vmatprep.mubr.bf16.mxu1 %v5543_v7  ;;  %v5556_v7 = vld [vmem:[%s7472_s0 + $0x844] ss:$36 sps:$4 sm:$0xff]  }
 0x24b   :  { %3493 = vmatprep.mubr.bf16.mxu0 %v5541_v10 }
 0x24c   :  { %v6819_v13 = vpop.f32.mrb[60].mxu1 }
 0x24d   :  { %v2831_v15 = vpop.f32.mrb[61].mxu1 }
 0x24e   :  { %v6824_v17 = vpop.f32.mrb[62].mxu1 }
 0x24f   :  { %v2834_v24 = vpop.f32.mrb[63].mxu1 }
 0x251   :  { %4707 = vmatmul.mubr.bf16.gmra.mrb[168].mxu1 %v5545_v16 }
 0x252   :  { %3494 = vmatmul.mubr.bf16.gmra.mrb[104].mxu0 %v5544_v20  ;;  %4710 = vmatprep.mubr.bf16.mxu1 %v5548_v21  ;;  %v5560_v20 = vld [vmem:[%s7472_s0 + $0x7b8] ss:$36 sps:$4 sm:$0xff]  }
 0x253   :  { %3501 = vmatprep.mubr.bf16.mxu0 %v5546_v25 }
 0x254   :  { %v6835_v26 = vpop.f32.mrb[64].mxu1 }
 0x255   :  { %v3287_v28 = vpop.f32.mrb[0].mxu0  ;;  %v2839_v30 = vpop.f32.mrb[65].mxu1 }
 0x256   :  { %v6841_v33 = vadd.f32 %v3287_v28, %v6269_v49  ;;  %v3289_v34 = vpop.f32.mrb[1].mxu0  ;;  %v6843_v35 = vpop.f32.mrb[66].mxu1  ;;  %v5563_v28 = vld [vmem:[%s7472_s0 + $0x800] ss:$36 sps:$4 sm:$0xff]  }
 0x257   :  { %v3290_v40 = vpop.f32.mrb[2].mxu0  ;;  %v2842_v42 = vpop.f32.mrb[67].mxu1  ;;  %v5561_v34 = vld [vmem:[%s7472_s0 + $0x88c] ss:$36 sps:$4 sm:$0xff]  }
 0x258   :  { %v6855_v49 = vadd.f32 %v3290_v40, %v6274_v52  ;;  %v3292_v45 = vpop.f32.mrb[3].mxu0  ;;  %v5554_v52 = vld [vmem:[%s7472_s0 + $0x7f8] ss:$36 sps:$4 sm:$0xff]  }
 0x259   :  { %4711 = vmatmul.mubr.bf16.gmra.mrb[172].mxu1 %v5550_v31 }
 0x25a   :  { %3502 = vmatmul.mubr.bf16.gmra.mrb[108].mxu0 %v5549_v37  ;;  %4714 = vmatprep.mubr.bf16.mxu1 %v5553_v6 }
 0x25b   :  { %3509 = vmatprep.mubr.bf16.mxu0 %v5551_v43  ;;  %v5565_v43 = vld [vmem:[%s7472_s0 + $0x848] ss:$36 sps:$4 sm:$0xff]  }
 0x25c   :  { %v6857_v46 = vpop.f32.mrb[68].mxu1 }
 0x25d   :  { %v3295_v50 = vpop.f32.mrb[4].mxu0  ;;  %v2847_v51 = vpop.f32.mrb[69].mxu1 }
 0x25e   :  { %v6863_v55 = vadd.f32 %v3295_v50, %v6285_v57  ;;  %v3297_v56 = vpop.f32.mrb[5].mxu0  ;;  %v6865_v58 = vpop.f32.mrb[70].mxu1 }
 0x25f   :  { %v3298_v1 = vpop.f32.mrb[6].mxu0  ;;  %v2850_v4 = vpop.f32.mrb[71].mxu1 }
 0x260   :  { %v6877_v57 = vadd.f32 %v3298_v1, %v6290_v60  ;;  %v3300_v9 = vpop.f32.mrb[7].mxu0  ;;  %v5559_v60 = vld [vmem:[%s7472_s0 + $0x840] ss:$36 sps:$4 sm:$0xff]  }
 0x261   :  { %4715 = vmatmul.mubr.bf16.gmra.mrb[176].mxu1 %v5555_v54  ;;  %v5568_v54 = vld [vmem:[%s7472_s0 + $0x890] ss:$36 sps:$4 sm:$0xff]  }
 0x262   :  { %3510 = vmatmul.mubr.bf16.gmra.mrb[112].mxu0 %v5554_v52  ;;  %4718 = vmatprep.mubr.bf16.mxu1 %v5558_v62  ;;  %v5566_v62 = vld [vmem:[%s7472_s0 + $0x8d4] ss:$36 sps:$4 sm:$0xff]  }
 0x263   :  { %3517 = vmatprep.mubr.bf16.mxu0 %v5556_v7 }
 0x264   :  { %v6879_v10 = vpop.f32.mrb[72].mxu1 }
 0x265   :  { %v3303_v15 = vpop.f32.mrb[8].mxu0  ;;  %v2855_v16 = vpop.f32.mrb[73].mxu1 }
 0x266   :  { %v6885_v21 = vadd.f32 %v3303_v15, %v6301_v2  ;;  %v3305_v24 = vpop.f32.mrb[9].mxu0  ;;  %v6887_v25 = vpop.f32.mrb[74].mxu1  ;;  %v5570_v15 = vld [vmem:[%s7472_s0 + $0x8d8] ss:$36 sps:$4 sm:$0xff]  }
 0x267   :  { %v3306_v30 = vpop.f32.mrb[10].mxu0  ;;  %v2858_v31 = vpop.f32.mrb[75].mxu1 }
 0x268   :  { %v6899_v2 = vadd.f32 %v3306_v30, %v6306_v5  ;;  %v3308_v37 = vpop.f32.mrb[11].mxu0  ;;  %v5564_v5 = vld [vmem:[%s7472_s0 + $0x888] ss:$36 sps:$4 sm:$0xff]  }
 0x269   :  { %4719 = vmatmul.mubr.bf16.gmra.mrb[180].mxu1 %v5560_v20 }
 0x26a   :  { %3518 = vmatmul.mubr.bf16.gmra.mrb[116].mxu0 %v5559_v60  ;;  %4722 = vmatprep.mubr.bf16.mxu1 %v5563_v28 }
 0x26b   :  { %3525 = vmatprep.mubr.bf16.mxu0 %v5561_v34 }
 0x26c   :  { %v6901_v6 = vpop.f32.mrb[76].mxu1 }
 0x26d   :  { %v3311_v40 = vpop.f32.mrb[12].mxu0  ;;  %v2863_v42 = vpop.f32.mrb[77].mxu1 }
 0x26e   :  { %v6907_v45 = vadd.f32 %v3311_v40, %v6317_v11  ;;  %v3313_v50 = vpop.f32.mrb[13].mxu0  ;;  %v6909_v51 = vpop.f32.mrb[78].mxu1 }
 0x26f   :  { %v3314_v56 = vpop.f32.mrb[14].mxu0  ;;  %v2866_v52 = vpop.f32.mrb[79].mxu1 }
 0x270   :  { %v6921_v11 = vadd.f32 %v3314_v56, %v6322_v14  ;;  %v3316_v1 = vpop.f32.mrb[15].mxu0  ;;  %v5569_v14 = vld [vmem:[%s7472_s0 + $0x8d0] ss:$36 sps:$4 sm:$0xff]  }
 0x271   :  { %4723 = vmatmul.mubr.bf16.gmra.mrb[184].mxu1 %v5565_v43 }
 0x272   :  { %3526 = vmatmul.mubr.bf16.gmra.mrb[120].mxu0 %v5564_v5  ;;  %4726 = vmatprep.mubr.bf16.mxu1 %v5568_v54 }
 0x273   :  { %3533 = vmatprep.mubr.bf16.mxu0 %v5566_v62 }
 0x274   :  { %v6923_v4 = vpop.f32.mrb[80].mxu1 }
 0x275   :  { %v3319_v7 = vpop.f32.mrb[16].mxu0  ;;  %v2871_v9 = vpop.f32.mrb[81].mxu1 }
 0x276   :  { %v6929_v16 = vadd.f32 %v3319_v7, %v6333_v19  ;;  %v3321_v20 = vpop.f32.mrb[17].mxu0  ;;  %v6931_v24 = vpop.f32.mrb[82].mxu1 }
 0x277   :  { %v3322_v60 = vpop.f32.mrb[18].mxu0  ;;  %v2874_v28 = vpop.f32.mrb[83].mxu1 }
 0x278   :  { %v6937_v30 = vadd.f32 %v3322_v60, %v6338_v22  ;;  %v3324_v31 = vpop.f32.mrb[19].mxu0 }
 0x279   :  { %4727 = vmatmul.mubr.bf16.gmra.mrb[188].mxu1 %v5570_v15 }
 0x27a   :  { %3534 = vmatmul.mubr.bf16.gmra.mrb[124].mxu0 %v5569_v14 }
 0x27c   :  { %v6939_v34 = vpop.f32.mrb[84].mxu1 }
 0x27d   :  { %v3327_v37 = vpop.f32.mrb[20].mxu0  ;;  %v2879_v19 = vpop.f32.mrb[85].mxu1 }
 0x27e   :  { %v6942_v40 = vadd.f32 %v3327_v37, %v6349_v27  ;;  %v3329_v42 = vpop.f32.mrb[21].mxu0  ;;  %v6944_v43 = vpop.f32.mrb[86].mxu1 }
 0x27f   :  { %v3330_v50 = vpop.f32.mrb[22].mxu0  ;;  %v2882_v5 = vpop.f32.mrb[87].mxu1 }
 0x280   :  { %v6947_v54 = vadd.f32 %v3330_v50, %v6354_v29  ;;  %v3332_v22 = vpop.f32.mrb[23].mxu0 }
 0x284   :  { %v6949_v56 = vpop.f32.mrb[88].mxu1 }
 0x285   :  { %v3335_v52 = vpop.f32.mrb[24].mxu0  ;;  %v2887_v62 = vpop.f32.mrb[89].mxu1 }
 0x286   :  { %v6952_v1 = vadd.f32 %v3335_v52, %v6372_v36  ;;  %v3337_v7 = vpop.f32.mrb[25].mxu0  ;;  %v6954_v9 = vpop.f32.mrb[90].mxu1 }
 0x287   :  { %v3338_v27 = vpop.f32.mrb[26].mxu0  ;;  %v2890_v15 = vpop.f32.mrb[91].mxu1 }
 0x288   :  { %v6957_v20 = vadd.f32 %v3338_v27, %v6377_v39  ;;  %v3340_v14 = vpop.f32.mrb[27].mxu0 }
 0x28c   :  { %v6959_v60 = vpop.f32.mrb[92].mxu1 }
 0x28d   :  { %v3343_v29 = vpop.f32.mrb[28].mxu0  ;;  %v2895_v28 = vpop.f32.mrb[93].mxu1 }
 0x28e   :  { %v6962_v31 = vadd.f32 %v3343_v29, %v6391_v44  ;;  %v3345_v37 = vpop.f32.mrb[29].mxu0  ;;  %v6964_v19 = vpop.f32.mrb[94].mxu1 }
 0x28f   :  { %v3346_v36 = vpop.f32.mrb[30].mxu0  ;;  %v2898_v42 = vpop.f32.mrb[95].mxu1 }
 0x290   :  { %v6967_v50 = vadd.f32 %v3346_v36, %v6399_v48  ;;  %v3348_v5 = vpop.f32.mrb[31].mxu0 }
 0x294   :  { %v6969_v22 = vpop.f32.mrb[96].mxu1 }
 0x295   :  { %v3351_v39 = vpop.f32.mrb[32].mxu0  ;;  %v2903_v52 = vpop.f32.mrb[97].mxu1 }
 0x296   :  { %v6972_v62 = vadd.f32 %v3351_v39, %v6707_v59  ;;  %v3353_v7 = vpop.f32.mrb[33].mxu0  ;;  %v6974_v27 = vpop.f32.mrb[98].mxu1 }
 0x297   :  { %7476 = vst [vmem:[#allocation2_spill] sm:$0xff] %v6974_v27  ;;  %v3354_v44 = vpop.f32.mrb[34].mxu0  ;;  %v2906_v15 = vpop.f32.mrb[99].mxu1 }
 0x298   :  { %v6977_v14 = vadd.f32 %v3354_v44, %v6712_v63  ;;  %v3356_v29 = vpop.f32.mrb[35].mxu0 }
 0x29c   :  { %v6979_v28 = vpop.f32.mrb[100].mxu1 }
 0x29d   :  { %7477 = vst [vmem:[#allocation3_spill] sm:$0xff] %v6979_v28  ;;  %v3359_v48 = vpop.f32.mrb[36].mxu0  ;;  %v2911_v37 = vpop.f32.mrb[101].mxu1 }
 0x29e   :  { %v6982_v36 = vadd.f32 %v3359_v48, %v6723_v8  ;;  %v3361_v42 = vpop.f32.mrb[37].mxu0  ;;  %v6984_v5 = vpop.f32.mrb[102].mxu1 }
 0x29f   :  { %7478 = vst [vmem:[#allocation4_spill] sm:$0xff] %v6984_v5  ;;  %v3362_v59 = vpop.f32.mrb[38].mxu0  ;;  %v2914_v39 = vpop.f32.mrb[103].mxu1 }
 0x2a0   :  { %v6987_v52 = vadd.f32 %v3362_v59, %v6728_v12  ;;  %v3364_v7 = vpop.f32.mrb[39].mxu0 }
 0x2a4   :  { %v6989_v15 = vpop.f32.mrb[104].mxu1 }
 0x2a5   :  { %7479 = vst [vmem:[#allocation5_spill] sm:$0xff] %v6989_v15  ;;  %v3367_v63 = vpop.f32.mrb[40].mxu0  ;;  %v2919_v44 = vpop.f32.mrb[105].mxu1 }
 0x2a6   :  { %v6992_v29 = vadd.f32 %v3367_v63, %v6739_v18  ;;  %v3369_v37 = vpop.f32.mrb[41].mxu0  ;;  %v6994_v28 = vpop.f32.mrb[106].mxu1 }
 0x2a7   :  { %7480 = vst [vmem:[#allocation6_spill] sm:$0xff] %v6994_v28  ;;  %v3370_v8 = vpop.f32.mrb[42].mxu0  ;;  %v2922_v48 = vpop.f32.mrb[107].mxu1 }
 0x2a8   :  { %v6997_v42 = vadd.f32 %v3370_v8, %v6744_v23  ;;  %v3372_v39 = vpop.f32.mrb[43].mxu0 }
 0x2ac   :  { %v6999_v5 = vpop.f32.mrb[108].mxu1 }
 0x2ad   :  { %7481 = vst [vmem:[#allocation7_spill] sm:$0xff] %v6999_v5  ;;  %v3375_v12 = vpop.f32.mrb[44].mxu0  ;;  %v2927_v59 = vpop.f32.mrb[109].mxu1 }
 0x2ae   :  { %v7002_v7 = vadd.f32 %v3375_v12, %v6755_v0  ;;  %v3377_v44 = vpop.f32.mrb[45].mxu0  ;;  %v7004_v15 = vpop.f32.mrb[110].mxu1 }
 0x2af   :  { %7482 = vst [vmem:[#allocation8_spill] sm:$0xff] %v7004_v15  ;;  %v3378_v18 = vpop.f32.mrb[46].mxu0  ;;  %v2930_v63 = vpop.f32.mrb[111].mxu1 }
 0x2b0   :  { %v7007_v37 = vadd.f32 %v3378_v18, %v6760_v32  ;;  %v3380_v48 = vpop.f32.mrb[47].mxu0 }
 0x2b4   :  { %v7009_v28 = vpop.f32.mrb[112].mxu1 }
 0x2b5   :  { %7483 = vst [vmem:[#allocation9_spill] sm:$0xff] %v7009_v28  ;;  %v3383_v23 = vpop.f32.mrb[48].mxu0  ;;  %v2935_v8 = vpop.f32.mrb[113].mxu1 }
 0x2b6   :  { %v7012_v39 = vadd.f32 %v3383_v23, %v6771_v38  ;;  %v3385_v59 = vpop.f32.mrb[49].mxu0  ;;  %v7014_v5 = vpop.f32.mrb[114].mxu1 }
 0x2b7   :  { %7484 = vst [vmem:[#allocation10_spill] sm:$0xff] %v7014_v5  ;;  %v3386_v0 = vpop.f32.mrb[50].mxu0  ;;  %v2938_v12 = vpop.f32.mrb[115].mxu1 }
 0x2b8   :  { %v7017_v44 = vadd.f32 %v3386_v0, %v6776_v41  ;;  %v3388_v63 = vpop.f32.mrb[51].mxu0 }
 0x2bc   :  { %v7019_v15 = vpop.f32.mrb[116].mxu1 }
 0x2bd   :  { %7485 = vst [vmem:[#allocation11_spill] sm:$0xff] %v7019_v15  ;;  %v3391_v32 = vpop.f32.mrb[52].mxu0  ;;  %v2943_v18 = vpop.f32.mrb[117].mxu1 }
 0x2be   :  { %v7022_v48 = vadd.f32 %v3391_v32, %v6787_v47  ;;  %v3393_v8 = vpop.f32.mrb[53].mxu0  ;;  %v7024_v28 = vpop.f32.mrb[118].mxu1 }
 0x2bf   :  { %7486 = vst [vmem:[#allocation12_spill] sm:$0xff] %v7024_v28  ;;  %v3394_v38 = vpop.f32.mrb[54].mxu0  ;;  %v2946_v23 = vpop.f32.mrb[119].mxu1 }
 0x2c0   :  { %v7027_v59 = vadd.f32 %v3394_v38, %v6792_v53  ;;  %v3396_v12 = vpop.f32.mrb[55].mxu0 }
 0x2c4   :  { %v7029_v5 = vpop.f32.mrb[120].mxu1 }
 0x2c5   :  { %7487 = vst [vmem:[#allocation13_spill] sm:$0xff] %v7029_v5  ;;  %v3399_v41 = vpop.f32.mrb[56].mxu0  ;;  %v2951_v0 = vpop.f32.mrb[121].mxu1 }
 0x2c6   :  { %v7032_v63 = vadd.f32 %v3399_v41, %v6803_v61  ;;  %v3401_v18 = vpop.f32.mrb[57].mxu0  ;;  %v7034_v15 = vpop.f32.mrb[122].mxu1 }
 0x2c7   :  { %7488 = vst [vmem:[#allocation14_spill] sm:$0xff] %v7034_v15  ;;  %v3402_v47 = vpop.f32.mrb[58].mxu0  ;;  %v2954_v32 = vpop.f32.mrb[123].mxu1 }
 0x2c8   :  { %v7037_v8 = vadd.f32 %v3402_v47, %v6808_v3  ;;  %v3404_v23 = vpop.f32.mrb[59].mxu0 }
 0x2cc   :  { %v7039_v28 = vpop.f32.mrb[124].mxu1 }
 0x2cd   :  { %7489 = vst [vmem:[#allocation15_spill] sm:$0xff] %v7039_v28  ;;  %v3407_v53 = vpop.f32.mrb[60].mxu0  ;;  %v2959_v38 = vpop.f32.mrb[125].mxu1 }
 0x2ce   :  { %v7042_v12 = vadd.f32 %v3407_v53, %v6819_v13  ;;  %v3409_v0 = vpop.f32.mrb[61].mxu0  ;;  %v7044_v5 = vpop.f32.mrb[126].mxu1 }
 0x2cf   :  { %7490 = vst [vmem:[#allocation16_spill] sm:$0xff] %v7044_v5  ;;  %v3410_v61 = vpop.f32.mrb[62].mxu0  ;;  %v2962_v41 = vpop.f32.mrb[127].mxu1 }
 0x2d0   :  { %v7047_v18 = vadd.f32 %v3410_v61, %v6824_v17  ;;  %v3412_v32 = vpop.f32.mrb[63].mxu0 }
 0x2d4   :  { %v4668_v15 = vpop.f32.mrb[128].mxu1 }
 0x2d5   :  { %v3415_v3 = vpop.f32.mrb[64].mxu0  ;;  %v3585_v47 = vadd.f32 %v6863_v55, %v4668_v15  ;;  %v3576_v23 = vpop.f32.mrb[129].mxu1 }
 0x2d6   :  { %v7051_v28 = vadd.f32 %v3415_v3, %v6835_v26  ;;  %v3417_v38 = vpop.f32.mrb[65].mxu0  ;;  %v3577_v13 = vadd.f32 %v6841_v33, %v3576_v23  ;;  %v4669_v53 = vpop.f32.mrb[130].mxu1 }
 0x2d7   :  { %v3418_v0 = vpop.f32.mrb[66].mxu0  ;;  %v3588_v5 = vadd.f32 %v6877_v57, %v4669_v53  ;;  %v3579_v41 = vpop.f32.mrb[131].mxu1 }
 0x2d8   :  { %v7056_v17 = vadd.f32 %v3418_v0, %v6843_v35  ;;  %v3420_v61 = vpop.f32.mrb[67].mxu0  ;;  %v3580_v32 = vadd.f32 %v6855_v49, %v3579_v41 }
 0x2dc   :  { %v4672_v27 = vpop.f32.mrb[132].mxu1 }
 0x2dd   :  { %v3423_v55 = vpop.f32.mrb[68].mxu0  ;;  %v3601_v15 = vadd.f32 %v6907_v45, %v4672_v27  ;;  %v3592_v26 = vpop.f32.mrb[133].mxu1 }
 0x2de   :  { %v7061_v3 = vadd.f32 %v3423_v55, %v6857_v46  ;;  %v3425_v33 = vpop.f32.mrb[69].mxu0  ;;  %v3593_v23 = vadd.f32 %v6885_v21, %v3592_v26  ;;  %v4673_v38 = vpop.f32.mrb[134].mxu1 }
 0x2df   :  { %v3426_v57 = vpop.f32.mrb[70].mxu0  ;;  %v3604_v53 = vadd.f32 %v6921_v11, %v4673_v38  ;;  %v3595_v35 = vpop.f32.mrb[135].mxu1 }
 0x2e0   :  { %v7066_v0 = vadd.f32 %v3426_v57, %v6865_v58  ;;  %v3428_v49 = vpop.f32.mrb[71].mxu0  ;;  %v3596_v41 = vadd.f32 %v6899_v2, %v3595_v35 }
 0x2e4   :  { %v4676_v61 = vpop.f32.mrb[136].mxu1 }
 0x2e5   :  { %v3431_v45 = vpop.f32.mrb[72].mxu0  ;;  %v7070_v27 = vadd.f32 %v6942_v40, %v4676_v61  ;;  %v3608_v46 = vpop.f32.mrb[137].mxu1 }
 0x2e6   :  { %v7073_v55 = vadd.f32 %v3431_v45, %v6879_v10  ;;  %v3433_v21 = vpop.f32.mrb[73].mxu0  ;;  %v7076_v26 = vadd.f32 %v6929_v16, %v3608_v46  ;;  %v4677_v11 = vpop.f32.mrb[138].mxu1  ;;  %v7090_v10 = vld [vmem:[%s7473_s2] ss:$0 sm:$0xff] }
 0x2e7   :  { %v3434_v33 = vpop.f32.mrb[74].mxu0  ;;  %v7079_v58 = vadd.f32 %v6947_v54, %v4677_v11  ;;  %v3611_v38 = vpop.f32.mrb[139].mxu1  ;;  %v3840_v35 = vmul.f32 %v7090_v10, %v3585_v47 }
 0x2e8   :  { %v7082_v2 = vadd.f32 %v3434_v33, %v6887_v25  ;;  %v3436_v57 = vpop.f32.mrb[75].mxu0  ;;  %v7085_v40 = vadd.f32 %v6937_v30, %v3611_v38  ;;  %v7099_v25 = vld [vmem:[%s7474_s3] ss:$0 sm:$0xff]  ;;  %v3838_v33 = vmul.f32 %v7090_v10, %v3577_v13 }
 0x2ea   :  { %7491 = vst [vmem:[#allocation17_spill] sm:$0xff] %v7082_v2 }
 0x2ec   :  { %v4680_v16 = vpop.f32.mrb[140].mxu1 }
 0x2ed   :  { %v3439_v49 = vpop.f32.mrb[76].mxu0  ;;  %v7094_v54 = vadd.f32 %v6962_v31, %v4680_v16  ;;  %v3624_v61 = vpop.f32.mrb[141].mxu1 }
 0x2ee   :  { %v7102_v30 = vadd.f32 %v3439_v49, %v6901_v6  ;;  %v3441_v45 = vpop.f32.mrb[77].mxu0  ;;  %v7105_v46 = vadd.f32 %v6952_v1, %v3624_v61  ;;  %v4681_v21 = vpop.f32.mrb[142].mxu1  ;;  %v3911_v6 = vadd.f32 %v7099_v25, %v3840_v35  ;;  %v3841_v1 = vmul.f32 %v7090_v10, %v3588_v5 }
 0x2ef   :  { %v3442_v11 = vpop.f32.mrb[78].mxu0  ;;  %v7108_v47 = vadd.f32 %v6967_v50, %v4681_v21  ;;  %v3627_v31 = vpop.f32.mrb[143].mxu1  ;;  %v3839_v49 = vmul.f32 %v7090_v10, %v3580_v32  ;;  %v3909_v61 = vadd.f32 %v7099_v25, %v3838_v33  ;;  %v3842_v35 = vmul.f32 %v7090_v10, %v3593_v23 }
 0x2f0   :  { %v7112_v38 = vadd.f32 %v3442_v11, %v6909_v51  ;;  %v3444_v57 = vpop.f32.mrb[79].mxu0  ;;  %v7115_v16 = vadd.f32 %v6957_v20, %v3627_v31  ;;  %v3975_v45 = vmax.f32 %v3911_v6, 0.0  ;;  %v3912_v21 = vadd.f32 %v7099_v25, %v3841_v1 }
 0x2f1   :  { %v3910_v13 = vadd.f32 %v7099_v25, %v3839_v49  ;;  %v3844_v20 = vmul.f32 %v7090_v10, %v3601_v15  ;;  %v3845_v6 = vmul.f32 %v7090_v10, %v3604_v53  ;;  %v3843_v1 = vmul.f32 %v7090_v10, %v3596_v41 }
 0x2f2   :  { %v3973_v15 = vmax.f32 %v3909_v61, 0.0 }
 0x2f4   :  { %v4684_v50 = vpop.f32.mrb[144].mxu1 }
 0x2f5   :  { %v3447_v51 = vpop.f32.mrb[80].mxu0  ;;  %v3649_v11 = vadd.f32 %v6982_v36, %v4684_v50  ;;  %v3640_v57 = vpop.f32.mrb[145].mxu1 }
 0x2f6   :  { %v7127_v5 = vadd.f32 %v3447_v51, %v6923_v4  ;;  %v3449_v32 = vpop.f32.mrb[81].mxu0  ;;  %v3641_v31 = vadd.f32 %v6972_v62, %v3640_v57  ;;  %v4685_v33 = vpop.f32.mrb[146].mxu1  ;;  %v3976_v57 = vmax.f32 %v3912_v21, 0.0 }
 0x2f7   :  { %v3856_v49 = vmul.f32 %v7090_v10, %v3649_v11  ;;  %v3450_v2 = vpop.f32.mrb[82].mxu0  ;;  %v3652_v36 = vadd.f32 %v6987_v52, %v4685_v33  ;;  %v3643_v50 = vpop.f32.mrb[147].mxu1  ;;  %v3974_v32 = vmax.f32 %v3910_v13, 0.0  ;;  %v3915_v11 = vadd.f32 %v7099_v25, %v3844_v20 }
 0x2f8   :  { %v3854_v23 = vmul.f32 %v7090_v10, %v3641_v31  ;;  %v7136_v4 = vadd.f32 %v3450_v2, %v6931_v24  ;;  %v3452_v51 = vpop.f32.mrb[83].mxu0  ;;  %v3644_v62 = vadd.f32 %v6977_v14, %v3643_v50  ;;  %v3913_v52 = vadd.f32 %v7099_v25, %v3842_v35 }
 0x2f9   :  { %v3927_v53 = vadd.f32 %v7099_v25, %v3856_v49  ;;  %v3857_v41 = vmul.f32 %v7090_v10, %v3652_v36  ;;  %v7146_v24 = vadd.f32 %v7099_v25, %v3845_v6  ;;  %v7149_v2 = vadd.f32 %v7099_v25, %v3843_v1 }
 0x2fa   :  { %v3925_v61 = vadd.f32 %v7099_v25, %v3854_v23  ;;  %v3855_v31 = vmul.f32 %v7090_v10, %v3644_v62  ;;  %v3848_v13 = vmul.f32 %v7090_v10, %v7070_v27  ;;  %v3846_v20 = vmul.f32 %v7090_v10, %v7076_v26 }
 0x2fb   :  { %v3991_v14 = vmax.f32 %v3927_v53, 0.0  ;;  %v3928_v21 = vadd.f32 %v7099_v25, %v3857_v41  ;;  %v3849_v6 = vmul.f32 %v7090_v10, %v7079_v58  ;;  %v3847_v58 = vmul.f32 %v7090_v10, %v7085_v40 }
 0x2fc   :  { %v3989_v35 = vmax.f32 %v3925_v61, 0.0  ;;  %v3926_v33 = vadd.f32 %v7099_v25, %v3855_v31  ;;  %v4688_v49 = vpop.f32.mrb[148].mxu1  ;;  %v3977_v40 = vmax.f32 %v3913_v52, 0.0 }
 0x2fd   :  { %v7159_v36 = vmax.f32 %v3975_v45, %v3991_v14  ;;  %v3992_v1 = vmax.f32 %v3928_v21, 0.0  ;;  %v3455_v50 = vpop.f32.mrb[84].mxu0  ;;  %v3665_v23 = vadd.f32 %v7002_v7, %v4688_v49  ;;  %v3656_v51 = vpop.f32.mrb[149].mxu1  ;;  %v3979_v49 = vmax.f32 %v3915_v11, 0.0 }
 0x2fe   :  { %v7162_v62 = vmax.f32 %v3973_v15, %v3989_v35  ;;  %v3990_v27 = vmax.f32 %v3926_v33, 0.0  ;;  %v7165_v53 = vadd.f32 %v3455_v50, %v6939_v34  ;;  %v3457_v26 = vpop.f32.mrb[85].mxu0  ;;  %v3657_v41 = vadd.f32 %v6992_v29, %v3656_v51  ;;  %v4689_v61 = vpop.f32.mrb[150].mxu1 }
 0x2ff   :  { %v7170_v45 = vmax.f32 %v3976_v57, %v3992_v1  ;;  %v3860_v31 = vmul.f32 %v7090_v10, %v3665_v23  ;;  %v3458_v14 = vpop.f32.mrb[86].mxu0  ;;  %v3668_v7 = vadd.f32 %v7007_v37, %v4689_v61  ;;  %v3659_v15 = vpop.f32.mrb[151].mxu1  ;;  %v3980_v50 = vmax.f32 %v7146_v24, 0.0 }
 0x300   :  { %v7174_v21 = vmax.f32 %v3974_v32, %v3990_v27  ;;  %v3858_v34 = vmul.f32 %v7090_v10, %v3657_v41  ;;  %v7178_v35 = vadd.f32 %v3458_v14, %v6944_v43  ;;  %v3460_v29 = vpop.f32.mrb[87].mxu0  ;;  %v3660_v33 = vadd.f32 %v6997_v42, %v3659_v15 }
 0x301   :  { %v3931_v57 = vadd.f32 %v7099_v25, %v3860_v31  ;;  %v3861_v1 = vmul.f32 %v7090_v10, %v3668_v7  ;;  %v3978_v37 = vmax.f32 %v7149_v2, 0.0  ;;  %v3919_v43 = vadd.f32 %v7099_v25, %v3848_v13 }
 0x302   :  { %v3929_v32 = vadd.f32 %v7099_v25, %v3858_v34  ;;  %v3859_v23 = vmul.f32 %v7090_v10, %v3660_v33  ;;  %v3917_v51 = vadd.f32 %v7099_v25, %v3846_v20  ;;  %v3920_v11 = vadd.f32 %v7099_v25, %v3849_v6 }
 0x303   :  { %v3995_v27 = vmax.f32 %v3931_v57, 0.0  ;;  %v3932_v42 = vadd.f32 %v7099_v25, %v3861_v1  ;;  %v3918_v52 = vadd.f32 %v7099_v25, %v3847_v58  ;;  %v3852_v2 = vmul.f32 %v7090_v10, %v7094_v54 }
 0x304   :  { %v3993_v26 = vmax.f32 %v3929_v32, 0.0  ;;  %v3930_v24 = vadd.f32 %v7099_v25, %v3859_v23  ;;  %v4692_v41 = vpop.f32.mrb[152].mxu1  ;;  %v3850_v54 = vmul.f32 %v7090_v10, %v7105_v46 }
 0x305   :  { %v7195_v61 = vmax.f32 %v3979_v49, %v3995_v27  ;;  %v3996_v31 = vmax.f32 %v3932_v42, 0.0  ;;  %v3463_v13 = vpop.f32.mrb[88].mxu0  ;;  %v3681_v20 = vadd.f32 %v7022_v48, %v4692_v41  ;;  %v3672_v14 = vpop.f32.mrb[153].mxu1  ;;  %v3983_v27 = vmax.f32 %v3919_v43, 0.0 }
 0x306   :  { %v7198_v7 = vmax.f32 %v3977_v40, %v3993_v26  ;;  %v3994_v15 = vmax.f32 %v3930_v24, 0.0  ;;  %v7201_v6 = vadd.f32 %v3463_v13, %v6949_v56  ;;  %v3465_v58 = vpop.f32.mrb[89].mxu0  ;;  %v3673_v34 = vadd.f32 %v7012_v39, %v3672_v14  ;;  %v4693_v29 = vpop.f32.mrb[154].mxu1 }
 0x307   :  { %v7206_v33 = vmax.f32 %v3980_v50, %v3996_v31  ;;  %v3864_v49 = vmul.f32 %v7090_v10, %v3681_v20  ;;  %v3466_v57 = vpop.f32.mrb[90].mxu0  ;;  %v3684_v48 = vadd.f32 %v7027_v59, %v4693_v29  ;;  %v3675_v40 = vpop.f32.mrb[155].mxu1  ;;  %v3981_v42 = vmax.f32 %v3917_v51, 0.0 }
 0x308   :  { %v7210_v1 = vmax.f32 %v3978_v37, %v3994_v15  ;;  %v3862_v56 = vmul.f32 %v7090_v10, %v3673_v34  ;;  %v7214_v32 = vadd.f32 %v3466_v57, %v6954_v9  ;;  %v3468_v39 = vpop.f32.mrb[91].mxu0  ;;  %v3676_v23 = vadd.f32 %v7017_v44, %v3675_v40 }
 0x309   :  { %v3935_v46 = vadd.f32 %v7099_v25, %v3864_v49  ;;  %v3865_v50 = vmul.f32 %v7090_v10, %v3684_v48  ;;  %v3984_v26 = vmax.f32 %v3920_v11, 0.0  ;;  %v3982_v24 = vmax.f32 %v3918_v52, 0.0 }
 0x30a   :  { %v3933_v59 = vadd.f32 %v7099_v25, %v3862_v56  ;;  %v3863_v37 = vmul.f32 %v7090_v10, %v3676_v23  ;;  %v3853_v41 = vmul.f32 %v7090_v10, %v7108_v47  ;;  %v3923_v44 = vadd.f32 %v7099_v25, %v3852_v2 }
 0x30b   :  { %v3999_v9 = vmax.f32 %v3935_v46, 0.0  ;;  %v3936_v31 = vadd.f32 %v7099_v25, %v3865_v50  ;;  %v3921_v43 = vadd.f32 %v7099_v25, %v3850_v54  ;;  %v3851_v11 = vmul.f32 %v7090_v10, %v7115_v16 }
 0x30c   :  { %v3997_v13 = vmax.f32 %v3933_v59, 0.0  ;;  %v3934_v20 = vadd.f32 %v7099_v25, %v3863_v37  ;;  %v4696_v51 = vpop.f32.mrb[156].mxu1  ;;  %v3924_v48 = vadd.f32 %v7099_v25, %v3853_v41  ;;  %v3987_v37 = vmax.f32 %v3923_v44, 0.0 }
 0x30d   :  { %v7229_v14 = vmax.f32 %v3983_v27, %v3999_v9  ;;  %v4000_v52 = vmax.f32 %v3936_v31, 0.0  ;;  %v3471_v15 = vpop.f32.mrb[92].mxu0  ;;  %v3697_v47 = vadd.f32 %v7042_v12, %v4696_v51  ;;  %v3688_v58 = vpop.f32.mrb[157].mxu1  ;;  %v3922_v50 = vadd.f32 %v7099_v25, %v3851_v11 }
 0x30e   :  { %v7232_v34 = vmax.f32 %v3981_v42, %v3997_v13  ;;  %v3998_v29 = vmax.f32 %v3934_v20, 0.0  ;;  %v7235_v2 = vadd.f32 %v3471_v15, %v6959_v60  ;;  %v3473_v54 = vpop.f32.mrb[93].mxu0  ;;  %v3689_v49 = vadd.f32 %v7032_v63, %v3688_v58  ;;  %v4697_v57 = vpop.f32.mrb[158].mxu1 }
 0x30f   :  { %v7239_v16 = vmax.f32 %v3984_v26, %v4000_v52  ;;  %v3868_v40 = vmul.f32 %v7090_v10, %v3697_v47  ;;  %v3474_v56 = vpop.f32.mrb[94].mxu0  ;;  %v3700_v12 = vadd.f32 %v7047_v18, %v4697_v57  ;;  %v3691_v39 = vpop.f32.mrb[159].mxu1  ;;  %v3985_v9 = vmax.f32 %v3921_v43, 0.0 }
 0x310   :  { %v7243_v23 = vmax.f32 %v3982_v24, %v3998_v29  ;;  %v3866_v27 = vmul.f32 %v7090_v10, %v3689_v49  ;;  %v7247_v60 = vadd.f32 %v3474_v56, %v6964_v19  ;;  %v3476_v46 = vpop.f32.mrb[95].mxu0  ;;  %v3692_v63 = vadd.f32 %v7037_v8, %v3691_v39 }
 0x311   :  { %v3939_v42 = vadd.f32 %v7099_v25, %v3868_v40  ;;  %v3869_v26 = vmul.f32 %v7090_v10, %v3700_v12  ;;  %v3988_v19 = vmax.f32 %v3924_v48, 0.0  ;;  %v3986_v20 = vmax.f32 %v3922_v50, 0.0 }
 0x312   :  { %v3937_v59 = vadd.f32 %v7099_v25, %v3866_v27  ;;  %v3867_v18 = vmul.f32 %v7090_v10, %v3692_v63 }
 0x313   :  { %v4003_v24 = vmax.f32 %v3939_v42, 0.0  ;;  %v3940_v41 = vadd.f32 %v7099_v25, %v3869_v26  ;;  %v7493_v42 = vld [vmem:[#allocation3_spill] sm:$0xff] }
 0x314   :  { %v4001_v31 = vmax.f32 %v3937_v59, 0.0  ;;  %v3938_v13 = vadd.f32 %v7099_v25, %v3867_v18  ;;  %v4700_v8 = vpop.f32.mrb[160].mxu1 }
 0x315   :  { %v7257_v51 = vmax.f32 %v3987_v37, %v4003_v24  ;;  %v4004_v11 = vmax.f32 %v3940_v41, 0.0  ;;  %v3479_v52 = vpop.f32.mrb[96].mxu0  ;;  %v3713_v15 = vadd.f32 %v7061_v3, %v4700_v8  ;;  %v3704_v47 = vpop.f32.mrb[161].mxu1  ;;  %v7492_v3 = vld [vmem:[#allocation2_spill] sm:$0xff] }
 0x316   :  { %v7260_v58 = vmax.f32 %v3985_v9, %v4001_v31  ;;  %v4002_v44 = vmax.f32 %v3938_v13, 0.0  ;;  %v7263_v29 = vadd.f32 %v3479_v52, %v6969_v22  ;;  %v3481_v43 = vpop.f32.mrb[97].mxu0  ;;  %v3705_v54 = vadd.f32 %v7051_v28, %v3704_v47  ;;  %v4701_v49 = vpop.f32.mrb[162].mxu1  ;;  %v7494_v9 = vld [vmem:[#allocation4_spill] sm:$0xff]  ;;  %v7495_v13 = vld [vmem:[#allocation17_spill] sm:$0xff] }
 0x317   :  { %v7266_v57 = vmax.f32 %v3988_v19, %v4004_v11  ;;  %v3482_v48 = vpop.f32.mrb[98].mxu0  ;;  %v3716_v40 = vadd.f32 %v7066_v0, %v4701_v49  ;;  %v3707_v56 = vpop.f32.mrb[163].mxu1  ;;  %v7496_v52 = vld [vmem:[#allocation5_spill] sm:$0xff] }
 0x318   :  { %v7269_v12 = vmax.f32 %v3986_v20, %v4002_v44  ;;  %v7272_v39 = vadd.f32 %v3482_v48, %v7492_v3  ;;  %v3484_v27 = vpop.f32.mrb[99].mxu0  ;;  %v3708_v46 = vadd.f32 %v7056_v17, %v3707_v56  ;;  %v7497_v56 = vld [vmem:[#allocation6_spill] sm:$0xff] }
 0x31c   :  { %v4704_v22 = vpop.f32.mrb[164].mxu1 }
 0x31d   :  { %v3487_v63 = vpop.f32.mrb[100].mxu0  ;;  %v3729_v50 = vadd.f32 %v7102_v30, %v4704_v22  ;;  %v3720_v28 = vpop.f32.mrb[165].mxu1  ;;  %v3872_v22 = vmul.f32 %v7090_v10, %v3713_v15 }
 0x31e   :  { %v4812_v26 = vadd.f32 %v3487_v63, %v7493_v42  ;;  %v3489_v59 = vpop.f32.mrb[101].mxu0  ;;  %v3721_v18 = vadd.f32 %v7073_v55, %v3720_v28  ;;  %v4705_v0 = vpop.f32.mrb[166].mxu1  ;;  %v3870_v28 = vmul.f32 %v7090_v10, %v3705_v54 }
 0x31f   :  { %v3490_v37 = vpop.f32.mrb[102].mxu0  ;;  %v3732_v24 = vadd.f32 %v7112_v38, %v4705_v0  ;;  %v3723_v41 = vpop.f32.mrb[167].mxu1  ;;  %v3943_v54 = vadd.f32 %v7099_v25, %v3872_v22 }
 0x320   :  { %v4813_v19 = vadd.f32 %v3490_v37, %v7494_v9  ;;  %v3492_v31 = vpop.f32.mrb[103].mxu0  ;;  %v3724_v17 = vadd.f32 %v7495_v13, %v3723_v41  ;;  %v7499_v13 = vld [vmem:[#allocation8_spill] sm:$0xff] }
 0x324   :  { %v4708_v8 = vpop.f32.mrb[168].mxu1 }
 0x325   :  { %v3495_v20 = vpop.f32.mrb[104].mxu0  ;;  %v3745_v30 = vadd.f32 %v7165_v53, %v4708_v8  ;;  %v3736_v11 = vpop.f32.mrb[169].mxu1 }
 0x326   :  { %v7283_v47 = vadd.f32 %v3495_v20, %v7496_v52  ;;  %v3497_v44 = vpop.f32.mrb[105].mxu0  ;;  %v7286_v55 = vadd.f32 %v7127_v5, %v3736_v11  ;;  %v4709_v43 = vpop.f32.mrb[170].mxu1  ;;  %v3941_v11 = vadd.f32 %v7099_v25, %v3870_v28  ;;  %v3871_v52 = vmul.f32 %v7090_v10, %v3708_v46 }
 0x327   :  { %v3498_v38 = vpop.f32.mrb[106].mxu0  ;;  %v7289_v49 = vadd.f32 %v7178_v35, %v4709_v43  ;;  %v3739_v48 = vpop.f32.mrb[171].mxu1  ;;  %v7498_v35 = vld [vmem:[#allocation7_spill] sm:$0xff]  ;;  %v3876_v44 = vmul.f32 %v7090_v10, %v3729_v50  ;;  %v3877_v43 = vmul.f32 %v7090_v10, %v3732_v24 }
 0x328   :  { %v7292_v3 = vadd.f32 %v3498_v38, %v7497_v56  ;;  %v3500_v27 = vpop.f32.mrb[107].mxu0  ;;  %v7295_v53 = vadd.f32 %v7136_v4, %v3739_v48  ;;  %v3875_v38 = vmul.f32 %v7090_v10, %v3724_v17  ;;  %v4007_v48 = vmax.f32 %v3943_v54, 0.0 }
 0x329   :  { %v4005_v27 = vmax.f32 %v3941_v11, 0.0  ;;  %v3942_v22 = vadd.f32 %v7099_v25, %v3871_v52  ;;  %v7328_v46 = vadd.f32 %v7099_v25, %v3876_v44  ;;  %v3880_v54 = vmul.f32 %v7090_v10, %v3745_v30 }
 0x32b   :  { %v4006_v44 = vmax.f32 %v3942_v22, 0.0  ;;  %v3878_v22 = vmul.f32 %v7090_v10, %v7286_v55 }
 0x32c   :  { %v4712_v63 = vpop.f32.mrb[172].mxu1 }
 0x32d   :  { %v3503_v5 = vpop.f32.mrb[108].mxu0  ;;  %v7300_v42 = vadd.f32 %v7235_v2, %v4712_v63  ;;  %v3752_v59 = vpop.f32.mrb[173].mxu1 }
 0x32e   :  { %v7303_v0 = vadd.f32 %v3503_v5, %v7498_v35  ;;  %v3505_v37 = vpop.f32.mrb[109].mxu0  ;;  %v7306_v41 = vadd.f32 %v7201_v6, %v3752_v59  ;;  %v4713_v9 = vpop.f32.mrb[174].mxu1  ;;  %v3873_v6 = vmul.f32 %v7090_v10, %v3716_v40  ;;  %v7338_v35 = vadd.f32 %v7099_v25, %v3877_v43 }
 0x32f   :  { %v3506_v4 = vpop.f32.mrb[110].mxu0  ;;  %v7309_v31 = vadd.f32 %v7247_v60, %v4713_v9  ;;  %v3755_v15 = vpop.f32.mrb[175].mxu1  ;;  %v3874_v60 = vmul.f32 %v7090_v10, %v3721_v18  ;;  %v7500_v18 = vld [vmem:[#allocation9_spill] sm:$0xff]  ;;  %v7341_v37 = vadd.f32 %v7099_v25, %v3875_v38  ;;  %v4011_v38 = vmax.f32 %v7328_v46, 0.0 }
 0x330   :  { %v7313_v8 = vadd.f32 %v3506_v4, %v7499_v13  ;;  %v3508_v2 = vpop.f32.mrb[111].mxu0  ;;  %v7316_v20 = vadd.f32 %v7214_v32, %v3755_v15  ;;  %v3944_v32 = vadd.f32 %v7099_v25, %v3873_v6 }
 0x331   :  { %v7331_v50 = vadd.f32 %v7099_v25, %v3874_v60  ;;  %v7501_v2 = vld [vmem:[#allocation10_spill] sm:$0xff] }
 0x332   :  { %v4008_v52 = vmax.f32 %v3944_v32, 0.0  ;;  %v7360_v32 = vadd.f32 %v7099_v25, %v3880_v54  ;;  %v7502_v54 = vld [vmem:[#allocation11_spill] sm:$0xff] }
 0x334   :  { %v4716_v56 = vpop.f32.mrb[176].mxu1 }
 0x335   :  { %v3511_v63 = vpop.f32.mrb[112].mxu0  ;;  %v3777_v28 = vadd.f32 %v4812_v26, %v4716_v56  ;;  %v3768_v40 = vpop.f32.mrb[177].mxu1 }
 0x336   :  { %v7334_v24 = vadd.f32 %v3511_v63, %v7500_v18  ;;  %v3513_v17 = vpop.f32.mrb[113].mxu0  ;;  %v3769_v5 = vadd.f32 %v7263_v29, %v3768_v40  ;;  %v4717_v59 = vpop.f32.mrb[178].mxu1  ;;  %v4012_v63 = vmax.f32 %v7338_v35, 0.0 }
 0x337   :  { %v3888_v26 = vmul.f32 %v7090_v10, %v3777_v28  ;;  %v3514_v9 = vpop.f32.mrb[114].mxu0  ;;  %v3780_v4 = vadd.f32 %v4813_v19, %v4717_v59  ;;  %v3771_v15 = vpop.f32.mrb[179].mxu1  ;;  %v4009_v19 = vmax.f32 %v7331_v50, 0.0  ;;  %v4010_v28 = vmax.f32 %v7341_v37, 0.0 }
 0x338   :  { %v3886_v13 = vmul.f32 %v7090_v10, %v3769_v5  ;;  %v7347_v11 = vadd.f32 %v3514_v9, %v7501_v2  ;;  %v3516_v29 = vpop.f32.mrb[115].mxu0  ;;  %v3772_v6 = vadd.f32 %v7272_v39, %v3771_v15  ;;  %v3881_v17 = vmul.f32 %v7090_v10, %v7289_v49 }
 0x339   :  { %v3959_v60 = vadd.f32 %v7099_v25, %v3888_v26  ;;  %v3889_v43 = vmul.f32 %v7090_v10, %v3780_v4 }
 0x33a   :  { %v3957_v30 = vadd.f32 %v7099_v25, %v3886_v13  ;;  %v3887_v56 = vmul.f32 %v7090_v10, %v3772_v6 }
 0x33b   :  { %v4023_v40 = vmax.f32 %v3959_v60, 0.0  ;;  %v3960_v39 = vadd.f32 %v7099_v25, %v3889_v43 }
 0x33c   :  { %v4021_v46 = vmax.f32 %v3957_v30, 0.0  ;;  %v3958_v50 = vadd.f32 %v7099_v25, %v3887_v56  ;;  %v4720_v18 = vpop.f32.mrb[180].mxu1 }
 0x33d   :  { %v4055_v5 = vmax.f32 %v4007_v48, %v4023_v40  ;;  %v4024_v59 = vmax.f32 %v3960_v39, 0.0  ;;  %v3519_v26 = vpop.f32.mrb[116].mxu0  ;;  %v3793_v9 = vadd.f32 %v7303_v0, %v4720_v18  ;;  %v3784_v4 = vpop.f32.mrb[181].mxu1  ;;  %v7503_v39 = vld [vmem:[#allocation12_spill] sm:$0xff] }
 0x33e   :  { %v4053_v15 = vmax.f32 %v4005_v27, %v4021_v46  ;;  %v4022_v13 = vmax.f32 %v3958_v50, 0.0  ;;  %v4820_v2 = vadd.f32 %v3519_v26, %v7502_v54  ;;  %v3521_v29 = vpop.f32.mrb[117].mxu0  ;;  %v3785_v55 = vadd.f32 %v7283_v47, %v3784_v4  ;;  %v4721_v6 = vpop.f32.mrb[182].mxu1 }
 0x33f   :  { %v4071_v60 = vmax.f32 %v7159_v36, %v4055_v5  ;;  %v4056_v43 = vmax.f32 %v4008_v52, %v4024_v59  ;;  %v3892_v30 = vmul.f32 %v7090_v10, %v3793_v9  ;;  %v3522_v49 = vpop.f32.mrb[118].mxu0  ;;  %v3796_v48 = vadd.f32 %v7313_v8, %v4721_v6  ;;  %v3787_v56 = vpop.f32.mrb[183].mxu1 }
 0x340   :  { %v4069_v0 = vmax.f32 %v7162_v62, %v4053_v15  ;;  %v4054_v40 = vmax.f32 %v4006_v44, %v4022_v13  ;;  %v3890_v27 = vmul.f32 %v7090_v10, %v3785_v55  ;;  %v4821_v46 = vadd.f32 %v3522_v49, %v7503_v39  ;;  %v3524_v50 = vpop.f32.mrb[119].mxu0 }
 0x341   :  { %v4072_v47 = vmax.f32 %v7170_v45, %v4056_v43  ;;  %v3963_v18 = vadd.f32 %v7099_v25, %v3892_v30  ;;  %v3893_v36 = vmul.f32 %v7090_v10, %v3796_v48  ;;  %v3788_v52 = vadd.f32 %v7292_v3, %v3787_v56  ;;  %v7505_v50 = vld [vmem:[#allocation14_spill] sm:$0xff] }
 0x342   :  { %v7381_v5 = vadd.f32 %v7099_v25, %v3878_v22  ;;  %v3879_v62 = vmul.f32 %v7090_v10, %v7295_v53  ;;  %v4070_v8 = vmax.f32 %v7174_v21, %v4054_v40  ;;  %v3961_v44 = vadd.f32 %v7099_v25, %v3890_v27 }
 0x343   :  { %v4571_v59 = vpack.c.bf16 %v4072_v47, %v4071_v60  ;;  %v4027_v26 = vmax.f32 %v3963_v18, 0.0  ;;  %v3964_v45 = vadd.f32 %v7099_v25, %v3893_v36  ;;  %v3891_v9 = vmul.f32 %v7090_v10, %v3788_v52 }
 0x344   :  { %v4015_v4 = vmax.f32 %v7360_v32, 0.0  ;;  %v7391_v3 = vadd.f32 %v7099_v25, %v3881_v17  ;;  %v4566_v22 = vpack.c.bf16 %v4070_v8, %v4069_v0  ;;  %v4025_v15 = vmax.f32 %v3961_v44, 0.0  ;;  %v4724_v13 = vpop.f32.mrb[184].mxu1  ;;  %v7504_v17 = vld [vmem:[#allocation13_spill] sm:$0xff] }
 0x345   :  { %4603 = vst [vmem:[%s7475_s4 + $0x8] sm:$0xff] %v4571_v59   ;;  %v4059_v21 = vmax.f32 %v4011_v38, %v4027_v26  ;;  %v4028_v53 = vmax.f32 %v3964_v45, 0.0  ;;  %v3962_v54 = vadd.f32 %v7099_v25, %v3891_v9  ;;  %v3527_v29 = vpop.f32.mrb[120].mxu0  ;;  %v3809_v55 = vadd.f32 %v4820_v2, %v4724_v13  ;;  %v3800_v6 = vpop.f32.mrb[185].mxu1 }
 0x346   :  { %v3950_v60 = vadd.f32 %v7099_v25, %v3879_v62  ;;  %4567 = vst [vmem:[%s7475_s4] sm:$0xff] %v4566_v22   ;;  %v4057_v32 = vmax.f32 %v4009_v19, %v4025_v15  ;;  %v4822_v43 = vadd.f32 %v3527_v29, %v7504_v17  ;;  %v3529_v30 = vpop.f32.mrb[121].mxu0  ;;  %v3801_v49 = vadd.f32 %v7334_v24, %v3800_v6  ;;  %v4725_v48 = vpop.f32.mrb[186].mxu1 }
 0x347   :  { %v4075_v38 = vmax.f32 %v7195_v61, %v4059_v21  ;;  %v4060_v56 = vmax.f32 %v4012_v63, %v4028_v53  ;;  %v4026_v2 = vmax.f32 %v3962_v54, 0.0  ;;  %v3896_v0 = vmul.f32 %v7090_v10, %v3809_v55  ;;  %v3530_v40 = vpop.f32.mrb[122].mxu0  ;;  %v3803_v27 = vpop.f32.mrb[187].mxu1  ;;  %v7506_v21 = vld [vmem:[#allocation15_spill] sm:$0xff] }
 0x348   :  { %v4073_v39 = vmax.f32 %v7198_v7, %v4057_v32  ;;  %v3894_v19 = vmul.f32 %v7090_v10, %v3801_v49  ;;  %v4823_v47 = vadd.f32 %v3530_v40, %v7505_v50  ;;  %v3812_v18 = vadd.f32 %v4821_v46, %v4725_v48  ;;  %v3532_v36 = vpop.f32.mrb[123].mxu0 }
 0x349   :  { %v4076_v24 = vmax.f32 %v7206_v33, %v4060_v56  ;;  %v4058_v61 = vmax.f32 %v4010_v28, %v4026_v2  ;;  %v3967_v35 = vadd.f32 %v7099_v25, %v3896_v0  ;;  %v3804_v63 = vadd.f32 %v7347_v11, %v3803_v27  ;;  %v7507_v2 = vld [vmem:[#allocation16_spill] sm:$0xff] }
 0x34a   :  { %v4013_v52 = vmax.f32 %v7381_v5, 0.0  ;;  %v3882_v7 = vmul.f32 %v7090_v10, %v7306_v41  ;;  %v3965_v62 = vadd.f32 %v7099_v25, %v3894_v19  ;;  %v3897_v8 = vmul.f32 %v7090_v10, %v3812_v18 }
 0x34b   :  { %v4581_v46 = vpack.c.bf16 %v4076_v24, %v4075_v38  ;;  %v4074_v44 = vmax.f32 %v7210_v1, %v4058_v61  ;;  %v4031_v33 = vmax.f32 %v3967_v35, 0.0  ;;  %v3895_v37 = vmul.f32 %v7090_v10, %v3804_v63 }
 0x34c   :  { %v4016_v28 = vmax.f32 %v7391_v3, 0.0  ;;  %v4014_v59 = vmax.f32 %v3950_v60, 0.0  ;;  %v4029_v26 = vmax.f32 %v3965_v62, 0.0  ;;  %v3968_v11 = vadd.f32 %v7099_v25, %v3897_v8  ;;  %v4728_v5 = vpop.f32.mrb[188].mxu1 }
 0x34d   :  { %v3884_v41 = vmul.f32 %v7090_v10, %v7300_v42  ;;  %4605 = vst [vmem:[%s7475_s4 + $0x18] sm:$0xff] %v4581_v46   ;;  %v4576_v45 = vpack.c.bf16 %v4074_v44, %v4073_v39  ;;  %v4063_v9 = vmax.f32 %v4015_v4, %v4031_v33  ;;  %v3966_v1 = vadd.f32 %v7099_v25, %v3895_v37  ;;  %v3535_v22 = vpop.f32.mrb[124].mxu0  ;;  %v3816_v15 = vpop.f32.mrb[189].mxu1 }
 0x34e   :  { %v4061_v13 = vmax.f32 %v4013_v52, %v4029_v26  ;;  %v4032_v3 = vmax.f32 %v3968_v11, 0.0  ;;  %v4824_v53 = vadd.f32 %v3535_v22, %v7506_v21  ;;  %v3537_v54 = vpop.f32.mrb[125].mxu0  ;;  %v3817_v29 = vadd.f32 %v4822_v43, %v3816_v15  ;;  %v4729_v55 = vpop.f32.mrb[190].mxu1 }
 0x34f   :  { %v3953_v6 = vadd.f32 %v7099_v25, %v3882_v7  ;;  %v3883_v42 = vmul.f32 %v7090_v10, %v7316_v20  ;;  %4604 = vst [vmem:[%s7475_s4 + $0x10] sm:$0xff] %v4576_v45   ;;  %v4079_v4 = vmax.f32 %v7229_v14, %v4063_v9  ;;  %v4030_v60 = vmax.f32 %v3966_v1, 0.0  ;;  %v3538_v32 = vpop.f32.mrb[126].mxu0  ;;  %v3819_v17 = vpop.f32.mrb[191].mxu1 }
 0x350   :  { %v4077_v30 = vmax.f32 %v7232_v34, %v4061_v13  ;;  %v4064_v49 = vmax.f32 %v4016_v28, %v4032_v3  ;;  %v3825_v48 = vadd.f32 %v4824_v53, %v4728_v5  ;;  %v3898_v43 = vmul.f32 %v7090_v10, %v3817_v29  ;;  %v3540_v38 = vpop.f32.mrb[127].mxu0 }
 0x351   :  { %v3885_v56 = vmul.f32 %v7090_v10, %v7309_v31  ;;  %v4062_v20 = vmax.f32 %v4014_v59, %v4030_v60  ;;  %v4825_v0 = vadd.f32 %v3538_v32, %v7507_v2  ;;  %v3820_v40 = vadd.f32 %v4823_v47, %v3819_v17 }
 0x352   :  { %v3955_v27 = vadd.f32 %v7099_v25, %v3884_v41  ;;  %v4080_v14 = vmax.f32 %v7239_v16, %v4064_v49  ;;  %v3900_v39 = vmul.f32 %v7090_v10, %v3825_v48  ;;  %v3969_v34 = vadd.f32 %v7099_v25, %v3898_v43 }
 0x353   :  { %v3954_v19 = vadd.f32 %v7099_v25, %v3883_v42  ;;  %v4078_v50 = vmax.f32 %v7243_v23, %v4062_v20  ;;  %v3828_v18 = vadd.f32 %v4825_v0, %v4729_v55  ;;  %v3899_v36 = vmul.f32 %v7090_v10, %v3820_v40 }
 0x354   :  { %v4017_v31 = vmax.f32 %v3953_v6, 0.0  ;;  %v4591_v24 = vpack.c.bf16 %v4080_v14, %v4079_v4  ;;  %v3971_v61 = vadd.f32 %v7099_v25, %v3900_v39  ;;  %v4033_v47 = vmax.f32 %v3969_v34, 0.0 }
 0x355   :  { %v3956_v35 = vadd.f32 %v7099_v25, %v3885_v56  ;;  %v4586_v63 = vpack.c.bf16 %v4078_v50, %v4077_v30  ;;  %v3901_v16 = vmul.f32 %v7090_v10, %v3828_v18  ;;  %v3970_v52 = vadd.f32 %v7099_v25, %v3899_v36 }
 0x356   :  { %v4019_v7 = vmax.f32 %v3955_v27, 0.0  ;;  %4607 = vst [vmem:[%s7475_s4 + $0x28] sm:$0xff] %v4591_v24   ;;  %v4035_v23 = vmax.f32 %v3971_v61, 0.0  ;;  %v4065_v62 = vmax.f32 %v4017_v31, %v4033_v47  ;;  %v4018_v8 = vmax.f32 %v3954_v19, 0.0 }
 0x357   :  { %4606 = vst [vmem:[%s7475_s4 + $0x20] sm:$0xff] %v4586_v63   ;;  %v3972_v46 = vadd.f32 %v7099_v25, %v3901_v16  ;;  %v4034_v44 = vmax.f32 %v3970_v52, 0.0  ;;  %v4020_v37 = vmax.f32 %v3956_v35, 0.0 }
 0x358   :  { %v4067_v33 = vmax.f32 %v4019_v7, %v4035_v23  ;;  %v4081_v10 = vmax.f32 %v7260_v58, %v4065_v62 }
 0x359   :  { %v4036_v28 = vmax.f32 %v3972_v46, 0.0  ;;  %v4066_v59 = vmax.f32 %v4018_v8, %v4034_v44 }
 0x35a   :  { %v4083_v26 = vmax.f32 %v7257_v51, %v4067_v33 }
 0x35b   :  { %v4068_v11 = vmax.f32 %v4020_v37, %v4036_v28  ;;  %v4082_v5 = vmax.f32 %v7269_v12, %v4066_v59 }
 0x35d   :  { %v4084_v41 = vmax.f32 %v7266_v57, %v4068_v11  ;;  %v4596_v45 = vpack.c.bf16 %v4082_v5, %v4081_v10 }
 0x35f   :  { %v4601_v9 = vpack.c.bf16 %v4084_v41, %v4083_v26  ;;  %4608 = vst [vmem:[%s7475_s4 + $0x30] sm:$0xff] %v4596_v45  }
 0x361   :  { %4609 = vst [vmem:[%s7475_s4 + $0x38] sm:$0xff] %v4601_v9  }

</bundles_post_ra>
